<compile_context>
chip_gen: v7x
topology: tpu7x:2x2x1
jax: 0.10.0
libtpu: 0.0.40
codegen_flags: <defaults>
</compile_context>

<pallas_src>
import functools
import math

import jax
import jax.numpy as jnp
from jax.experimental import pallas as pl
from jax.experimental.pallas import tpu as pltpu


def _round_up(x, m):
    return ((x + m - 1) // m) * m


# ---------------------------------------------------------------------------
# Pallas kernels
# ---------------------------------------------------------------------------
def _matmul_bias_act_kernel(x_ref, w_ref, b_ref, o_ref, *, apply_relu):
    """Single full-K step: out = relu?(x @ w + b). bf16 operands, f32 epilogue."""
    acc = jnp.dot(x_ref[...], w_ref[...], preferred_element_type=jnp.float32)
    out = acc + b_ref[...]                       # bias is already f32
    if apply_relu:
        out = jnp.maximum(out, 0.0)
    o_ref[...] = out.astype(o_ref.dtype)


def _fc_head_kernel(x_ref, w1_ref, b1_ref, w2_ref, b2_ref, w3_ref, b3_ref, o_ref):
    """Fused 3-layer MLP head; intermediate activations never leave VMEM/vregs."""
    h = jnp.dot(x_ref[...], w1_ref[...], preferred_element_type=jnp.float32)
    h = jnp.maximum(h + b1_ref[...], 0.0).astype(w2_ref.dtype)
    h = jnp.dot(h, w2_ref[...], preferred_element_type=jnp.float32)
    h = jnp.maximum(h + b2_ref[...], 0.0).astype(w3_ref.dtype)
    out = jnp.dot(h, w3_ref[...], preferred_element_type=jnp.float32)
    o_ref[...] = out + b3_ref[...]


# ---------------------------------------------------------------------------
# Pallas wrappers
# ---------------------------------------------------------------------------
def _pick_tn(n, tn_max):
    if n % 128 != 0:
        return n                       # N < 128: full-dim block (tiny output)
    tn = min(tn_max, n)
    tn -= tn % 128
    while n % tn != 0:
        tn -= 128
    return tn


def matmul_bias_act(x, w, b, *, apply_relu, out_dtype, tm_max=256, tn_max=512):
    """relu_opt(x @ w + b). x:(M,Kp) bf16, w:(Kp,N) bf16, b:(1,N) f32.

    Kp is already a multiple of 128 (weights padded once at init). Single
    full-K step per (i, j) tile -> MXU accumulates internally, no scratch.
    """
    M, K = x.shape
    K2, N = w.shape
    assert K == K2 and K % 128 == 0, (K, K2)

    tn = _pick_tn(N, tn_max)
    # Expose >= 2 M tiles when M allows it (v7x megacore), cap the tile size.
    tm = min(tm_max, max(8, _round_up(-(-M // 2), 8)))
    Mp = _round_up(M, tm)
    xp = jnp.pad(x, ((0, Mp - M), (0, 0))) if Mp > M else x

    grid = (Mp // tm, N // tn)
    cost = pl.CostEstimate(
        flops=2 * Mp * N * K,
        transcendentals=0,
        bytes_accessed=(Mp * K + K * N + Mp * N) * 2 + N * 4,
    )

    out = pl.pallas_call(
        functools.partial(_matmul_bias_act_kernel, apply_relu=apply_relu),
        out_shape=jax.ShapeDtypeStruct((Mp, N), out_dtype),
        grid_spec=pltpu.PrefetchScalarGridSpec(
            num_scalar_prefetch=0,
            grid=grid,
            in_specs=[
                pl.BlockSpec((tm, K), lambda i, j: (i, 0)),   # activations
                pl.BlockSpec((K, tn), lambda i, j: (0, j)),   # weights (full K)
                pl.BlockSpec((1, tn), lambda i, j: (0, j)),   # bias (f32)
            ],
            out_specs=pl.BlockSpec((tm, tn), lambda i, j: (i, j)),
        ),
        compiler_params=pltpu.CompilerParams(
            dimension_semantics=("parallel", "parallel"),
        ),
        cost_estimate=cost,
    )(xp, w, b)

    return out[:M] if Mp > M else out


def fc_head(x, fc_params):
    """Fused Linear->ReLU->Linear->ReLU->Linear in a single pallas_call."""
    w1, b1, w2, b2, w3, b3 = fc_params
    B, _ = x.shape
    Mp = _round_up(B, 8)
    xp = jnp.pad(x, ((0, Mp - B), (0, 0))) if Mp > B else x
    ncp = w3.shape[1]
    out = pl.pallas_call(
        _fc_head_kernel,
        out_shape=jax.ShapeDtypeStruct((Mp, ncp), jnp.float32),
    )(xp, w1, b1, w2, b2, w3, b3)
    return out[:B]


# ---------------------------------------------------------------------------
# Conv (im2col + Pallas matmul) and max-pool, channels-last
# ---------------------------------------------------------------------------
def _im2col_nhwc(x, k, pad):
    """x: (B,H,W,C) -> patches (B,H,W,k*k*C), stride 1, 'same' padding.

    K ordering is (kh, kw, c), matching the weight prep in prepare_params()."""
    B, H, W, C = x.shape
    xp = jnp.pad(x, ((0, 0), (pad, pad), (pad, pad), (0, 0)))
    cols = [xp[:, di:di + H, dj:dj + W, :] for di in range(k) for dj in range(k)]
    return jnp.concatenate(cols, axis=-1)


def conv2d_relu_nhwc(x, w_mat, b_row, *, ksize, pad):
    """Conv2d(stride=1, 'same') + ReLU via im2col + single-K-step Pallas matmul."""
    B, H, W, C = x.shape
    Kp, O = w_mat.shape
    patches = _im2col_nhwc(x, ksize, pad)                 # (B,H,W,k*k*C) bf16
    K = ksize * ksize * C
    x2d = patches.reshape(B * H * W, K)
    if Kp > K:                                            # pad K to the weight's 128-multiple
        x2d = jnp.pad(x2d, ((0, 0), (0, Kp - K)))
    out = matmul_bias_act(x2d, w_mat, b_row, apply_relu=True,
                          out_dtype=jnp.bfloat16)
    return out.reshape(B, H, W, O)                        # stays NHWC


def max_pool_3x3_s2_nhwc(x):
    return jax.lax.reduce_window(
        x, jnp.array(-jnp.inf, x.dtype), jax.lax.max,
        window_dimensions=(1, 3, 3, 1),
        window_strides=(1, 2, 2, 1),
        padding="VALID")


# ---------------------------------------------------------------------------
# Full ConvFCBase forward (Pallas path, NHWC / bf16 operands)
# ---------------------------------------------------------------------------
def convfc_forward(x_nchw, prep, *, num_classes):
    x = jnp.transpose(x_nchw, (0, 2, 3, 1)).astype(jnp.bfloat16)   # NCHW->NHWC once
    for (w_mat, b_row) in prep["conv"]:
        x = conv2d_relu_nhwc(x, w_mat, b_row, ksize=5, pad=2)
        x = max_pool_3x3_s2_nhwc(x)
    B = x.shape[0]
    feats = x.reshape(B, -1)           # NHWC flatten; FC1 rows were permuted at init
    logits = fc_head(feats, prep["fc"])
    return logits[:, :num_classes]


# ---------------------------------------------------------------------------
# Parameters: PyTorch-style raw params + one-time Pallas-friendly preparation
# ---------------------------------------------------------------------------
def init_params(key, num_classes, dtype=jnp.float32):
    """Matches the PyTorch init: conv N(0, sqrt(2/n)) with zero bias; Linear default."""
    conv_cfg = [(3, 32), (32, 64), (64, 128)]
    fc_cfg = [(1152, 1000), (1000, 1000), (1000, num_classes)]
    conv_params, fc_params = [], []
    for cin, cout in conv_cfg:
        key, kw = jax.random.split(key)
        n = 5 * 5 * cout
        w = jax.random.normal(kw, (cout, cin, 5, 5), dtype) * math.sqrt(2.0 / n)
        conv_params.append((w, jnp.zeros((cout,), dtype)))
    for fin, fout in fc_cfg:
        key, kw, kb = jax.random.split(key, 3)
        bound = 1.0 / math.sqrt(fin)
        # Stored as (in, out) = W^T relative to PyTorch's (out, in).
        w = jax.random.uniform(kw, (fin, fout), dtype, -bound, bound)
        b = jax.random.uniform(kb, (fout,), dtype, -bound, bound)
        fc_params.append((w, b))
    return {"conv": conv_params, "fc": fc_params}


def prepare_params(params, *, input_hw=32):
    """One-time weight prep: transpose to (K,N), pad K/N to 128 multiples, cast to
    bf16, fold the NCHW flatten order into FC1's rows. Biases kept in f32."""
    prep_conv = []
    for (w, b) in params["conv"]:
        O, C, KH, KW = w.shape
        K = KH * KW * C
        Kp = _round_up(K, 128)
        w_mat = jnp.transpose(w, (2, 3, 1, 0)).reshape(K, O)     # rows = (kh,kw,c)
        w_mat = jnp.pad(w_mat, ((0, Kp - K), (0, 0))).astype(jnp.bfloat16)
        prep_conv.append((w_mat, b.astype(jnp.float32).reshape(1, O)))

    # Final spatial size after the conv/pool stack ('same' conv, 3x3/s2 pool).
    hw = input_hw
    for _ in params["conv"]:
        hw = (hw - 3) // 2 + 1
    c_last = params["conv"][-1][0].shape[0]

    (w1, b1), (w2, b2), (w3, b3) = params["fc"]
    # Permute FC1 rows from NCHW flatten (c,h,w) to NHWC flatten (h,w,c).
    w1 = w1.reshape(c_last, hw, hw, -1).transpose(1, 2, 0, 3).reshape(w1.shape[0], -1)

    def fc_prep(w, b, kp, np_):
        K, N = w.shape
        wp = jnp.pad(w, ((0, kp - K), (0, np_ - N))).astype(jnp.bfloat16)
        bp = jnp.pad(b, ((0, np_ - N),)).astype(jnp.float32).reshape(1, np_)
        return wp, bp

    n1p = _round_up(w1.shape[1], 128)          # 1000 -> 1024
    n2p = _round_up(w2.shape[1], 128)          # 1000 -> 1024
    ncp = _round_up(w3.shape[1], 128)          # num_classes -> 128
    w1p, b1p = fc_prep(w1, b1, w1.shape[0], n1p)
    w2p, b2p = fc_prep(w2, b2, n1p, n2p)       # padded K rows are zero -> exact
    w3p, b3p = fc_prep(w3, b3, n2p, ncp)
    return {"conv": prep_conv, "fc": (w1p, b1p, w2p, b2p, w3p, b3p)}


# ---------------------------------------------------------------------------
# Pure-JAX reference (independent wiring: lax.conv, NCHW) with matching bf16
# quantization points, for correctness checking.
# ---------------------------------------------------------------------------
def reference_forward(x, params):
    out = x
    for (w, b) in params["conv"]:
        out = jax.lax.conv_general_dilated(
            out.astype(jnp.bfloat16), w.astype(jnp.bfloat16),
            window_strides=(1, 1), padding=((2, 2), (2, 2)),
            dimension_numbers=("NCHW", "OIHW", "NCHW"),
            preferred_element_type=jnp.float32)
        out = jnp.maximum(out + b[None, :, None, None].astype(jnp.float32), 0.0)
        out = out.astype(jnp.bfloat16)
        out = jax.lax.reduce_window(
            out, jnp.array(-jnp.inf, out.dtype), jax.lax.max,
            window_dimensions=(1, 1, 3, 3), window_strides=(1, 1, 2, 2),
            padding="VALID")
    out = out.reshape(out.shape[0], -1)
    n_fc = len(params["fc"])
    for idx, (w, b) in enumerate(params["fc"]):
        out = jnp.dot(out.astype(jnp.bfloat16), w.astype(jnp.bfloat16),
                      preferred_element_type=jnp.float32) + b.astype(jnp.float32)
        if idx < n_fc - 1:
            out = jnp.maximum(out, 0.0)
    return out


if __name__ == "__main__":
    num_classes = 10
    key = jax.random.PRNGKey(0)
    k_x, k_p = jax.random.split(key)

    # 3x32x32 input -> three (conv+pool) stages -> 128*3*3 = 1152 features.
    x = jax.random.normal(k_x, (2, 3, 32, 32), jnp.float32)
    params = init_params(k_p, num_classes)
    prep = prepare_params(params, input_hw=32)

    fwd = jax.jit(functools.partial(convfc_forward, num_classes=num_classes))
    out = jax.block_until_ready(fwd(x, prep))
    assert out.shape == (2, num_classes), out.shape

    ref = reference_forward(x, params)
    max_err = float(jnp.max(jnp.abs(out - ref)))
    assert jnp.allclose(out, ref, atol=2e-2, rtol=2e-2), f"max abs err {max_err}"

    print("KERNEL_OK")
</pallas_src>

<mosaic_0001>
module attributes {stable_mosaic.version = 11 : i64} {
  func.func @_matmul_bias_act_kernel(%arg0: i32, %arg1: i32, %arg2: memref<256x128xbf16, #tpu.memory_space<vmem>>, %arg3: memref<128x32xbf16, #tpu.memory_space<vmem>>, %arg4: memref<1x32xf32, #tpu.memory_space<vmem>>, %arg5: memref<256x32xbf16, #tpu.memory_space<vmem>>) attributes {dimension_semantics = [#tpu.dimension_semantics<parallel>, #tpu.dimension_semantics<parallel>], iteration_bounds = array<i64: 8, 1>, scalar_prefetch = 0 : i64, scratch_operands = 0 : i64, tpu.core_type = #tpu.core_type<tc>, window_params = [{transform_indices = @transform_0, window_bounds = array<i64: 256, 128>}, {transform_indices = @transform_1, window_bounds = array<i64: 128, 32>}, {transform_indices = @transform_2, window_bounds = array<i64: 1, 32>}, {transform_indices = @transform_3, window_bounds = array<i64: 256, 32>}]} {
    %c0 = arith.constant 0 : index
    %c0_0 = arith.constant 0 : index
    %0 = vector.load %arg2[%c0, %c0_0] : memref<256x128xbf16, #tpu.memory_space<vmem>>, vector<256x128xbf16>
    %c0_1 = arith.constant 0 : index
    %c0_2 = arith.constant 0 : index
    %1 = vector.load %arg3[%c0_1, %c0_2] : memref<128x32xbf16, #tpu.memory_space<vmem>>, vector<128x32xbf16>
    %cst = arith.constant dense<0.000000e+00> : vector<256x32xf32>
    %2 = tpu.matmul %0, %1, %cst {dimension_numbers = #tpu.dot_dimension_numbers<[1], [0], [0], [1], [0, 0, 1, 1], [], []>} : vector<256x128xbf16>, vector<128x32xbf16>, vector<256x32xf32> -> vector<256x32xf32>
    %c0_3 = arith.constant 0 : index
    %c0_4 = arith.constant 0 : index
    %3 = vector.load %arg4[%c0_3, %c0_4] : memref<1x32xf32, #tpu.memory_space<vmem>>, vector<1x32xf32>
    %4 = vector.broadcast %3 : vector<1x32xf32> to vector<256x32xf32>
    %5 = arith.addf %2, %4 : vector<256x32xf32>
    %cst_5 = arith.constant 0.000000e+00 : f32
    %6 = vector.broadcast %cst_5 : f32 to vector<256x32xf32>
    %7 = arith.maximumf %5, %6 : vector<256x32xf32>
    %8 = arith.truncf %7 : vector<256x32xf32> to vector<256x32xbf16>
    %c0_6 = arith.constant 0 : index
    %c0_7 = arith.constant 0 : index
    %9 = vector.load %arg5[%c0_6, %c0_7] : memref<256x32xbf16, #tpu.memory_space<vmem>>, vector<256x32xbf16>
    tpu.vector_store %arg5[%c0_6, %c0_7], %8 {strides = array<i32>} : memref<256x32xbf16, #tpu.memory_space<vmem>>, vector<256x32xbf16>,
    return
  }
  func.func @transform_0(%arg0: i32, %arg1: i32) -> (i32, i32) {
    %c0_i32 = arith.constant 0 : i32
    %c0_i32_0 = arith.constant 0 : i32
    return %arg0, %c0_i32 : i32, i32
  }
  func.func @transform_1(%arg0: i32, %arg1: i32) -> (i32, i32) {
    %c0_i32 = arith.constant 0 : i32
    %c0_i32_0 = arith.constant 0 : i32
    return %c0_i32, %arg1 : i32, i32
  }
  func.func @transform_2(%arg0: i32, %arg1: i32) -> (i32, i32) {
    %c0_i32 = arith.constant 0 : i32
    %c0_i32_0 = arith.constant 0 : i32
    return %c0_i32, %arg1 : i32, i32
  }
  func.func @transform_3(%arg0: i32, %arg1: i32) -> (i32, i32) {
    %c0_i32 = arith.constant 0 : i32
    return %arg0, %arg1 : i32, i32
  }
}

module attributes {stable_mosaic.version = 11 : i64} {
  func.func @_matmul_bias_act_kernel(%arg0: i32, %arg1: i32, %arg2: memref<232x896xbf16, #tpu.memory_space<vmem>>, %arg3: memref<896x64xbf16, #tpu.memory_space<vmem>>, %arg4: memref<1x64xf32, #tpu.memory_space<vmem>>, %arg5: memref<232x64xbf16, #tpu.memory_space<vmem>>) attributes {dimension_semantics = [#tpu.dimension_semantics<parallel>, #tpu.dimension_semantics<parallel>], iteration_bounds = array<i64: 2, 1>, scalar_prefetch = 0 : i64, scratch_operands = 0 : i64, tpu.core_type = #tpu.core_type<tc>, window_params = [{transform_indices = @transform_0, window_bounds = array<i64: 232, 896>}, {transform_indices = @transform_1, window_bounds = array<i64: 896, 64>}, {transform_indices = @transform_2, window_bounds = array<i64: 1, 64>}, {transform_indices = @transform_3, window_bounds = array<i64: 232, 64>}]} {
    %c0 = arith.constant 0 : index
    %c0_0 = arith.constant 0 : index
    %0 = vector.load %arg2[%c0, %c0_0] : memref<232x896xbf16, #tpu.memory_space<vmem>>, vector<232x896xbf16>
    %c0_1 = arith.constant 0 : index
    %c0_2 = arith.constant 0 : index
    %1 = vector.load %arg3[%c0_1, %c0_2] : memref<896x64xbf16, #tpu.memory_space<vmem>>, vector<896x64xbf16>
    %cst = arith.constant dense<0.000000e+00> : vector<232x64xf32>
    %2 = tpu.matmul %0, %1, %cst {dimension_numbers = #tpu.dot_dimension_numbers<[1], [0], [0], [1], [0, 0, 1, 1], [], []>} : vector<232x896xbf16>, vector<896x64xbf16>, vector<232x64xf32> -> vector<232x64xf32>
    %c0_3 = arith.constant 0 : index
    %c0_4 = arith.constant 0 : index
    %3 = vector.load %arg4[%c0_3, %c0_4] : memref<1x64xf32, #tpu.memory_space<vmem>>, vector<1x64xf32>
    %4 = vector.broadcast %3 : vector<1x64xf32> to vector<232x64xf32>
    %5 = arith.addf %2, %4 : vector<232x64xf32>
    %cst_5 = arith.constant 0.000000e+00 : f32
    %6 = vector.broadcast %cst_5 : f32 to vector<232x64xf32>
    %7 = arith.maximumf %5, %6 : vector<232x64xf32>
    %8 = arith.truncf %7 : vector<232x64xf32> to vector<232x64xbf16>
    %c0_6 = arith.constant 0 : index
    %c0_7 = arith.constant 0 : index
    %9 = vector.load %arg5[%c0_6, %c0_7] : memref<232x64xbf16, #tpu.memory_space<vmem>>, vector<232x64xbf16>
    tpu.vector_store %arg5[%c0_6, %c0_7], %8 {strides = array<i32>} : memref<232x64xbf16, #tpu.memory_space<vmem>>, vector<232x64xbf16>,
    return
  }
  func.func @transform_0(%arg0: i32, %arg1: i32) -> (i32, i32) {
    %c0_i32 = arith.constant 0 : i32
    %c0_i32_0 = arith.constant 0 : i32
    return %arg0, %c0_i32 : i32, i32
  }
  func.func @transform_1(%arg0: i32, %arg1: i32) -> (i32, i32) {
    %c0_i32 = arith.constant 0 : i32
    %c0_i32_0 = arith.constant 0 : i32
    return %c0_i32, %arg1 : i32, i32
  }
  func.func @transform_2(%arg0: i32, %arg1: i32) -> (i32, i32) {
    %c0_i32 = arith.constant 0 : i32
    %c0_i32_0 = arith.constant 0 : i32
    return %c0_i32, %arg1 : i32, i32
  }
  func.func @transform_3(%arg0: i32, %arg1: i32) -> (i32, i32) {
    %c0_i32 = arith.constant 0 : i32
    return %arg0, %arg1 : i32, i32
  }
}

module attributes {stable_mosaic.version = 11 : i64} {
  func.func @_matmul_bias_act_kernel(%arg0: i32, %arg1: i32, %arg2: memref<56x1664xbf16, #tpu.memory_space<vmem>>, %arg3: memref<1664x128xbf16, #tpu.memory_space<vmem>>, %arg4: memref<1x128xf32, #tpu.memory_space<vmem>>, %arg5: memref<56x128xbf16, #tpu.memory_space<vmem>>) attributes {dimension_semantics = [#tpu.dimension_semantics<parallel>, #tpu.dimension_semantics<parallel>], iteration_bounds = array<i64: 2, 1>, scalar_prefetch = 0 : i64, scratch_operands = 0 : i64, tpu.core_type = #tpu.core_type<tc>, window_params = [{transform_indices = @transform_0, window_bounds = array<i64: 56, 1664>}, {transform_indices = @transform_1, window_bounds = array<i64: 1664, 128>}, {transform_indices = @transform_2, window_bounds = array<i64: 1, 128>}, {transform_indices = @transform_3, window_bounds = array<i64: 56, 128>}]} {
    %c0 = arith.constant 0 : index
    %c0_0 = arith.constant 0 : index
    %0 = vector.load %arg2[%c0, %c0_0] : memref<56x1664xbf16, #tpu.memory_space<vmem>>, vector<56x1664xbf16>
    %c0_1 = arith.constant 0 : index
    %c0_2 = arith.constant 0 : index
    %1 = vector.load %arg3[%c0_1, %c0_2] : memref<1664x128xbf16, #tpu.memory_space<vmem>>, vector<1664x128xbf16>
    %cst = arith.constant dense<0.000000e+00> : vector<56x128xf32>
    %2 = tpu.matmul %0, %1, %cst {dimension_numbers = #tpu.dot_dimension_numbers<[1], [0], [0], [1], [0, 0, 1, 1], [], []>} : vector<56x1664xbf16>, vector<1664x128xbf16>, vector<56x128xf32> -> vector<56x128xf32>
    %c0_3 = arith.constant 0 : index
    %c0_4 = arith.constant 0 : index
    %3 = vector.load %arg4[%c0_3, %c0_4] : memref<1x128xf32, #tpu.memory_space<vmem>>, vector<1x128xf32>
    %4 = vector.broadcast %3 : vector<1x128xf32> to vector<56x128xf32>
    %5 = arith.addf %2, %4 : vector<56x128xf32>
    %cst_5 = arith.constant 0.000000e+00 : f32
    %6 = vector.broadcast %cst_5 : f32 to vector<56x128xf32>
    %7 = arith.maximumf %5, %6 : vector<56x128xf32>
    %8 = arith.truncf %7 : vector<56x128xf32> to vector<56x128xbf16>
    %c0_6 = arith.constant 0 : index
    %c0_7 = arith.constant 0 : index
    %9 = vector.load %arg5[%c0_6, %c0_7] : memref<56x128xbf16, #tpu.memory_space<vmem>>, vector<56x128xbf16>
    tpu.vector_store %arg5[%c0_6, %c0_7], %8 {strides = array<i32>} : memref<56x128xbf16, #tpu.memory_space<vmem>>, vector<56x128xbf16>,
    return
  }
  func.func @transform_0(%arg0: i32, %arg1: i32) -> (i32, i32) {
    %c0_i32 = arith.constant 0 : i32
    %c0_i32_0 = arith.constant 0 : i32
    return %arg0, %c0_i32 : i32, i32
  }
  func.func @transform_1(%arg0: i32, %arg1: i32) -> (i32, i32) {
    %c0_i32 = arith.constant 0 : i32
    %c0_i32_0 = arith.constant 0 : i32
    return %c0_i32, %arg1 : i32, i32
  }
  func.func @transform_2(%arg0: i32, %arg1: i32) -> (i32, i32) {
    %c0_i32 = arith.constant 0 : i32
    %c0_i32_0 = arith.constant 0 : i32
    return %c0_i32, %arg1 : i32, i32
  }
  func.func @transform_3(%arg0: i32, %arg1: i32) -> (i32, i32) {
    %c0_i32 = arith.constant 0 : i32
    return %arg0, %arg1 : i32, i32
  }
}

module attributes {stable_mosaic.version = 11 : i64} {
  func.func @_fc_head_kernel(%arg0: memref<8x1152xbf16, #tpu.memory_space<vmem>>, %arg1: memref<1152x1024xbf16, #tpu.memory_space<vmem>>, %arg2: memref<1x1024xf32, #tpu.memory_space<vmem>>, %arg3: memref<1024x1024xbf16, #tpu.memory_space<vmem>>, %arg4: memref<1x1024xf32, #tpu.memory_space<vmem>>, %arg5: memref<1024x128xbf16, #tpu.memory_space<vmem>>, %arg6: memref<1x128xf32, #tpu.memory_space<vmem>>, %arg7: memref<8x128xf32, #tpu.memory_space<vmem>>) attributes {dimension_semantics = [], scalar_prefetch = 0 : i64, scratch_operands = 0 : i64, tpu.core_type = #tpu.core_type<tc>} {
    %c0 = arith.constant 0 : index
    %c0_0 = arith.constant 0 : index
    %0 = vector.load %arg0[%c0, %c0_0] : memref<8x1152xbf16, #tpu.memory_space<vmem>>, vector<8x1152xbf16>
    %c0_1 = arith.constant 0 : index
    %c0_2 = arith.constant 0 : index
    %1 = vector.load %arg1[%c0_1, %c0_2] : memref<1152x1024xbf16, #tpu.memory_space<vmem>>, vector<1152x1024xbf16>
    %cst = arith.constant dense<0.000000e+00> : vector<8x1024xf32>
    %2 = tpu.matmul %0, %1, %cst {dimension_numbers = #tpu.dot_dimension_numbers<[1], [0], [0], [1], [0, 0, 1, 1], [], []>} : vector<8x1152xbf16>, vector<1152x1024xbf16>, vector<8x1024xf32> -> vector<8x1024xf32>
    %c0_3 = arith.constant 0 : index
    %c0_4 = arith.constant 0 : index
    %3 = vector.load %arg2[%c0_3, %c0_4] : memref<1x1024xf32, #tpu.memory_space<vmem>>, vector<1x1024xf32>
    %4 = vector.broadcast %3 : vector<1x1024xf32> to vector<8x1024xf32>
    %5 = arith.addf %2, %4 : vector<8x1024xf32>
    %cst_5 = arith.constant 0.000000e+00 : f32
    %6 = vector.broadcast %cst_5 : f32 to vector<8x1024xf32>
    %7 = arith.maximumf %5, %6 : vector<8x1024xf32>
    %8 = arith.truncf %7 : vector<8x1024xf32> to vector<8x1024xbf16>
    %c0_6 = arith.constant 0 : index
    %c0_7 = arith.constant 0 : index
    %9 = vector.load %arg3[%c0_6, %c0_7] : memref<1024x1024xbf16, #tpu.memory_space<vmem>>, vector<1024x1024xbf16>
    %cst_8 = arith.constant dense<0.000000e+00> : vector<8x1024xf32>
    %10 = tpu.matmul %8, %9, %cst_8 {dimension_numbers = #tpu.dot_dimension_numbers<[1], [0], [0], [1], [0, 0, 1, 1], [], []>} : vector<8x1024xbf16>, vector<1024x1024xbf16>, vector<8x1024xf32> -> vector<8x1024xf32>
    %c0_9 = arith.constant 0 : index
    %c0_10 = arith.constant 0 : index
    %11 = vector.load %arg4[%c0_9, %c0_10] : memref<1x1024xf32, #tpu.memory_space<vmem>>, vector<1x1024xf32>
    %12 = vector.broadcast %11 : vector<1x1024xf32> to vector<8x1024xf32>
    %13 = arith.addf %10, %12 : vector<8x1024xf32>
    %cst_11 = arith.constant 0.000000e+00 : f32
    %14 = vector.broadcast %cst_11 : f32 to vector<8x1024xf32>
    %15 = arith.maximumf %13, %14 : vector<8x1024xf32>
    %16 = arith.truncf %15 : vector<8x1024xf32> to vector<8x1024xbf16>
    %c0_12 = arith.constant 0 : index
    %c0_13 = arith.constant 0 : index
    %17 = vector.load %arg5[%c0_12, %c0_13] : memref<1024x128xbf16, #tpu.memory_space<vmem>>, vector<1024x128xbf16>
    %cst_14 = arith.constant dense<0.000000e+00> : vector<8x128xf32>
    %18 = tpu.matmul %16, %17, %cst_14 {dimension_numbers = #tpu.dot_dimension_numbers<[1], [0], [0], [1], [0, 0, 1, 1], [], []>} : vector<8x1024xbf16>, vector<1024x128xbf16>, vector<8x128xf32> -> vector<8x128xf32>
    %c0_15 = arith.constant 0 : index
    %c0_16 = arith.constant 0 : index
    %19 = vector.load %arg6[%c0_15, %c0_16] : memref<1x128xf32, #tpu.memory_space<vmem>>, vector<1x128xf32>
    %20 = vector.broadcast %19 : vector<1x128xf32> to vector<8x128xf32>
    %21 = arith.addf %18, %20 : vector<8x128xf32>
    %c0_17 = arith.constant 0 : index
    %c0_18 = arith.constant 0 : index
    %22 = vector.load %arg7[%c0_17, %c0_18] : memref<8x128xf32, #tpu.memory_space<vmem>>, vector<8x128xf32>
    tpu.vector_store %arg7[%c0_17, %c0_18], %21 {strides = array<i32>} : memref<8x128xf32, #tpu.memory_space<vmem>>, vector<8x128xf32>,
    return
  }
}

</mosaic_0001>

<bundles_post_ra>
// kernel: convfc_forward.4
= control target key start
LH: loop header
LB: loop body
LE: loop exit
PB: predicated region body
PF: predicated region fallthrough
CT: control target
= control target key end

     0   :  { %s1163_s12 = smov 0   ;;  %s1165_s13 = smov 0   ;;  %s1348_s0 = inlined_call_operand.vmem [shape: bf16[2048,128], index: 0, kind: input, shape index: {}]   ;;  %s1349_s1 = inlined_call_operand.vmem [shape: bf16[128,32], index: 1, kind: input, shape index: {}]   ;;  %s1350_s2 = inlined_call_operand.vmem [shape: f32[1,32], index: 2, kind: input, shape index: {}]   ;;  %s1351_s3 = inlined_call_operand.vmem [shape: bf16[2048,32], index: 3, kind: output, shape index: {}]  }
   0x1   :  { %s1167_s14 = smov 0  }
   0x2 LB: > { %s25_s15 = sadd.s32 1, %s1137_s13  ;;  %p887_p0 = scmp.ge.s32.totalorder %s1141_s14, 1  ;;  %s1141_s14 = sphi %s1167_s14, %s13_s14   ;;  %s1137_s13 = sphi %s1165_s13, %s1353_s13   ;;  %s1133_s12 = sphi %s1163_s12, %s1352_s12  }
   0x3   : > { %p27_p1 = scmp.ge.s32.totalorder %s25_s15, 8  ;;  %p169_p2 = scmp.lt.s32.totalorder %s1141_s14, 9 }
   0x5   : > { %s1355_s15 = smov (%p27_p1, %s25_s15), 0  ;;  %p170_p3 = pnand %p887_p0, %p169_p2 }
   0x6   : > { %v1095_v0 = vld [vmem:[%s1349_s1] sm:$0xff] (!%p170_p3)   ;;  %s888_s18 = sshll.u32 (!%p170_p3), %s1133_s12, 5  ;;  %v1096_v1 = vld [vmem:[%s1349_s1 + $0x8] sm:$0xff] (!%p170_p3)   ;;  %v1097_v2 = vld [vmem:[%s1349_s1 + $0x10] sm:$0xff] (!%p170_p3)   ;;  %vm746_vm0 = vcmask (!%p170_p3), 257024  }
   0x7   : > { %173 = sbr.rel (%p170_p3) target bundleno = 285 (0x11d), region = 32  ;;  %p204_p4 = scmp.lt.s32.totalorder (!%p170_p3), %s888_s18, 255  ;;  %1007 = vmatprep.subr.bf16.mxu0 (!%p170_p3), %v1095_v0  ;;  %1055 = vmatprep.subr.bf16.mxu1 (!%p170_p3), %v1095_v0  ;;  %v1098_v3 = vld [vmem:[%s1349_s1 + $0x18] sm:$0xff] (!%p170_p3)   ;;  %v1099_v6 = vld [vmem:[%s1349_s1 + $0x20] sm:$0xff] (!%p170_p3)   ;;  %v1100_v7 = vld [vmem:[%s1349_s1 + $0x28] sm:$0xff] (!%p170_p3)  }
   0x8   : > { %1008 = vmatpush3.bf16.msra.mxu0 (!%p170_p3), %v1095_v0  ;;  %1063 = vmatpush3.bf16.msra.mxu1 (!%p170_p3), %v1095_v0  ;;  %v1101_v8 = vld [vmem:[%s1349_s1 + $0x30] sm:$0xff] (!%p170_p3)   ;;  %v1102_v9 = vld [vmem:[%s1349_s1 + $0x38] sm:$0xff] (!%p170_p3)   ;;  %v1234_v24 = vld [vmem:[%s1350_s2] ss:$0 sm:$0xff] (!%p170_p3) }
   0x9   : > { %1009 = vmatprep.subr.bf16.mxu0 (!%p170_p3), %v1096_v1  ;;  %1056 = vmatprep.subr.bf16.mxu1 (!%p170_p3), %v1096_v1 }
   0xc   : > { %1010 = vmatpush3.bf16.msra.mxu0 (!%p170_p3), %v1096_v1  ;;  %1064 = vmatpush3.bf16.msra.mxu1 (!%p170_p3), %v1096_v1 }
   0xd   : > { %1011 = vmatprep.subr.bf16.mxu0 (!%p170_p3), %v1097_v2  ;;  %1057 = vmatprep.subr.bf16.mxu1 (!%p170_p3), %v1097_v2 }
   0xe   : > { %s1357_s18 = smov (!%p204_p4, %s888_s18), 255 }
   0xf   : > { %s889_s23 = sshll.u32 %s1357_s18, 2 }
  0x10   : > { %s1198_s26 = scalar_lea.vmem %s1348_s0, %s889_s23  ;;  %1012 = vmatpush3.bf16.msra.mxu0 %v1097_v2  ;;  %1065 = vmatpush3.bf16.msra.mxu1 %v1097_v2  ;;  %s1247_s17 = scalar_lea.vmem %s1351_s3, %s889_s23 }
  0x11   : > { %v1103_v4 = vld [vmem:[%s1198_s26] sm:$0xff]   ;;  %1013 = vmatprep.subr.bf16.mxu0 %v1098_v3  ;;  %1058 = vmatprep.subr.bf16.mxu1 %v1098_v3  ;;  %v1105_v10 = vld [vmem:[%s1198_s26 + $0x8] sm:$0xff]   ;;  %v1107_v12 = vld [vmem:[%s1198_s26 + $0x10] sm:$0xff]  }
  0x12   : > { %v1104_v5 = vld [vmem:[%s1198_s26 + $0x40] sm:$0xff]   ;;  %1023 = vmatprep.mubr.bf16.mxu0 %v1103_v4  ;;  %v1106_v11 = vld [vmem:[%s1198_s26 + $0x48] sm:$0xff]   ;;  %v1108_v13 = vld [vmem:[%s1198_s26 + $0x50] sm:$0xff]  }
  0x13   : > { %1039 = vmatprep.mubr.bf16.mxu1 %v1104_v5  ;;  %v1109_v14 = vld [vmem:[%s1198_s26 + $0x18] sm:$0xff]   ;;  %v1111_v16 = vld [vmem:[%s1198_s26 + $0x20] sm:$0xff]   ;;  %v1113_v18 = vld [vmem:[%s1198_s26 + $0x28] sm:$0xff]  }
  0x14   : > { %1014 = vmatpush3.bf16.msra.mxu0 %v1098_v3  ;;  %1066 = vmatpush3.bf16.msra.mxu1 %v1098_v3  ;;  %v1110_v15 = vld [vmem:[%s1198_s26 + $0x58] sm:$0xff]   ;;  %v1112_v17 = vld [vmem:[%s1198_s26 + $0x60] sm:$0xff]   ;;  %v1114_v19 = vld [vmem:[%s1198_s26 + $0x68] sm:$0xff]  }
  0x15   : > { %1015 = vmatprep.subr.bf16.mxu0 %v1099_v6  ;;  %1059 = vmatprep.subr.bf16.mxu1 %v1099_v6  ;;  %v1115_v20 = vld [vmem:[%s1198_s26 + $0x30] sm:$0xff]   ;;  %v1117_v22 = vld [vmem:[%s1198_s26 + $0x38] sm:$0xff]  }
  0x16   : > { %v1116_v21 = vld [vmem:[%s1198_s26 + $0x70] sm:$0xff]   ;;  %v1118_v23 = vld [vmem:[%s1198_s26 + $0x78] sm:$0xff]  }
  0x18   : > { %1016 = vmatpush3.bf16.msra.mxu0 %v1099_v6  ;;  %1067 = vmatpush3.bf16.msra.mxu1 %v1099_v6 }
  0x19   : > { %1017 = vmatprep.subr.bf16.mxu0 %v1100_v7  ;;  %1060 = vmatprep.subr.bf16.mxu1 %v1100_v7 }
  0x1c   : > { %1018 = vmatpush3.bf16.msra.mxu0 %v1100_v7  ;;  %1068 = vmatpush3.bf16.msra.mxu1 %v1100_v7 }
  0x1d   : > { %1019 = vmatprep.subr.bf16.mxu0 %v1101_v8  ;;  %1061 = vmatprep.subr.bf16.mxu1 %v1101_v8 }
  0x20   : > { %1020 = vmatpush3.bf16.msra.mxu0 %v1101_v8  ;;  %1069 = vmatpush3.bf16.msra.mxu1 %v1101_v8 }
  0x21   : > { %1021 = vmatprep.subr.bf16.mxu0 %v1102_v9  ;;  %1062 = vmatprep.subr.bf16.mxu1 %v1102_v9 }
  0x24   : > { %1022 = vmatpush3.bf16.msra.mxu0 %v1102_v9  ;;  %1070 = vmatpush3.bf16.msra.mxu1 %v1102_v9 }
  0x27   : > { %1024 = vmatmul.mubr.bf16.vlgmr.msra.gmra.mrb[0].mxu0 %v1105_v10  ;;  %1040 = vmatmul.mubr.bf16.vlgmr.msra.gmra.mrb[0].mxu1 %v1106_v11 }
  0x28   : > { %1027 = vmatprep.mubr.bf16.mxu0 %v1107_v12  ;;  %1043 = vmatprep.mubr.bf16.mxu1 %v1108_v13 }
  0x2f   : > { %1028 = vmatmul.mubr.bf16.gmra.mrb[4].mxu0 %v1109_v14  ;;  %1044 = vmatmul.mubr.bf16.gmra.mrb[4].mxu1 %v1110_v15 }
  0x30   : > { %1031 = vmatprep.mubr.bf16.mxu0 %v1111_v16  ;;  %1047 = vmatprep.mubr.bf16.mxu1 %v1112_v17 }
  0x37   : > { %1032 = vmatmul.mubr.bf16.gmra.mrb[8].mxu0 %v1113_v18  ;;  %1048 = vmatmul.mubr.bf16.gmra.mrb[8].mxu1 %v1114_v19 }
  0x38   : > { %1035 = vmatprep.mubr.bf16.mxu0 %v1115_v20  ;;  %1051 = vmatprep.mubr.bf16.mxu1 %v1116_v21 }
  0x3f   : > { %1036 = vmatmul.mubr.bf16.gmra.mrb[12].mxu0 %v1117_v22  ;;  %1052 = vmatmul.mubr.bf16.gmra.mrb[12].mxu1 %v1118_v23 }
  0xfa   : > { %v1025_v25 = vpop.f32.mrb[0].mxu0  ;;  %v1041_v26 = vpop.f32.mrb[0].mxu1 }
  0xfb   : > { %v468_v27 = vadd.f32 %v1025_v25, %v1234_v24  ;;  %v532_v28 = vadd.f32 %v1041_v26, %v1234_v24  ;;  %v459_v29 = vpop.f32.mrb[1].mxu0  ;;  %v523_v30 = vpop.f32.mrb[1].mxu1 }
  0xfc   : > { %v460_v31 = vadd.f32 %v1234_v24, %v459_v29  ;;  %v524_v32 = vadd.f32 %v1234_v24, %v523_v30  ;;  %v1026_v33 = vpop.f32.mrb[2].mxu0  ;;  %v1042_v34 = vpop.f32.mrb[2].mxu1 }
  0xfd   : > { %v588_v35 = vmax.f32 %v468_v27, 0.0  ;;  %v604_v36 = vmax.f32 %v532_v28, 0.0  ;;  %v471_v37 = vadd.f32 %v1026_v33, %v1234_v24  ;;  %v535_v38 = vadd.f32 %v1042_v34, %v1234_v24  ;;  %v462_v39 = vpop.f32.mrb[3].mxu0  ;;  %v526_v40 = vpop.f32.mrb[3].mxu1 }
  0xfe   : > { %v586_v41 = vmax.f32 %v460_v31, 0.0  ;;  %v602_v42 = vmax.f32 %v524_v32, 0.0  ;;  %v463_v43 = vadd.f32 %v1234_v24, %v462_v39  ;;  %v527_v44 = vadd.f32 %v1234_v24, %v526_v40 }
  0xff   : > { %v953_v45 = vpack.c.bf16 %v588_v35, %v588_v35  ;;  %v969_v46 = vpack.c.bf16 %v604_v36, %v604_v36  ;;  %v589_v47 = vmax.f32 %v471_v37, 0.0  ;;  %v605_v48 = vmax.f32 %v535_v38, 0.0 }
 0x100   : > { %v951_v49 = vpack.c.bf16 %v586_v41, %v586_v41  ;;  %v967_v50 = vpack.c.bf16 %v602_v42, %v602_v42  ;;  %v587_v51 = vmax.f32 %v463_v43, 0.0  ;;  %v603_v52 = vmax.f32 %v527_v44, 0.0 }
 0x101   : > { %749 = vst.msk [vmem:[%s1247_s17 + $0x8] sm:$0xf] %vm746_vm0, %v953_v45  ;;  %765 = vst.msk [vmem:[%s1247_s17 + $0x48] sm:$0xf] %vm746_vm0, %v969_v46  ;;  %v954_v53 = vpack.c.bf16 %v589_v47, %v589_v47  ;;  %v970_v54 = vpack.c.bf16 %v605_v48, %v605_v48 }
 0x102   : > { %747 = vst.msk [vmem:[%s1247_s17] sm:$0xf] %vm746_vm0, %v951_v49  ;;  %763 = vst.msk [vmem:[%s1247_s17 + $0x40] sm:$0xf] %vm746_vm0, %v967_v50  ;;  %v952_v55 = vpack.c.bf16 %v587_v51, %v587_v51  ;;  %v968_v56 = vpack.c.bf16 %v603_v52, %v603_v52  ;;  %v1029_v57 = vpop.f32.mrb[4].mxu0  ;;  %v1045_v58 = vpop.f32.mrb[4].mxu1 }
 0x103   : > { %750 = vst.msk [vmem:[%s1247_s17 + $0xc] sm:$0xf] %vm746_vm0, %v954_v53  ;;  %766 = vst.msk [vmem:[%s1247_s17 + $0x4c] sm:$0xf] %vm746_vm0, %v970_v54  ;;  %v484_v59 = vadd.f32 %v1029_v57, %v1234_v24  ;;  %v548_v60 = vadd.f32 %v1045_v58, %v1234_v24  ;;  %v475_v61 = vpop.f32.mrb[5].mxu0  ;;  %v539_v62 = vpop.f32.mrb[5].mxu1 }
 0x104   : > { %748 = vst.msk [vmem:[%s1247_s17 + $0x4] sm:$0xf] %vm746_vm0, %v952_v55  ;;  %764 = vst.msk [vmem:[%s1247_s17 + $0x44] sm:$0xf] %vm746_vm0, %v968_v56  ;;  %v476_v63 = vadd.f32 %v1234_v24, %v475_v61  ;;  %v540_v0 = vadd.f32 %v1234_v24, %v539_v62  ;;  %v1030_v1 = vpop.f32.mrb[6].mxu0  ;;  %v1046_v2 = vpop.f32.mrb[6].mxu1 }
 0x105   : > { %v592_v3 = vmax.f32 %v484_v59, 0.0  ;;  %v608_v4 = vmax.f32 %v548_v60, 0.0  ;;  %v487_v5 = vadd.f32 %v1030_v1, %v1234_v24  ;;  %v551_v6 = vadd.f32 %v1046_v2, %v1234_v24  ;;  %v478_v7 = vpop.f32.mrb[7].mxu0  ;;  %v542_v8 = vpop.f32.mrb[7].mxu1 }
 0x106   : > { %v590_v9 = vmax.f32 %v476_v63, 0.0  ;;  %v606_v10 = vmax.f32 %v540_v0, 0.0  ;;  %v479_v11 = vadd.f32 %v1234_v24, %v478_v7  ;;  %v543_v12 = vadd.f32 %v1234_v24, %v542_v8 }
 0x107   : > { %v957_v13 = vpack.c.bf16 %v592_v3, %v592_v3  ;;  %v973_v14 = vpack.c.bf16 %v608_v4, %v608_v4  ;;  %v593_v15 = vmax.f32 %v487_v5, 0.0  ;;  %v609_v16 = vmax.f32 %v551_v6, 0.0 }
 0x108   : > { %v955_v17 = vpack.c.bf16 %v590_v9, %v590_v9  ;;  %v971_v18 = vpack.c.bf16 %v606_v10, %v606_v10  ;;  %v591_v19 = vmax.f32 %v479_v11, 0.0  ;;  %v607_v20 = vmax.f32 %v543_v12, 0.0 }
 0x109   : > { %753 = vst.msk [vmem:[%s1247_s17 + $0x18] sm:$0xf] %vm746_vm0, %v957_v13  ;;  %769 = vst.msk [vmem:[%s1247_s17 + $0x58] sm:$0xf] %vm746_vm0, %v973_v14  ;;  %v958_v21 = vpack.c.bf16 %v593_v15, %v593_v15  ;;  %v974_v22 = vpack.c.bf16 %v609_v16, %v609_v16 }
 0x10a   : > { %751 = vst.msk [vmem:[%s1247_s17 + $0x10] sm:$0xf] %vm746_vm0, %v955_v17  ;;  %767 = vst.msk [vmem:[%s1247_s17 + $0x50] sm:$0xf] %vm746_vm0, %v971_v18  ;;  %v956_v23 = vpack.c.bf16 %v591_v19, %v591_v19  ;;  %v972_v25 = vpack.c.bf16 %v607_v20, %v607_v20  ;;  %v1033_v26 = vpop.f32.mrb[8].mxu0  ;;  %v1049_v27 = vpop.f32.mrb[8].mxu1 }
 0x10b   : > { %754 = vst.msk [vmem:[%s1247_s17 + $0x1c] sm:$0xf] %vm746_vm0, %v958_v21  ;;  %770 = vst.msk [vmem:[%s1247_s17 + $0x5c] sm:$0xf] %vm746_vm0, %v974_v22  ;;  %v500_v28 = vadd.f32 %v1033_v26, %v1234_v24  ;;  %v564_v29 = vadd.f32 %v1049_v27, %v1234_v24  ;;  %v491_v30 = vpop.f32.mrb[9].mxu0  ;;  %v555_v31 = vpop.f32.mrb[9].mxu1 }
 0x10c   : > { %752 = vst.msk [vmem:[%s1247_s17 + $0x14] sm:$0xf] %vm746_vm0, %v956_v23  ;;  %768 = vst.msk [vmem:[%s1247_s17 + $0x54] sm:$0xf] %vm746_vm0, %v972_v25  ;;  %v492_v32 = vadd.f32 %v1234_v24, %v491_v30  ;;  %v556_v33 = vadd.f32 %v1234_v24, %v555_v31  ;;  %v1034_v34 = vpop.f32.mrb[10].mxu0  ;;  %v1050_v35 = vpop.f32.mrb[10].mxu1 }
 0x10d   : > { %v596_v36 = vmax.f32 %v500_v28, 0.0  ;;  %v612_v37 = vmax.f32 %v564_v29, 0.0  ;;  %v503_v38 = vadd.f32 %v1034_v34, %v1234_v24  ;;  %v567_v39 = vadd.f32 %v1050_v35, %v1234_v24  ;;  %v494_v40 = vpop.f32.mrb[11].mxu0  ;;  %v558_v41 = vpop.f32.mrb[11].mxu1 }
 0x10e   : > { %v594_v42 = vmax.f32 %v492_v32, 0.0  ;;  %v610_v43 = vmax.f32 %v556_v33, 0.0  ;;  %v495_v44 = vadd.f32 %v1234_v24, %v494_v40  ;;  %v559_v45 = vadd.f32 %v1234_v24, %v558_v41 }
 0x10f   : > { %v961_v46 = vpack.c.bf16 %v596_v36, %v596_v36  ;;  %v977_v47 = vpack.c.bf16 %v612_v37, %v612_v37  ;;  %v597_v48 = vmax.f32 %v503_v38, 0.0  ;;  %v613_v49 = vmax.f32 %v567_v39, 0.0 }
 0x110   : > { %v959_v50 = vpack.c.bf16 %v594_v42, %v594_v42  ;;  %v975_v51 = vpack.c.bf16 %v610_v43, %v610_v43  ;;  %v595_v52 = vmax.f32 %v495_v44, 0.0  ;;  %v611_v53 = vmax.f32 %v559_v45, 0.0 }
 0x111   : > { %757 = vst.msk [vmem:[%s1247_s17 + $0x28] sm:$0xf] %vm746_vm0, %v961_v46  ;;  %773 = vst.msk [vmem:[%s1247_s17 + $0x68] sm:$0xf] %vm746_vm0, %v977_v47  ;;  %v962_v54 = vpack.c.bf16 %v597_v48, %v597_v48  ;;  %v978_v55 = vpack.c.bf16 %v613_v49, %v613_v49 }
 0x112   : > { %755 = vst.msk [vmem:[%s1247_s17 + $0x20] sm:$0xf] %vm746_vm0, %v959_v50  ;;  %771 = vst.msk [vmem:[%s1247_s17 + $0x60] sm:$0xf] %vm746_vm0, %v975_v51  ;;  %v960_v56 = vpack.c.bf16 %v595_v52, %v595_v52  ;;  %v976_v57 = vpack.c.bf16 %v611_v53, %v611_v53  ;;  %v1037_v58 = vpop.f32.mrb[12].mxu0  ;;  %v1053_v59 = vpop.f32.mrb[12].mxu1 }
 0x113   : > { %758 = vst.msk [vmem:[%s1247_s17 + $0x2c] sm:$0xf] %vm746_vm0, %v962_v54  ;;  %774 = vst.msk [vmem:[%s1247_s17 + $0x6c] sm:$0xf] %vm746_vm0, %v978_v55  ;;  %v516_v60 = vadd.f32 %v1037_v58, %v1234_v24  ;;  %v580_v61 = vadd.f32 %v1053_v59, %v1234_v24  ;;  %v507_v62 = vpop.f32.mrb[13].mxu0  ;;  %v571_v63 = vpop.f32.mrb[13].mxu1 }
 0x114   : > { %756 = vst.msk [vmem:[%s1247_s17 + $0x24] sm:$0xf] %vm746_vm0, %v960_v56  ;;  %772 = vst.msk [vmem:[%s1247_s17 + $0x64] sm:$0xf] %vm746_vm0, %v976_v57  ;;  %v508_v0 = vadd.f32 %v1234_v24, %v507_v62  ;;  %v572_v1 = vadd.f32 %v1234_v24, %v571_v63  ;;  %v1038_v2 = vpop.f32.mrb[14].mxu0  ;;  %v1054_v3 = vpop.f32.mrb[14].mxu1 }
 0x115   : > { %v600_v4 = vmax.f32 %v516_v60, 0.0  ;;  %v616_v5 = vmax.f32 %v580_v61, 0.0  ;;  %v519_v6 = vadd.f32 %v1038_v2, %v1234_v24  ;;  %v583_v7 = vadd.f32 %v1054_v3, %v1234_v24  ;;  %v510_v8 = vpop.f32.mrb[15].mxu0  ;;  %v574_v9 = vpop.f32.mrb[15].mxu1 }
 0x116   : > { %v598_v10 = vmax.f32 %v508_v0, 0.0  ;;  %v614_v11 = vmax.f32 %v572_v1, 0.0  ;;  %v511_v12 = vadd.f32 %v1234_v24, %v510_v8  ;;  %v575_v13 = vadd.f32 %v1234_v24, %v574_v9 }
 0x117   : > { %v965_v14 = vpack.c.bf16 %v600_v4, %v600_v4  ;;  %v981_v15 = vpack.c.bf16 %v616_v5, %v616_v5  ;;  %v601_v16 = vmax.f32 %v519_v6, 0.0  ;;  %v617_v17 = vmax.f32 %v583_v7, 0.0 }
 0x118   : > { %v963_v18 = vpack.c.bf16 %v598_v10, %v598_v10  ;;  %v979_v19 = vpack.c.bf16 %v614_v11, %v614_v11  ;;  %v599_v20 = vmax.f32 %v511_v12, 0.0  ;;  %v615_v21 = vmax.f32 %v575_v13, 0.0 }
 0x119   : > { %761 = vst.msk [vmem:[%s1247_s17 + $0x38] sm:$0xf] %vm746_vm0, %v965_v14  ;;  %777 = vst.msk [vmem:[%s1247_s17 + $0x78] sm:$0xf] %vm746_vm0, %v981_v15  ;;  %v966_v22 = vpack.c.bf16 %v601_v16, %v601_v16  ;;  %v982_v23 = vpack.c.bf16 %v617_v17, %v617_v17 }
 0x11a   : > { %759 = vst.msk [vmem:[%s1247_s17 + $0x30] sm:$0xf] %vm746_vm0, %v963_v18  ;;  %775 = vst.msk [vmem:[%s1247_s17 + $0x70] sm:$0xf] %vm746_vm0, %v979_v19  ;;  %v964_v24 = vpack.c.bf16 %v599_v20, %v599_v20  ;;  %v980_v25 = vpack.c.bf16 %v615_v21, %v615_v21 }
 0x11b   : > { %762 = vst.msk [vmem:[%s1247_s17 + $0x3c] sm:$0xf] %vm746_vm0, %v966_v22  ;;  %778 = vst.msk [vmem:[%s1247_s17 + $0x7c] sm:$0xf] %vm746_vm0, %v982_v23 }
 0x11c   : > { %760 = vst.msk [vmem:[%s1247_s17 + $0x34] sm:$0xf] %vm746_vm0, %v964_v24  ;;  %776 = vst.msk [vmem:[%s1247_s17 + $0x74] sm:$0xf] %vm746_vm0, %v980_v25 }
 0x11d PF: > { %s13_s14 = sadd.s32 1, %s1141_s14   ;;  %s1352_s12 = smov %s1137_s13 }
 0x11e   : > { %p10_p5 = scmp.ge.s32.totalorder %s13_s14, 10   ;;  %s1353_s13 = smov %s1355_s15 }
 0x120   :  { %12 = sbr.rel (!%p10_p5) target bundleno = 2 (0x2), region = 68 }

// kernel: convfc_forward.5
= control target key start
LH: loop header
LB: loop body
LE: loop exit
PB: predicated region body
PF: predicated region fallthrough
CT: control target
= control target key end

     0   :  { %s3139_s12 = smov 0   ;;  %s3141_s13 = smov 0   ;;  %s3670_s0 = inlined_call_operand.vmem [shape: bf16[464,896], index: 0, kind: input, shape index: {}]   ;;  %s3671_s1 = inlined_call_operand.vmem [shape: bf16[896,64], index: 1, kind: input, shape index: {}]   ;;  %s3672_s2 = inlined_call_operand.vmem [shape: f32[1,64], index: 2, kind: input, shape index: {}]   ;;  %s3673_s3 = inlined_call_operand.vmem [shape: bf16[464,64], index: 3, kind: output, shape index: {}]  }
   0x1   :  { %s3143_s14 = smov 0  }
   0x2 LB: > { %s25_s15 = sadd.s32 1, %s3111_s13  ;;  %p2221_p0 = scmp.ge.s32.totalorder %s3115_s14, 1  ;;  %s3115_s14 = sphi %s3143_s14, %s13_s14   ;;  %s3111_s13 = sphi %s3141_s13, %s3675_s13   ;;  %s3107_s12 = sphi %s3139_s12, %s3674_s12  }
   0x3   : > { %p27_p1 = scmp.ge.s32.totalorder %s25_s15, 2  ;;  %p170_p2 = scmp.lt.s32.totalorder %s3115_s14, 3 }
   0x5   : > { %s3677_s15 = smov (%p27_p1, %s25_s15), 0  ;;  %p171_p3 = pnand %p2221_p0, %p170_p2 }
   0x6   : > { %v2890_v0 = vld [vmem:[%s3671_s1 + $0x40] sm:$0xff] (!%p171_p3)   ;;  %v2894_v4 = vld [vmem:[%s3671_s1 + $0x48] sm:$0xff] (!%p171_p3)   ;;  %v2898_v8 = vld [vmem:[%s3671_s1 + $0x50] sm:$0xff] (!%p171_p3)   ;;  %s205_s19 = smul.u32 (!%p171_p3), 29, %s3107_s12  ;;  %v3117_v38 = vmov (!%p171_p3), 0.0   ;;  %vm3118_vm0 = vmmov (!%p171_p3), 0  }
   0x7   : > { %174 = sbr.rel (%p171_p3) target bundleno = 495 (0x1ef), region = 32  ;;  %v2891_v1 = vld [vmem:[%s3671_s1] sm:$0xff] (!%p171_p3)   ;;  %2446 = vmatprep.subr.bf16.mxu0 (!%p171_p3), %v2890_v0  ;;  %v2895_v5 = vld [vmem:[%s3671_s1 + $0x8] sm:$0xff] (!%p171_p3)   ;;  %v2899_v9 = vld [vmem:[%s3671_s1 + $0x10] sm:$0xff] (!%p171_p3)   ;;  %vm2083_vm1 = vcmask (!%p171_p3), 519168  }
   0x8   : > { %v2892_v2 = vld [vmem:[%s3671_s1 + $0xc0] sm:$0xff] (!%p171_p3)   ;;  %2447 = vmatpush3.bf16.msra.mxu0 (!%p171_p3), %v2891_v1  ;;  %v2896_v6 = vld [vmem:[%s3671_s1 + $0xc8] sm:$0xff] (!%p171_p3)   ;;  %v2900_v10 = vld [vmem:[%s3671_s1 + $0xd0] sm:$0xff] (!%p171_p3)   ;;  %p206_p4 = scmp.lt.s32.totalorder (!%p171_p3), %s205_s19, 57 }
   0x9   : > { %v2893_v3 = vld [vmem:[%s3671_s1 + $0x80] sm:$0xff] (!%p171_p3)   ;;  %2552 = vmatprep.subr.bf16.mxu1 (!%p171_p3), %v2892_v2  ;;  %2448 = vmatprep.subr.bf16.mxu0 (!%p171_p3), %v2894_v4  ;;  %v2897_v7 = vld [vmem:[%s3671_s1 + $0x88] sm:$0xff] (!%p171_p3)   ;;  %v2901_v11 = vld [vmem:[%s3671_s1 + $0x90] sm:$0xff] (!%p171_p3)  }
   0xa   : > { %2553 = vmatpush3.bf16.msra.mxu1 (!%p171_p3), %v2893_v3  ;;  %v2902_v12 = vld [vmem:[%s3671_s1 + $0x58] sm:$0xff] (!%p171_p3)   ;;  %v2906_v16 = vld [vmem:[%s3671_s1 + $0x60] sm:$0xff] (!%p171_p3)   ;;  %v2910_v20 = vld [vmem:[%s3671_s1 + $0x68] sm:$0xff] (!%p171_p3)  }
   0xb   : > { %2554 = vmatprep.subr.bf16.mxu1 (!%p171_p3), %v2896_v6  ;;  %v2903_v13 = vld [vmem:[%s3671_s1 + $0x18] sm:$0xff] (!%p171_p3)   ;;  %v2907_v17 = vld [vmem:[%s3671_s1 + $0x20] sm:$0xff] (!%p171_p3)   ;;  %v2911_v21 = vld [vmem:[%s3671_s1 + $0x28] sm:$0xff] (!%p171_p3)  }
   0xc   : > { %2449 = vmatpush3.bf16.msra.mxu0 (!%p171_p3), %v2895_v5  ;;  %v2904_v14 = vld [vmem:[%s3671_s1 + $0xd8] sm:$0xff] (!%p171_p3)   ;;  %v2908_v18 = vld [vmem:[%s3671_s1 + $0xe0] sm:$0xff] (!%p171_p3)   ;;  %v2912_v22 = vld [vmem:[%s3671_s1 + $0xe8] sm:$0xff] (!%p171_p3)  }
   0xd   : > { %2450 = vmatprep.subr.bf16.mxu0 (!%p171_p3), %v2898_v8  ;;  %v2905_v15 = vld [vmem:[%s3671_s1 + $0x98] sm:$0xff] (!%p171_p3)   ;;  %v2909_v19 = vld [vmem:[%s3671_s1 + $0xa0] sm:$0xff] (!%p171_p3)   ;;  %v2913_v23 = vld [vmem:[%s3671_s1 + $0xa8] sm:$0xff] (!%p171_p3)  }
   0xe   : > { %2555 = vmatpush3.bf16.msra.mxu1 %v2897_v7  ;;  %s3679_s19 = smov (!%p206_p4, %s205_s19), 57  ;;  %v2914_v24 = vld [vmem:[%s3671_s1 + $0x70] sm:$0xff]   ;;  %v2918_v28 = vld [vmem:[%s3671_s1 + $0x78] sm:$0xff]   ;;  %v2925_v34 = vld [vmem:[%s3671_s1 + $0x140] sm:$0xff]  }
   0xf   : > { %2556 = vmatprep.subr.bf16.mxu1 %v2900_v10  ;;  %s2863_s21 = smul.u32 28, %s3679_s19  ;;  %v2915_v25 = vld [vmem:[%s3671_s1 + $0x30] sm:$0xff]   ;;  %v2919_v29 = vld [vmem:[%s3671_s1 + $0x38] sm:$0xff]   ;;  %v2929_v37 = vld [vmem:[%s3671_s1 + $0x100] sm:$0xff]  }
  0x10   : > { %2451 = vmatpush3.bf16.msra.mxu0 %v2899_v9  ;;  %v2916_v26 = vld [vmem:[%s3671_s1 + $0xf0] sm:$0xff]   ;;  %v2920_v30 = vld [vmem:[%s3671_s1 + $0xf8] sm:$0xff]   ;;  %v2930_v39 = vld [vmem:[%s3671_s1 + $0x180] sm:$0xff]  }
  0x11   : > { %2452 = vmatprep.subr.bf16.mxu0 %v2902_v12  ;;  %v2917_v27 = vld [vmem:[%s3671_s1 + $0xb0] sm:$0xff]   ;;  %s3253_s4 = scalar_lea.vmem %s3670_s0, %s2863_s21  ;;  %v2924_v33 = vld [vmem:[%s3671_s1 + $0xb8] sm:$0xff]   ;;  %v2939_v45 = vld [vmem:[%s3671_s1 + $0x148] sm:$0xff]  }
  0x12   : > { %2557 = vmatpush3.bf16.msra.mxu1 %v2901_v11  ;;  %v2921_v31 = vld [vmem:[%s3253_s4] ss:$28 sps:$4 sm:$0xff]   ;;  %v2926_v35 = vld [vmem:[%s3253_s4 + $0x8] ss:$28 sps:$4 sm:$0xff]   ;;  %v2933_v41 = vld [vmem:[%s3253_s4 + $0x38] ss:$28 sps:$4 sm:$0xff]  }
  0x13   : > { %2558 = vmatprep.subr.bf16.mxu1 %v2904_v14  ;;  %v2923_v32 = vld [vmem:[%s3253_s4 + $0x4] ss:$28 sps:$4 sm:$0xff]   ;;  %v2928_v36 = vld [vmem:[%s3253_s4 + $0xc] ss:$28 sps:$4 sm:$0xff]   ;;  %v2931_v40 = vld [vmem:[%s3253_s4 + $0x3c] ss:$28 sps:$4 sm:$0xff]  }
  0x14   : > { %2453 = vmatpush3.bf16.msra.mxu0 %v2903_v13  ;;  %1361 = vmatprep.mubr.bf16.mxu0 %v2923_v32  ;;  %v2934_v42 = vld [vmem:[%s3253_s4 + $0x44] ss:$28 sps:$4 sm:$0xff]   ;;  %v2937_v43 = vld [vmem:[%s3253_s4 + $0x74] ss:$28 sps:$4 sm:$0xff]   ;;  %v2941_v46 = vld [vmem:[%s3671_s1 + $0x108] sm:$0xff]  }
  0x15   : > { %2454 = vmatprep.subr.bf16.mxu0 %v2906_v16  ;;  %1513 = vmatprep.mubr.bf16.mxu1 %v2928_v36  ;;  %v2936_v44 = vld [vmem:[%s3253_s4 + $0x40] ss:$28 sps:$4 sm:$0xff]   ;;  %v2945_v48 = vld [vmem:[%s3671_s1 + $0x188] sm:$0xff]   ;;  %v2952_v51 = vld [vmem:[%s3671_s1 + $0x150] sm:$0xff]  }
  0x16   : > { %2559 = vmatpush3.bf16.msra.mxu1 %v2905_v15  ;;  %v2942_v47 = vld [vmem:[%s3253_s4 + $0x7c] ss:$28 sps:$4 sm:$0xff]   ;;  %v2940_v49 = vld [vmem:[%s3253_s4 + $0x70] ss:$28 sps:$4 sm:$0xff]   ;;  %v2948_v56 = vld [vmem:[%s3253_s4 + $0xa8] ss:$28 sps:$4 sm:$0xff]  }
  0x17   : > { %2560 = vmatprep.subr.bf16.mxu1 %v2908_v18  ;;  %v2946_v50 = vld [vmem:[%s3253_s4 + $0xac] ss:$28 sps:$4 sm:$0xff]   ;;  %v2944_v52 = vld [vmem:[%s3253_s4 + $0x78] ss:$28 sps:$4 sm:$0xff]   ;;  %v2953_v58 = vld [vmem:[%s3253_s4 + $0xe4] ss:$28 sps:$4 sm:$0xff]  }
  0x18   : > { %2455 = vmatpush3.bf16.msra.mxu0 %v2907_v17  ;;  %v2949_v53 = vld [vmem:[%s3253_s4 + $0xb4] ss:$28 sps:$4 sm:$0xff]   ;;  %v2967_v59 = vld [vmem:[%s3671_s1 + $0x158] sm:$0xff]   ;;  %v2957_v61 = vld [vmem:[%s3253_s4 + $0xec] ss:$28 sps:$4 sm:$0xff]  }
  0x19   : > { %2456 = vmatprep.subr.bf16.mxu0 %v2910_v20  ;;  %v2955_v54 = vld [vmem:[%s3671_s1 + $0x110] sm:$0xff]   ;;  %v2968_v60 = vld [vmem:[%s3671_s1 + $0x118] sm:$0xff]   ;;  %v2959_v0 = vld [vmem:[%s3253_s4 + $0xe8] ss:$28 sps:$4 sm:$0xff]  }
  0x1a   : > { %2561 = vmatpush3.bf16.msra.mxu1 %v2909_v19  ;;  %v2960_v55 = vld [vmem:[%s3671_s1 + $0x190] sm:$0xff]   ;;  %v2975_v62 = vld [vmem:[%s3671_s1 + $0x198] sm:$0xff]   ;;  %v2964_v2 = vld [vmem:[%s3253_s4 + $0x124] ss:$28 sps:$4 sm:$0xff]  }
  0x1b   : > { %2562 = vmatprep.subr.bf16.mxu1 %v2912_v22  ;;  %v2951_v57 = vld [vmem:[%s3253_s4 + $0xb0] ss:$28 sps:$4 sm:$0xff]   ;;  %v2956_v63 = vld [vmem:[%s3253_s4 + $0xe0] ss:$28 sps:$4 sm:$0xff]   ;;  %v2963_v6 = vld [vmem:[%s3253_s4 + $0x118] ss:$28 sps:$4 sm:$0xff]  }
  0x1c   : > { %2457 = vmatpush3.bf16.msra.mxu0 %v2911_v21  ;;  %v2961_v1 = vld [vmem:[%s3253_s4 + $0x11c] ss:$28 sps:$4 sm:$0xff]   ;;  %v2982_v3 = vld [vmem:[%s3671_s1 + $0x160] sm:$0xff]   ;;  %v2969_v7 = vld [vmem:[%s3253_s4 + $0x154] ss:$28 sps:$4 sm:$0xff]  }
  0x1d   : > { %2458 = vmatprep.subr.bf16.mxu0 %v2914_v24  ;;  %v2983_v4 = vld [vmem:[%s3671_s1 + $0x120] sm:$0xff]   ;;  %v2972_v9 = vld [vmem:[%s3253_s4 + $0x15c] ss:$28 sps:$4 sm:$0xff]   ;;  %v2997_v10 = vld [vmem:[%s3671_s1 + $0x168] sm:$0xff]  }
  0x1e   : > { %2563 = vmatpush3.bf16.msra.mxu1 %v2913_v23  ;;  %v2990_v5 = vld [vmem:[%s3671_s1 + $0x1a0] sm:$0xff]   ;;  %v2998_v11 = vld [vmem:[%s3671_s1 + $0x128] sm:$0xff]   ;;  %v2974_v15 = vld [vmem:[%s3253_s4 + $0x158] ss:$28 sps:$4 sm:$0xff]  }
  0x1f   : > { %2564 = vmatprep.subr.bf16.mxu1 %v2916_v26  ;;  %v2966_v8 = vld [vmem:[%s3253_s4 + $0x120] ss:$28 sps:$4 sm:$0xff]   ;;  %v3004_v12 = vld [vmem:[%s3671_s1 + $0x1a8] sm:$0xff]   ;;  %v2979_v16 = vld [vmem:[%s3253_s4 + $0x194] ss:$28 sps:$4 sm:$0xff]  }
  0x20   : > { %2459 = vmatpush3.bf16.msra.mxu0 %v2915_v25  ;;  %v2971_v13 = vld [vmem:[%s3253_s4 + $0x150] ss:$28 sps:$4 sm:$0xff]   ;;  %v2978_v20 = vld [vmem:[%s3253_s4 + $0x188] ss:$28 sps:$4 sm:$0xff]   ;;  %v3026_v23 = vld [vmem:[%s3671_s1 + $0x178] sm:$0xff]  }
  0x21   : > { %2460 = vmatprep.subr.bf16.mxu0 %v2918_v28  ;;  %v2976_v14 = vld [vmem:[%s3253_s4 + $0x18c] ss:$28 sps:$4 sm:$0xff]   ;;  %v3012_v17 = vld [vmem:[%s3671_s1 + $0x170] sm:$0xff]   ;;  %v2984_v21 = vld [vmem:[%s3253_s4 + $0x1c4] ss:$28 sps:$4 sm:$0xff]  }
  0x22   : > { %2565 = vmatpush3.bf16.msra.mxu1 %v2917_v27  ;;  %v3013_v18 = vld [vmem:[%s3671_s1 + $0x130] sm:$0xff]   ;;  %v2987_v24 = vld [vmem:[%s3253_s4 + $0x1cc] ss:$28 sps:$4 sm:$0xff]   ;;  %v3028_v25 = vld [vmem:[%s3671_s1 + $0x138] sm:$0xff]  }
  0x23   : > { %2566 = vmatprep.subr.bf16.mxu1 %v2920_v30  ;;  %v3017_v19 = vld [vmem:[%s3671_s1 + $0x1b0] sm:$0xff]   ;;  %v3030_v26 = vld [vmem:[%s3671_s1 + $0x1b8] sm:$0xff]   ;;  %v2994_v30 = vld [vmem:[%s3253_s4 + $0x204] ss:$28 sps:$4 sm:$0xff]  }
  0x24   : > { %2461 = vmatpush3.bf16.msra.mxu0 %v2919_v29  ;;  %v2981_v22 = vld [vmem:[%s3253_s4 + $0x190] ss:$28 sps:$4 sm:$0xff]   ;;  %v2986_v27 = vld [vmem:[%s3253_s4 + $0x1c0] ss:$28 sps:$4 sm:$0xff]   ;;  %v2989_v29 = vld [vmem:[%s3253_s4 + $0x1c8] ss:$28 sps:$4 sm:$0xff]  }
  0x25   : > { %2658 = vmatprep.subr.bf16.mxu0 %v2925_v34  ;;  %v2991_v28 = vld [vmem:[%s3253_s4 + $0x1fc] ss:$28 sps:$4 sm:$0xff]   ;;  %v2999_v32 = vld [vmem:[%s3253_s4 + $0x234] ss:$28 sps:$4 sm:$0xff]   ;;  %v3006_v36 = vld [vmem:[%s3253_s4 + $0x26c] ss:$28 sps:$4 sm:$0xff]  }
  0x26   : > { %2567 = vmatpush3.bf16.msra.mxu1 %v2924_v33  ;;  %v2996_v33 = vld [vmem:[%s3253_s4 + $0x200] ss:$28 sps:$4 sm:$0xff]  }
  0x27   : > { %1362 = vmatmul.mubr.bf16.vlgmr.msra.gmra.mrb[0].mxu0 %v2921_v31  ;;  %2787 = vmatprep.subr.bf16.mxu1 %v3117_v38  ;;  %v2993_v31 = vld [vmem:[%s3253_s4 + $0x1f8] ss:$28 sps:$4 sm:$0xff]  }
  0x28   : > { %2659 = vmatpush3.bf16.msra.mxu0 %v2929_v37  ;;  %1369 = vmatprep.mubr.bf16.mxu0 %v2931_v40  ;;  %v3002_v34 = vld [vmem:[%s3253_s4 + $0x23c] ss:$28 sps:$4 sm:$0xff]   ;;  %v3008_v40 = vld [vmem:[%s3253_s4 + $0x268] ss:$28 sps:$4 sm:$0xff]  }
  0x29   : > { %1514 = vmatmul.mubr.bf16.vlgmr.msra.gmra.mrb[0].mxu1 %v2926_v35  ;;  %2660 = vmatprep.subr.bf16.mxu0 %v2939_v45  ;;  %v3001_v35 = vld [vmem:[%s3253_s4 + $0x230] ss:$28 sps:$4 sm:$0xff]   ;;  %v3005_v37 = vld [vmem:[%s3253_s4 + $0x238] ss:$28 sps:$4 sm:$0xff]  }
  0x2a   : > { %2788 = vmatpush3.bf16.msra.mxu1 %v2930_v39  ;;  %1521 = vmatprep.mubr.bf16.mxu1 %v2934_v42  ;;  %v3009_v39 = vld [vmem:[%s3253_s4 + $0x274] ss:$28 sps:$4 sm:$0xff]   ;;  %v3021_v45 = vld [vmem:[%s3253_s4 + $0x2dc] ss:$28 sps:$4 sm:$0xff]  }
  0x2b   : > { %2789 = vmatprep.subr.bf16.mxu1 %v3117_v38  ;;  %v3011_v42 = vld [vmem:[%s3253_s4 + $0x270] ss:$28 sps:$4 sm:$0xff]  }
  0x2c   : > { %2661 = vmatpush3.bf16.msra.mxu0 %v2941_v46  ;;  %v3020_v46 = vld [vmem:[%s3253_s4 + $0x2a8] ss:$28 sps:$4 sm:$0xff]  }
  0x2d   : > { %2662 = vmatprep.subr.bf16.mxu0 %v2952_v51  ;;  %v342_v51 = vld [vmem:[%s3253_s4 + $0x318] sm:$0xff] }
  0x2e   : > { %2790 = vmatpush3.bf16.msra.mxu1 %v2945_v48  ;;  %v341_v48 = vld [vmem:[%s3253_s4 + $0x310] sm:$0xff] }
  0x2f   : > { %1370 = vmatmul.mubr.bf16.gmra.mrb[4].mxu0 %v2933_v41  ;;  %2791 = vmatprep.subr.bf16.mxu1 %v3117_v38  ;;  %v3014_v41 = vld [vmem:[%s3253_s4 + $0x2a4] ss:$28 sps:$4 sm:$0xff]  }
  0x30   : > { %1377 = vmatprep.mubr.bf16.mxu0 %v2937_v43  ;;  %2663 = vmatpush3.bf16.msra.mxu0 %v2955_v54  ;;  %v3018_v43 = vld [vmem:[%s3253_s4 + $0x2ac] ss:$28 sps:$4 sm:$0xff]   ;;  %v2323_v54 = vcombine.low %v341_v48, %v341_v48 }
  0x31   : > { %1522 = vmatmul.mubr.bf16.gmra.mrb[4].mxu1 %v2936_v44  ;;  %2664 = vmatprep.subr.bf16.mxu0 %v2967_v59  ;;  %v3016_v44 = vld [vmem:[%s3253_s4 + $0x2a0] ss:$28 sps:$4 sm:$0xff]   ;;  %v3037_v59 = vld [vmem:[%s3253_s4 + $0x18] ss:$28 sps:$4 sm:$0xff]  }
  0x32   : > { %1529 = vmatprep.mubr.bf16.mxu1 %v2942_v47  ;;  %2792 = vmatpush3.bf16.msra.mxu1 %v2960_v55  ;;  %v3024_v47 = vld [vmem:[%s3253_s4 + $0x2e4] ss:$28 sps:$4 sm:$0xff]   ;;  %v3036_v55 = vld [vmem:[%s3253_s4 + $0x14] ss:$28 sps:$4 sm:$0xff]  }
  0x33   : > { %2793 = vmatprep.subr.bf16.mxu1 %v3117_v38 }
  0x34   : > { %2665 = vmatpush3.bf16.msra.mxu0 %v2968_v60  ;;  %v3040_v60 = vld [vmem:[%s3253_s4 + $0x48] ss:$28 sps:$4 sm:$0xff]  }
  0x35   : > { %2666 = vmatprep.subr.bf16.mxu0 %v2982_v3  ;;  %v3050_v3 = vld [vmem:[%s3253_s4 + $0xf4] ss:$28 sps:$4 sm:$0xff]  }
  0x36   : > { %2794 = vmatpush3.bf16.msra.mxu1 %v2975_v62  ;;  %v3041_v62 = vld [vmem:[%s3253_s4 + $0x50] ss:$28 sps:$4 sm:$0xff]  }
  0x37   : > { %1378 = vmatmul.mubr.bf16.gmra.mrb[8].mxu0 %v2940_v49  ;;  %2795 = vmatprep.subr.bf16.mxu1 %v3117_v38  ;;  %v3023_v49 = vld [vmem:[%s3253_s4 + $0x2d8] ss:$28 sps:$4 sm:$0xff]  }
  0x38   : > { %1385 = vmatprep.mubr.bf16.mxu0 %v2946_v50  ;;  %2667 = vmatpush3.bf16.msra.mxu0 %v2983_v4  ;;  %v2324_v50 = vcombine.high %v341_v48, %v341_v48  ;;  %v3049_v4 = vld [vmem:[%s3253_s4 + $0xc0] ss:$28 sps:$4 sm:$0xff]  }
  0x39   : > { %1530 = vmatmul.mubr.bf16.gmra.mrb[8].mxu1 %v2944_v52  ;;  %2668 = vmatprep.subr.bf16.mxu0 %v2997_v10  ;;  %v3027_v52 = vld [vmem:[%s3253_s4 + $0x2e0] ss:$28 sps:$4 sm:$0xff]   ;;  %v3057_v10 = vld [vmem:[%s3253_s4 + $0x130] ss:$28 sps:$4 sm:$0xff]  }
  0x3a   : > { %1537 = vmatprep.mubr.bf16.mxu1 %v2949_v53  ;;  %2796 = vmatpush3.bf16.msra.mxu1 %v2990_v5  ;;  %v2326_v53 = vcombine.high %v342_v51, %v342_v51  ;;  %v3052_v5 = vld [vmem:[%s3253_s4 + $0xf0] ss:$28 sps:$4 sm:$0xff]  }
  0x3b   : > { %2797 = vmatprep.subr.bf16.mxu1 %v3117_v38 }
  0x3c   : > { %2669 = vmatpush3.bf16.msra.mxu0 %v2998_v11  ;;  %v3060_v11 = vld [vmem:[%s3253_s4 + $0x160] ss:$28 sps:$4 sm:$0xff]  }
  0x3d   : > { %2670 = vmatprep.subr.bf16.mxu0 %v3012_v17  ;;  %v3068_v17 = vld [vmem:[%s3253_s4 + $0x1d0] ss:$28 sps:$4 sm:$0xff]  }
  0x3e   : > { %2798 = vmatpush3.bf16.msra.mxu1 %v3004_v12  ;;  %v3062_v12 = vld [vmem:[%s3253_s4 + $0x19c] ss:$28 sps:$4 sm:$0xff]  }
  0x3f   : > { %1386 = vmatmul.mubr.bf16.gmra.mrb[12].mxu0 %v2948_v56  ;;  %2799 = vmatprep.subr.bf16.mxu1 %v3117_v38  ;;  %v2325_v56 = vcombine.low %v342_v51, %v342_v51 }
  0x40   : > { %1393 = vmatprep.mubr.bf16.mxu0 %v2953_v58  ;;  %2671 = vmatpush3.bf16.msra.mxu0 %v3013_v18  ;;  %v3038_v58 = vld [vmem:[%s3253_s4 + $0x4c] ss:$28 sps:$4 sm:$0xff]  }
  0x41   : > { %1538 = vmatmul.mubr.bf16.gmra.mrb[12].mxu1 %v2951_v57  ;;  %2672 = vmatprep.subr.bf16.mxu0 %v3026_v23  ;;  %v3034_v57 = vld [vmem:[%s3253_s4 + $0x10] ss:$28 sps:$4 sm:$0xff]   ;;  %v3076_v23 = vld [vmem:[%s3253_s4 + $0x240] ss:$28 sps:$4 sm:$0xff]  }
  0x42   : > { %1545 = vmatprep.mubr.bf16.mxu1 %v2957_v61  ;;  %2800 = vmatpush3.bf16.msra.mxu1 %v3017_v19  ;;  %v3042_v61 = vld [vmem:[%s3253_s4 + $0x84] ss:$28 sps:$4 sm:$0xff]   ;;  %v3070_v18 = vld [vmem:[%s3253_s4 + $0x20c] ss:$28 sps:$4 sm:$0xff]   ;;  %v3069_v19 = vld [vmem:[%s3253_s4 + $0x1d8] ss:$28 sps:$4 sm:$0xff]  }
  0x43   : > { %2801 = vmatprep.subr.bf16.mxu1 %v3117_v38 }
  0x44   : > { %2673 = vmatpush3.bf16.msra.mxu0 %v3028_v25  ;;  %v3077_v25 = vld [vmem:[%s3253_s4 + $0x248] ss:$28 sps:$4 sm:$0xff]  }
  0x46   : > { %2802 = vmatpush3.bf16.msra.mxu1 %v3030_v26  ;;  %v3080_v26 = vld [vmem:[%s3253_s4 + $0x278] ss:$28 sps:$4 sm:$0xff]  }
  0x47   : > { %1394 = vmatmul.mubr.bf16.gmra.mrb[16].mxu0 %v2956_v63  ;;  %v3044_v63 = vld [vmem:[%s3253_s4 + $0x80] ss:$28 sps:$4 sm:$0xff]  }
  0x48   : > { %1401 = vmatprep.mubr.bf16.mxu0 %v2961_v1  ;;  %v3045_v1 = vld [vmem:[%s3253_s4 + $0x88] ss:$28 sps:$4 sm:$0xff]  }
  0x49   : > { %1546 = vmatmul.mubr.bf16.gmra.mrb[16].mxu1 %v2959_v0  ;;  %v3046_v0 = vld [vmem:[%s3253_s4 + $0xbc] ss:$28 sps:$4 sm:$0xff]  }
  0x4a   : > { %1553 = vmatprep.mubr.bf16.mxu1 %v2964_v2  ;;  %v3048_v2 = vld [vmem:[%s3253_s4 + $0xb8] ss:$28 sps:$4 sm:$0xff]  }
  0x4f   : > { %1402 = vmatmul.mubr.bf16.gmra.mrb[20].mxu0 %v2963_v6  ;;  %v3054_v6 = vld [vmem:[%s3253_s4 + $0x12c] ss:$28 sps:$4 sm:$0xff]  }
  0x50   : > { %1409 = vmatprep.mubr.bf16.mxu0 %v2969_v7  ;;  %v3053_v7 = vld [vmem:[%s3253_s4 + $0xf8] ss:$28 sps:$4 sm:$0xff]  }
  0x51   : > { %1554 = vmatmul.mubr.bf16.gmra.mrb[20].mxu1 %v2966_v8  ;;  %v3056_v8 = vld [vmem:[%s3253_s4 + $0x128] ss:$28 sps:$4 sm:$0xff]  }
  0x52   : > { %1561 = vmatprep.mubr.bf16.mxu1 %v2972_v9  ;;  %v3058_v9 = vld [vmem:[%s3253_s4 + $0x164] ss:$28 sps:$4 sm:$0xff]  }
  0x57   : > { %1410 = vmatmul.mubr.bf16.gmra.mrb[24].mxu0 %v2971_v13  ;;  %v3061_v13 = vld [vmem:[%s3253_s4 + $0x168] ss:$28 sps:$4 sm:$0xff]  }
  0x58   : > { %1417 = vmatprep.mubr.bf16.mxu0 %v2976_v14  ;;  %v3064_v14 = vld [vmem:[%s3253_s4 + $0x198] ss:$28 sps:$4 sm:$0xff]  }
  0x59   : > { %1562 = vmatmul.mubr.bf16.gmra.mrb[24].mxu1 %v2974_v15  ;;  %v3066_v15 = vld [vmem:[%s3253_s4 + $0x1d4] ss:$28 sps:$4 sm:$0xff]  }
  0x5a   : > { %1569 = vmatprep.mubr.bf16.mxu1 %v2979_v16  ;;  %v3065_v16 = vld [vmem:[%s3253_s4 + $0x1a0] ss:$28 sps:$4 sm:$0xff]  }
  0x5f   : > { %1418 = vmatmul.mubr.bf16.gmra.mrb[28].mxu0 %v2978_v20  ;;  %v3072_v20 = vld [vmem:[%s3253_s4 + $0x208] ss:$28 sps:$4 sm:$0xff]  }
  0x60   : > { %1425 = vmatprep.mubr.bf16.mxu0 %v2984_v21  ;;  %v3074_v21 = vld [vmem:[%s3253_s4 + $0x244] ss:$28 sps:$4 sm:$0xff]  }
  0x61   : > { %1570 = vmatmul.mubr.bf16.gmra.mrb[28].mxu1 %v2981_v22  ;;  %v3073_v22 = vld [vmem:[%s3253_s4 + $0x210] ss:$28 sps:$4 sm:$0xff]  }
  0x62   : > { %1577 = vmatprep.mubr.bf16.mxu1 %v2987_v24  ;;  %v3078_v24 = vld [vmem:[%s3253_s4 + $0x27c] ss:$28 sps:$4 sm:$0xff]  }
  0x67   : > { %1426 = vmatmul.mubr.bf16.gmra.mrb[32].mxu0 %v2986_v27  ;;  %v3082_v27 = vld [vmem:[%s3253_s4 + $0x2b4] ss:$28 sps:$4 sm:$0xff]  }
  0x68   : > { %1433 = vmatprep.mubr.bf16.mxu0 %v2991_v28  ;;  %v3081_v28 = vld [vmem:[%s3253_s4 + $0x280] ss:$28 sps:$4 sm:$0xff]  }
  0x69   : > { %1578 = vmatmul.mubr.bf16.gmra.mrb[32].mxu1 %v2989_v29 }
  0x6a   : > { %1585 = vmatprep.mubr.bf16.mxu1 %v2994_v30  ;;  %v3466_v30 = vld [vmem:[%s3672_s2] ss:$0 sm:$0xff] }
  0x6f   : > { %1434 = vmatmul.mubr.bf16.gmra.mrb[36].mxu0 %v2993_v31 }
  0x70   : > { %1441 = vmatprep.mubr.bf16.mxu0 %v2999_v32  ;;  %v3084_v32 = vld [vmem:[%s3253_s4 + $0x2b0] ss:$28 sps:$4 sm:$0xff]  }
  0x71   : > { %1586 = vmatmul.mubr.bf16.gmra.mrb[36].mxu1 %v2996_v33 }
  0x72   : > { %1593 = vmatprep.mubr.bf16.mxu1 %v3002_v34 }
  0x77   : > { %1442 = vmatmul.mubr.bf16.gmra.mrb[40].mxu0 %v3001_v35  ;;  %v3086_v35 = vld [vmem:[%s3253_s4 + $0x2ec] ss:$28 sps:$4 sm:$0xff]  }
  0x78   : > { %1449 = vmatprep.mubr.bf16.mxu0 %v3006_v36 }
  0x79   : > { %1594 = vmatmul.mubr.bf16.gmra.mrb[40].mxu1 %v3005_v37 }
  0x7a   : > { %1601 = vmatprep.mubr.bf16.mxu1 %v3009_v39 }
  0x7f   : > { %1450 = vmatmul.mubr.bf16.gmra.mrb[44].mxu0 %v3008_v40 }
  0x80   : > { %1457 = vmatprep.mubr.bf16.mxu0 %v3014_v41 }
  0x81   : > { %1602 = vmatmul.mubr.bf16.gmra.mrb[44].mxu1 %v3011_v42  ;;  %v3085_v42 = vld [vmem:[%s3253_s4 + $0x2b8] ss:$28 sps:$4 sm:$0xff]  }
  0x82   : > { %1609 = vmatprep.mubr.bf16.mxu1 %v3018_v43 }
  0x87   : > { %1458 = vmatmul.mubr.bf16.gmra.mrb[48].mxu0 %v3016_v44 }
  0x88   : > { %1465 = vmatprep.mubr.bf16.mxu0 %v3021_v45 }
  0x89   : > { %1610 = vmatmul.mubr.bf16.gmra.mrb[48].mxu1 %v3020_v46 }
  0x8a   : > { %1617 = vmatprep.mubr.bf16.mxu1 %v3024_v47 }
  0x8f   : > { %1466 = vmatmul.mubr.bf16.gmra.mrb[52].mxu0 %v3023_v49  ;;  %v343_v49 = vld [vmem:[%s3253_s4 + $0x320] sm:$0xff] }
  0x90   : > { %1473 = vmatprep.mubr.bf16.mxu0 %v2324_v50 }
  0x91   : > { %1618 = vmatmul.mubr.bf16.gmra.mrb[52].mxu1 %v3027_v52 }
  0x92   : > { %1625 = vmatprep.mubr.bf16.mxu1 %v2326_v53  ;;  %v3088_v53 = vld [vmem:[%s3253_s4 + $0x2e8] ss:$28 sps:$4 sm:$0xff]  }
  0x97   : > { %1474 = vmatmul.mubr.bf16.gmra.mrb[56].mxu0 %v2323_v54 }
  0x98   : > { %1665 = vmatprep.mubr.bf16.mxu0 %v3036_v55 }
  0x99   : > { %1626 = vmatmul.mubr.bf16.gmra.mrb[56].mxu1 %v2325_v56  ;;  %v2328_v56 = vcombine.high %v343_v49, %v343_v49 }
  0x9a   : > { %2803 = vmatprep.mubr.msk.bf16.mxu1 %vm3118_vm0, %v3117_v38 }
  0x9f   : > { %1666 = vmatmul.mubr.bf16.vlgmr.msra.gmra.mrb[60].mxu0 %v3034_v57 }
  0xa0   : > { %1673 = vmatprep.mubr.bf16.mxu0 %v3038_v58 }
  0xa1   : > { %2804 = vmatmul.mubr.bf16.vlgmr.msra.gmra.mrb[60].mxu1 %v3037_v59 }
  0xa2   : > { %2807 = vmatprep.mubr.msk.bf16.mxu1 %vm3118_vm0, %v3117_v38 }
  0xa7   : > { %1674 = vmatmul.mubr.bf16.gmra.mrb[64].mxu0 %v3040_v60 }
  0xa8   : > { %1681 = vmatprep.mubr.bf16.mxu0 %v3042_v61 }
  0xa9   : > { %2808 = vmatmul.mubr.bf16.gmra.mrb[64].mxu1 %v3041_v62  ;;  %v3089_v62 = vld [vmem:[%s3253_s4 + $0x2f0] ss:$28 sps:$4 sm:$0xff]  }
  0xaa   : > { %2811 = vmatprep.mubr.msk.bf16.mxu1 %vm3118_vm0, %v3117_v38 }
  0xaf   : > { %1682 = vmatmul.mubr.bf16.gmra.mrb[68].mxu0 %v3044_v63 }
  0xb0   : > { %1689 = vmatprep.mubr.bf16.mxu0 %v3046_v0 }
  0xb1   : > { %2812 = vmatmul.mubr.bf16.gmra.mrb[68].mxu1 %v3045_v1 }
  0xb2   : > { %2815 = vmatprep.mubr.msk.bf16.mxu1 %vm3118_vm0, %v3117_v38 }
  0xb7   : > { %1690 = vmatmul.mubr.bf16.gmra.mrb[72].mxu0 %v3048_v2 }
  0xb8   : > { %1697 = vmatprep.mubr.bf16.mxu0 %v3050_v3 }
  0xb9   : > { %2816 = vmatmul.mubr.bf16.gmra.mrb[72].mxu1 %v3049_v4 }
  0xba   : > { %2819 = vmatprep.mubr.msk.bf16.mxu1 %vm3118_vm0, %v3117_v38 }
  0xbf   : > { %1698 = vmatmul.mubr.bf16.gmra.mrb[76].mxu0 %v3052_v5 }
  0xc0   : > { %1705 = vmatprep.mubr.bf16.mxu0 %v3054_v6 }
  0xc1   : > { %2820 = vmatmul.mubr.bf16.gmra.mrb[76].mxu1 %v3053_v7 }
  0xc2   : > { %2823 = vmatprep.mubr.msk.bf16.mxu1 %vm3118_vm0, %v3117_v38 }
  0xc7   : > { %1706 = vmatmul.mubr.bf16.gmra.mrb[80].mxu0 %v3056_v8  ;;  %v2327_v8 = vcombine.low %v343_v49, %v343_v49 }
  0xc8   : > { %1713 = vmatprep.mubr.bf16.mxu0 %v3058_v9 }
  0xc9   : > { %2824 = vmatmul.mubr.bf16.gmra.mrb[80].mxu1 %v3057_v10 }
  0xca   : > { %2827 = vmatprep.mubr.msk.bf16.mxu1 %vm3118_vm0, %v3117_v38 }
  0xcf   : > { %1714 = vmatmul.mubr.bf16.gmra.mrb[84].mxu0 %v3060_v11 }
  0xd0   : > { %1721 = vmatprep.mubr.bf16.mxu0 %v3062_v12 }
  0xd1   : > { %2828 = vmatmul.mubr.bf16.gmra.mrb[84].mxu1 %v3061_v13 }
  0xd2   : > { %2831 = vmatprep.mubr.msk.bf16.mxu1 %vm3118_vm0, %v3117_v38 }
  0xd7   : > { %1722 = vmatmul.mubr.bf16.gmra.mrb[88].mxu0 %v3064_v14 }
  0xd8   : > { %1729 = vmatprep.mubr.bf16.mxu0 %v3066_v15 }
  0xd9   : > { %2832 = vmatmul.mubr.bf16.gmra.mrb[88].mxu1 %v3065_v16  ;;  %v3092_v16 = vld [vmem:[%s3253_s4 + $0x328] ss:$0 sps:$4 sm:$0xff]   ;;  %s2223_s4 = sshll.u32 %s3679_s19, 2 }
  0xda   : > { %2835 = vmatprep.mubr.msk.bf16.mxu1 %vm3118_vm0, %v3117_v38  ;;  %s3574_s24 = scalar_lea.vmem %s3673_s3, %s2223_s4 }
  0xdf   : > { %1730 = vmatmul.mubr.bf16.gmra.mrb[92].mxu0 %v3068_v17 }
  0xe0   : > { %1737 = vmatprep.mubr.bf16.mxu0 %v3070_v18 }
  0xe1   : > { %2836 = vmatmul.mubr.bf16.gmra.mrb[92].mxu1 %v3069_v19 }
  0xe2   : > { %2839 = vmatprep.mubr.msk.bf16.mxu1 %vm3118_vm0, %v3117_v38 }
  0xe7   : > { %1738 = vmatmul.mubr.bf16.gmra.mrb[96].mxu0 %v3072_v20 }
  0xe8   : > { %1745 = vmatprep.mubr.bf16.mxu0 %v3074_v21 }
  0xe9   : > { %2840 = vmatmul.mubr.bf16.gmra.mrb[96].mxu1 %v3073_v22 }
  0xea   : > { %2843 = vmatprep.mubr.msk.bf16.mxu1 %vm3118_vm0, %v3117_v38 }
  0xef   : > { %1746 = vmatmul.mubr.bf16.gmra.mrb[100].mxu0 %v3076_v23 }
  0xf0   : > { %1753 = vmatprep.mubr.bf16.mxu0 %v3078_v24 }
  0xf1   : > { %2844 = vmatmul.mubr.bf16.gmra.mrb[100].mxu1 %v3077_v25 }
  0xf2   : > { %2847 = vmatprep.mubr.msk.bf16.mxu1 %vm3118_vm0, %v3117_v38 }
  0xf7   : > { %1754 = vmatmul.mubr.bf16.gmra.mrb[104].mxu0 %v3080_v26 }
  0xf8   : > { %1761 = vmatprep.mubr.bf16.mxu0 %v3082_v27 }
  0xf9   : > { %2848 = vmatmul.mubr.bf16.gmra.mrb[104].mxu1 %v3081_v28 }
  0xfa   : > { %v2462_v29 = vpop.f32.mrb[0].mxu0  ;;  %2851 = vmatprep.mubr.msk.bf16.mxu1 %vm3118_vm0, %v3117_v38 }
  0xfb   : > { %v2463_v31 = vpop.f32.mrb[1].mxu0 }
  0xfc   : > { %v2464_v33 = vadd.f32 %v2463_v31, %v2462_v29  ;;  %v2465_v34 = vpop.f32.mrb[2].mxu0  ;;  %v2568_v36 = vpop.f32.mrb[0].mxu1 }
  0xfd   : > { %v2466_v37 = vpop.f32.mrb[3].mxu0  ;;  %v2569_v41 = vpop.f32.mrb[1].mxu1 }
  0xfe   : > { %v1364_v39 = vadd.f32 %v2464_v33, %v3466_v30  ;;  %v2467_v40 = vadd.f32 %v2466_v37, %v2465_v34  ;;  %v2570_v43 = vadd.f32 %v2569_v41, %v2568_v36  ;;  %v2571_v44 = vpop.f32.mrb[2].mxu1 }
  0xff   : > { %1762 = vmatmul.mubr.bf16.gmra.mrb[108].mxu0 %v3084_v32  ;;  %v2572_v46 = vpop.f32.mrb[3].mxu1 }
 0x100   : > { %v1367_v45 = vadd.f32 %v2467_v40, %v3466_v30  ;;  %1769 = vmatprep.mubr.bf16.mxu0 %v3086_v35  ;;  %v3475_v47 = vadd.f32 %v2570_v43, %v1364_v39  ;;  %v2573_v48 = vadd.f32 %v2572_v46, %v2571_v44 }
 0x101   : > { %2852 = vmatmul.mubr.bf16.gmra.mrb[108].mxu1 %v3085_v42 }
 0x102   : > { %v2468_v50 = vpop.f32.mrb[4].mxu0  ;;  %v3478_v51 = vadd.f32 %v2573_v48, %v1367_v45  ;;  %2855 = vmatprep.mubr.msk.bf16.mxu1 %vm3118_vm0, %v3117_v38 }
 0x103   : > { %v2469_v52 = vpop.f32.mrb[5].mxu0 }
 0x104   : > { %v2470_v54 = vadd.f32 %v2469_v52, %v2468_v50  ;;  %v2471_v55 = vpop.f32.mrb[6].mxu0  ;;  %v2574_v57 = vpop.f32.mrb[4].mxu1 }
 0x105   : > { %v2472_v58 = vpop.f32.mrb[7].mxu0  ;;  %v2575_v61 = vpop.f32.mrb[5].mxu1 }
 0x106   : > { %v1372_v59 = vadd.f32 %v2470_v54, %v3466_v30  ;;  %v2473_v60 = vadd.f32 %v2472_v58, %v2471_v55  ;;  %v2576_v63 = vadd.f32 %v2575_v61, %v2574_v57  ;;  %v2577_v0 = vpop.f32.mrb[6].mxu1 }
 0x107   : > { %1770 = vmatmul.mubr.bf16.gmra.mrb[112].mxu0 %v3088_v53  ;;  %v2578_v2 = vpop.f32.mrb[7].mxu1 }
 0x108   : > { %v1375_v1 = vadd.f32 %v2473_v60, %v3466_v30  ;;  %1777 = vmatprep.mubr.bf16.mxu0 %v2328_v56  ;;  %v3486_v3 = vadd.f32 %v2576_v63, %v1372_v59  ;;  %v2579_v4 = vadd.f32 %v2578_v2, %v2577_v0 }
 0x109   : > { %2856 = vmatmul.mubr.bf16.gmra.mrb[112].mxu1 %v3089_v62 }
 0x10a   : > { %v2474_v5 = vpop.f32.mrb[8].mxu0  ;;  %v3488_v6 = vadd.f32 %v2579_v4, %v1375_v1  ;;  %2859 = vmatprep.mubr.msk.bf16.mxu1 %vm3118_vm0, %v3117_v38 }
 0x10b   : > { %v2475_v7 = vpop.f32.mrb[9].mxu0 }
 0x10c   : > { %v2476_v9 = vadd.f32 %v2475_v7, %v2474_v5  ;;  %v2477_v10 = vpop.f32.mrb[10].mxu0  ;;  %v2580_v11 = vpop.f32.mrb[8].mxu1 }
 0x10d   : > { %v2478_v12 = vpop.f32.mrb[11].mxu0  ;;  %v2581_v15 = vpop.f32.mrb[9].mxu1 }
 0x10e   : > { %v1380_v13 = vadd.f32 %v2476_v9, %v3466_v30  ;;  %v2479_v14 = vadd.f32 %v2478_v12, %v2477_v10  ;;  %v2582_v17 = vadd.f32 %v2581_v15, %v2580_v11  ;;  %v2583_v18 = vpop.f32.mrb[10].mxu1 }
 0x10f   : > { %1778 = vmatmul.mubr.bf16.gmra.mrb[116].mxu0 %v2327_v8  ;;  %v2584_v20 = vpop.f32.mrb[11].mxu1 }
 0x110   : > { %v1383_v19 = vadd.f32 %v2479_v14, %v3466_v30  ;;  %v3495_v21 = vadd.f32 %v2582_v17, %v1380_v13  ;;  %v2585_v22 = vadd.f32 %v2584_v20, %v2583_v18 }
 0x111   : > { %2860 = vmatmul.mubr.bf16.gmra.mrb[116].mxu1 %v3092_v16 }
 0x112   : > { %v2480_v23 = vpop.f32.mrb[12].mxu0  ;;  %v3497_v38 = vadd.f32 %v2585_v22, %v1383_v19 }
 0x113   : > { %v2481_v24 = vpop.f32.mrb[13].mxu0 }
 0x114   : > { %v2482_v25 = vadd.f32 %v2481_v24, %v2480_v23  ;;  %v2483_v26 = vpop.f32.mrb[14].mxu0  ;;  %v2586_v27 = vpop.f32.mrb[12].mxu1 }
 0x115   : > { %v2484_v28 = vpop.f32.mrb[15].mxu0  ;;  %v2587_v32 = vpop.f32.mrb[13].mxu1 }
 0x116   : > { %v1388_v29 = vadd.f32 %v2482_v25, %v3466_v30  ;;  %v2485_v31 = vadd.f32 %v2484_v28, %v2483_v26  ;;  %v2588_v33 = vadd.f32 %v2587_v32, %v2586_v27  ;;  %v2589_v34 = vpop.f32.mrb[14].mxu1 }
 0x117   : > { %v2590_v36 = vpop.f32.mrb[15].mxu1 }
 0x118   : > { %v1391_v35 = vadd.f32 %v2485_v31, %v3466_v30  ;;  %v3501_v37 = vadd.f32 %v2588_v33, %v1388_v29  ;;  %v2591_v39 = vadd.f32 %v2590_v36, %v2589_v34 }
 0x11a   : > { %v2486_v40 = vpop.f32.mrb[16].mxu0  ;;  %v3503_v41 = vadd.f32 %v2591_v39, %v1391_v35 }
 0x11b   : > { %v2487_v42 = vpop.f32.mrb[17].mxu0 }
 0x11c   : > { %v2488_v43 = vadd.f32 %v2487_v42, %v2486_v40  ;;  %v2489_v44 = vpop.f32.mrb[18].mxu0  ;;  %v2592_v45 = vpop.f32.mrb[16].mxu1 }
 0x11d   : > { %v2490_v46 = vpop.f32.mrb[19].mxu0  ;;  %v2593_v50 = vpop.f32.mrb[17].mxu1 }
 0x11e   : > { %v1396_v48 = vadd.f32 %v2488_v43, %v3466_v30  ;;  %v2491_v49 = vadd.f32 %v2490_v46, %v2489_v44  ;;  %v2594_v52 = vadd.f32 %v2593_v50, %v2592_v45  ;;  %v2595_v53 = vpop.f32.mrb[18].mxu1 }
 0x11f   : > { %v2596_v55 = vpop.f32.mrb[19].mxu1 }
 0x120   : > { %v1399_v54 = vadd.f32 %v2491_v49, %v3466_v30  ;;  %v3507_v56 = vadd.f32 %v2594_v52, %v1396_v48  ;;  %v2597_v57 = vadd.f32 %v2596_v55, %v2595_v53 }
 0x122   : > { %v2492_v58 = vpop.f32.mrb[20].mxu0  ;;  %v3509_v59 = vadd.f32 %v2597_v57, %v1399_v54 }
 0x123   : > { %v2493_v60 = vpop.f32.mrb[21].mxu0 }
 0x124   : > { %v2494_v61 = vadd.f32 %v2493_v60, %v2492_v58  ;;  %v2495_v62 = vpop.f32.mrb[22].mxu0  ;;  %v2598_v63 = vpop.f32.mrb[20].mxu1 }
 0x125   : > { %v2496_v0 = vpop.f32.mrb[23].mxu0  ;;  %v2599_v4 = vpop.f32.mrb[21].mxu1 }
 0x126   : > { %v1404_v1 = vadd.f32 %v2494_v61, %v3466_v30  ;;  %v2497_v2 = vadd.f32 %v2496_v0, %v2495_v62  ;;  %v2600_v5 = vadd.f32 %v2599_v4, %v2598_v63  ;;  %v2601_v7 = vpop.f32.mrb[22].mxu1 }
 0x127   : > { %v2602_v9 = vpop.f32.mrb[23].mxu1 }
 0x128   : > { %v1407_v8 = vadd.f32 %v2497_v2, %v3466_v30  ;;  %v3513_v10 = vadd.f32 %v2600_v5, %v1404_v1  ;;  %v2603_v11 = vadd.f32 %v2602_v9, %v2601_v7 }
 0x12a   : > { %v2498_v12 = vpop.f32.mrb[24].mxu0  ;;  %v3515_v13 = vadd.f32 %v2603_v11, %v1407_v8 }
 0x12b   : > { %v2499_v14 = vpop.f32.mrb[25].mxu0 }
 0x12c   : > { %v2500_v15 = vadd.f32 %v2499_v14, %v2498_v12  ;;  %v2501_v16 = vpop.f32.mrb[26].mxu0  ;;  %v2604_v17 = vpop.f32.mrb[24].mxu1 }
 0x12d   : > { %v2502_v18 = vpop.f32.mrb[27].mxu0  ;;  %v2605_v22 = vpop.f32.mrb[25].mxu1 }
 0x12e   : > { %v1412_v19 = vadd.f32 %v2500_v15, %v3466_v30  ;;  %v2503_v20 = vadd.f32 %v2502_v18, %v2501_v16  ;;  %v2606_v23 = vadd.f32 %v2605_v22, %v2604_v17  ;;  %v2607_v24 = vpop.f32.mrb[26].mxu1 }
 0x12f   : > { %v2608_v26 = vpop.f32.mrb[27].mxu1 }
 0x130   : > { %v1415_v25 = vadd.f32 %v2503_v20, %v3466_v30  ;;  %v3519_v27 = vadd.f32 %v2606_v23, %v1412_v19  ;;  %v2609_v28 = vadd.f32 %v2608_v26, %v2607_v24 }
 0x132   : > { %v2504_v29 = vpop.f32.mrb[28].mxu0  ;;  %v3521_v31 = vadd.f32 %v2609_v28, %v1415_v25 }
 0x133   : > { %v2505_v32 = vpop.f32.mrb[29].mxu0 }
 0x134   : > { %v2506_v33 = vadd.f32 %v2505_v32, %v2504_v29  ;;  %v2507_v34 = vpop.f32.mrb[30].mxu0  ;;  %v2610_v35 = vpop.f32.mrb[28].mxu1 }
 0x135   : > { %v2508_v36 = vpop.f32.mrb[31].mxu0  ;;  %v2611_v42 = vpop.f32.mrb[29].mxu1 }
 0x136   : > { %v1420_v39 = vadd.f32 %v2506_v33, %v3466_v30  ;;  %v2509_v40 = vadd.f32 %v2508_v36, %v2507_v34  ;;  %v2612_v43 = vadd.f32 %v2611_v42, %v2610_v35  ;;  %v2613_v44 = vpop.f32.mrb[30].mxu1 }
 0x137   : > { %v2614_v46 = vpop.f32.mrb[31].mxu1 }
 0x138   : > { %v1423_v45 = vadd.f32 %v2509_v40, %v3466_v30  ;;  %v3525_v48 = vadd.f32 %v2612_v43, %v1420_v39  ;;  %v2615_v49 = vadd.f32 %v2614_v46, %v2613_v44 }
 0x13a   : > { %v2510_v50 = vpop.f32.mrb[32].mxu0  ;;  %v3527_v52 = vadd.f32 %v2615_v49, %v1423_v45 }
 0x13b   : > { %v2511_v53 = vpop.f32.mrb[33].mxu0 }
 0x13c   : > { %v2512_v54 = vadd.f32 %v2511_v53, %v2510_v50  ;;  %v2513_v55 = vpop.f32.mrb[34].mxu0  ;;  %v2616_v57 = vpop.f32.mrb[32].mxu1 }
 0x13d   : > { %v2514_v58 = vpop.f32.mrb[35].mxu0  ;;  %v2617_v62 = vpop.f32.mrb[33].mxu1 }
 0x13e   : > { %v1428_v60 = vadd.f32 %v2512_v54, %v3466_v30  ;;  %v2515_v61 = vadd.f32 %v2514_v58, %v2513_v55  ;;  %v2618_v63 = vadd.f32 %v2617_v62, %v2616_v57  ;;  %v2619_v0 = vpop.f32.mrb[34].mxu1 }
 0x13f   : > { %v2620_v2 = vpop.f32.mrb[35].mxu1 }
 0x140   : > { %v1431_v1 = vadd.f32 %v2515_v61, %v3466_v30  ;;  %v3531_v4 = vadd.f32 %v2618_v63, %v1428_v60  ;;  %v2621_v5 = vadd.f32 %v2620_v2, %v2619_v0 }
 0x142   : > { %v2516_v7 = vpop.f32.mrb[36].mxu0  ;;  %v3533_v8 = vadd.f32 %v2621_v5, %v1431_v1 }
 0x143   : > { %v2517_v9 = vpop.f32.mrb[37].mxu0 }
 0x144   : > { %v2518_v11 = vadd.f32 %v2517_v9, %v2516_v7  ;;  %v2519_v12 = vpop.f32.mrb[38].mxu0  ;;  %v2622_v14 = vpop.f32.mrb[36].mxu1 }
 0x145   : > { %v2520_v15 = vpop.f32.mrb[39].mxu0  ;;  %v2623_v18 = vpop.f32.mrb[37].mxu1 }
 0x146   : > { %v1436_v16 = vadd.f32 %v2518_v11, %v3466_v30  ;;  %v2521_v17 = vadd.f32 %v2520_v15, %v2519_v12  ;;  %v2624_v19 = vadd.f32 %v2623_v18, %v2622_v14  ;;  %v2625_v20 = vpop.f32.mrb[38].mxu1 }
 0x147   : > { %v2626_v23 = vpop.f32.mrb[39].mxu1 }
 0x148   : > { %v1439_v22 = vadd.f32 %v2521_v17, %v3466_v30  ;;  %v3537_v24 = vadd.f32 %v2624_v19, %v1436_v16  ;;  %v2627_v25 = vadd.f32 %v2626_v23, %v2625_v20 }
 0x14a   : > { %v2522_v26 = vpop.f32.mrb[40].mxu0  ;;  %v3539_v28 = vadd.f32 %v2627_v25, %v1439_v22 }
 0x14b   : > { %v2523_v29 = vpop.f32.mrb[41].mxu0 }
 0x14c   : > { %v2524_v32 = vadd.f32 %v2523_v29, %v2522_v26  ;;  %v2525_v33 = vpop.f32.mrb[42].mxu0  ;;  %v2628_v34 = vpop.f32.mrb[40].mxu1 }
 0x14d   : > { %v2526_v35 = vpop.f32.mrb[43].mxu0  ;;  %v2629_v40 = vpop.f32.mrb[41].mxu1 }
 0x14e   : > { %v1444_v36 = vadd.f32 %v2524_v32, %v3466_v30  ;;  %v2527_v39 = vadd.f32 %v2526_v35, %v2525_v33  ;;  %v2630_v42 = vadd.f32 %v2629_v40, %v2628_v34  ;;  %v2631_v43 = vpop.f32.mrb[42].mxu1 }
 0x14f   : > { %v2632_v45 = vpop.f32.mrb[43].mxu1 }
 0x150   : > { %v1447_v44 = vadd.f32 %v2527_v39, %v3466_v30  ;;  %v3543_v46 = vadd.f32 %v2630_v42, %v1444_v36  ;;  %v2633_v49 = vadd.f32 %v2632_v45, %v2631_v43 }
 0x152   : > { %v2528_v50 = vpop.f32.mrb[44].mxu0  ;;  %v3545_v53 = vadd.f32 %v2633_v49, %v1447_v44 }
 0x153   : > { %v2529_v54 = vpop.f32.mrb[45].mxu0 }
 0x154   : > { %v2530_v55 = vadd.f32 %v2529_v54, %v2528_v50  ;;  %v2531_v57 = vpop.f32.mrb[46].mxu0  ;;  %v2634_v58 = vpop.f32.mrb[44].mxu1 }
 0x155   : > { %v2532_v60 = vpop.f32.mrb[47].mxu0  ;;  %v2635_v63 = vpop.f32.mrb[45].mxu1 }
 0x156   : > { %v1452_v61 = vadd.f32 %v2530_v55, %v3466_v30  ;;  %v2533_v62 = vadd.f32 %v2532_v60, %v2531_v57  ;;  %v2636_v0 = vadd.f32 %v2635_v63, %v2634_v58  ;;  %v2637_v1 = vpop.f32.mrb[46].mxu1 }
 0x157   : > { %v2638_v5 = vpop.f32.mrb[47].mxu1 }
 0x158   : > { %v1455_v2 = vadd.f32 %v2533_v62, %v3466_v30  ;;  %v3549_v7 = vadd.f32 %v2636_v0, %v1452_v61  ;;  %v2639_v9 = vadd.f32 %v2638_v5, %v2637_v1 }
 0x15a   : > { %v2534_v11 = vpop.f32.mrb[48].mxu0  ;;  %v3551_v12 = vadd.f32 %v2639_v9, %v1455_v2 }
 0x15b   : > { %v2535_v14 = vpop.f32.mrb[49].mxu0 }
 0x15c   : > { %v2536_v15 = vadd.f32 %v2535_v14, %v2534_v11  ;;  %v2537_v16 = vpop.f32.mrb[50].mxu0  ;;  %v2640_v17 = vpop.f32.mrb[48].mxu1 }
 0x15d   : > { %v2538_v18 = vpop.f32.mrb[51].mxu0  ;;  %v2641_v22 = vpop.f32.mrb[49].mxu1 }
 0x15e   : > { %v1460_v19 = vadd.f32 %v2536_v15, %v3466_v30  ;;  %v2539_v20 = vadd.f32 %v2538_v18, %v2537_v16  ;;  %v2642_v23 = vadd.f32 %v2641_v22, %v2640_v17  ;;  %v2643_v25 = vpop.f32.mrb[50].mxu1 }
 0x15f   : > { %v2644_v29 = vpop.f32.mrb[51].mxu1 }
 0x160   : > { %v1463_v26 = vadd.f32 %v2539_v20, %v3466_v30  ;;  %v3555_v32 = vadd.f32 %v2642_v23, %v1460_v19  ;;  %v2645_v33 = vadd.f32 %v2644_v29, %v2643_v25 }
 0x162   : > { %v2540_v34 = vpop.f32.mrb[52].mxu0  ;;  %v3557_v35 = vadd.f32 %v2645_v33, %v1463_v26 }
 0x163   : > { %v2541_v36 = vpop.f32.mrb[53].mxu0 }
 0x164   : > { %v2542_v39 = vadd.f32 %v2541_v36, %v2540_v34  ;;  %v2543_v40 = vpop.f32.mrb[54].mxu0  ;;  %v2646_v42 = vpop.f32.mrb[52].mxu1 }
 0x165   : > { %v2544_v43 = vpop.f32.mrb[55].mxu0  ;;  %v2647_v49 = vpop.f32.mrb[53].mxu1 }
 0x166   : > { %v1468_v44 = vadd.f32 %v2542_v39, %v3466_v30  ;;  %v2545_v45 = vadd.f32 %v2544_v43, %v2543_v40  ;;  %v2648_v50 = vadd.f32 %v2647_v49, %v2646_v42  ;;  %v2649_v54 = vpop.f32.mrb[54].mxu1 }
 0x167   : > { %v2650_v57 = vpop.f32.mrb[55].mxu1 }
 0x168   : > { %v1471_v55 = vadd.f32 %v2545_v45, %v3466_v30  ;;  %v3561_v58 = vadd.f32 %v2648_v50, %v1468_v44  ;;  %v2651_v60 = vadd.f32 %v2650_v57, %v2649_v54 }
 0x16a   : > { %v2546_v61 = vpop.f32.mrb[56].mxu0  ;;  %v3563_v62 = vadd.f32 %v2651_v60, %v1471_v55 }
 0x16b   : > { %v2547_v63 = vpop.f32.mrb[57].mxu0 }
 0x16c   : > { %v2548_v0 = vadd.f32 %v2547_v63, %v2546_v61  ;;  %v2549_v1 = vpop.f32.mrb[58].mxu0  ;;  %v2652_v2 = vpop.f32.mrb[56].mxu1 }
 0x16d   : > { %v2550_v5 = vpop.f32.mrb[59].mxu0  ;;  %v2653_v11 = vpop.f32.mrb[57].mxu1 }
 0x16e   : > { %v1476_v9 = vadd.f32 %v2548_v0, %v3466_v30  ;;  %v2654_v14 = vadd.f32 %v2653_v11, %v2652_v2  ;;  %v2655_v15 = vpop.f32.mrb[58].mxu1 }
 0x16f   : > { %v2656_v16 = vpop.f32.mrb[59].mxu1 }
 0x170   : > { %v3566_v17 = vadd.f32 %v2654_v14, %v1476_v9 }
 0x172   : > { %v2674_v18 = vpop.f32.mrb[60].mxu0 }
 0x173   : > { %v2675_v19 = vpop.f32.mrb[61].mxu0 }
 0x174   : > { %v2676_v20 = vadd.f32 %v2675_v19, %v2674_v18  ;;  %v2677_v22 = vpop.f32.mrb[62].mxu0  ;;  %v1819_v25 = vpop.f32.mrb[60].mxu1 }
 0x175   : > { %v2678_v23 = vpop.f32.mrb[63].mxu0  ;;  %v2805_v33 = vpop.f32.mrb[61].mxu1 }
 0x176   : > { %v2679_v26 = vadd.f32 %v2678_v23, %v2677_v22  ;;  %v1668_v29 = vadd.f32 %v2676_v20, %v3475_v47  ;;  %v1822_v34 = vpop.f32.mrb[62].mxu1 }
 0x177   : > { %v2806_v39 = vpop.f32.mrb[63].mxu1 }
 0x178   : > { %v1820_v30 = vadd.f32 %v1819_v25, %v1668_v29  ;;  %v1671_v36 = vadd.f32 %v2679_v26, %v3478_v51 }
 0x17a   : > { %v1937_v40 = vmax.f32 %v1820_v30, 0.0  ;;  %v1823_v42 = vadd.f32 %v1822_v34, %v1671_v36  ;;  %v2680_v43 = vpop.f32.mrb[64].mxu0 }
 0x17b   : > { %v2681_v44 = vpop.f32.mrb[65].mxu0 }
 0x17c   : > { %v2417_v47 = vpack.c.bf16 %v1937_v40, %v1937_v40  ;;  %v1938_v45 = vmax.f32 %v1823_v42, 0.0  ;;  %v2682_v49 = vadd.f32 %v2681_v44, %v2680_v43  ;;  %v2683_v50 = vpop.f32.mrb[66].mxu0  ;;  %v1827_v55 = vpop.f32.mrb[64].mxu1 }
 0x17d   : > { %v2684_v54 = vpop.f32.mrb[67].mxu0  ;;  %v2809_v61 = vpop.f32.mrb[65].mxu1 }
 0x17e   : > { %2084 = vst.msk [vmem:[%s3574_s24] sm:$0xf] %vm2083_vm1, %v2417_v47  ;;  %v2418_v51 = vpack.c.bf16 %v1938_v45, %v1938_v45  ;;  %v2685_v57 = vadd.f32 %v2684_v54, %v2683_v50  ;;  %v1676_v60 = vadd.f32 %v2682_v49, %v3486_v3  ;;  %v1830_v63 = vpop.f32.mrb[66].mxu1 }
 0x17f   : > { %v2810_v2 = vpop.f32.mrb[67].mxu1 }
 0x180   : > { %2085 = vst.msk [vmem:[%s3574_s24 + $0x4] sm:$0xf] %vm2083_vm1, %v2418_v51  ;;  %v1828_v0 = vadd.f32 %v1827_v55, %v1676_v60  ;;  %v1679_v1 = vadd.f32 %v2685_v57, %v3488_v6 }
 0x182   : > { %v1939_v5 = vmax.f32 %v1828_v0, 0.0  ;;  %v1831_v9 = vadd.f32 %v1830_v63, %v1679_v1  ;;  %v2686_v11 = vpop.f32.mrb[68].mxu0 }
 0x183   : > { %v2687_v14 = vpop.f32.mrb[69].mxu0 }
 0x184   : > { %v2419_v15 = vpack.c.bf16 %v1939_v5, %v1939_v5  ;;  %v1940_v16 = vmax.f32 %v1831_v9, 0.0  ;;  %v2688_v18 = vadd.f32 %v2687_v14, %v2686_v11  ;;  %v2689_v19 = vpop.f32.mrb[70].mxu0  ;;  %v1835_v3 = vpop.f32.mrb[68].mxu1 }
 0x185   : > { %v2690_v20 = vpop.f32.mrb[71].mxu0  ;;  %v2813_v26 = vpop.f32.mrb[69].mxu1 }
 0x186   : > { %2086 = vst.msk [vmem:[%s3574_s24 + $0x8] sm:$0xf] %vm2083_vm1, %v2419_v15  ;;  %v2420_v22 = vpack.c.bf16 %v1940_v16, %v1940_v16  ;;  %v2691_v23 = vadd.f32 %v2690_v20, %v2689_v19  ;;  %v1684_v25 = vadd.f32 %v2688_v18, %v3495_v21  ;;  %v1838_v6 = vpop.f32.mrb[70].mxu1 }
 0x187   : > { %v2814_v34 = vpop.f32.mrb[71].mxu1 }
 0x188   : > { %2087 = vst.msk [vmem:[%s3574_s24 + $0xc] sm:$0xf] %vm2083_vm1, %v2420_v22  ;;  %v1836_v29 = vadd.f32 %v1835_v3, %v1684_v25  ;;  %v1687_v33 = vadd.f32 %v2691_v23, %v3497_v38 }
 0x18a   : > { %v1941_v30 = vmax.f32 %v1836_v29, 0.0  ;;  %v1839_v36 = vadd.f32 %v1838_v6, %v1687_v33  ;;  %v2692_v39 = vpop.f32.mrb[72].mxu0 }
 0x18b   : > { %v2693_v40 = vpop.f32.mrb[73].mxu0 }
 0x18c   : > { %v2421_v42 = vpack.c.bf16 %v1941_v30, %v1941_v30  ;;  %v1942_v43 = vmax.f32 %v1839_v36, 0.0  ;;  %v2694_v44 = vadd.f32 %v2693_v40, %v2692_v39  ;;  %v2695_v47 = vpop.f32.mrb[74].mxu0  ;;  %v1843_v21 = vpop.f32.mrb[72].mxu1 }
 0x18d   : > { %v2696_v45 = vpop.f32.mrb[75].mxu0  ;;  %v2817_v55 = vpop.f32.mrb[73].mxu1 }
 0x18e   : > { %2088 = vst.msk [vmem:[%s3574_s24 + $0x10] sm:$0xf] %vm2083_vm1, %v2421_v42  ;;  %v2422_v49 = vpack.c.bf16 %v1942_v43, %v1942_v43  ;;  %v2697_v50 = vadd.f32 %v2696_v45, %v2695_v47  ;;  %v1692_v54 = vadd.f32 %v2694_v44, %v3501_v37  ;;  %v1846_v38 = vpop.f32.mrb[74].mxu1 }
 0x18f   : > { %v2818_v60 = vpop.f32.mrb[75].mxu1 }
 0x190   : > { %2089 = vst.msk [vmem:[%s3574_s24 + $0x14] sm:$0xf] %vm2083_vm1, %v2422_v49  ;;  %v1844_v51 = vadd.f32 %v1843_v21, %v1692_v54  ;;  %v1695_v57 = vadd.f32 %v2697_v50, %v3503_v41 }
 0x192   : > { %v1943_v61 = vmax.f32 %v1844_v51, 0.0  ;;  %v1847_v63 = vadd.f32 %v1846_v38, %v1695_v57  ;;  %v2698_v0 = vpop.f32.mrb[76].mxu0 }
 0x193   : > { %v2699_v1 = vpop.f32.mrb[77].mxu0 }
 0x194   : > { %v2423_v2 = vpack.c.bf16 %v1943_v61, %v1943_v61  ;;  %v1944_v5 = vmax.f32 %v1847_v63, 0.0  ;;  %v2700_v9 = vadd.f32 %v2699_v1, %v2698_v0  ;;  %v2701_v11 = vpop.f32.mrb[78].mxu0  ;;  %v1851_v37 = vpop.f32.mrb[76].mxu1 }
 0x195   : > { %v2702_v14 = vpop.f32.mrb[79].mxu0  ;;  %v2821_v19 = vpop.f32.mrb[77].mxu1 }
 0x196   : > { %2090 = vst.msk [vmem:[%s3574_s24 + $0x18] sm:$0xf] %vm2083_vm1, %v2423_v2  ;;  %v2424_v15 = vpack.c.bf16 %v1944_v5, %v1944_v5  ;;  %v2703_v16 = vadd.f32 %v2702_v14, %v2701_v11  ;;  %v1700_v18 = vadd.f32 %v2700_v9, %v3507_v56  ;;  %v1854_v41 = vpop.f32.mrb[78].mxu1 }
 0x197   : > { %v2822_v22 = vpop.f32.mrb[79].mxu1 }
 0x198   : > { %2091 = vst.msk [vmem:[%s3574_s24 + $0x1c] sm:$0xf] %vm2083_vm1, %v2424_v15  ;;  %v1852_v20 = vadd.f32 %v1851_v37, %v1700_v18  ;;  %v1703_v3 = vadd.f32 %v2703_v16, %v3509_v59 }
 0x19a   : > { %v1945_v23 = vmax.f32 %v1852_v20, 0.0  ;;  %v1855_v25 = vadd.f32 %v1854_v41, %v1703_v3  ;;  %v2704_v26 = vpop.f32.mrb[80].mxu0 }
 0x19b   : > { %v2705_v6 = vpop.f32.mrb[81].mxu0 }
 0x19c   : > { %v2425_v29 = vpack.c.bf16 %v1945_v23, %v1945_v23  ;;  %v1946_v33 = vmax.f32 %v1855_v25, 0.0  ;;  %v2706_v34 = vadd.f32 %v2705_v6, %v2704_v26  ;;  %v2707_v30 = vpop.f32.mrb[82].mxu0  ;;  %v1859_v56 = vpop.f32.mrb[80].mxu1 }
 0x19d   : > { %v2708_v36 = vpop.f32.mrb[83].mxu0  ;;  %v2825_v43 = vpop.f32.mrb[81].mxu1 }
 0x19e   : > { %2092 = vst.msk [vmem:[%s3574_s24 + $0x20] sm:$0xf] %vm2083_vm1, %v2425_v29  ;;  %v2426_v39 = vpack.c.bf16 %v1946_v33, %v1946_v33  ;;  %v2709_v40 = vadd.f32 %v2708_v36, %v2707_v30  ;;  %v1708_v42 = vadd.f32 %v2706_v34, %v3513_v10  ;;  %v1862_v59 = vpop.f32.mrb[82].mxu1 }
 0x19f   : > { %v2826_v45 = vpop.f32.mrb[83].mxu1 }
 0x1a0   : > { %2093 = vst.msk [vmem:[%s3574_s24 + $0x24] sm:$0xf] %vm2083_vm1, %v2426_v39  ;;  %v1860_v44 = vadd.f32 %v1859_v56, %v1708_v42  ;;  %v1711_v47 = vadd.f32 %v2709_v40, %v3515_v13 }
 0x1a2   : > { %v1947_v21 = vmax.f32 %v1860_v44, 0.0  ;;  %v1863_v49 = vadd.f32 %v1862_v59, %v1711_v47  ;;  %v2710_v50 = vpop.f32.mrb[84].mxu0 }
 0x1a3   : > { %v2711_v54 = vpop.f32.mrb[85].mxu0 }
 0x1a4   : > { %v2427_v55 = vpack.c.bf16 %v1947_v21, %v1947_v21  ;;  %v1948_v38 = vmax.f32 %v1863_v49, 0.0  ;;  %v2712_v51 = vadd.f32 %v2711_v54, %v2710_v50  ;;  %v2713_v57 = vpop.f32.mrb[86].mxu0  ;;  %v1867_v10 = vpop.f32.mrb[84].mxu1 }
 0x1a5   : > { %v2714_v60 = vpop.f32.mrb[87].mxu0  ;;  %v2829_v1 = vpop.f32.mrb[85].mxu1 }
 0x1a6   : > { %2094 = vst.msk [vmem:[%s3574_s24 + $0x28] sm:$0xf] %vm2083_vm1, %v2427_v55  ;;  %v2428_v61 = vpack.c.bf16 %v1948_v38, %v1948_v38  ;;  %v2715_v63 = vadd.f32 %v2714_v60, %v2713_v57  ;;  %v1716_v0 = vadd.f32 %v2712_v51, %v3519_v27  ;;  %v1870_v13 = vpop.f32.mrb[86].mxu1 }
 0x1a7   : > { %v2830_v9 = vpop.f32.mrb[87].mxu1 }
 0x1a8   : > { %2095 = vst.msk [vmem:[%s3574_s24 + $0x2c] sm:$0xf] %vm2083_vm1, %v2428_v61  ;;  %v1868_v2 = vadd.f32 %v1867_v10, %v1716_v0  ;;  %v1719_v5 = vadd.f32 %v2715_v63, %v3521_v31 }
 0x1aa   : > { %v1949_v11 = vmax.f32 %v1868_v2, 0.0  ;;  %v1871_v14 = vadd.f32 %v1870_v13, %v1719_v5  ;;  %v2716_v37 = vpop.f32.mrb[88].mxu0 }
 0x1ab   : > { %v2717_v15 = vpop.f32.mrb[89].mxu0 }
 0x1ac   : > { %v2429_v16 = vpack.c.bf16 %v1949_v11, %v1949_v11  ;;  %v1950_v18 = vmax.f32 %v1871_v14, 0.0  ;;  %v2718_v19 = vadd.f32 %v2717_v15, %v2716_v37  ;;  %v2719_v41 = vpop.f32.mrb[90].mxu0  ;;  %v1875_v27 = vpop.f32.mrb[88].mxu1 }
 0x1ad   : > { %v2720_v20 = vpop.f32.mrb[91].mxu0  ;;  %v2833_v25 = vpop.f32.mrb[89].mxu1 }
 0x1ae   : > { %2096 = vst.msk [vmem:[%s3574_s24 + $0x30] sm:$0xf] %vm2083_vm1, %v2429_v16  ;;  %v2430_v3 = vpack.c.bf16 %v1950_v18, %v1950_v18  ;;  %v2721_v22 = vadd.f32 %v2720_v20, %v2719_v41  ;;  %v1724_v23 = vadd.f32 %v2718_v19, %v3525_v48  ;;  %v1878_v31 = vpop.f32.mrb[90].mxu1 }
 0x1af   : > { %v2834_v29 = vpop.f32.mrb[91].mxu1 }
 0x1b0   : > { %2097 = vst.msk [vmem:[%s3574_s24 + $0x34] sm:$0xf] %vm2083_vm1, %v2430_v3  ;;  %v1876_v26 = vadd.f32 %v1875_v27, %v1724_v23  ;;  %v1727_v6 = vadd.f32 %v2721_v22, %v3527_v52 }
 0x1b2   : > { %v1951_v33 = vmax.f32 %v1876_v26, 0.0  ;;  %v1879_v34 = vadd.f32 %v1878_v31, %v1727_v6  ;;  %v2722_v30 = vpop.f32.mrb[92].mxu0 }
 0x1b3   : > { %v2723_v36 = vpop.f32.mrb[93].mxu0 }
 0x1b4   : > { %v2431_v56 = vpack.c.bf16 %v1951_v33, %v1951_v33  ;;  %v1952_v39 = vmax.f32 %v1879_v34, 0.0  ;;  %v2724_v40 = vadd.f32 %v2723_v36, %v2722_v30  ;;  %v2725_v42 = vpop.f32.mrb[94].mxu0  ;;  %v1883_v48 = vpop.f32.mrb[92].mxu1 }
 0x1b5   : > { %v2726_v43 = vpop.f32.mrb[95].mxu0  ;;  %v2837_v45 = vpop.f32.mrb[93].mxu1 }
 0x1b6   : > { %2098 = vst.msk [vmem:[%s3574_s24 + $0x38] sm:$0xf] %vm2083_vm1, %v2431_v56  ;;  %v2432_v59 = vpack.c.bf16 %v1952_v39, %v1952_v39  ;;  %v2727_v44 = vadd.f32 %v2726_v43, %v2725_v42  ;;  %v1732_v47 = vadd.f32 %v2724_v40, %v3531_v4  ;;  %v1886_v52 = vpop.f32.mrb[94].mxu1 }
 0x1b7   : > { %v2838_v50 = vpop.f32.mrb[95].mxu1 }
 0x1b8   : > { %2099 = vst.msk [vmem:[%s3574_s24 + $0x3c] sm:$0xf] %vm2083_vm1, %v2432_v59  ;;  %v1884_v21 = vadd.f32 %v1883_v48, %v1732_v47  ;;  %v1735_v49 = vadd.f32 %v2727_v44, %v3533_v8 }
 0x1ba   : > { %v1953_v54 = vmax.f32 %v1884_v21, 0.0  ;;  %v1887_v55 = vadd.f32 %v1886_v52, %v1735_v49  ;;  %v2728_v38 = vpop.f32.mrb[96].mxu0 }
 0x1bb   : > { %v2729_v51 = vpop.f32.mrb[97].mxu0 }
 0x1bc   : > { %v2433_v57 = vpack.c.bf16 %v1953_v54, %v1953_v54  ;;  %v1954_v60 = vmax.f32 %v1887_v55, 0.0  ;;  %v2730_v10 = vadd.f32 %v2729_v51, %v2728_v38  ;;  %v2731_v61 = vpop.f32.mrb[98].mxu0  ;;  %v1891_v4 = vpop.f32.mrb[96].mxu1 }
 0x1bd   : > { %v2732_v63 = vpop.f32.mrb[99].mxu0  ;;  %v2841_v2 = vpop.f32.mrb[97].mxu1 }
 0x1be   : > { %2100 = vst.msk [vmem:[%s3574_s24 + $0x40] sm:$0xf] %vm2083_vm1, %v2433_v57  ;;  %v2434_v0 = vpack.c.bf16 %v1954_v60, %v1954_v60  ;;  %v2733_v1 = vadd.f32 %v2732_v63, %v2731_v61  ;;  %v1740_v13 = vadd.f32 %v2730_v10, %v3537_v24  ;;  %v1894_v8 = vpop.f32.mrb[98].mxu1 }
 0x1bf   : > { %v2842_v11 = vpop.f32.mrb[99].mxu1 }
 0x1c0   : > { %2101 = vst.msk [vmem:[%s3574_s24 + $0x44] sm:$0xf] %vm2083_vm1, %v2434_v0  ;;  %v1892_v5 = vadd.f32 %v1891_v4, %v1740_v13  ;;  %v1743_v9 = vadd.f32 %v2733_v1, %v3539_v28 }
 0x1c2   : > { %v1955_v14 = vmax.f32 %v1892_v5, 0.0  ;;  %v1895_v37 = vadd.f32 %v1894_v8, %v1743_v9  ;;  %v2734_v15 = vpop.f32.mrb[100].mxu0 }
 0x1c3   : > { %v2735_v16 = vpop.f32.mrb[101].mxu0 }
 0x1c4   : > { %v2435_v18 = vpack.c.bf16 %v1955_v14, %v1955_v14  ;;  %v1956_v19 = vmax.f32 %v1895_v37, 0.0  ;;  %v2736_v41 = vadd.f32 %v2735_v16, %v2734_v15  ;;  %v2737_v20 = vpop.f32.mrb[102].mxu0  ;;  %v1899_v24 = vpop.f32.mrb[100].mxu1 }
 0x1c5   : > { %v2738_v27 = vpop.f32.mrb[103].mxu0  ;;  %v2845_v25 = vpop.f32.mrb[101].mxu1 }
 0x1c6   : > { %2102 = vst.msk [vmem:[%s3574_s24 + $0x48] sm:$0xf] %vm2083_vm1, %v2435_v18  ;;  %v2436_v3 = vpack.c.bf16 %v1956_v19, %v1956_v19  ;;  %v2739_v22 = vadd.f32 %v2738_v27, %v2737_v20  ;;  %v1748_v23 = vadd.f32 %v2736_v41, %v3543_v46  ;;  %v1902_v28 = vpop.f32.mrb[102].mxu1 }
 0x1c7   : > { %v2846_v6 = vpop.f32.mrb[103].mxu1 }
 0x1c8   : > { %2103 = vst.msk [vmem:[%s3574_s24 + $0x4c] sm:$0xf] %vm2083_vm1, %v2436_v3  ;;  %v1900_v31 = vadd.f32 %v1899_v24, %v1748_v23  ;;  %v1751_v26 = vadd.f32 %v2739_v22, %v3545_v53 }
 0x1ca   : > { %v1957_v29 = vmax.f32 %v1900_v31, 0.0  ;;  %v1903_v33 = vadd.f32 %v1902_v28, %v1751_v26  ;;  %v2740_v34 = vpop.f32.mrb[104].mxu0 }
 0x1cb   : > { %v2741_v30 = vpop.f32.mrb[105].mxu0 }
 0x1cc   : > { %v2437_v36 = vpack.c.bf16 %v1957_v29, %v1957_v29  ;;  %v1958_v56 = vmax.f32 %v1903_v33, 0.0  ;;  %v2742_v39 = vadd.f32 %v2741_v30, %v2740_v34  ;;  %v2743_v40 = vpop.f32.mrb[106].mxu0  ;;  %v1907_v46 = vpop.f32.mrb[104].mxu1 }
 0x1cd   : > { %v2744_v42 = vpop.f32.mrb[107].mxu0  ;;  %v2849_v44 = vpop.f32.mrb[105].mxu1 }
 0x1ce   : > { %2104 = vst.msk [vmem:[%s3574_s24 + $0x50] sm:$0xf] %vm2083_vm1, %v2437_v36  ;;  %v2438_v43 = vpack.c.bf16 %v1958_v56, %v1958_v56  ;;  %v2745_v48 = vadd.f32 %v2744_v42, %v2743_v40  ;;  %v1756_v59 = vadd.f32 %v2742_v39, %v3549_v7  ;;  %v1910_v53 = vpop.f32.mrb[106].mxu1 }
 0x1cf   : > { %v2850_v52 = vpop.f32.mrb[107].mxu1 }
 0x1d0   : > { %2105 = vst.msk [vmem:[%s3574_s24 + $0x54] sm:$0xf] %vm2083_vm1, %v2438_v43  ;;  %v1908_v47 = vadd.f32 %v1907_v46, %v1756_v59  ;;  %v1759_v45 = vadd.f32 %v2745_v48, %v3551_v12 }
 0x1d2   : > { %v1959_v21 = vmax.f32 %v1908_v47, 0.0  ;;  %v1911_v49 = vadd.f32 %v1910_v53, %v1759_v45  ;;  %v2746_v50 = vpop.f32.mrb[108].mxu0 }
 0x1d3   : > { %v2747_v54 = vpop.f32.mrb[109].mxu0 }
 0x1d4   : > { %v2439_v55 = vpack.c.bf16 %v1959_v21, %v1959_v21  ;;  %v1960_v38 = vmax.f32 %v1911_v49, 0.0  ;;  %v2748_v51 = vadd.f32 %v2747_v54, %v2746_v50  ;;  %v2749_v57 = vpop.f32.mrb[110].mxu0  ;;  %v1915_v7 = vpop.f32.mrb[108].mxu1 }
 0x1d5   : > { %v2750_v60 = vpop.f32.mrb[111].mxu0  ;;  %v2853_v4 = vpop.f32.mrb[109].mxu1 }
 0x1d6   : > { %2106 = vst.msk [vmem:[%s3574_s24 + $0x58] sm:$0xf] %vm2083_vm1, %v2439_v55  ;;  %v2440_v10 = vpack.c.bf16 %v1960_v38, %v1960_v38  ;;  %v2751_v61 = vadd.f32 %v2750_v60, %v2749_v57  ;;  %v1764_v63 = vadd.f32 %v2748_v51, %v3555_v32  ;;  %v1918_v12 = vpop.f32.mrb[110].mxu1 }
 0x1d7   : > { %v2854_v13 = vpop.f32.mrb[111].mxu1 }
 0x1d8   : > { %2107 = vst.msk [vmem:[%s3574_s24 + $0x5c] sm:$0xf] %vm2083_vm1, %v2440_v10  ;;  %v1916_v0 = vadd.f32 %v1915_v7, %v1764_v63  ;;  %v1767_v1 = vadd.f32 %v2751_v61, %v3557_v35 }
 0x1da   : > { %v1961_v2 = vmax.f32 %v1916_v0, 0.0  ;;  %v1919_v8 = vadd.f32 %v1918_v12, %v1767_v1  ;;  %v2752_v5 = vpop.f32.mrb[112].mxu0 }
 0x1db   : > { %v2753_v9 = vpop.f32.mrb[113].mxu0 }
 0x1dc   : > { %v2441_v11 = vpack.c.bf16 %v1961_v2, %v1961_v2  ;;  %v1962_v14 = vmax.f32 %v1919_v8, 0.0  ;;  %v2754_v37 = vadd.f32 %v2753_v9, %v2752_v5  ;;  %v2755_v15 = vpop.f32.mrb[114].mxu0  ;;  %v1923_v32 = vpop.f32.mrb[112].mxu1 }
 0x1dd   : > { %v2756_v16 = vpop.f32.mrb[115].mxu0  ;;  %v2857_v20 = vpop.f32.mrb[113].mxu1 }
 0x1de   : > { %2108 = vst.msk [vmem:[%s3574_s24 + $0x60] sm:$0xf] %vm2083_vm1, %v2441_v11  ;;  %v2442_v18 = vpack.c.bf16 %v1962_v14, %v1962_v14  ;;  %v2757_v19 = vadd.f32 %v2756_v16, %v2755_v15  ;;  %v1772_v41 = vadd.f32 %v2754_v37, %v3561_v58  ;;  %v1926_v35 = vpop.f32.mrb[114].mxu1 }
 0x1df   : > { %v2858_v3 = vpop.f32.mrb[115].mxu1 }
 0x1e0   : > { %2109 = vst.msk [vmem:[%s3574_s24 + $0x64] sm:$0xf] %vm2083_vm1, %v2442_v18  ;;  %v1924_v27 = vadd.f32 %v1923_v32, %v1772_v41  ;;  %v1775_v24 = vadd.f32 %v2757_v19, %v3563_v62 }
 0x1e2   : > { %v1963_v22 = vmax.f32 %v1924_v27, 0.0  ;;  %v1927_v23 = vadd.f32 %v1926_v35, %v1775_v24  ;;  %v2758_v25 = vpop.f32.mrb[116].mxu0 }
 0x1e3   : > { %v2759_v28 = vpop.f32.mrb[117].mxu0 }
 0x1e4   : > { %v2443_v31 = vpack.c.bf16 %v1963_v22, %v1963_v22  ;;  %v1964_v26 = vmax.f32 %v1927_v23, 0.0  ;;  %v2760_v6 = vadd.f32 %v2759_v28, %v2758_v25  ;;  %v2761_v29 = vpop.f32.mrb[118].mxu0  ;;  %v1931_v33 = vpop.f32.mrb[116].mxu1 }
 0x1e5   : > { %v2762_v58 = vpop.f32.mrb[119].mxu0  ;;  %v2861_v36 = vpop.f32.mrb[117].mxu1 }
 0x1e6   : > { %2110 = vst.msk [vmem:[%s3574_s24 + $0x68] sm:$0xf] %vm2083_vm1, %v2443_v31  ;;  %v2444_v34 = vpack.c.bf16 %v1964_v26, %v1964_v26  ;;  %v1780_v30 = vadd.f32 %v2760_v6, %v3566_v17  ;;  %v1934_v62 = vpop.f32.mrb[118].mxu1 }
 0x1e7   : > { %v2862_v39 = vpop.f32.mrb[119].mxu1 }
 0x1e8   : > { %2111 = vst.msk [vmem:[%s3574_s24 + $0x6c] sm:$0xf] %vm2083_vm1, %v2444_v34  ;;  %v1932_v56 = vadd.f32 %v1931_v33, %v1780_v30 }
 0x1ea   : > { %v1965_v40 = vmax.f32 %v1932_v56, 0.0 }
 0x1ec   : > { %v2445_v42 = vpack.c.bf16 %v1965_v40, %v1965_v40 }
 0x1ee   : > { %2112 = vst.msk [vmem:[%s3574_s24 + $0x70] sm:$0xf] %vm2083_vm1, %v2445_v42 }
 0x1ef PF: > { %s13_s14 = sadd.s32 1, %s3115_s14   ;;  %s3674_s12 = smov %s3111_s13 }
 0x1f0   : > { %p10_p5 = scmp.ge.s32.totalorder %s13_s14, 4   ;;  %s3675_s13 = smov %s3677_s15 }
 0x1f2   :  { %12 = sbr.rel (!%p10_p5) target bundleno = 2 (0x2), region = 68 }

// kernel: convfc_forward.6
= control target key start
LH: loop header
LB: loop body
LE: loop exit
PB: predicated region body
PF: predicated region fallthrough
CT: control target
= control target key end

     0   :  { %s2688_s12 = smov 0   ;;  %s2690_s13 = smov 0   ;;  %s3091_s0 = inlined_call_operand.vmem [shape: bf16[112,1664], index: 0, kind: input, shape index: {}]   ;;  %s3092_s1 = inlined_call_operand.vmem [shape: bf16[1664,128], index: 1, kind: input, shape index: {}]   ;;  %s3093_s2 = inlined_call_operand.vmem [shape: f32[1,128], index: 2, kind: input, shape index: {}]   ;;  %s3094_s3 = inlined_call_operand.vmem [shape: bf16[112,128], index: 3, kind: output, shape index: {}]  }
   0x1   :  { %s2692_s14 = smov 0  }
   0x2 LB: > { %s25_s15 = sadd.s32 1, %s2662_s13  ;;  %p1960_p0 = scmp.ge.s32.totalorder %s2666_s14, 1  ;;  %s2666_s14 = sphi %s2692_s14, %s13_s14   ;;  %s2662_s13 = sphi %s2690_s13, %s3096_s13   ;;  %s2658_s12 = sphi %s2688_s12, %s3095_s12  }
   0x3   : > { %p27_p1 = scmp.ge.s32.totalorder %s25_s15, 2  ;;  %p170_p2 = scmp.lt.s32.totalorder %s2666_s14, 3 }
   0x5   : > { %s3098_s15 = smov (%p27_p1, %s25_s15), 0  ;;  %p171_p3 = pnand %p1960_p0, %p170_p2 }
   0x6   : > { %v2470_v0 = vld [vmem:[%s3092_s1 + $0x40] sm:$0xff] (!%p171_p3)   ;;  %v2474_v4 = vld [vmem:[%s3092_s1 + $0x48] sm:$0xff] (!%p171_p3)   ;;  %v2478_v8 = vld [vmem:[%s3092_s1 + $0x50] sm:$0xff] (!%p171_p3)   ;;  %s205_s21 = smul.u32 (!%p171_p3), 7, %s2658_s12 }
   0x7   : > { %174 = sbr.rel (%p171_p3) target bundleno = 360 (0x168), region = 32  ;;  %v2471_v1 = vld [vmem:[%s3092_s1 + $0xc0] sm:$0xff] (!%p171_p3)   ;;  %2153 = vmatprep.subr.bf16.mxu0 (!%p171_p3), %v2470_v0  ;;  %v2475_v5 = vld [vmem:[%s3092_s1 + $0xc8] sm:$0xff] (!%p171_p3)   ;;  %v2479_v9 = vld [vmem:[%s3092_s1 + $0xd0] sm:$0xff] (!%p171_p3)  }
   0x8   : > { %v2472_v2 = vld [vmem:[%s3092_s1] sm:$0xff] (!%p171_p3)   ;;  %2193 = vmatprep.subr.bf16.mxu1 (!%p171_p3), %v2471_v1  ;;  %v2476_v6 = vld [vmem:[%s3092_s1 + $0x8] sm:$0xff] (!%p171_p3)   ;;  %v2480_v10 = vld [vmem:[%s3092_s1 + $0x10] sm:$0xff] (!%p171_p3)   ;;  %p206_p4 = scmp.lt.s32.totalorder (!%p171_p3), %s205_s21, 13 }
   0x9   : > { %v2473_v3 = vld [vmem:[%s3092_s1 + $0x80] sm:$0xff] (!%p171_p3)   ;;  %2154 = vmatpush3.bf16.msra.mxu0 (!%p171_p3), %v2472_v2  ;;  %v2477_v7 = vld [vmem:[%s3092_s1 + $0x88] sm:$0xff] (!%p171_p3)   ;;  %v2481_v11 = vld [vmem:[%s3092_s1 + $0x90] sm:$0xff] (!%p171_p3)  }
   0xa   : > { %2194 = vmatpush3.bf16.msra.mxu1 (!%p171_p3), %v2473_v3  ;;  %2155 = vmatprep.subr.bf16.mxu0 (!%p171_p3), %v2474_v4  ;;  %v2482_v12 = vld [vmem:[%s3092_s1 + $0x58] sm:$0xff] (!%p171_p3)   ;;  %v2486_v16 = vld [vmem:[%s3092_s1 + $0x60] sm:$0xff] (!%p171_p3)   ;;  %v2490_v20 = vld [vmem:[%s3092_s1 + $0x68] sm:$0xff] (!%p171_p3)  }
   0xb   : > { %2195 = vmatprep.subr.bf16.mxu1 (!%p171_p3), %v2475_v5  ;;  %v2483_v13 = vld [vmem:[%s3092_s1 + $0xd8] sm:$0xff] (!%p171_p3)   ;;  %v2487_v17 = vld [vmem:[%s3092_s1 + $0xe0] sm:$0xff] (!%p171_p3)   ;;  %v2491_v21 = vld [vmem:[%s3092_s1 + $0xe8] sm:$0xff] (!%p171_p3)  }
   0xc   : > { %v2484_v14 = vld [vmem:[%s3092_s1 + $0x18] sm:$0xff] (!%p171_p3)   ;;  %v2488_v18 = vld [vmem:[%s3092_s1 + $0x20] sm:$0xff] (!%p171_p3)   ;;  %v2492_v22 = vld [vmem:[%s3092_s1 + $0x28] sm:$0xff] (!%p171_p3)  }
   0xd   : > { %2156 = vmatpush3.bf16.msra.mxu0 (!%p171_p3), %v2476_v6  ;;  %v2485_v15 = vld [vmem:[%s3092_s1 + $0x98] sm:$0xff] (!%p171_p3)   ;;  %v2489_v19 = vld [vmem:[%s3092_s1 + $0xa0] sm:$0xff] (!%p171_p3)   ;;  %v2493_v23 = vld [vmem:[%s3092_s1 + $0xa8] sm:$0xff] (!%p171_p3)  }
   0xe   : > { %2196 = vmatpush3.bf16.msra.mxu1 %v2477_v7  ;;  %2157 = vmatprep.subr.bf16.mxu0 %v2478_v8  ;;  %s3100_s21 = smov (!%p206_p4, %s205_s21), 13  ;;  %v2494_v24 = vld [vmem:[%s3092_s1 + $0x70] sm:$0xff]   ;;  %v2498_v28 = vld [vmem:[%s3092_s1 + $0x78] sm:$0xff]   ;;  %v2508_v36 = vld [vmem:[%s3092_s1 + $0x140] sm:$0xff]  }
   0xf   : > { %2197 = vmatprep.subr.bf16.mxu1 %v2479_v9  ;;  %v2495_v25 = vld [vmem:[%s3092_s1 + $0xf0] sm:$0xff]   ;;  %s2445_s23 = smul.u32 52, %s3100_s21  ;;  %v2499_v29 = vld [vmem:[%s3092_s1 + $0xf8] sm:$0xff]   ;;  %v2509_v37 = vld [vmem:[%s3092_s1 + $0x1c0] sm:$0xff]  }
  0x10   : > { %v2496_v26 = vld [vmem:[%s3092_s1 + $0x30] sm:$0xff]   ;;  %v2500_v30 = vld [vmem:[%s3092_s1 + $0x38] sm:$0xff]   ;;  %v2510_v38 = vld [vmem:[%s3092_s1 + $0x100] sm:$0xff]  }
  0x11   : > { %2158 = vmatpush3.bf16.msra.mxu0 %v2480_v10  ;;  %v2497_v27 = vld [vmem:[%s3092_s1 + $0xb0] sm:$0xff]   ;;  %s2805_s6 = scalar_lea.vmem %s3091_s0, %s2445_s23  ;;  %v2501_v31 = vld [vmem:[%s3092_s1 + $0xb8] sm:$0xff]   ;;  %v2511_v39 = vld [vmem:[%s3092_s1 + $0x180] sm:$0xff]  }
  0x12   : > { %2198 = vmatpush3.bf16.msra.mxu1 %v2481_v11  ;;  %2159 = vmatprep.subr.bf16.mxu0 %v2482_v12  ;;  %v2502_v32 = vld [vmem:[%s2805_s6] ss:$52 sps:$4 sm:$0xff]   ;;  %v2504_v33 = vld [vmem:[%s2805_s6 + $0x4] ss:$52 sps:$4 sm:$0xff]   ;;  %v2505_v34 = vld [vmem:[%s2805_s6 + $0x8] ss:$52 sps:$4 sm:$0xff]  }
  0x13   : > { %2199 = vmatprep.subr.bf16.mxu1 %v2483_v13  ;;  %v2507_v35 = vld [vmem:[%s2805_s6 + $0xc] ss:$52 sps:$4 sm:$0xff]   ;;  %1393 = vmatprep.mubr.bf16.mxu0 %v2504_v33  ;;  %v2518_v45 = vld [vmem:[%s2805_s6 + $0x74] ss:$52 sps:$4 sm:$0xff]   ;;  %v2521_v47 = vld [vmem:[%s2805_s6 + $0x70] ss:$52 sps:$4 sm:$0xff]  }
  0x14   : > { %1457 = vmatprep.mubr.bf16.mxu1 %v2507_v35  ;;  %v2512_v40 = vld [vmem:[%s3092_s1 + $0x148] sm:$0xff]   ;;  %v2522_v48 = vld [vmem:[%s3092_s1 + $0x150] sm:$0xff]   ;;  %v2526_v52 = vld [vmem:[%s3092_s1 + $0x158] sm:$0xff]  }
  0x15   : > { %2160 = vmatpush3.bf16.msra.mxu0 %v2484_v14  ;;  %v2513_v41 = vld [vmem:[%s3092_s1 + $0x1c8] sm:$0xff]   ;;  %v2523_v49 = vld [vmem:[%s3092_s1 + $0x1d0] sm:$0xff]   ;;  %v2527_v53 = vld [vmem:[%s3092_s1 + $0x1d8] sm:$0xff]  }
  0x16   : > { %2200 = vmatpush3.bf16.msra.mxu1 %v2485_v15  ;;  %2161 = vmatprep.subr.bf16.mxu0 %v2486_v16  ;;  %v2514_v42 = vld [vmem:[%s3092_s1 + $0x108] sm:$0xff]   ;;  %v2524_v50 = vld [vmem:[%s3092_s1 + $0x110] sm:$0xff]   ;;  %v2528_v54 = vld [vmem:[%s3092_s1 + $0x118] sm:$0xff]  }
  0x17   : > { %2201 = vmatprep.subr.bf16.mxu1 %v2487_v17  ;;  %v2515_v43 = vld [vmem:[%s3092_s1 + $0x188] sm:$0xff]   ;;  %v2525_v51 = vld [vmem:[%s3092_s1 + $0x190] sm:$0xff]   ;;  %v2529_v55 = vld [vmem:[%s3092_s1 + $0x198] sm:$0xff]  }
  0x18   : > { %v2516_v44 = vld [vmem:[%s2805_s6 + $0x6c] ss:$52 sps:$4 sm:$0xff]   ;;  %v2520_v46 = vld [vmem:[%s2805_s6 + $0x68] ss:$52 sps:$4 sm:$0xff]   ;;  %v2534_v58 = vld [vmem:[%s2805_s6 + $0xd0] ss:$52 sps:$4 sm:$0xff]  }
  0x19   : > { %2162 = vmatpush3.bf16.msra.mxu0 %v2488_v18  ;;  %v2530_v56 = vld [vmem:[%s2805_s6 + $0xd4] ss:$52 sps:$4 sm:$0xff]   ;;  %v2532_v57 = vld [vmem:[%s2805_s6 + $0xdc] ss:$52 sps:$4 sm:$0xff]   ;;  %v2535_v59 = vld [vmem:[%s2805_s6 + $0xd8] ss:$52 sps:$4 sm:$0xff]  }
  0x1a   : > { %2202 = vmatpush3.bf16.msra.mxu1 %v2489_v19  ;;  %2163 = vmatprep.subr.bf16.mxu0 %v2490_v20  ;;  %v2536_v60 = vld [vmem:[%s3092_s1 + $0x160] sm:$0xff]   ;;  %v2540_v0 = vld [vmem:[%s3092_s1 + $0x168] sm:$0xff]   ;;  %v271_v4 = vld [vmem:[%s2805_s6 + $0x138] sm:$0xff] }
  0x1b   : > { %2203 = vmatprep.subr.bf16.mxu1 %v2491_v21  ;;  %v2537_v61 = vld [vmem:[%s3092_s1 + $0x1e0] sm:$0xff]   ;;  %v2541_v1 = vld [vmem:[%s3092_s1 + $0x1e8] sm:$0xff]   ;;  %v2004_v6 = vcombine.high %v271_v4, %v271_v4  ;;  %v2003_v8 = vcombine.low %v271_v4, %v271_v4  ;;  %v2548_v10 = vld [vmem:[%s3092_s1 + $0x170] sm:$0xff]  }
  0x1c   : > { %v2538_v62 = vld [vmem:[%s3092_s1 + $0x120] sm:$0xff]   ;;  %v2542_v2 = vld [vmem:[%s3092_s1 + $0x128] sm:$0xff]   ;;  %v2549_v11 = vld [vmem:[%s3092_s1 + $0x1f0] sm:$0xff]  }
  0x1d   : > { %2164 = vmatpush3.bf16.msra.mxu0 %v2492_v22  ;;  %v2539_v63 = vld [vmem:[%s3092_s1 + $0x1a0] sm:$0xff]   ;;  %v2543_v3 = vld [vmem:[%s3092_s1 + $0x1a8] sm:$0xff]   ;;  %v2550_v12 = vld [vmem:[%s3092_s1 + $0x130] sm:$0xff]  }
  0x1e   : > { %2204 = vmatpush3.bf16.msra.mxu1 %v2493_v23  ;;  %2165 = vmatprep.subr.bf16.mxu0 %v2494_v24  ;;  %v272_v5 = vld [vmem:[%s2805_s6 + $0x140] sm:$0xff]  ;;  %v2551_v13 = vld [vmem:[%s3092_s1 + $0x1b0] sm:$0xff]   ;;  %v2552_v14 = vld [vmem:[%s3092_s1 + $0x178] sm:$0xff]  }
  0x1f   : > { %2205 = vmatprep.subr.bf16.mxu1 %v2495_v25  ;;  %v2006_v7 = vcombine.high %v272_v5, %v272_v5  ;;  %v2005_v9 = vcombine.low %v272_v5, %v272_v5  ;;  %v2553_v15 = vld [vmem:[%s3092_s1 + $0x1f8] sm:$0xff]   ;;  %v2556_v18 = vld [vmem:[%s2805_s6 + $0x10] ss:$52 sps:$4 sm:$0xff]   ;;  %v2558_v19 = vld [vmem:[%s2805_s6 + $0x14] ss:$52 sps:$4 sm:$0xff]  }
  0x20   : > { %v2554_v16 = vld [vmem:[%s3092_s1 + $0x138] sm:$0xff]   ;;  %v2562_v22 = vld [vmem:[%s3092_s1 + $0x240] sm:$0xff]   ;;  %v2577_v35 = vld [vmem:[%s3092_s1 + $0x2d0] sm:$0xff]  }
  0x21   : > { %2166 = vmatpush3.bf16.msra.mxu0 %v2496_v26  ;;  %v2555_v17 = vld [vmem:[%s3092_s1 + $0x1b8] sm:$0xff]   ;;  %v2563_v23 = vld [vmem:[%s3092_s1 + $0x2c0] sm:$0xff]   ;;  %v2566_v26 = vld [vmem:[%s3092_s1 + $0x248] sm:$0xff]  }
  0x22   : > { %2206 = vmatpush3.bf16.msra.mxu1 %v2497_v27  ;;  %2167 = vmatprep.subr.bf16.mxu0 %v2498_v28  ;;  %v2559_v20 = vld [vmem:[%s2805_s6 + $0x18] ss:$52 sps:$4 sm:$0xff]   ;;  %v2561_v21 = vld [vmem:[%s2805_s6 + $0x1c] ss:$52 sps:$4 sm:$0xff]   ;;  %v2564_v24 = vld [vmem:[%s3092_s1 + $0x200] sm:$0xff]  }
  0x23   : > { %2207 = vmatprep.subr.bf16.mxu1 %v2499_v29  ;;  %v2565_v25 = vld [vmem:[%s3092_s1 + $0x280] sm:$0xff]   ;;  %v2567_v27 = vld [vmem:[%s3092_s1 + $0x2c8] sm:$0xff]  }
  0x24   : > { %v2568_v28 = vld [vmem:[%s3092_s1 + $0x208] sm:$0xff]   ;;  %v2575_v33 = vld [vmem:[%s2805_s6 + $0x80] ss:$52 sps:$4 sm:$0xff]   ;;  %v2612_v5 = vld [vmem:[%s2805_s6 + $0x24] ss:$52 sps:$4 sm:$0xff]  }
  0x25   : > { %2168 = vmatpush3.bf16.msra.mxu0 %v2500_v30  ;;  %v2569_v29 = vld [vmem:[%s3092_s1 + $0x288] sm:$0xff]   ;;  %v2570_v30 = vld [vmem:[%s2805_s6 + $0x7c] ss:$52 sps:$4 sm:$0xff]   ;;  %v2610_v4 = vld [vmem:[%s2805_s6 + $0x20] ss:$52 sps:$4 sm:$0xff]  }
  0x26   : > { %2208 = vmatpush3.bf16.msra.mxu1 %v2501_v31  ;;  %2233 = vmatprep.subr.bf16.mxu0 %v2508_v36  ;;  %v2572_v31 = vld [vmem:[%s2805_s6 + $0x84] ss:$52 sps:$4 sm:$0xff]   ;;  %v2578_v36 = vld [vmem:[%s3092_s1 + $0x210] sm:$0xff]  }
  0x27   : > { %2273 = vmatprep.subr.bf16.mxu1 %v2509_v37  ;;  %v2579_v37 = vld [vmem:[%s3092_s1 + $0x290] sm:$0xff]  }
  0x28   : > { %1394 = vmatmul.mubr.bf16.vlgmr.msra.gmra.mrb[0].mxu0 %v2502_v32  ;;  %v2574_v32 = vld [vmem:[%s2805_s6 + $0x78] ss:$52 sps:$4 sm:$0xff]  }
  0x29   : > { %1458 = vmatmul.mubr.bf16.vlgmr.msra.gmra.mrb[0].mxu1 %v2505_v34  ;;  %2234 = vmatpush3.bf16.msra.mxu0 %v2510_v38  ;;  %v2576_v34 = vld [vmem:[%s3092_s1 + $0x250] sm:$0xff]   ;;  %v2580_v38 = vld [vmem:[%s3092_s1 + $0x258] sm:$0xff]  }
  0x2a   : > { %2274 = vmatpush3.bf16.msra.mxu1 %v2511_v39  ;;  %2235 = vmatprep.subr.bf16.mxu0 %v2512_v40  ;;  %v2581_v39 = vld [vmem:[%s3092_s1 + $0x2d8] sm:$0xff]  }
  0x2b   : > { %2275 = vmatprep.subr.bf16.mxu1 %v2513_v41  ;;  %1401 = vmatprep.mubr.bf16.mxu0 %v2516_v44  ;;  %v2582_v40 = vld [vmem:[%s3092_s1 + $0x218] sm:$0xff]   ;;  %v2588_v44 = vld [vmem:[%s2805_s6 + $0xe0] ss:$52 sps:$4 sm:$0xff]  }
  0x2c   : > { %1465 = vmatprep.mubr.bf16.mxu1 %v2518_v45  ;;  %v2583_v41 = vld [vmem:[%s3092_s1 + $0x298] sm:$0xff]  }
  0x2d   : > { %2236 = vmatpush3.bf16.msra.mxu0 %v2514_v42  ;;  %v2584_v42 = vld [vmem:[%s2805_s6 + $0xe4] ss:$52 sps:$4 sm:$0xff]   ;;  %v2589_v45 = vld [vmem:[%s2805_s6 + $0xe8] ss:$52 sps:$4 sm:$0xff]  }
  0x2e   : > { %2276 = vmatpush3.bf16.msra.mxu1 %v2515_v43  ;;  %2237 = vmatprep.subr.bf16.mxu0 %v2522_v48  ;;  %v2586_v43 = vld [vmem:[%s2805_s6 + $0xec] ss:$52 sps:$4 sm:$0xff]  }
  0x2f   : > { %2277 = vmatprep.subr.bf16.mxu1 %v2523_v49  ;;  %v2592_v48 = vld [vmem:[%s3092_s1 + $0x220] sm:$0xff]  }
  0x30   : > { %1402 = vmatmul.mubr.bf16.gmra.mrb[4].mxu0 %v2520_v46  ;;  %v2590_v46 = vld [vmem:[%s3092_s1 + $0x260] sm:$0xff]  }
  0x31   : > { %1466 = vmatmul.mubr.bf16.gmra.mrb[4].mxu1 %v2521_v47  ;;  %2238 = vmatpush3.bf16.msra.mxu0 %v2524_v50  ;;  %v2591_v47 = vld [vmem:[%s3092_s1 + $0x2e0] sm:$0xff]   ;;  %v2594_v50 = vld [vmem:[%s3092_s1 + $0x268] sm:$0xff]  }
  0x32   : > { %2278 = vmatpush3.bf16.msra.mxu1 %v2525_v51  ;;  %2239 = vmatprep.subr.bf16.mxu0 %v2526_v52  ;;  %v2593_v49 = vld [vmem:[%s3092_s1 + $0x2a0] sm:$0xff]   ;;  %v2595_v51 = vld [vmem:[%s3092_s1 + $0x2e8] sm:$0xff]  }
  0x33   : > { %2279 = vmatprep.subr.bf16.mxu1 %v2527_v53  ;;  %1409 = vmatprep.mubr.bf16.mxu0 %v2530_v56  ;;  %v2596_v52 = vld [vmem:[%s3092_s1 + $0x228] sm:$0xff]   ;;  %v274_v56 = vld [vmem:[%s2805_s6 + $0x150] sm:$0xff] }
  0x34   : > { %1473 = vmatprep.mubr.bf16.mxu1 %v2532_v57  ;;  %v2597_v53 = vld [vmem:[%s3092_s1 + $0x2a8] sm:$0xff]  }
  0x35   : > { %2240 = vmatpush3.bf16.msra.mxu0 %v2528_v54  ;;  %v273_v54 = vld [vmem:[%s2805_s6 + $0x148] sm:$0xff] }
  0x36   : > { %2280 = vmatpush3.bf16.msra.mxu1 %v2529_v55  ;;  %2241 = vmatprep.subr.bf16.mxu0 %v2536_v60  ;;  %v2008_v55 = vcombine.high %v273_v54, %v273_v54  ;;  %v2007_v57 = vcombine.low %v273_v54, %v273_v54  ;;  %v2602_v60 = vld [vmem:[%s3092_s1 + $0x270] sm:$0xff]  }
  0x37   : > { %2281 = vmatprep.subr.bf16.mxu1 %v2537_v61  ;;  %v2603_v61 = vld [vmem:[%s3092_s1 + $0x2f0] sm:$0xff]  }
  0x38   : > { %1410 = vmatmul.mubr.bf16.gmra.mrb[8].mxu0 %v2534_v58  ;;  %v2010_v58 = vcombine.high %v274_v56, %v274_v56 }
  0x39   : > { %1474 = vmatmul.mubr.bf16.gmra.mrb[8].mxu1 %v2535_v59  ;;  %2242 = vmatpush3.bf16.msra.mxu0 %v2538_v62  ;;  %v2009_v59 = vcombine.low %v274_v56, %v274_v56  ;;  %v2604_v62 = vld [vmem:[%s3092_s1 + $0x230] sm:$0xff]  }
  0x3a   : > { %2282 = vmatpush3.bf16.msra.mxu1 %v2539_v63  ;;  %2243 = vmatprep.subr.bf16.mxu0 %v2540_v0  ;;  %v2605_v63 = vld [vmem:[%s3092_s1 + $0x2b0] sm:$0xff]   ;;  %v2606_v0 = vld [vmem:[%s3092_s1 + $0x278] sm:$0xff]  }
  0x3b   : > { %2283 = vmatprep.subr.bf16.mxu1 %v2541_v1  ;;  %1417 = vmatprep.mubr.bf16.mxu0 %v2004_v6  ;;  %v2607_v1 = vld [vmem:[%s3092_s1 + $0x2f8] sm:$0xff]  }
  0x3c   : > { %1481 = vmatprep.mubr.bf16.mxu1 %v2006_v7  ;;  %v2613_v6 = vld [vmem:[%s2805_s6 + $0x28] ss:$52 sps:$4 sm:$0xff]   ;;  %v2615_v7 = vld [vmem:[%s2805_s6 + $0x2c] ss:$52 sps:$4 sm:$0xff]  }
  0x3d   : > { %2244 = vmatpush3.bf16.msra.mxu0 %v2542_v2  ;;  %v2608_v2 = vld [vmem:[%s3092_s1 + $0x238] sm:$0xff]  }
  0x3e   : > { %2284 = vmatpush3.bf16.msra.mxu1 %v2543_v3  ;;  %2245 = vmatprep.subr.bf16.mxu0 %v2548_v10  ;;  %v2609_v3 = vld [vmem:[%s3092_s1 + $0x2b8] sm:$0xff]   ;;  %v2618_v10 = vld [vmem:[%s2805_s6 + $0x8c] ss:$52 sps:$4 sm:$0xff]  }
  0x3f   : > { %2285 = vmatprep.subr.bf16.mxu1 %v2549_v11  ;;  %v2620_v11 = vld [vmem:[%s2805_s6 + $0x94] ss:$52 sps:$4 sm:$0xff]  }
  0x40   : > { %1418 = vmatmul.mubr.bf16.gmra.mrb[12].mxu0 %v2003_v8  ;;  %v2616_v8 = vld [vmem:[%s3092_s1 + $0x300] sm:$0xff]  }
  0x41   : > { %1482 = vmatmul.mubr.bf16.gmra.mrb[12].mxu1 %v2005_v9  ;;  %2246 = vmatpush3.bf16.msra.mxu0 %v2550_v12  ;;  %v2617_v9 = vld [vmem:[%s3092_s1 + $0x308] sm:$0xff]  }
  0x42   : > { %2286 = vmatpush3.bf16.msra.mxu1 %v2551_v13  ;;  %2247 = vmatprep.subr.bf16.mxu0 %v2552_v14  ;;  %v2622_v12 = vld [vmem:[%s2805_s6 + $0x88] ss:$52 sps:$4 sm:$0xff]   ;;  %v2624_v13 = vld [vmem:[%s3092_s1 + $0x310] sm:$0xff]  }
  0x43   : > { %2287 = vmatprep.subr.bf16.mxu1 %v2553_v15  ;;  %1521 = vmatprep.mubr.bf16.mxu0 %v2558_v19  ;;  %v2623_v14 = vld [vmem:[%s2805_s6 + $0x90] ss:$52 sps:$4 sm:$0xff]   ;;  %v2626_v15 = vld [vmem:[%s2805_s6 + $0xf4] ss:$52 sps:$4 sm:$0xff]   ;;  %v275_v19 = vld [vmem:[%s2805_s6 + $0x158] sm:$0xff] }
  0x44   : > { %1585 = vmatprep.mubr.bf16.mxu1 %v2561_v21  ;;  %v2630_v21 = vld [vmem:[%s2805_s6 + $0xf0] ss:$52 sps:$4 sm:$0xff]  }
  0x45   : > { %2248 = vmatpush3.bf16.msra.mxu0 %v2554_v16  ;;  %v2625_v16 = vld [vmem:[%s3092_s1 + $0x318] sm:$0xff]  }
  0x46   : > { %2288 = vmatpush3.bf16.msra.mxu1 %v2555_v17  ;;  %2313 = vmatprep.subr.bf16.mxu0 %v2562_v22  ;;  %v2628_v17 = vld [vmem:[%s2805_s6 + $0xfc] ss:$52 sps:$4 sm:$0xff]   ;;  %v2631_v22 = vld [vmem:[%s2805_s6 + $0xf8] ss:$52 sps:$4 sm:$0xff]  }
  0x47   : > { %2353 = vmatprep.subr.bf16.mxu1 %v2563_v23  ;;  %v2012_v23 = vcombine.high %v275_v19, %v275_v19 }
  0x48   : > { %1522 = vmatmul.mubr.bf16.vlgmr.msra.gmra.mrb[16].mxu0 %v2556_v18  ;;  %v2632_v18 = vld [vmem:[%s3092_s1 + $0x320] sm:$0xff]  }
  0x49   : > { %1586 = vmatmul.mubr.bf16.vlgmr.msra.gmra.mrb[16].mxu1 %v2559_v20  ;;  %2314 = vmatpush3.bf16.msra.mxu0 %v2564_v24  ;;  %v276_v20 = vld [vmem:[%s2805_s6 + $0x160] sm:$0xff] }
  0x4a   : > { %2354 = vmatpush3.bf16.msra.mxu1 %v2565_v25  ;;  %2315 = vmatprep.subr.bf16.mxu0 %v2566_v26  ;;  %v2014_v24 = vcombine.high %v276_v20, %v276_v20  ;;  %v2633_v25 = vld [vmem:[%s3092_s1 + $0x328] sm:$0xff]   ;;  %v2638_v26 = vld [vmem:[%s3092_s1 + $0x330] sm:$0xff]  }
  0x4b   : > { %2355 = vmatprep.subr.bf16.mxu1 %v2567_v27  ;;  %1529 = vmatprep.mubr.bf16.mxu0 %v2570_v30  ;;  %v2011_v27 = vcombine.low %v275_v19, %v275_v19  ;;  %v2641_v30 = vld [vmem:[%s2805_s6 + $0x100] ss:$52 sps:$4 sm:$0xff]  }
  0x4c   : > { %1593 = vmatprep.mubr.bf16.mxu1 %v2572_v31  ;;  %v2639_v31 = vld [vmem:[%s3092_s1 + $0x338] sm:$0xff]  }
  0x4d   : > { %2316 = vmatpush3.bf16.msra.mxu0 %v2568_v28  ;;  %v2013_v28 = vcombine.low %v276_v20, %v276_v20 }
  0x4e   : > { %2356 = vmatpush3.bf16.msra.mxu1 %v2569_v29  ;;  %2317 = vmatprep.subr.bf16.mxu0 %v2576_v34  ;;  %v2640_v29 = vld [vmem:[%s2805_s6 + $0x30] ss:$52 sps:$4 sm:$0xff]  }
  0x4f   : > { %2357 = vmatprep.subr.bf16.mxu1 %v2577_v35 }
  0x50   : > { %1530 = vmatmul.mubr.bf16.gmra.mrb[20].mxu0 %v2574_v32  ;;  %v2642_v32 = vld [vmem:[%s2805_s6 + $0x98] ss:$52 sps:$4 sm:$0xff]  }
  0x51   : > { %1594 = vmatmul.mubr.bf16.gmra.mrb[20].mxu1 %v2575_v33  ;;  %2318 = vmatpush3.bf16.msra.mxu0 %v2578_v36  ;;  %v2643_v33 = vld [vmem:[%s2805_s6 + $0x168] ss:$0 sps:$4 sm:$0xff]   ;;  %v1963_v36 = vld [vmem:[%s3093_s2] ss:$0 sm:$0xff]  ;;  %s1962_s6 = sshll.u32 %s3100_s21, 2 }
  0x52   : > { %2358 = vmatpush3.bf16.msra.mxu1 %v2579_v37  ;;  %2319 = vmatprep.subr.bf16.mxu0 %v2580_v38  ;;  %s226_s4 = scalar_lea.vmem %s3094_s3, %s1962_s6 }
  0x53   : > { %2359 = vmatprep.subr.bf16.mxu1 %v2581_v39  ;;  %1537 = vmatprep.mubr.bf16.mxu0 %v2584_v42 }
  0x54   : > { %1601 = vmatprep.mubr.bf16.mxu1 %v2586_v43 }
  0x55   : > { %2320 = vmatpush3.bf16.msra.mxu0 %v2582_v40 }
  0x56   : > { %2360 = vmatpush3.bf16.msra.mxu1 %v2583_v41  ;;  %2321 = vmatprep.subr.bf16.mxu0 %v2590_v46 }
  0x57   : > { %2361 = vmatprep.subr.bf16.mxu1 %v2591_v47 }
  0x58   : > { %1538 = vmatmul.mubr.bf16.gmra.mrb[24].mxu0 %v2588_v44 }
  0x59   : > { %1602 = vmatmul.mubr.bf16.gmra.mrb[24].mxu1 %v2589_v45  ;;  %2322 = vmatpush3.bf16.msra.mxu0 %v2592_v48 }
  0x5a   : > { %2362 = vmatpush3.bf16.msra.mxu1 %v2593_v49  ;;  %2323 = vmatprep.subr.bf16.mxu0 %v2594_v50 }
  0x5b   : > { %2363 = vmatprep.subr.bf16.mxu1 %v2595_v51  ;;  %1545 = vmatprep.mubr.bf16.mxu0 %v2008_v55 }
  0x5c   : > { %1609 = vmatprep.mubr.bf16.mxu1 %v2010_v58 }
  0x5d   : > { %2324 = vmatpush3.bf16.msra.mxu0 %v2596_v52 }
  0x5e   : > { %2364 = vmatpush3.bf16.msra.mxu1 %v2597_v53  ;;  %2325 = vmatprep.subr.bf16.mxu0 %v2602_v60 }
  0x5f   : > { %2365 = vmatprep.subr.bf16.mxu1 %v2603_v61 }
  0x60   : > { %1546 = vmatmul.mubr.bf16.gmra.mrb[28].mxu0 %v2007_v57 }
  0x61   : > { %1610 = vmatmul.mubr.bf16.gmra.mrb[28].mxu1 %v2009_v59  ;;  %2326 = vmatpush3.bf16.msra.mxu0 %v2604_v62 }
  0x62   : > { %2366 = vmatpush3.bf16.msra.mxu1 %v2605_v63  ;;  %2327 = vmatprep.subr.bf16.mxu0 %v2606_v0 }
  0x63   : > { %2367 = vmatprep.subr.bf16.mxu1 %v2607_v1  ;;  %1649 = vmatprep.mubr.bf16.mxu0 %v2612_v5 }
  0x64   : > { %1713 = vmatprep.mubr.bf16.mxu1 %v2615_v7 }
  0x65   : > { %2328 = vmatpush3.bf16.msra.mxu0 %v2608_v2 }
  0x66   : > { %2368 = vmatpush3.bf16.msra.mxu1 %v2609_v3  ;;  %2405 = vmatprep.subr.bf16.mxu0 %v2616_v8 }
  0x67   : > { %2429 = vmatprep.subr.bf16.mxu1 %v2616_v8 }
  0x68   : > { %1650 = vmatmul.mubr.bf16.vlgmr.msra.gmra.mrb[32].mxu0 %v2610_v4 }
  0x69   : > { %1714 = vmatmul.mubr.bf16.vlgmr.msra.gmra.mrb[32].mxu1 %v2613_v6  ;;  %2406 = vmatpush3.bf16.msra.mxu0 %v2616_v8 }
  0x6a   : > { %2437 = vmatpush3.bf16.msra.mxu1 %v2616_v8  ;;  %2407 = vmatprep.subr.bf16.mxu0 %v2617_v9 }
  0x6b   : > { %2430 = vmatprep.subr.bf16.mxu1 %v2617_v9  ;;  %1657 = vmatprep.mubr.bf16.mxu0 %v2618_v10 }
  0x6c   : > { %1721 = vmatprep.mubr.bf16.mxu1 %v2620_v11 }
  0x6d   : > { %2408 = vmatpush3.bf16.msra.mxu0 %v2617_v9 }
  0x6e   : > { %2438 = vmatpush3.bf16.msra.mxu1 %v2617_v9  ;;  %2409 = vmatprep.subr.bf16.mxu0 %v2624_v13 }
  0x6f   : > { %2431 = vmatprep.subr.bf16.mxu1 %v2624_v13 }
  0x70   : > { %1658 = vmatmul.mubr.bf16.gmra.mrb[36].mxu0 %v2622_v12 }
  0x71   : > { %1722 = vmatmul.mubr.bf16.gmra.mrb[36].mxu1 %v2623_v14  ;;  %1665 = vmatprep.mubr.bf16.mxu0 %v2626_v15 }
  0x72   : > { %2410 = vmatpush3.bf16.msra.mxu0 %v2624_v13  ;;  %1729 = vmatprep.mubr.bf16.mxu1 %v2628_v17 }
  0x73   : > { %2439 = vmatpush3.bf16.msra.mxu1 %v2624_v13  ;;  %2411 = vmatprep.subr.bf16.mxu0 %v2625_v16 }
  0x74   : > { %2432 = vmatprep.subr.bf16.mxu1 %v2625_v16 }
  0x76   : > { %2412 = vmatpush3.bf16.msra.mxu0 %v2625_v16 }
  0x77   : > { %2440 = vmatpush3.bf16.msra.mxu1 %v2625_v16  ;;  %2413 = vmatprep.subr.bf16.mxu0 %v2632_v18 }
  0x78   : > { %1666 = vmatmul.mubr.bf16.gmra.mrb[40].mxu0 %v2630_v21  ;;  %2433 = vmatprep.subr.bf16.mxu1 %v2632_v18 }
  0x79   : > { %1730 = vmatmul.mubr.bf16.gmra.mrb[40].mxu1 %v2631_v22  ;;  %1673 = vmatprep.mubr.bf16.mxu0 %v2012_v23 }
  0x7a   : > { %2414 = vmatpush3.bf16.msra.mxu0 %v2632_v18  ;;  %1737 = vmatprep.mubr.bf16.mxu1 %v2014_v24 }
  0x7b   : > { %2441 = vmatpush3.bf16.msra.mxu1 %v2632_v18  ;;  %2415 = vmatprep.subr.bf16.mxu0 %v2633_v25 }
  0x7c   : > { %2434 = vmatprep.subr.bf16.mxu1 %v2633_v25 }
  0x7e   : > { %2416 = vmatpush3.bf16.msra.mxu0 %v2633_v25 }
  0x7f   : > { %2442 = vmatpush3.bf16.msra.mxu1 %v2633_v25  ;;  %2417 = vmatprep.subr.bf16.mxu0 %v2638_v26 }
  0x80   : > { %1674 = vmatmul.mubr.bf16.gmra.mrb[44].mxu0 %v2011_v27  ;;  %2435 = vmatprep.subr.bf16.mxu1 %v2638_v26 }
  0x81   : > { %1738 = vmatmul.mubr.bf16.gmra.mrb[44].mxu1 %v2013_v28  ;;  %2421 = vmatprep.mubr.bf16.mxu0 %v2640_v29 }
  0x82   : > { %2418 = vmatpush3.bf16.msra.mxu0 %v2638_v26  ;;  %2425 = vmatprep.mubr.bf16.mxu1 %v2641_v30 }
  0x83   : > { %2443 = vmatpush3.bf16.msra.mxu1 %v2638_v26  ;;  %2419 = vmatprep.subr.bf16.mxu0 %v2639_v31 }
  0x84   : > { %2436 = vmatprep.subr.bf16.mxu1 %v2639_v31 }
  0x86   : > { %2420 = vmatpush3.bf16.msra.mxu0 %v2639_v31 }
  0x87   : > { %2444 = vmatpush3.bf16.msra.mxu1 %v2639_v31 }
  0x89   : > { %2422 = vmatmul.mubr.bf16.vlgmr.msra.gmra.mrb[48].mxu0 %v2642_v32 }
  0x8a   : > { %2426 = vmatmul.mubr.bf16.vlgmr.msra.gmra.mrb[48].mxu1 %v2643_v33 }
  0xfb   : > { %v2169_v34 = vpop.f32.mrb[0].mxu0 }
  0xfc   : > { %v2209_v35 = vpop.f32.mrb[0].mxu1  ;;  %v2170_v37 = vpop.f32.mrb[1].mxu0 }
  0xfd   : > { %v2171_v38 = vadd.f32 %v2170_v37, %v2169_v34  ;;  %v2210_v39 = vpop.f32.mrb[1].mxu1  ;;  %v2172_v40 = vpop.f32.mrb[2].mxu0 }
  0xfe   : > { %v2211_v41 = vadd.f32 %v2210_v39, %v2209_v35  ;;  %v2212_v42 = vpop.f32.mrb[2].mxu1  ;;  %v2173_v43 = vpop.f32.mrb[3].mxu0 }
  0xff   : > { %v1396_v44 = vadd.f32 %v2171_v38, %v1963_v36  ;;  %v2174_v45 = vadd.f32 %v2173_v43, %v2172_v40  ;;  %v2213_v46 = vpop.f32.mrb[3].mxu1 }
 0x100   : > { %v2214_v47 = vadd.f32 %v2213_v46, %v2212_v42 }
 0x101   : > { %v1460_v48 = vadd.f32 %v2211_v41, %v1396_v44  ;;  %v1399_v49 = vadd.f32 %v2174_v45, %v1963_v36 }
 0x103   : > { %v1463_v50 = vadd.f32 %v2214_v47, %v1399_v49  ;;  %v2175_v51 = vpop.f32.mrb[4].mxu0 }
 0x104   : > { %v2215_v52 = vpop.f32.mrb[4].mxu1  ;;  %v2176_v53 = vpop.f32.mrb[5].mxu0 }
 0x105   : > { %v2177_v54 = vadd.f32 %v2176_v53, %v2175_v51  ;;  %v2216_v55 = vpop.f32.mrb[5].mxu1  ;;  %v2178_v56 = vpop.f32.mrb[6].mxu0 }
 0x106   : > { %v2217_v57 = vadd.f32 %v2216_v55, %v2215_v52  ;;  %v2218_v58 = vpop.f32.mrb[6].mxu1  ;;  %v2179_v59 = vpop.f32.mrb[7].mxu0 }
 0x107   : > { %v1404_v60 = vadd.f32 %v2177_v54, %v1963_v36  ;;  %v2180_v61 = vadd.f32 %v2179_v59, %v2178_v56  ;;  %v2219_v62 = vpop.f32.mrb[7].mxu1 }
 0x108   : > { %v2220_v63 = vadd.f32 %v2219_v62, %v2218_v58 }
 0x109   : > { %v1468_v0 = vadd.f32 %v2217_v57, %v1404_v60  ;;  %v1407_v1 = vadd.f32 %v2180_v61, %v1963_v36 }
 0x10b   : > { %v1471_v2 = vadd.f32 %v2220_v63, %v1407_v1  ;;  %v2181_v3 = vpop.f32.mrb[8].mxu0 }
 0x10c   : > { %v2221_v4 = vpop.f32.mrb[8].mxu1  ;;  %v2182_v5 = vpop.f32.mrb[9].mxu0 }
 0x10d   : > { %v2183_v6 = vadd.f32 %v2182_v5, %v2181_v3  ;;  %v2222_v7 = vpop.f32.mrb[9].mxu1  ;;  %v2184_v8 = vpop.f32.mrb[10].mxu0 }
 0x10e   : > { %v2223_v9 = vadd.f32 %v2222_v7, %v2221_v4  ;;  %v2224_v10 = vpop.f32.mrb[10].mxu1  ;;  %v2185_v11 = vpop.f32.mrb[11].mxu0 }
 0x10f   : > { %v1412_v12 = vadd.f32 %v2183_v6, %v1963_v36  ;;  %v2186_v13 = vadd.f32 %v2185_v11, %v2184_v8  ;;  %v2225_v14 = vpop.f32.mrb[11].mxu1 }
 0x110   : > { %v2226_v15 = vadd.f32 %v2225_v14, %v2224_v10 }
 0x111   : > { %v1476_v16 = vadd.f32 %v2223_v9, %v1412_v12  ;;  %v1415_v17 = vadd.f32 %v2186_v13, %v1963_v36 }
 0x113   : > { %v1479_v18 = vadd.f32 %v2226_v15, %v1415_v17  ;;  %v2187_v19 = vpop.f32.mrb[12].mxu0 }
 0x114   : > { %v2227_v20 = vpop.f32.mrb[12].mxu1  ;;  %v2188_v21 = vpop.f32.mrb[13].mxu0 }
 0x115   : > { %v2228_v22 = vpop.f32.mrb[13].mxu1  ;;  %v2189_v23 = vadd.f32 %v2188_v21, %v2187_v19  ;;  %v2190_v25 = vpop.f32.mrb[14].mxu0 }
 0x116   : > { %v2229_v24 = vadd.f32 %v2228_v22, %v2227_v20  ;;  %v2230_v26 = vpop.f32.mrb[14].mxu1  ;;  %v2191_v27 = vpop.f32.mrb[15].mxu0 }
 0x117   : > { %v2231_v28 = vpop.f32.mrb[15].mxu1  ;;  %v1420_v29 = vadd.f32 %v2189_v23, %v1963_v36 }
 0x119   : > { %v1484_v30 = vadd.f32 %v2229_v24, %v1420_v29 }
 0x11b   : > { %v2249_v31 = vpop.f32.mrb[16].mxu0 }
 0x11c   : > { %v2289_v32 = vpop.f32.mrb[16].mxu1  ;;  %v2250_v33 = vpop.f32.mrb[17].mxu0 }
 0x11d   : > { %v2251_v34 = vadd.f32 %v2250_v33, %v2249_v31  ;;  %v2290_v35 = vpop.f32.mrb[17].mxu1  ;;  %v2252_v37 = vpop.f32.mrb[18].mxu0 }
 0x11e   : > { %v2291_v38 = vadd.f32 %v2290_v35, %v2289_v32  ;;  %v2292_v39 = vpop.f32.mrb[18].mxu1  ;;  %v2253_v40 = vpop.f32.mrb[19].mxu0 }
 0x11f   : > { %v1524_v41 = vadd.f32 %v2251_v34, %v1460_v48  ;;  %v2254_v42 = vadd.f32 %v2253_v40, %v2252_v37  ;;  %v2293_v43 = vpop.f32.mrb[19].mxu1 }
 0x120   : > { %v2294_v44 = vadd.f32 %v2293_v43, %v2292_v39 }
 0x121   : > { %v1588_v45 = vadd.f32 %v2291_v38, %v1524_v41  ;;  %v1527_v46 = vadd.f32 %v2254_v42, %v1463_v50 }
 0x123   : > { %v1591_v47 = vadd.f32 %v2294_v44, %v1527_v46  ;;  %v2255_v49 = vpop.f32.mrb[20].mxu0 }
 0x124   : > { %v2295_v51 = vpop.f32.mrb[20].mxu1  ;;  %v2256_v36 = vpop.f32.mrb[21].mxu0 }
 0x125   : > { %v2257_v52 = vadd.f32 %v2256_v36, %v2255_v49  ;;  %v2296_v53 = vpop.f32.mrb[21].mxu1  ;;  %v2258_v54 = vpop.f32.mrb[22].mxu0 }
 0x126   : > { %v2297_v55 = vadd.f32 %v2296_v53, %v2295_v51  ;;  %v2298_v56 = vpop.f32.mrb[22].mxu1  ;;  %v2259_v57 = vpop.f32.mrb[23].mxu0 }
 0x127   : > { %v1532_v58 = vadd.f32 %v2257_v52, %v1468_v0  ;;  %v2260_v59 = vadd.f32 %v2259_v57, %v2258_v54  ;;  %v2299_v60 = vpop.f32.mrb[23].mxu1 }
 0x128   : > { %v2300_v61 = vadd.f32 %v2299_v60, %v2298_v56 }
 0x129   : > { %v1596_v48 = vadd.f32 %v2297_v55, %v1532_v58  ;;  %v1535_v62 = vadd.f32 %v2260_v59, %v1471_v2 }
 0x12b   : > { %v1599_v63 = vadd.f32 %v2300_v61, %v1535_v62  ;;  %v2261_v1 = vpop.f32.mrb[24].mxu0 }
 0x12c   : > { %v2301_v3 = vpop.f32.mrb[24].mxu1  ;;  %v2262_v50 = vpop.f32.mrb[25].mxu0 }
 0x12d   : > { %v2302_v4 = vpop.f32.mrb[25].mxu1  ;;  %v2263_v5 = vadd.f32 %v2262_v50, %v2261_v1  ;;  %v2264_v7 = vpop.f32.mrb[26].mxu0 }
 0x12e   : > { %v2303_v6 = vadd.f32 %v2302_v4, %v2301_v3  ;;  %v2304_v8 = vpop.f32.mrb[26].mxu1  ;;  %v2265_v9 = vpop.f32.mrb[27].mxu0 }
 0x12f   : > { %v2305_v10 = vpop.f32.mrb[27].mxu1  ;;  %v1540_v11 = vadd.f32 %v2263_v5, %v1476_v16  ;;  %v2266_v12 = vadd.f32 %v2265_v9, %v2264_v7 }
 0x130   : > { %v2306_v13 = vadd.f32 %v2305_v10, %v2304_v8 }
 0x131   : > { %v1604_v0 = vadd.f32 %v2303_v6, %v1540_v11  ;;  %v1543_v14 = vadd.f32 %v2266_v12, %v1479_v18 }
 0x133   : > { %v1607_v15 = vadd.f32 %v2306_v13, %v1543_v14  ;;  %v2267_v17 = vpop.f32.mrb[28].mxu0 }
 0x134   : > { %v2307_v19 = vpop.f32.mrb[28].mxu1  ;;  %v2268_v2 = vpop.f32.mrb[29].mxu0 }
 0x135   : > { %v2269_v20 = vadd.f32 %v2268_v2, %v2267_v17  ;;  %v2308_v21 = vpop.f32.mrb[29].mxu1  ;;  %v2270_v22 = vpop.f32.mrb[30].mxu0 }
 0x136   : > { %v2309_v23 = vadd.f32 %v2308_v21, %v2307_v19  ;;  %v2310_v24 = vpop.f32.mrb[30].mxu1  ;;  %v2271_v25 = vpop.f32.mrb[31].mxu0 }
 0x137   : > { %v1548_v26 = vadd.f32 %v2269_v20, %v1484_v30  ;;  %v2311_v27 = vpop.f32.mrb[31].mxu1 }
 0x139   : > { %v1612_v28 = vadd.f32 %v2309_v23, %v1548_v26 }
 0x13b   : > { %v2329_v29 = vpop.f32.mrb[32].mxu0 }
 0x13c   : > { %v2369_v31 = vpop.f32.mrb[32].mxu1  ;;  %v2330_v16 = vpop.f32.mrb[33].mxu0 }
 0x13d   : > { %v2331_v32 = vadd.f32 %v2330_v16, %v2329_v29  ;;  %v2370_v33 = vpop.f32.mrb[33].mxu1  ;;  %v2332_v34 = vpop.f32.mrb[34].mxu0 }
 0x13e   : > { %v2371_v18 = vadd.f32 %v2370_v33, %v2369_v31  ;;  %v2372_v35 = vpop.f32.mrb[34].mxu1  ;;  %v2333_v37 = vpop.f32.mrb[35].mxu0 }
 0x13f   : > { %v1652_v38 = vadd.f32 %v2331_v32, %v1588_v45  ;;  %v2334_v39 = vadd.f32 %v2333_v37, %v2332_v34  ;;  %v2373_v40 = vpop.f32.mrb[35].mxu1 }
 0x140   : > { %v2374_v41 = vadd.f32 %v2373_v40, %v2372_v35 }
 0x141   : > { %v1655_v42 = vadd.f32 %v2334_v39, %v1591_v47  ;;  %v1716_v43 = vadd.f32 %v2371_v18, %v1652_v38 }
 0x143   : > { %v2335_v44 = vpop.f32.mrb[36].mxu0  ;;  %v1719_v46 = vadd.f32 %v2374_v41, %v1655_v42 }
 0x144   : > { %v2375_v30 = vpop.f32.mrb[36].mxu1  ;;  %v2336_v49 = vpop.f32.mrb[37].mxu0 }
 0x145   : > { %v2337_v51 = vadd.f32 %v2336_v49, %v2335_v44  ;;  %v2376_v36 = vpop.f32.mrb[37].mxu1  ;;  %v2338_v52 = vpop.f32.mrb[38].mxu0 }
 0x146   : > { %v2377_v53 = vadd.f32 %v2376_v36, %v2375_v30  ;;  %v2378_v54 = vpop.f32.mrb[38].mxu1  ;;  %v2339_v55 = vpop.f32.mrb[39].mxu0 }
 0x147   : > { %v1660_v56 = vadd.f32 %v2337_v51, %v1596_v48  ;;  %v2340_v57 = vadd.f32 %v2339_v55, %v2338_v52  ;;  %v2379_v58 = vpop.f32.mrb[39].mxu1 }
 0x148   : > { %v2380_v59 = vadd.f32 %v2379_v58, %v2378_v54 }
 0x149   : > { %v1663_v45 = vadd.f32 %v2340_v57, %v1599_v63  ;;  %v1724_v60 = vadd.f32 %v2377_v53, %v1660_v56 }
 0x14b   : > { %v2341_v61 = vpop.f32.mrb[40].mxu0  ;;  %v1727_v62 = vadd.f32 %v2380_v59, %v1663_v45 }
 0x14c   : > { %v2381_v47 = vpop.f32.mrb[40].mxu1  ;;  %v2342_v1 = vpop.f32.mrb[41].mxu0 }
 0x14d   : > { %v2343_v3 = vadd.f32 %v2342_v1, %v2341_v61  ;;  %v2382_v50 = vpop.f32.mrb[41].mxu1  ;;  %v2344_v4 = vpop.f32.mrb[42].mxu0 }
 0x14e   : > { %v2383_v5 = vadd.f32 %v2382_v50, %v2381_v47  ;;  %v2384_v6 = vpop.f32.mrb[42].mxu1  ;;  %v2345_v7 = vpop.f32.mrb[43].mxu0 }
 0x14f   : > { %v1668_v8 = vadd.f32 %v2343_v3, %v1604_v0  ;;  %v2346_v9 = vadd.f32 %v2345_v7, %v2344_v4  ;;  %v2385_v10 = vpop.f32.mrb[43].mxu1 }
 0x150   : > { %v2386_v11 = vadd.f32 %v2385_v10, %v2384_v6 }
 0x151   : > { %v1671_v48 = vadd.f32 %v2346_v9, %v1607_v15  ;;  %v1732_v12 = vadd.f32 %v2383_v5, %v1668_v8 }
 0x153   : > { %v2347_v13 = vpop.f32.mrb[44].mxu0  ;;  %v1735_v14 = vadd.f32 %v2386_v11, %v1671_v48 }
 0x154   : > { %v2387_v63 = vpop.f32.mrb[44].mxu1  ;;  %v2348_v17 = vpop.f32.mrb[45].mxu0 }
 0x155   : > { %v2349_v19 = vadd.f32 %v2348_v17, %v2347_v13  ;;  %v2388_v2 = vpop.f32.mrb[45].mxu1  ;;  %v2350_v20 = vpop.f32.mrb[46].mxu0 }
 0x156   : > { %v2389_v21 = vadd.f32 %v2388_v2, %v2387_v63  ;;  %v2390_v22 = vpop.f32.mrb[46].mxu1  ;;  %v2351_v23 = vpop.f32.mrb[47].mxu0 }
 0x157   : > { %v1676_v24 = vadd.f32 %v2349_v19, %v1612_v28  ;;  %v2391_v25 = vpop.f32.mrb[47].mxu1 }
 0x159   : > { %v1740_v26 = vadd.f32 %v2389_v21, %v1676_v24 }
 0x15c   : > { %v2423_v0 = vpop.f32.mrb[48].mxu0 }
 0x15d   : > { %v1788_v27 = vadd.f32 %v2423_v0, %v1724_v60  ;;  %v2427_v29 = vpop.f32.mrb[48].mxu1  ;;  %v1779_v31 = vpop.f32.mrb[49].mxu0 }
 0x15e   : > { %v1804_v15 = vadd.f32 %v2427_v29, %v1740_v26  ;;  %v1780_v16 = vadd.f32 %v1779_v31, %v1716_v43  ;;  %v1795_v32 = vpop.f32.mrb[49].mxu1  ;;  %v2424_v33 = vpop.f32.mrb[50].mxu0 }
 0x15f   : > { %v1796_v34 = vadd.f32 %v1795_v32, %v1732_v12  ;;  %v1791_v18 = vadd.f32 %v2424_v33, %v1727_v62  ;;  %v2428_v35 = vpop.f32.mrb[50].mxu1  ;;  %v1782_v37 = vpop.f32.mrb[51].mxu0  ;;  %v1811_v41 = vmax.f32 %v1788_v27, 0.0 }
 0x160   : > { %v1815_v38 = vmax.f32 %v1804_v15, 0.0  ;;  %v1783_v39 = vadd.f32 %v1782_v37, %v1719_v46  ;;  %v1798_v40 = vpop.f32.mrb[51].mxu1  ;;  %v1809_v30 = vmax.f32 %v1780_v16, 0.0 }
 0x161   : > { %v1812_v28 = vmax.f32 %v1791_v18, 0.0  ;;  %v1799_v42 = vadd.f32 %v1798_v40, %v1735_v14  ;;  %v1813_v43 = vmax.f32 %v1796_v34, 0.0 }
 0x162   : > { %v2135_v44 = vpack.c.bf16 %v1815_v38, %v1815_v38  ;;  %v1810_v49 = vmax.f32 %v1783_v39, 0.0 }
 0x163   : > { %v2144_v51 = vpack.c.bf16 %v1812_v28, %v1811_v41  ;;  %v1814_v36 = vmax.f32 %v1799_v42, 0.0 }
 0x164   : > { %1851 = vst [vmem:[%s226_s4 + $0x18] sm:$0xf] %v2135_v44  ;;  %v2139_v52 = vpack.c.bf16 %v1810_v49, %v1809_v30 }
 0x165   : > { %2151 = vst [vmem:[%s226_s4 + $0x8] sm:$0xff] %v2144_v51   ;;  %v2149_v53 = vpack.c.bf16 %v1814_v36, %v1813_v43 }
 0x166   : > { %2140 = vst [vmem:[%s226_s4] sm:$0xff] %v2139_v52  }
 0x167   : > { %2152 = vst [vmem:[%s226_s4 + $0x10] sm:$0xff] %v2149_v53  }
 0x168 PF: > { %s13_s14 = sadd.s32 1, %s2666_s14   ;;  %s3095_s12 = smov %s2662_s13 }
 0x169   : > { %p10_p5 = scmp.ge.s32.totalorder %s13_s14, 4   ;;  %s3096_s13 = smov %s3098_s15 }
 0x16b   :  { %12 = sbr.rel (!%p10_p5) target bundleno = 2 (0x2), region = 68 }

// kernel: convfc_forward.7
= control target key start
LH: loop header
LB: loop body
LE: loop exit
PB: predicated region body
PF: predicated region fallthrough
CT: control target
= control target key end

     0   :  { %s14067_s1 = inlined_call_operand.vmem [shape: bf16[1152,1024], index: 1, kind: input, shape index: {}]   ;;  %s14068_s0 = inlined_call_operand.vmem [shape: bf16[8,1152], index: 0, kind: input, shape index: {}]   ;;  %s14069_s2 = inlined_call_operand.vmem [shape: f32[1,1024], index: 2, kind: input, shape index: {}]   ;;  %s14070_s3 = inlined_call_operand.vmem [shape: bf16[1024,1024], index: 3, kind: input, shape index: {}]   ;;  %s14071_s5 = inlined_call_operand.vmem [shape: bf16[1024,128], index: 5, kind: input, shape index: {}]   ;;  %s14072_s4 = inlined_call_operand.vmem [shape: f32[1,1024], index: 4, kind: input, shape index: {}]   ;;  %s14073_s6 = inlined_call_operand.vmem [shape: f32[1,128], index: 6, kind: input, shape index: {}]   ;;  %s14074_s7 = inlined_call_operand.vmem [shape: f32[8,128], index: 7, kind: output, shape index: {}]  }
   0x1   :  { %v32_v0 = vld [vmem:[%s14067_s1] sm:$0xff]  ;;  %v33_v2 = vld [vmem:[%s14067_s1 + $0x8] sm:$0xff] }
   0x2   :  { %v36_v1 = vld [vmem:[%s14067_s1 + $0x20] sm:$0xff]  ;;  %v37_v4 = vld [vmem:[%s14067_s1 + $0x28] sm:$0xff] }
   0x3   :  { %v8878_v3 = vcombine.high %v32_v0, %v36_v1  ;;  %v8877_v5 = vcombine.low %v32_v0, %v36_v1  ;;  %v40_v6 = vld [vmem:[%s14067_s1 + $0x40] sm:$0xff]  ;;  %v8880_v8 = vcombine.high %v33_v2, %v37_v4  ;;  %v8879_v9 = vcombine.low %v33_v2, %v37_v4  ;;  %v41_v11 = vld [vmem:[%s14067_s1 + $0x48] sm:$0xff] }
   0x4   :  { %v44_v7 = vld [vmem:[%s14067_s1 + $0x60] sm:$0xff]  ;;  %v45_v12 = vld [vmem:[%s14067_s1 + $0x68] sm:$0xff] }
   0x5   :  { %v8886_v10 = vcombine.high %v40_v6, %v44_v7  ;;  %v48_v13 = vld [vmem:[%s14067_s1 + $0x80] sm:$0xff]  ;;  %3562 = vmatprep.subr.bf16.mxu0 %v8878_v3  ;;  %v8888_v14 = vcombine.high %v41_v11, %v45_v12  ;;  %v49_v16 = vld [vmem:[%s14067_s1 + $0x88] sm:$0xff]  ;;  %3767 = vmatprep.subr.bf16.mxu1 %v8880_v8  ;;  %v8885_v18 = vcombine.low %v40_v6, %v44_v7 }
   0x6   :  { %v52_v15 = vld [vmem:[%s14067_s1 + $0xa0] sm:$0xff]  ;;  %v53_v17 = vld [vmem:[%s14067_s1 + $0xa8] sm:$0xff]  ;;  %3563 = vmatpush1.bf16.msra.mxu0 %v8877_v5  ;;  %3768 = vmatpush1.bf16.msra.mxu1 %v8879_v9  ;;  %v8887_v19 = vcombine.low %v41_v11, %v45_v12 }
   0x7   :  { %3564 = vmatprep.subr.bf16.mxu0 %v8886_v10  ;;  %v8894_v20 = vcombine.high %v48_v13, %v52_v15  ;;  %3769 = vmatprep.subr.bf16.mxu1 %v8888_v14  ;;  %v8896_v21 = vcombine.high %v49_v16, %v53_v17  ;;  %v56_v22 = vld [vmem:[%s14067_s1 + $0xc0] sm:$0xff]  ;;  %v57_v24 = vld [vmem:[%s14067_s1 + $0xc8] sm:$0xff]  ;;  %v8893_v26 = vcombine.low %v48_v13, %v52_v15 }
   0x8   :  { %v60_v23 = vld [vmem:[%s14067_s1 + $0xe0] sm:$0xff]  ;;  %v61_v25 = vld [vmem:[%s14067_s1 + $0xe8] sm:$0xff]  ;;  %v8895_v27 = vcombine.low %v49_v16, %v53_v17 }
   0x9   :  { %v8902_v28 = vcombine.high %v56_v22, %v60_v23  ;;  %v8904_v29 = vcombine.high %v57_v24, %v61_v25  ;;  %v64_v30 = vld [vmem:[%s14067_s1 + $0x100] sm:$0xff]  ;;  %v65_v32 = vld [vmem:[%s14067_s1 + $0x108] sm:$0xff]  ;;  %v8901_v34 = vcombine.low %v56_v22, %v60_v23  ;;  %v8903_v35 = vcombine.low %v57_v24, %v61_v25 }
   0xa   :  { %3565 = vmatpush1.bf16.msra.mxu0 %v8885_v18  ;;  %3770 = vmatpush1.bf16.msra.mxu1 %v8887_v19  ;;  %v68_v31 = vld [vmem:[%s14067_s1 + $0x120] sm:$0xff]  ;;  %v69_v33 = vld [vmem:[%s14067_s1 + $0x128] sm:$0xff] }
   0xb   :  { %3566 = vmatprep.subr.bf16.mxu0 %v8894_v20  ;;  %3771 = vmatprep.subr.bf16.mxu1 %v8896_v21  ;;  %v8910_v36 = vcombine.high %v64_v30, %v68_v31  ;;  %v8912_v37 = vcombine.high %v65_v32, %v69_v33  ;;  %v72_v38 = vld [vmem:[%s14067_s1 + $0x140] sm:$0xff]  ;;  %v73_v40 = vld [vmem:[%s14067_s1 + $0x148] sm:$0xff]  ;;  %v8909_v42 = vcombine.low %v64_v30, %v68_v31 }
   0xc   :  { %v76_v39 = vld [vmem:[%s14067_s1 + $0x160] sm:$0xff]  ;;  %v77_v41 = vld [vmem:[%s14067_s1 + $0x168] sm:$0xff]  ;;  %v8911_v43 = vcombine.low %v65_v32, %v69_v33 }
   0xd   :  { %v8918_v44 = vcombine.high %v72_v38, %v76_v39  ;;  %v8920_v45 = vcombine.high %v73_v40, %v77_v41  ;;  %v80_v46 = vld [vmem:[%s14067_s1 + $0x180] sm:$0xff]  ;;  %v81_v48 = vld [vmem:[%s14067_s1 + $0x188] sm:$0xff]  ;;  %v8917_v50 = vcombine.low %v72_v38, %v76_v39  ;;  %v8919_v51 = vcombine.low %v73_v40, %v77_v41 }
   0xe   :  { %3567 = vmatpush1.bf16.msra.mxu0 %v8893_v26  ;;  %3772 = vmatpush1.bf16.msra.mxu1 %v8895_v27  ;;  %v84_v47 = vld [vmem:[%s14067_s1 + $0x1a0] sm:$0xff]  ;;  %v85_v49 = vld [vmem:[%s14067_s1 + $0x1a8] sm:$0xff] }
   0xf   :  { %3568 = vmatprep.subr.bf16.mxu0 %v8902_v28  ;;  %3773 = vmatprep.subr.bf16.mxu1 %v8904_v29  ;;  %v8926_v52 = vcombine.high %v80_v46, %v84_v47  ;;  %v10450_v53 = vld [vmem:[%s14068_s0] sm:$0xff]  ;;  %v8928_v54 = vcombine.high %v81_v48, %v85_v49  ;;  %v89_v58 = vld [vmem:[%s14067_s1 + $0x1c8] sm:$0xff]  ;;  %v8925_v60 = vcombine.low %v80_v46, %v84_v47 }
  0x10   :  { %v88_v55 = vld [vmem:[%s14067_s1 + $0x1c0] sm:$0xff]  ;;  %v10460_v57 = vcombine.high %v10450_v53, %v10450_v53  ;;  %v93_v59 = vld [vmem:[%s14067_s1 + $0x1e8] sm:$0xff]  ;;  %v8927_v61 = vcombine.low %v81_v48, %v85_v49 }
  0x11   :  { %v92_v56 = vld [vmem:[%s14067_s1 + $0x1e0] sm:$0xff]  ;;  %v8936_v63 = vcombine.high %v89_v58, %v93_v59  ;;  %v97_v2 = vld [vmem:[%s14067_s1 + $0x208] sm:$0xff]  ;;  %v8935_v5 = vcombine.low %v89_v58, %v93_v59 }
  0x12   :  { %3569 = vmatpush1.bf16.msra.mxu0 %v8901_v34  ;;  %3774 = vmatpush1.bf16.msra.mxu1 %v8903_v35  ;;  %v8934_v62 = vcombine.high %v88_v55, %v92_v56  ;;  %v96_v0 = vld [vmem:[%s14067_s1 + $0x200] sm:$0xff]  ;;  %v101_v3 = vld [vmem:[%s14067_s1 + $0x228] sm:$0xff]  ;;  %v8933_v4 = vcombine.low %v88_v55, %v92_v56 }
  0x13   :  { %3570 = vmatprep.subr.bf16.mxu0 %v8910_v36  ;;  %3775 = vmatprep.subr.bf16.mxu1 %v8912_v37  ;;  %v100_v1 = vld [vmem:[%s14067_s1 + $0x220] sm:$0xff]  ;;  %v8944_v7 = vcombine.high %v97_v2, %v101_v3  ;;  %v105_v10 = vld [vmem:[%s14067_s1 + $0x248] sm:$0xff]  ;;  %v8943_v13 = vcombine.low %v97_v2, %v101_v3 }
  0x14   :  { %3594 = vmatprep.mubr.bf16.mxu0 %v10460_v57  ;;  %3799 = vmatprep.mubr.bf16.mxu1 %v10460_v57  ;;  %v8942_v6 = vcombine.high %v96_v0, %v100_v1  ;;  %v104_v8 = vld [vmem:[%s14067_s1 + $0x240] sm:$0xff]  ;;  %v109_v11 = vld [vmem:[%s14067_s1 + $0x268] sm:$0xff]  ;;  %v8941_v12 = vcombine.low %v96_v0, %v100_v1 }
  0x15   :  { %v108_v9 = vld [vmem:[%s14067_s1 + $0x260] sm:$0xff]  ;;  %v8952_v15 = vcombine.high %v105_v10, %v109_v11  ;;  %v113_v18 = vld [vmem:[%s14067_s1 + $0x288] sm:$0xff]  ;;  %v8951_v21 = vcombine.low %v105_v10, %v109_v11 }
  0x16   :  { %3571 = vmatpush1.bf16.msra.mxu0 %v8909_v42  ;;  %3776 = vmatpush1.bf16.msra.mxu1 %v8911_v43  ;;  %v8950_v14 = vcombine.high %v104_v8, %v108_v9  ;;  %v112_v16 = vld [vmem:[%s14067_s1 + $0x280] sm:$0xff]  ;;  %v117_v19 = vld [vmem:[%s14067_s1 + $0x2a8] sm:$0xff]  ;;  %v8949_v20 = vcombine.low %v104_v8, %v108_v9 }
  0x17   :  { %3572 = vmatprep.subr.bf16.mxu0 %v8918_v44  ;;  %3777 = vmatprep.subr.bf16.mxu1 %v8920_v45  ;;  %v116_v17 = vld [vmem:[%s14067_s1 + $0x2a0] sm:$0xff]  ;;  %v8960_v23 = vcombine.high %v113_v18, %v117_v19  ;;  %v121_v26 = vld [vmem:[%s14067_s1 + $0x2c8] sm:$0xff]  ;;  %v8959_v29 = vcombine.low %v113_v18, %v117_v19 }
  0x18   :  { %v8958_v22 = vcombine.high %v112_v16, %v116_v17  ;;  %v120_v24 = vld [vmem:[%s14067_s1 + $0x2c0] sm:$0xff]  ;;  %v125_v27 = vld [vmem:[%s14067_s1 + $0x2e8] sm:$0xff]  ;;  %v8957_v28 = vcombine.low %v112_v16, %v116_v17 }
  0x19   :  { %v124_v25 = vld [vmem:[%s14067_s1 + $0x2e0] sm:$0xff]  ;;  %v8968_v31 = vcombine.high %v121_v26, %v125_v27  ;;  %v129_v34 = vld [vmem:[%s14067_s1 + $0x308] sm:$0xff]  ;;  %v8967_v37 = vcombine.low %v121_v26, %v125_v27 }
  0x1a   :  { %3573 = vmatpush1.bf16.msra.mxu0 %v8917_v50  ;;  %3778 = vmatpush1.bf16.msra.mxu1 %v8919_v51  ;;  %v8966_v30 = vcombine.high %v120_v24, %v124_v25  ;;  %v128_v32 = vld [vmem:[%s14067_s1 + $0x300] sm:$0xff]  ;;  %v133_v35 = vld [vmem:[%s14067_s1 + $0x328] sm:$0xff]  ;;  %v8965_v36 = vcombine.low %v120_v24, %v124_v25 }
  0x1b   :  { %3574 = vmatprep.subr.bf16.mxu0 %v8926_v52  ;;  %3779 = vmatprep.subr.bf16.mxu1 %v8928_v54  ;;  %v132_v33 = vld [vmem:[%s14067_s1 + $0x320] sm:$0xff]  ;;  %v8976_v39 = vcombine.high %v129_v34, %v133_v35  ;;  %v137_v42 = vld [vmem:[%s14067_s1 + $0x348] sm:$0xff]  ;;  %v8975_v45 = vcombine.low %v129_v34, %v133_v35 }
  0x1c   :  { %v8974_v38 = vcombine.high %v128_v32, %v132_v33  ;;  %v136_v40 = vld [vmem:[%s14067_s1 + $0x340] sm:$0xff]  ;;  %v141_v43 = vld [vmem:[%s14067_s1 + $0x368] sm:$0xff]  ;;  %v8973_v44 = vcombine.low %v128_v32, %v132_v33 }
  0x1d   :  { %v140_v41 = vld [vmem:[%s14067_s1 + $0x360] sm:$0xff]  ;;  %v8984_v47 = vcombine.high %v137_v42, %v141_v43  ;;  %v145_v50 = vld [vmem:[%s14067_s1 + $0x388] sm:$0xff]  ;;  %v8983_v54 = vcombine.low %v137_v42, %v141_v43 }
  0x1e   :  { %3575 = vmatpush1.bf16.msra.mxu0 %v8925_v60  ;;  %3780 = vmatpush1.bf16.msra.mxu1 %v8927_v61  ;;  %v8982_v46 = vcombine.high %v136_v40, %v140_v41  ;;  %v144_v48 = vld [vmem:[%s14067_s1 + $0x380] sm:$0xff]  ;;  %v149_v51 = vld [vmem:[%s14067_s1 + $0x3a8] sm:$0xff]  ;;  %v8981_v52 = vcombine.low %v136_v40, %v140_v41 }
  0x1f   :  { %3576 = vmatprep.subr.bf16.mxu0 %v8934_v62  ;;  %3781 = vmatprep.subr.bf16.mxu1 %v8936_v63  ;;  %v148_v49 = vld [vmem:[%s14067_s1 + $0x3a0] sm:$0xff]  ;;  %v8992_v56 = vcombine.high %v145_v50, %v149_v51  ;;  %v153_v60 = vld [vmem:[%s14067_s1 + $0x3c8] sm:$0xff]  ;;  %v8991_v63 = vcombine.low %v145_v50, %v149_v51 }
  0x20   :  { %v8990_v55 = vcombine.high %v144_v48, %v148_v49  ;;  %v152_v58 = vld [vmem:[%s14067_s1 + $0x3c0] sm:$0xff]  ;;  %v157_v61 = vld [vmem:[%s14067_s1 + $0x3e8] sm:$0xff]  ;;  %v8989_v62 = vcombine.low %v144_v48, %v148_v49 }
  0x21   :  { %v156_v59 = vld [vmem:[%s14067_s1 + $0x3e0] sm:$0xff]  ;;  %v9000_v1 = vcombine.high %v153_v60, %v157_v61 }
  0x22   :  { %3577 = vmatpush1.bf16.msra.mxu0 %v8933_v4  ;;  %3782 = vmatpush1.bf16.msra.mxu1 %v8935_v5  ;;  %v8998_v0 = vcombine.high %v152_v58, %v156_v59  ;;  %v160_v2 = vld [vmem:[%s14067_s1 + $0x400] sm:$0xff]  ;;  %v161_v4 = vld [vmem:[%s14067_s1 + $0x408] sm:$0xff] }
  0x23   :  { %3578 = vmatprep.subr.bf16.mxu0 %v8942_v6  ;;  %3783 = vmatprep.subr.bf16.mxu1 %v8944_v7  ;;  %v164_v3 = vld [vmem:[%s14067_s1 + $0x420] sm:$0xff]  ;;  %v165_v5 = vld [vmem:[%s14067_s1 + $0x428] sm:$0xff]  ;;  %v8997_v6 = vcombine.low %v152_v58, %v156_v59  ;;  %v8999_v7 = vcombine.low %v153_v60, %v157_v61 }
  0x24   :  { %v9006_v8 = vcombine.high %v160_v2, %v164_v3  ;;  %v9008_v9 = vcombine.high %v161_v4, %v165_v5  ;;  %v168_v10 = vld [vmem:[%s14067_s1 + $0x440] sm:$0xff]  ;;  %v9005_v16 = vcombine.low %v160_v2, %v164_v3  ;;  %v9007_v17 = vcombine.low %v161_v4, %v165_v5 }
  0x25   :  { %v172_v11 = vld [vmem:[%s14067_s1 + $0x460] sm:$0xff] }
  0x26   :  { %3579 = vmatpush1.bf16.msra.mxu0 %v8941_v12  ;;  %3784 = vmatpush1.bf16.msra.mxu1 %v8943_v13  ;;  %v10586_v12 = vcombine.low %v10450_v53, %v10450_v53  ;;  %v169_v13 = vld [vmem:[%s14067_s1 + $0x448] sm:$0xff]  ;;  %v9014_v53 = vcombine.high %v168_v10, %v172_v11  ;;  %v176_v19 = vld [vmem:[%s14067_s1 + $0x480] sm:$0xff]  ;;  %v9013_v24 = vcombine.low %v168_v10, %v172_v11 }
  0x27   :  { %3580 = vmatprep.subr.bf16.mxu0 %v8950_v14  ;;  %3785 = vmatprep.subr.bf16.mxu1 %v8952_v15  ;;  %v173_v14 = vld [vmem:[%s14067_s1 + $0x468] sm:$0xff] }
  0x28   :  { %v10597_v15 = vld [vmem:[%s14068_s0 + $0x8] sm:$0xff]  ;;  %v9016_v18 = vcombine.high %v169_v13, %v173_v14  ;;  %v9015_v25 = vcombine.low %v169_v13, %v173_v14 }
  0x2a   :  { %3581 = vmatpush1.bf16.msra.mxu0 %v8949_v20  ;;  %3786 = vmatpush1.bf16.msra.mxu1 %v8951_v21  ;;  %v180_v20 = vld [vmem:[%s14067_s1 + $0x4a0] sm:$0xff]  ;;  %v10607_v21 = vcombine.high %v10597_v15, %v10597_v15 }
  0x2b   :  { %3582 = vmatprep.subr.bf16.mxu0 %v8958_v22  ;;  %3787 = vmatprep.subr.bf16.mxu1 %v8960_v23  ;;  %v177_v22 = vld [vmem:[%s14067_s1 + $0x488] sm:$0xff]  ;;  %v9022_v26 = vcombine.high %v176_v19, %v180_v20  ;;  %v9021_v32 = vcombine.low %v176_v19, %v180_v20 }
  0x2c   :  { %v181_v23 = vld [vmem:[%s14067_s1 + $0x4a8] sm:$0xff] }
  0x2d   :  { %v9024_v27 = vcombine.high %v177_v22, %v181_v23  ;;  %v9023_v33 = vcombine.low %v177_v22, %v181_v23 }
  0x2e   :  { %3583 = vmatpush1.bf16.msra.mxu0 %v8957_v28  ;;  %3788 = vmatpush1.bf16.msra.mxu1 %v8959_v29  ;;  %v184_v28 = vld [vmem:[%s14067_s1 + $0x4c0] sm:$0xff] }
  0x2f   :  { %3584 = vmatprep.subr.bf16.mxu0 %v8966_v30  ;;  %3789 = vmatprep.subr.bf16.mxu1 %v8968_v31  ;;  %v188_v29 = vld [vmem:[%s14067_s1 + $0x4e0] sm:$0xff]  ;;  %v185_v30 = vld [vmem:[%s14067_s1 + $0x4c8] sm:$0xff] }
  0x30   :  { %v189_v31 = vld [vmem:[%s14067_s1 + $0x4e8] sm:$0xff]  ;;  %v9030_v34 = vcombine.high %v184_v28, %v188_v29  ;;  %v9029_v40 = vcombine.low %v184_v28, %v188_v29 }
  0x31   :  { %v9032_v35 = vcombine.high %v185_v30, %v189_v31  ;;  %v9031_v41 = vcombine.low %v185_v30, %v189_v31 }
  0x32   :  { %3585 = vmatpush1.bf16.msra.mxu0 %v8965_v36  ;;  %3790 = vmatpush1.bf16.msra.mxu1 %v8967_v37  ;;  %v192_v36 = vld [vmem:[%s14067_s1 + $0x500] sm:$0xff] }
  0x33   :  { %3586 = vmatprep.subr.bf16.mxu0 %v8974_v38  ;;  %3791 = vmatprep.subr.bf16.mxu1 %v8976_v39  ;;  %v196_v37 = vld [vmem:[%s14067_s1 + $0x520] sm:$0xff]  ;;  %v193_v38 = vld [vmem:[%s14067_s1 + $0x508] sm:$0xff] }
  0x34   :  { %v197_v39 = vld [vmem:[%s14067_s1 + $0x528] sm:$0xff]  ;;  %v9038_v42 = vcombine.high %v192_v36, %v196_v37  ;;  %v9037_v48 = vcombine.low %v192_v36, %v196_v37 }
  0x35   :  { %v9040_v43 = vcombine.high %v193_v38, %v197_v39  ;;  %v9039_v49 = vcombine.low %v193_v38, %v197_v39 }
  0x36   :  { %3587 = vmatpush1.bf16.msra.mxu0 %v8973_v44  ;;  %3792 = vmatpush1.bf16.msra.mxu1 %v8975_v45  ;;  %v200_v44 = vld [vmem:[%s14067_s1 + $0x540] sm:$0xff] }
  0x37   :  { %3588 = vmatprep.subr.bf16.mxu0 %v8982_v46  ;;  %3793 = vmatprep.subr.bf16.mxu1 %v8984_v47  ;;  %v204_v45 = vld [vmem:[%s14067_s1 + $0x560] sm:$0xff]  ;;  %v201_v46 = vld [vmem:[%s14067_s1 + $0x548] sm:$0xff] }
  0x38   :  { %v205_v47 = vld [vmem:[%s14067_s1 + $0x568] sm:$0xff]  ;;  %v9046_v50 = vcombine.high %v200_v44, %v204_v45  ;;  %v9045_v58 = vcombine.low %v200_v44, %v204_v45 }
  0x39   :  { %v9048_v51 = vcombine.high %v201_v46, %v205_v47  ;;  %v9047_v59 = vcombine.low %v201_v46, %v205_v47 }
  0x3a   :  { %3589 = vmatpush1.bf16.msra.mxu0 %v8981_v52  ;;  %3794 = vmatpush1.bf16.msra.mxu1 %v8983_v54  ;;  %v208_v52 = vld [vmem:[%s14067_s1 + $0x580] sm:$0xff] }
  0x3b   :  { %3590 = vmatprep.subr.bf16.mxu0 %v8990_v55  ;;  %3795 = vmatprep.subr.bf16.mxu1 %v8992_v56  ;;  %v212_v54 = vld [vmem:[%s14067_s1 + $0x5a0] sm:$0xff]  ;;  %v209_v55 = vld [vmem:[%s14067_s1 + $0x588] sm:$0xff] }
  0x3c   :  { %v213_v56 = vld [vmem:[%s14067_s1 + $0x5a8] sm:$0xff]  ;;  %v9054_v60 = vcombine.high %v208_v52, %v212_v54  ;;  %v9053_v2 = vcombine.low %v208_v52, %v212_v54 }
  0x3d   :  { %v9056_v61 = vcombine.high %v209_v55, %v213_v56  ;;  %v9055_v3 = vcombine.low %v209_v55, %v213_v56 }
  0x3e   :  { %3591 = vmatpush1.bf16.msra.mxu0 %v8989_v62  ;;  %3796 = vmatpush1.bf16.msra.mxu1 %v8991_v63  ;;  %v216_v62 = vld [vmem:[%s14067_s1 + $0x5c0] sm:$0xff] }
  0x3f   :  { %3592 = vmatprep.subr.bf16.mxu0 %v8998_v0  ;;  %3797 = vmatprep.subr.bf16.mxu1 %v9000_v1  ;;  %v220_v63 = vld [vmem:[%s14067_s1 + $0x5e0] sm:$0xff]  ;;  %v217_v0 = vld [vmem:[%s14067_s1 + $0x5c8] sm:$0xff] }
  0x40   :  { %v221_v1 = vld [vmem:[%s14067_s1 + $0x5e8] sm:$0xff]  ;;  %v9062_v4 = vcombine.high %v216_v62, %v220_v63  ;;  %v9061_v10 = vcombine.low %v216_v62, %v220_v63 }
  0x41   :  { %v9064_v5 = vcombine.high %v217_v0, %v221_v1  ;;  %v9063_v11 = vcombine.low %v217_v0, %v221_v1 }
  0x42   :  { %3593 = vmatpush1.bf16.msra.mxu0 %v8997_v6  ;;  %3798 = vmatpush1.bf16.msra.mxu1 %v8999_v7  ;;  %v224_v6 = vld [vmem:[%s14067_s1 + $0x600] sm:$0xff] }
  0x43   :  { %3603 = vmatprep.subr.bf16.mxu0 %v9006_v8  ;;  %3808 = vmatprep.subr.bf16.mxu1 %v9008_v9  ;;  %v228_v7 = vld [vmem:[%s14067_s1 + $0x620] sm:$0xff]  ;;  %v225_v8 = vld [vmem:[%s14067_s1 + $0x608] sm:$0xff] }
  0x44   :  { %v229_v9 = vld [vmem:[%s14067_s1 + $0x628] sm:$0xff]  ;;  %v9070_v13 = vcombine.high %v224_v6, %v228_v7  ;;  %v9069_v19 = vcombine.low %v224_v6, %v228_v7 }
  0x45   :  { %3595 = vmatmul.mubr.bf16.vlgmr.msra.gmra.mrb[0].mxu0 %v10586_v12  ;;  %3800 = vmatmul.mubr.bf16.vlgmr.msra.gmra.mrb[0].mxu1 %v10586_v12  ;;  %v9072_v14 = vcombine.high %v225_v8, %v229_v9  ;;  %v9071_v20 = vcombine.low %v225_v8, %v229_v9 }
  0x46   :  { %3604 = vmatpush1.bf16.msra.mxu0 %v9005_v16  ;;  %3809 = vmatpush1.bf16.msra.mxu1 %v9007_v17  ;;  %v232_v16 = vld [vmem:[%s14067_s1 + $0x640] sm:$0xff] }
  0x47   :  { %3605 = vmatprep.subr.bf16.mxu0 %v9014_v53  ;;  %3810 = vmatprep.subr.bf16.mxu1 %v9016_v18  ;;  %v236_v17 = vld [vmem:[%s14067_s1 + $0x660] sm:$0xff]  ;;  %v233_v53 = vld [vmem:[%s14067_s1 + $0x648] sm:$0xff] }
  0x48   :  { %3635 = vmatprep.mubr.bf16.mxu0 %v10607_v21  ;;  %3840 = vmatprep.mubr.bf16.mxu1 %v10607_v21  ;;  %v237_v18 = vld [vmem:[%s14067_s1 + $0x668] sm:$0xff]  ;;  %v9078_v22 = vcombine.high %v232_v16, %v236_v17  ;;  %v9077_v28 = vcombine.low %v232_v16, %v236_v17 }
  0x49   :  { %v9080_v23 = vcombine.high %v233_v53, %v237_v18  ;;  %v9079_v29 = vcombine.low %v233_v53, %v237_v18 }
  0x4a   :  { %3606 = vmatpush1.bf16.msra.mxu0 %v9013_v24  ;;  %3811 = vmatpush1.bf16.msra.mxu1 %v9015_v25  ;;  %v240_v24 = vld [vmem:[%s14067_s1 + $0x680] sm:$0xff] }
  0x4b   :  { %3607 = vmatprep.subr.bf16.mxu0 %v9022_v26  ;;  %3812 = vmatprep.subr.bf16.mxu1 %v9024_v27  ;;  %v244_v25 = vld [vmem:[%s14067_s1 + $0x6a0] sm:$0xff]  ;;  %v241_v26 = vld [vmem:[%s14067_s1 + $0x688] sm:$0xff] }
  0x4c   :  { %v245_v27 = vld [vmem:[%s14067_s1 + $0x6a8] sm:$0xff]  ;;  %v9086_v30 = vcombine.high %v240_v24, %v244_v25  ;;  %v9085_v36 = vcombine.low %v240_v24, %v244_v25  ;;  %v10806_v25 = vld [vmem:[%s14068_s0 + $0x10] sm:$0xff] }
  0x4d   :  { %v9088_v31 = vcombine.high %v241_v26, %v245_v27  ;;  %v9087_v37 = vcombine.low %v241_v26, %v245_v27  ;;  %v301_v24 = vld [vmem:[%s14067_s1 + $0x868] sm:$0xff] }
  0x4e   :  { %3608 = vmatpush1.bf16.msra.mxu0 %v9021_v32  ;;  %3813 = vmatpush1.bf16.msra.mxu1 %v9023_v33  ;;  %v248_v32 = vld [vmem:[%s14067_s1 + $0x6c0] sm:$0xff] }
  0x4f   :  { %3609 = vmatprep.subr.bf16.mxu0 %v9030_v34  ;;  %3814 = vmatprep.subr.bf16.mxu1 %v9032_v35  ;;  %v252_v33 = vld [vmem:[%s14067_s1 + $0x6e0] sm:$0xff]  ;;  %v249_v34 = vld [vmem:[%s14067_s1 + $0x6c8] sm:$0xff] }
  0x50   :  { %v253_v35 = vld [vmem:[%s14067_s1 + $0x6e8] sm:$0xff]  ;;  %v9094_v38 = vcombine.high %v248_v32, %v252_v33  ;;  %v9093_v44 = vcombine.low %v248_v32, %v252_v33 }
  0x51   :  { %v9096_v39 = vcombine.high %v249_v34, %v253_v35  ;;  %v9095_v45 = vcombine.low %v249_v34, %v253_v35  ;;  %v305_v32 = vld [vmem:[%s14067_s1 + $0x888] sm:$0xff] }
  0x52   :  { %3610 = vmatpush1.bf16.msra.mxu0 %v9029_v40  ;;  %3815 = vmatpush1.bf16.msra.mxu1 %v9031_v41  ;;  %v256_v40 = vld [vmem:[%s14067_s1 + $0x700] sm:$0xff]  ;;  %v309_v33 = vld [vmem:[%s14067_s1 + $0x8a8] sm:$0xff] }
  0x53   :  { %3611 = vmatprep.subr.bf16.mxu0 %v9038_v42  ;;  %3816 = vmatprep.subr.bf16.mxu1 %v9040_v43  ;;  %v260_v41 = vld [vmem:[%s14067_s1 + $0x720] sm:$0xff]  ;;  %v257_v42 = vld [vmem:[%s14067_s1 + $0x708] sm:$0xff] }
  0x54   :  { %v261_v43 = vld [vmem:[%s14067_s1 + $0x728] sm:$0xff]  ;;  %v9102_v46 = vcombine.high %v256_v40, %v260_v41  ;;  %v9101_v52 = vcombine.low %v256_v40, %v260_v41 }
  0x55   :  { %v9104_v47 = vcombine.high %v257_v42, %v261_v43  ;;  %v9103_v54 = vcombine.low %v257_v42, %v261_v43  ;;  %v313_v40 = vld [vmem:[%s14067_s1 + $0x8c8] sm:$0xff]  ;;  %v9151_v43 = vcombine.low %v305_v32, %v309_v33 }
  0x56   :  { %3612 = vmatpush1.bf16.msra.mxu0 %v9037_v48  ;;  %3817 = vmatpush1.bf16.msra.mxu1 %v9039_v49  ;;  %v264_v48 = vld [vmem:[%s14067_s1 + $0x740] sm:$0xff]  ;;  %v317_v41 = vld [vmem:[%s14067_s1 + $0x8e8] sm:$0xff] }
  0x57   :  { %3613 = vmatprep.subr.bf16.mxu0 %v9046_v50  ;;  %3818 = vmatprep.subr.bf16.mxu1 %v9048_v51  ;;  %v268_v49 = vld [vmem:[%s14067_s1 + $0x760] sm:$0xff]  ;;  %v265_v50 = vld [vmem:[%s14067_s1 + $0x748] sm:$0xff] }
  0x58   :  { %v269_v51 = vld [vmem:[%s14067_s1 + $0x768] sm:$0xff]  ;;  %v9110_v55 = vcombine.high %v264_v48, %v268_v49  ;;  %v9109_v62 = vcombine.low %v264_v48, %v268_v49 }
  0x59   :  { %v9112_v56 = vcombine.high %v265_v50, %v269_v51  ;;  %v9111_v63 = vcombine.low %v265_v50, %v269_v51  ;;  %v321_v48 = vld [vmem:[%s14067_s1 + $0x908] sm:$0xff]  ;;  %v9159_v51 = vcombine.low %v313_v40, %v317_v41 }
  0x5a   :  { %3614 = vmatpush1.bf16.msra.mxu0 %v9045_v58  ;;  %3819 = vmatpush1.bf16.msra.mxu1 %v9047_v59  ;;  %v272_v58 = vld [vmem:[%s14067_s1 + $0x780] sm:$0xff]  ;;  %v325_v49 = vld [vmem:[%s14067_s1 + $0x928] sm:$0xff] }
  0x5b   :  { %3615 = vmatprep.subr.bf16.mxu0 %v9054_v60  ;;  %3820 = vmatprep.subr.bf16.mxu1 %v9056_v61  ;;  %v276_v59 = vld [vmem:[%s14067_s1 + $0x7a0] sm:$0xff]  ;;  %v273_v60 = vld [vmem:[%s14067_s1 + $0x788] sm:$0xff] }
  0x5c   :  { %v277_v61 = vld [vmem:[%s14067_s1 + $0x7a8] sm:$0xff]  ;;  %v9118_v0 = vcombine.high %v272_v58, %v276_v59  ;;  %v9117_v6 = vcombine.low %v272_v58, %v276_v59 }
  0x5d   :  { %v9120_v1 = vcombine.high %v273_v60, %v277_v61  ;;  %v9119_v7 = vcombine.low %v273_v60, %v277_v61  ;;  %v329_v58 = vld [vmem:[%s14067_s1 + $0x948] sm:$0xff]  ;;  %v9167_v61 = vcombine.low %v321_v48, %v325_v49 }
  0x5e   :  { %3616 = vmatpush1.bf16.msra.mxu0 %v9053_v2  ;;  %3821 = vmatpush1.bf16.msra.mxu1 %v9055_v3  ;;  %v280_v2 = vld [vmem:[%s14067_s1 + $0x7c0] sm:$0xff]  ;;  %v333_v59 = vld [vmem:[%s14067_s1 + $0x968] sm:$0xff] }
  0x5f   :  { %3617 = vmatprep.subr.bf16.mxu0 %v9062_v4  ;;  %3822 = vmatprep.subr.bf16.mxu1 %v9064_v5  ;;  %v284_v3 = vld [vmem:[%s14067_s1 + $0x7e0] sm:$0xff]  ;;  %v281_v4 = vld [vmem:[%s14067_s1 + $0x7c8] sm:$0xff] }
  0x60   :  { %v285_v5 = vld [vmem:[%s14067_s1 + $0x7e8] sm:$0xff]  ;;  %v9126_v8 = vcombine.high %v280_v2, %v284_v3  ;;  %v9125_v16 = vcombine.low %v280_v2, %v284_v3 }
  0x61   :  { %v9128_v9 = vcombine.high %v281_v4, %v285_v5  ;;  %v9127_v17 = vcombine.low %v281_v4, %v285_v5  ;;  %v337_v2 = vld [vmem:[%s14067_s1 + $0x988] sm:$0xff]  ;;  %v9175_v5 = vcombine.low %v329_v58, %v333_v59 }
  0x62   :  { %3618 = vmatpush1.bf16.msra.mxu0 %v9061_v10  ;;  %3823 = vmatpush1.bf16.msra.mxu1 %v9063_v11  ;;  %v288_v10 = vld [vmem:[%s14067_s1 + $0x800] sm:$0xff]  ;;  %v341_v3 = vld [vmem:[%s14067_s1 + $0x9a8] sm:$0xff] }
  0x63   :  { %3619 = vmatprep.subr.bf16.mxu0 %v9070_v13  ;;  %3824 = vmatprep.subr.bf16.mxu1 %v9072_v14  ;;  %v292_v11 = vld [vmem:[%s14067_s1 + $0x820] sm:$0xff]  ;;  %v289_v13 = vld [vmem:[%s14067_s1 + $0x808] sm:$0xff] }
  0x64   :  { %v293_v14 = vld [vmem:[%s14067_s1 + $0x828] sm:$0xff]  ;;  %v9134_v53 = vcombine.high %v288_v10, %v292_v11  ;;  %v9133_v26 = vcombine.low %v288_v10, %v292_v11 }
  0x65   :  { %v9136_v18 = vcombine.high %v289_v13, %v293_v14  ;;  %v9135_v27 = vcombine.low %v289_v13, %v293_v14  ;;  %v345_v10 = vld [vmem:[%s14067_s1 + $0x9c8] sm:$0xff]  ;;  %v9183_v14 = vcombine.low %v337_v2, %v341_v3 }
  0x66   :  { %3620 = vmatpush1.bf16.msra.mxu0 %v9069_v19  ;;  %3825 = vmatpush1.bf16.msra.mxu1 %v9071_v20  ;;  %v296_v19 = vld [vmem:[%s14067_s1 + $0x840] sm:$0xff]  ;;  %v349_v11 = vld [vmem:[%s14067_s1 + $0x9e8] sm:$0xff] }
  0x67   :  { %3621 = vmatprep.subr.bf16.mxu0 %v9078_v22  ;;  %3826 = vmatprep.subr.bf16.mxu1 %v9080_v23  ;;  %v300_v20 = vld [vmem:[%s14067_s1 + $0x860] sm:$0xff]  ;;  %v10795_v22 = vcombine.low %v10597_v15, %v10597_v15  ;;  %v297_v23 = vld [vmem:[%s14067_s1 + $0x848] sm:$0xff] }
  0x68   :  { %v9142_v15 = vcombine.high %v296_v19, %v300_v20  ;;  %v9141_v34 = vcombine.low %v296_v19, %v300_v20  ;;  %v9143_v35 = vcombine.low %v297_v23, %v301_v24  ;;  %v353_v19 = vld [vmem:[%s14067_s1 + $0xa08] sm:$0xff] }
  0x69   :  { %v357_v20 = vld [vmem:[%s14067_s1 + $0xa28] sm:$0xff] }
  0x6a   :  { %3622 = vmatpush1.bf16.msra.mxu0 %v9077_v28  ;;  %3827 = vmatpush1.bf16.msra.mxu1 %v9079_v29  ;;  %v9144_v28 = vcombine.high %v297_v23, %v301_v24  ;;  %v304_v29 = vld [vmem:[%s14067_s1 + $0x880] sm:$0xff]  ;;  %v9191_v24 = vcombine.low %v345_v10, %v349_v11 }
  0x6b   :  { %3623 = vmatprep.subr.bf16.mxu0 %v9086_v30  ;;  %3828 = vmatprep.subr.bf16.mxu1 %v9088_v31  ;;  %v308_v30 = vld [vmem:[%s14067_s1 + $0x8a0] sm:$0xff]  ;;  %v10816_v31 = vcombine.high %v10806_v25, %v10806_v25 }
  0x6c   :  { %v9149_v42 = vcombine.low %v304_v29, %v308_v30 }
  0x6e   :  { %3624 = vmatpush1.bf16.msra.mxu0 %v9085_v36  ;;  %3829 = vmatpush1.bf16.msra.mxu1 %v9087_v37  ;;  %v9150_v36 = vcombine.high %v304_v29, %v308_v30  ;;  %v9152_v37 = vcombine.high %v305_v32, %v309_v33  ;;  %v361_v29 = vld [vmem:[%s14067_s1 + $0xa48] sm:$0xff]  ;;  %v9199_v33 = vcombine.low %v353_v19, %v357_v20 }
  0x6f   :  { %3625 = vmatprep.subr.bf16.mxu0 %v9094_v38  ;;  %3830 = vmatprep.subr.bf16.mxu1 %v9096_v39  ;;  %v312_v38 = vld [vmem:[%s14067_s1 + $0x8c0] sm:$0xff]  ;;  %v365_v30 = vld [vmem:[%s14067_s1 + $0xa68] sm:$0xff] }
  0x70   :  { %v316_v39 = vld [vmem:[%s14067_s1 + $0x8e0] sm:$0xff] }
  0x71   :  { %v9157_v50 = vcombine.low %v312_v38, %v316_v39 }
  0x72   :  { %3626 = vmatpush1.bf16.msra.mxu0 %v9093_v44  ;;  %3831 = vmatpush1.bf16.msra.mxu1 %v9095_v45  ;;  %v9158_v44 = vcombine.high %v312_v38, %v316_v39  ;;  %v9160_v45 = vcombine.high %v313_v40, %v317_v41  ;;  %v369_v38 = vld [vmem:[%s14067_s1 + $0xa88] sm:$0xff]  ;;  %v9207_v41 = vcombine.low %v361_v29, %v365_v30 }
  0x73   :  { %3627 = vmatprep.subr.bf16.mxu0 %v9102_v46  ;;  %3832 = vmatprep.subr.bf16.mxu1 %v9104_v47  ;;  %v320_v46 = vld [vmem:[%s14067_s1 + $0x900] sm:$0xff]  ;;  %v373_v39 = vld [vmem:[%s14067_s1 + $0xaa8] sm:$0xff] }
  0x74   :  { %v324_v47 = vld [vmem:[%s14067_s1 + $0x920] sm:$0xff] }
  0x75   :  { %v9165_v60 = vcombine.low %v320_v46, %v324_v47 }
  0x76   :  { %3628 = vmatpush1.bf16.msra.mxu0 %v9101_v52  ;;  %3833 = vmatpush1.bf16.msra.mxu1 %v9103_v54  ;;  %v9166_v52 = vcombine.high %v320_v46, %v324_v47  ;;  %v9168_v54 = vcombine.high %v321_v48, %v325_v49  ;;  %v377_v46 = vld [vmem:[%s14067_s1 + $0xac8] sm:$0xff]  ;;  %v9215_v49 = vcombine.low %v369_v38, %v373_v39 }
  0x77   :  { %3629 = vmatprep.subr.bf16.mxu0 %v9110_v55  ;;  %3834 = vmatprep.subr.bf16.mxu1 %v9112_v56  ;;  %v328_v55 = vld [vmem:[%s14067_s1 + $0x940] sm:$0xff]  ;;  %v381_v47 = vld [vmem:[%s14067_s1 + $0xae8] sm:$0xff] }
  0x78   :  { %v332_v56 = vld [vmem:[%s14067_s1 + $0x960] sm:$0xff] }
  0x79   :  { %v9173_v4 = vcombine.low %v328_v55, %v332_v56 }
  0x7a   :  { %3630 = vmatpush1.bf16.msra.mxu0 %v9109_v62  ;;  %3835 = vmatpush1.bf16.msra.mxu1 %v9111_v63  ;;  %v9174_v62 = vcombine.high %v328_v55, %v332_v56  ;;  %v9176_v63 = vcombine.high %v329_v58, %v333_v59  ;;  %v385_v55 = vld [vmem:[%s14067_s1 + $0xb08] sm:$0xff]  ;;  %v9223_v59 = vcombine.low %v377_v46, %v381_v47 }
  0x7b   :  { %3631 = vmatprep.subr.bf16.mxu0 %v9118_v0  ;;  %3836 = vmatprep.subr.bf16.mxu1 %v9120_v1  ;;  %v336_v0 = vld [vmem:[%s14067_s1 + $0x980] sm:$0xff]  ;;  %v389_v56 = vld [vmem:[%s14067_s1 + $0xb28] sm:$0xff] }
  0x7c   :  { %v340_v1 = vld [vmem:[%s14067_s1 + $0x9a0] sm:$0xff] }
  0x7d   :  { %v9181_v13 = vcombine.low %v336_v0, %v340_v1 }
  0x7e   :  { %3632 = vmatpush1.bf16.msra.mxu0 %v9117_v6  ;;  %3837 = vmatpush1.bf16.msra.mxu1 %v9119_v7  ;;  %v9182_v6 = vcombine.high %v336_v0, %v340_v1  ;;  %v9184_v7 = vcombine.high %v337_v2, %v341_v3  ;;  %v393_v0 = vld [vmem:[%s14067_s1 + $0xb48] sm:$0xff]  ;;  %v9231_v3 = vcombine.low %v385_v55, %v389_v56 }
  0x7f   :  { %3633 = vmatprep.subr.bf16.mxu0 %v9126_v8  ;;  %3838 = vmatprep.subr.bf16.mxu1 %v9128_v9  ;;  %v344_v8 = vld [vmem:[%s14067_s1 + $0x9c0] sm:$0xff]  ;;  %v397_v1 = vld [vmem:[%s14067_s1 + $0xb68] sm:$0xff] }
  0x80   :  { %v348_v9 = vld [vmem:[%s14067_s1 + $0x9e0] sm:$0xff] }
  0x81   :  { %v9189_v23 = vcombine.low %v344_v8, %v348_v9 }
  0x82   :  { %3634 = vmatpush1.bf16.msra.mxu0 %v9125_v16  ;;  %3839 = vmatpush1.bf16.msra.mxu1 %v9127_v17  ;;  %v9190_v16 = vcombine.high %v344_v8, %v348_v9  ;;  %v9192_v17 = vcombine.high %v345_v10, %v349_v11  ;;  %v401_v8 = vld [vmem:[%s14067_s1 + $0xb88] sm:$0xff]  ;;  %v9239_v11 = vcombine.low %v393_v0, %v397_v1 }
  0x83   :  { %3644 = vmatprep.subr.bf16.mxu0 %v9134_v53  ;;  %3849 = vmatprep.subr.bf16.mxu1 %v9136_v18  ;;  %v352_v53 = vld [vmem:[%s14067_s1 + $0xa00] sm:$0xff]  ;;  %v405_v9 = vld [vmem:[%s14067_s1 + $0xba8] sm:$0xff] }
  0x84   :  { %v356_v18 = vld [vmem:[%s14067_s1 + $0xa20] sm:$0xff] }
  0x85   :  { %3636 = vmatmul.mubr.bf16.vlgmr.msra.gmra.mrb[0].mxu0 %v10795_v22  ;;  %3841 = vmatmul.mubr.bf16.vlgmr.msra.gmra.mrb[0].mxu1 %v10795_v22  ;;  %v9197_v32 = vcombine.low %v352_v53, %v356_v18 }
  0x86   :  { %3645 = vmatpush1.bf16.msra.mxu0 %v9133_v26  ;;  %3850 = vmatpush1.bf16.msra.mxu1 %v9135_v27  ;;  %v9198_v26 = vcombine.high %v352_v53, %v356_v18  ;;  %v9200_v27 = vcombine.high %v353_v19, %v357_v20  ;;  %v409_v53 = vld [vmem:[%s14067_s1 + $0xbc8] sm:$0xff]  ;;  %v9247_v20 = vcombine.low %v401_v8, %v405_v9 }
  0x87   :  { %3646 = vmatprep.subr.bf16.mxu0 %v9142_v15  ;;  %3851 = vmatprep.subr.bf16.mxu1 %v9144_v28  ;;  %v360_v15 = vld [vmem:[%s14067_s1 + $0xa40] sm:$0xff]  ;;  %v413_v18 = vld [vmem:[%s14067_s1 + $0xbe8] sm:$0xff] }
  0x88   :  { %3676 = vmatprep.mubr.bf16.mxu0 %v10816_v31  ;;  %3881 = vmatprep.mubr.bf16.mxu1 %v10816_v31  ;;  %v364_v28 = vld [vmem:[%s14067_s1 + $0xa60] sm:$0xff] }
  0x89   :  { %v9205_v40 = vcombine.low %v360_v15, %v364_v28 }
  0x8a   :  { %3647 = vmatpush1.bf16.msra.mxu0 %v9141_v34  ;;  %3852 = vmatpush1.bf16.msra.mxu1 %v9143_v35  ;;  %v9206_v34 = vcombine.high %v360_v15, %v364_v28  ;;  %v9208_v35 = vcombine.high %v361_v29, %v365_v30  ;;  %v417_v15 = vld [vmem:[%s14067_s1 + $0xc08] sm:$0xff]  ;;  %v9255_v30 = vcombine.low %v409_v53, %v413_v18 }
  0x8b   :  { %3648 = vmatprep.subr.bf16.mxu0 %v9150_v36  ;;  %3853 = vmatprep.subr.bf16.mxu1 %v9152_v37  ;;  %v368_v36 = vld [vmem:[%s14067_s1 + $0xa80] sm:$0xff]  ;;  %v421_v28 = vld [vmem:[%s14067_s1 + $0xc28] sm:$0xff] }
  0x8c   :  { %v372_v37 = vld [vmem:[%s14067_s1 + $0xaa0] sm:$0xff] }
  0x8d   :  { %v9213_v48 = vcombine.low %v368_v36, %v372_v37 }
  0x8e   :  { %3649 = vmatpush1.bf16.msra.mxu0 %v9149_v42  ;;  %3854 = vmatpush1.bf16.msra.mxu1 %v9151_v43  ;;  %v9214_v42 = vcombine.high %v368_v36, %v372_v37  ;;  %v9216_v43 = vcombine.high %v369_v38, %v373_v39  ;;  %v11004_v36 = vcombine.low %v10806_v25, %v10806_v25  ;;  %v425_v37 = vld [vmem:[%s14067_s1 + $0xc48] sm:$0xff]  ;;  %v11015_v39 = vld [vmem:[%s14068_s0 + $0x18] sm:$0xff] }
  0x8f   :  { %3650 = vmatprep.subr.bf16.mxu0 %v9158_v44  ;;  %3855 = vmatprep.subr.bf16.mxu1 %v9160_v45  ;;  %v376_v44 = vld [vmem:[%s14067_s1 + $0xac0] sm:$0xff]  ;;  %v429_v38 = vld [vmem:[%s14067_s1 + $0xc68] sm:$0xff] }
  0x90   :  { %v380_v45 = vld [vmem:[%s14067_s1 + $0xae0] sm:$0xff] }
  0x91   :  { %v9221_v58 = vcombine.low %v376_v44, %v380_v45 }
  0x92   :  { %3651 = vmatpush1.bf16.msra.mxu0 %v9157_v50  ;;  %3856 = vmatpush1.bf16.msra.mxu1 %v9159_v51  ;;  %v9222_v50 = vcombine.high %v376_v44, %v380_v45  ;;  %v9224_v51 = vcombine.high %v377_v46, %v381_v47  ;;  %v436_v44 = vld [vmem:[%s14067_s1 + $0xca0] sm:$0xff]  ;;  %v11025_v45 = vcombine.high %v11015_v39, %v11015_v39  ;;  %v433_v46 = vld [vmem:[%s14067_s1 + $0xc88] sm:$0xff] }
  0x93   :  { %3652 = vmatprep.subr.bf16.mxu0 %v9166_v52  ;;  %3857 = vmatprep.subr.bf16.mxu1 %v9168_v54  ;;  %v384_v52 = vld [vmem:[%s14067_s1 + $0xb00] sm:$0xff]  ;;  %v437_v47 = vld [vmem:[%s14067_s1 + $0xca8] sm:$0xff] }
  0x94   :  { %v388_v54 = vld [vmem:[%s14067_s1 + $0xb20] sm:$0xff] }
  0x95   :  { %v9229_v2 = vcombine.low %v384_v52, %v388_v54 }
  0x96   :  { %3653 = vmatpush1.bf16.msra.mxu0 %v9165_v60  ;;  %3858 = vmatpush1.bf16.msra.mxu1 %v9167_v61  ;;  %v9230_v60 = vcombine.high %v384_v52, %v388_v54  ;;  %v9232_v61 = vcombine.high %v385_v55, %v389_v56  ;;  %v440_v52 = vld [vmem:[%s14067_s1 + $0xcc0] sm:$0xff]  ;;  %v441_v55 = vld [vmem:[%s14067_s1 + $0xcc8] sm:$0xff] }
  0x97   :  { %3654 = vmatprep.subr.bf16.mxu0 %v9174_v62  ;;  %3859 = vmatprep.subr.bf16.mxu1 %v9176_v63  ;;  %v392_v62 = vld [vmem:[%s14067_s1 + $0xb40] sm:$0xff]  ;;  %v445_v56 = vld [vmem:[%s14067_s1 + $0xce8] sm:$0xff] }
  0x98   :  { %v396_v63 = vld [vmem:[%s14067_s1 + $0xb60] sm:$0xff] }
  0x99   :  { %v9237_v10 = vcombine.low %v392_v62, %v396_v63  ;;  %v444_v54 = vld [vmem:[%s14067_s1 + $0xce0] sm:$0xff] }
  0x9a   :  { %3655 = vmatpush1.bf16.msra.mxu0 %v9173_v4  ;;  %3860 = vmatpush1.bf16.msra.mxu1 %v9175_v5  ;;  %v9238_v4 = vcombine.high %v392_v62, %v396_v63  ;;  %v9240_v5 = vcombine.high %v393_v0, %v397_v1  ;;  %v448_v62 = vld [vmem:[%s14067_s1 + $0xd00] sm:$0xff]  ;;  %v449_v0 = vld [vmem:[%s14067_s1 + $0xd08] sm:$0xff] }
  0x9b   :  { %3656 = vmatprep.subr.bf16.mxu0 %v9182_v6  ;;  %3861 = vmatprep.subr.bf16.mxu1 %v9184_v7  ;;  %v400_v6 = vld [vmem:[%s14067_s1 + $0xb80] sm:$0xff]  ;;  %v453_v1 = vld [vmem:[%s14067_s1 + $0xd28] sm:$0xff] }
  0x9c   :  { %v404_v7 = vld [vmem:[%s14067_s1 + $0xba0] sm:$0xff] }
  0x9d   :  { %v9245_v19 = vcombine.low %v400_v6, %v404_v7  ;;  %v452_v63 = vld [vmem:[%s14067_s1 + $0xd20] sm:$0xff] }
  0x9e   :  { %3657 = vmatpush1.bf16.msra.mxu0 %v9181_v13  ;;  %3862 = vmatpush1.bf16.msra.mxu1 %v9183_v14  ;;  %v9246_v13 = vcombine.high %v400_v6, %v404_v7  ;;  %v9248_v14 = vcombine.high %v401_v8, %v405_v9  ;;  %v456_v6 = vld [vmem:[%s14067_s1 + $0xd40] sm:$0xff]  ;;  %v457_v8 = vld [vmem:[%s14067_s1 + $0xd48] sm:$0xff] }
  0x9f   :  { %3658 = vmatprep.subr.bf16.mxu0 %v9190_v16  ;;  %3863 = vmatprep.subr.bf16.mxu1 %v9192_v17  ;;  %v408_v16 = vld [vmem:[%s14067_s1 + $0xbc0] sm:$0xff]  ;;  %v461_v9 = vld [vmem:[%s14067_s1 + $0xd68] sm:$0xff] }
  0xa0   :  { %v412_v17 = vld [vmem:[%s14067_s1 + $0xbe0] sm:$0xff] }
  0xa1   :  { %v9253_v29 = vcombine.low %v408_v16, %v412_v17  ;;  %v460_v7 = vld [vmem:[%s14067_s1 + $0xd60] sm:$0xff] }
  0xa2   :  { %3659 = vmatpush1.bf16.msra.mxu0 %v9189_v23  ;;  %3864 = vmatpush1.bf16.msra.mxu1 %v9191_v24  ;;  %v9254_v23 = vcombine.high %v408_v16, %v412_v17  ;;  %v9256_v24 = vcombine.high %v409_v53, %v413_v18  ;;  %v464_v16 = vld [vmem:[%s14067_s1 + $0xd80] sm:$0xff]  ;;  %v465_v53 = vld [vmem:[%s14067_s1 + $0xd88] sm:$0xff] }
  0xa3   :  { %3660 = vmatprep.subr.bf16.mxu0 %v9198_v26  ;;  %3865 = vmatprep.subr.bf16.mxu1 %v9200_v27  ;;  %v416_v26 = vld [vmem:[%s14067_s1 + $0xc00] sm:$0xff]  ;;  %v469_v18 = vld [vmem:[%s14067_s1 + $0xda8] sm:$0xff] }
  0xa4   :  { %v420_v27 = vld [vmem:[%s14067_s1 + $0xc20] sm:$0xff] }
  0xa5   :  { %v468_v17 = vld [vmem:[%s14067_s1 + $0xda0] sm:$0xff] }
  0xa6   :  { %3661 = vmatpush1.bf16.msra.mxu0 %v9197_v32  ;;  %3866 = vmatpush1.bf16.msra.mxu1 %v9199_v33  ;;  %v9262_v32 = vcombine.high %v416_v26, %v420_v27  ;;  %v9264_v33 = vcombine.high %v417_v15, %v421_v28 }
  0xa7   :  { %3662 = vmatprep.subr.bf16.mxu0 %v9206_v34  ;;  %3867 = vmatprep.subr.bf16.mxu1 %v9208_v35  ;;  %v424_v34 = vld [vmem:[%s14067_s1 + $0xc40] sm:$0xff] }
  0xa8   :  { %v428_v35 = vld [vmem:[%s14067_s1 + $0xc60] sm:$0xff] }
  0xa9   :  { %v9270_v25 = vcombine.high %v424_v34, %v428_v35 }
  0xaa   :  { %3663 = vmatpush1.bf16.msra.mxu0 %v9205_v40  ;;  %3868 = vmatpush1.bf16.msra.mxu1 %v9207_v41  ;;  %v9261_v40 = vcombine.low %v416_v26, %v420_v27  ;;  %v9263_v41 = vcombine.low %v417_v15, %v421_v28  ;;  %v472_v26 = vld [vmem:[%s14067_s1 + $0xdc0] sm:$0xff]  ;;  %v473_v15 = vld [vmem:[%s14067_s1 + $0xdc8] sm:$0xff] }
  0xab   :  { %3664 = vmatprep.subr.bf16.mxu0 %v9214_v42  ;;  %3869 = vmatprep.subr.bf16.mxu1 %v9216_v43  ;;  %v9272_v42 = vcombine.high %v425_v37, %v429_v38  ;;  %v432_v43 = vld [vmem:[%s14067_s1 + $0xc80] sm:$0xff]  ;;  %v477_v28 = vld [vmem:[%s14067_s1 + $0xde8] sm:$0xff] }
  0xac   :  { %v476_v27 = vld [vmem:[%s14067_s1 + $0xde0] sm:$0xff] }
  0xae   :  { %3665 = vmatpush1.bf16.msra.mxu0 %v9213_v48  ;;  %3870 = vmatpush1.bf16.msra.mxu1 %v9215_v49  ;;  %v9269_v48 = vcombine.low %v424_v34, %v428_v35  ;;  %v9271_v49 = vcombine.low %v425_v37, %v429_v38  ;;  %v480_v34 = vld [vmem:[%s14067_s1 + $0xe00] sm:$0xff]  ;;  %v481_v37 = vld [vmem:[%s14067_s1 + $0xe08] sm:$0xff] }
  0xaf   :  { %3666 = vmatprep.subr.bf16.mxu0 %v9222_v50  ;;  %3871 = vmatprep.subr.bf16.mxu1 %v9224_v51  ;;  %v9278_v50 = vcombine.high %v432_v43, %v436_v44  ;;  %v9280_v51 = vcombine.high %v433_v46, %v437_v47  ;;  %v484_v35 = vld [vmem:[%s14067_s1 + $0xe20] sm:$0xff]  ;;  %v485_v38 = vld [vmem:[%s14067_s1 + $0xe28] sm:$0xff] }
  0xb2   :  { %3667 = vmatpush1.bf16.msra.mxu0 %v9221_v58  ;;  %3872 = vmatpush1.bf16.msra.mxu1 %v9223_v59  ;;  %v9277_v58 = vcombine.low %v432_v43, %v436_v44  ;;  %v9279_v59 = vcombine.low %v433_v46, %v437_v47  ;;  %v488_v43 = vld [vmem:[%s14067_s1 + $0xe40] sm:$0xff]  ;;  %v489_v46 = vld [vmem:[%s14067_s1 + $0xe48] sm:$0xff] }
  0xb3   :  { %3668 = vmatprep.subr.bf16.mxu0 %v9230_v60  ;;  %3873 = vmatprep.subr.bf16.mxu1 %v9232_v61  ;;  %v9286_v60 = vcombine.high %v440_v52, %v444_v54  ;;  %v9288_v61 = vcombine.high %v441_v55, %v445_v56  ;;  %v492_v44 = vld [vmem:[%s14067_s1 + $0xe60] sm:$0xff]  ;;  %v493_v47 = vld [vmem:[%s14067_s1 + $0xe68] sm:$0xff] }
  0xb6   :  { %3669 = vmatpush1.bf16.msra.mxu0 %v9229_v2  ;;  %3874 = vmatpush1.bf16.msra.mxu1 %v9231_v3  ;;  %v9285_v2 = vcombine.low %v440_v52, %v444_v54  ;;  %v9287_v3 = vcombine.low %v441_v55, %v445_v56  ;;  %v496_v52 = vld [vmem:[%s14067_s1 + $0xe80] sm:$0xff]  ;;  %v497_v55 = vld [vmem:[%s14067_s1 + $0xe88] sm:$0xff] }
  0xb7   :  { %3670 = vmatprep.subr.bf16.mxu0 %v9238_v4  ;;  %3875 = vmatprep.subr.bf16.mxu1 %v9240_v5  ;;  %v9294_v4 = vcombine.high %v448_v62, %v452_v63  ;;  %v9296_v5 = vcombine.high %v449_v0, %v453_v1  ;;  %v500_v54 = vld [vmem:[%s14067_s1 + $0xea0] sm:$0xff]  ;;  %v501_v56 = vld [vmem:[%s14067_s1 + $0xea8] sm:$0xff] }
  0xba   :  { %3671 = vmatpush1.bf16.msra.mxu0 %v9237_v10  ;;  %3876 = vmatpush1.bf16.msra.mxu1 %v9239_v11  ;;  %v9293_v10 = vcombine.low %v448_v62, %v452_v63  ;;  %v9295_v11 = vcombine.low %v449_v0, %v453_v1  ;;  %v504_v62 = vld [vmem:[%s14067_s1 + $0xec0] sm:$0xff]  ;;  %v505_v0 = vld [vmem:[%s14067_s1 + $0xec8] sm:$0xff] }
  0xbb   :  { %3672 = vmatprep.subr.bf16.mxu0 %v9246_v13  ;;  %3877 = vmatprep.subr.bf16.mxu1 %v9248_v14  ;;  %v9302_v13 = vcombine.high %v456_v6, %v460_v7  ;;  %v9304_v14 = vcombine.high %v457_v8, %v461_v9  ;;  %v508_v63 = vld [vmem:[%s14067_s1 + $0xee0] sm:$0xff]  ;;  %v509_v1 = vld [vmem:[%s14067_s1 + $0xee8] sm:$0xff] }
  0xbe   :  { %3673 = vmatpush1.bf16.msra.mxu0 %v9245_v19  ;;  %3878 = vmatpush1.bf16.msra.mxu1 %v9247_v20  ;;  %v9301_v19 = vcombine.low %v456_v6, %v460_v7  ;;  %v9303_v20 = vcombine.low %v457_v8, %v461_v9  ;;  %v512_v6 = vld [vmem:[%s14067_s1 + $0xf00] sm:$0xff]  ;;  %v513_v8 = vld [vmem:[%s14067_s1 + $0xf08] sm:$0xff] }
  0xbf   :  { %3674 = vmatprep.subr.bf16.mxu0 %v9254_v23  ;;  %3879 = vmatprep.subr.bf16.mxu1 %v9256_v24  ;;  %v9310_v23 = vcombine.high %v464_v16, %v468_v17  ;;  %v9312_v24 = vcombine.high %v465_v53, %v469_v18  ;;  %v516_v7 = vld [vmem:[%s14067_s1 + $0xf20] sm:$0xff]  ;;  %v517_v9 = vld [vmem:[%s14067_s1 + $0xf28] sm:$0xff] }
  0xc2   :  { %3675 = vmatpush1.bf16.msra.mxu0 %v9253_v29  ;;  %3880 = vmatpush1.bf16.msra.mxu1 %v9255_v30  ;;  %v9309_v29 = vcombine.low %v464_v16, %v468_v17  ;;  %v9311_v30 = vcombine.low %v465_v53, %v469_v18  ;;  %v520_v16 = vld [vmem:[%s14067_s1 + $0xf40] sm:$0xff]  ;;  %v521_v53 = vld [vmem:[%s14067_s1 + $0xf48] sm:$0xff] }
  0xc3   :  { %3685 = vmatprep.subr.bf16.mxu0 %v9262_v32  ;;  %3890 = vmatprep.subr.bf16.mxu1 %v9264_v33  ;;  %v9318_v32 = vcombine.high %v472_v26, %v476_v27  ;;  %v9320_v33 = vcombine.high %v473_v15, %v477_v28  ;;  %v524_v17 = vld [vmem:[%s14067_s1 + $0xf60] sm:$0xff]  ;;  %v525_v18 = vld [vmem:[%s14067_s1 + $0xf68] sm:$0xff] }
  0xc5   :  { %3677 = vmatmul.mubr.bf16.vlgmr.msra.gmra.mrb[0].mxu0 %v11004_v36  ;;  %3882 = vmatmul.mubr.bf16.vlgmr.msra.gmra.mrb[0].mxu1 %v11004_v36 }
  0xc6   :  { %3686 = vmatpush1.bf16.msra.mxu0 %v9261_v40  ;;  %3891 = vmatpush1.bf16.msra.mxu1 %v9263_v41  ;;  %v9317_v40 = vcombine.low %v472_v26, %v476_v27  ;;  %v9319_v41 = vcombine.low %v473_v15, %v477_v28  ;;  %v528_v26 = vld [vmem:[%s14067_s1 + $0xf80] sm:$0xff]  ;;  %v529_v15 = vld [vmem:[%s14067_s1 + $0xf88] sm:$0xff] }
  0xc7   :  { %3687 = vmatprep.subr.bf16.mxu0 %v9270_v25  ;;  %3892 = vmatprep.subr.bf16.mxu1 %v9272_v42  ;;  %v9326_v25 = vcombine.high %v480_v34, %v484_v35  ;;  %v9328_v42 = vcombine.high %v481_v37, %v485_v38  ;;  %v532_v27 = vld [vmem:[%s14067_s1 + $0xfa0] sm:$0xff]  ;;  %v533_v28 = vld [vmem:[%s14067_s1 + $0xfa8] sm:$0xff] }
  0xc8   :  { %3717 = vmatprep.mubr.bf16.mxu0 %v11025_v45  ;;  %3922 = vmatprep.mubr.bf16.mxu1 %v11025_v45 }
  0xca   :  { %3688 = vmatpush1.bf16.msra.mxu0 %v9269_v48  ;;  %3893 = vmatpush1.bf16.msra.mxu1 %v9271_v49  ;;  %v9325_v48 = vcombine.low %v480_v34, %v484_v35  ;;  %v9327_v49 = vcombine.low %v481_v37, %v485_v38  ;;  %v536_v34 = vld [vmem:[%s14067_s1 + $0xfc0] sm:$0xff]  ;;  %v537_v37 = vld [vmem:[%s14067_s1 + $0xfc8] sm:$0xff] }
  0xcb   :  { %3689 = vmatprep.subr.bf16.mxu0 %v9278_v50  ;;  %3894 = vmatprep.subr.bf16.mxu1 %v9280_v51  ;;  %v9334_v50 = vcombine.high %v488_v43, %v492_v44  ;;  %v9336_v51 = vcombine.high %v489_v46, %v493_v47  ;;  %v540_v35 = vld [vmem:[%s14067_s1 + $0xfe0] sm:$0xff]  ;;  %v541_v38 = vld [vmem:[%s14067_s1 + $0xfe8] sm:$0xff] }
  0xce   :  { %3690 = vmatpush1.bf16.msra.mxu0 %v9277_v58  ;;  %3895 = vmatpush1.bf16.msra.mxu1 %v9279_v59  ;;  %v9333_v58 = vcombine.low %v488_v43, %v492_v44  ;;  %v9335_v59 = vcombine.low %v489_v46, %v493_v47  ;;  %v544_v43 = vld [vmem:[%s14067_s1 + $0x1000] sm:$0xff]  ;;  %v545_v46 = vld [vmem:[%s14067_s1 + $0x1008] sm:$0xff] }
  0xcf   :  { %3691 = vmatprep.subr.bf16.mxu0 %v9286_v60  ;;  %3896 = vmatprep.subr.bf16.mxu1 %v9288_v61  ;;  %v9342_v60 = vcombine.high %v496_v52, %v500_v54  ;;  %v9344_v61 = vcombine.high %v497_v55, %v501_v56  ;;  %v548_v44 = vld [vmem:[%s14067_s1 + $0x1020] sm:$0xff]  ;;  %v549_v47 = vld [vmem:[%s14067_s1 + $0x1028] sm:$0xff] }
  0xd2   :  { %3692 = vmatpush1.bf16.msra.mxu0 %v9285_v2  ;;  %3897 = vmatpush1.bf16.msra.mxu1 %v9287_v3  ;;  %v9341_v2 = vcombine.low %v496_v52, %v500_v54  ;;  %v9343_v3 = vcombine.low %v497_v55, %v501_v56  ;;  %v552_v52 = vld [vmem:[%s14067_s1 + $0x1040] sm:$0xff]  ;;  %v11213_v55 = vcombine.low %v11015_v39, %v11015_v39  ;;  %v553_v56 = vld [vmem:[%s14067_s1 + $0x1048] sm:$0xff] }
  0xd3   :  { %3693 = vmatprep.subr.bf16.mxu0 %v9294_v4  ;;  %3898 = vmatprep.subr.bf16.mxu1 %v9296_v5  ;;  %v9350_v4 = vcombine.high %v504_v62, %v508_v63  ;;  %v9352_v5 = vcombine.high %v505_v0, %v509_v1  ;;  %v556_v54 = vld [vmem:[%s14067_s1 + $0x1060] sm:$0xff] }
  0xd4   :  { %v560_v39 = vld [vmem:[%s14067_s1 + $0x1080] sm:$0xff] }
  0xd6   :  { %3694 = vmatpush1.bf16.msra.mxu0 %v9293_v10  ;;  %3899 = vmatpush1.bf16.msra.mxu1 %v9295_v11  ;;  %v9349_v10 = vcombine.low %v504_v62, %v508_v63  ;;  %v9351_v11 = vcombine.low %v505_v0, %v509_v1  ;;  %v564_v63 = vld [vmem:[%s14067_s1 + $0x10a0] sm:$0xff]  ;;  %v561_v0 = vld [vmem:[%s14067_s1 + $0x1088] sm:$0xff] }
  0xd7   :  { %3695 = vmatprep.subr.bf16.mxu0 %v9302_v13  ;;  %3900 = vmatprep.subr.bf16.mxu1 %v9304_v14  ;;  %v9358_v13 = vcombine.high %v512_v6, %v516_v7  ;;  %v9360_v14 = vcombine.high %v513_v8, %v517_v9  ;;  %v565_v1 = vld [vmem:[%s14067_s1 + $0x10a8] sm:$0xff] }
  0xda   :  { %3696 = vmatpush1.bf16.msra.mxu0 %v9301_v19  ;;  %3901 = vmatpush1.bf16.msra.mxu1 %v9303_v20  ;;  %v9357_v19 = vcombine.low %v512_v6, %v516_v7  ;;  %v9359_v20 = vcombine.low %v513_v8, %v517_v9  ;;  %v568_v6 = vld [vmem:[%s14067_s1 + $0x10c0] sm:$0xff]  ;;  %v10322_v8 = vmov 0   ;;  %v569_v9 = vld [vmem:[%s14067_s1 + $0x10c8] sm:$0xff] }
  0xdb   :  { %3697 = vmatprep.subr.bf16.mxu0 %v9310_v23  ;;  %3902 = vmatprep.subr.bf16.mxu1 %v9312_v24  ;;  %v9366_v23 = vcombine.high %v520_v16, %v524_v17  ;;  %v9368_v24 = vcombine.high %v521_v53, %v525_v18  ;;  %v572_v7 = vld [vmem:[%s14067_s1 + $0x10e0] sm:$0xff] }
  0xde   :  { %3698 = vmatpush1.bf16.msra.mxu0 %v9309_v29  ;;  %3903 = vmatpush1.bf16.msra.mxu1 %v9311_v30  ;;  %v9365_v29 = vcombine.low %v520_v16, %v524_v17  ;;  %v9367_v30 = vcombine.low %v521_v53, %v525_v18  ;;  %v576_v17 = vld [vmem:[%s14067_s1 + $0x1100] sm:$0xff]  ;;  %v577_v18 = vld [vmem:[%s14067_s1 + $0x1108] sm:$0xff] }
  0xdf   :  { %3699 = vmatprep.subr.bf16.mxu0 %v9318_v32  ;;  %3904 = vmatprep.subr.bf16.mxu1 %v9320_v33  ;;  %v9374_v32 = vcombine.high %v528_v26, %v532_v27  ;;  %v9376_v33 = vcombine.high %v529_v15, %v533_v28  ;;  %v580_v53 = vld [vmem:[%s14067_s1 + $0x1120] sm:$0xff] }
  0xe2   :  { %3700 = vmatpush1.bf16.msra.mxu0 %v9317_v40  ;;  %3905 = vmatpush1.bf16.msra.mxu1 %v9319_v41  ;;  %v9373_v40 = vcombine.low %v528_v26, %v532_v27  ;;  %v9375_v41 = vcombine.low %v529_v15, %v533_v28  ;;  %v584_v27 = vld [vmem:[%s14067_s1 + $0x1140] sm:$0xff]  ;;  %v585_v28 = vld [vmem:[%s14067_s1 + $0x1148] sm:$0xff] }
  0xe3   :  { %3701 = vmatprep.subr.bf16.mxu0 %v9326_v25  ;;  %3906 = vmatprep.subr.bf16.mxu1 %v9328_v42  ;;  %v9382_v25 = vcombine.high %v536_v34, %v540_v35  ;;  %v9384_v42 = vcombine.high %v537_v37, %v541_v38  ;;  %v588_v15 = vld [vmem:[%s14067_s1 + $0x1160] sm:$0xff] }
  0xe6   :  { %3702 = vmatpush1.bf16.msra.mxu0 %v9325_v48  ;;  %3907 = vmatpush1.bf16.msra.mxu1 %v9327_v49  ;;  %v9381_v48 = vcombine.low %v536_v34, %v540_v35  ;;  %v9383_v49 = vcombine.low %v537_v37, %v541_v38  ;;  %v592_v35 = vld [vmem:[%s14067_s1 + $0x1180] sm:$0xff]  ;;  %v593_v38 = vld [vmem:[%s14067_s1 + $0x1188] sm:$0xff] }
  0xe7   :  { %3703 = vmatprep.subr.bf16.mxu0 %v9334_v50  ;;  %3908 = vmatprep.subr.bf16.mxu1 %v9336_v51  ;;  %v9390_v50 = vcombine.high %v544_v43, %v548_v44  ;;  %v9392_v51 = vcombine.high %v545_v46, %v549_v47  ;;  %v596_v37 = vld [vmem:[%s14067_s1 + $0x11a0] sm:$0xff] }
  0xea   :  { %3704 = vmatpush1.bf16.msra.mxu0 %v9333_v58  ;;  %3909 = vmatpush1.bf16.msra.mxu1 %v9335_v59  ;;  %v557_v58 = vld [vmem:[%s14067_s1 + $0x1068] sm:$0xff]  ;;  %v9389_v59 = vcombine.low %v544_v43, %v548_v44  ;;  %v600_v44 = vld [vmem:[%s14067_s1 + $0x11c0] sm:$0xff] }
  0xeb   :  { %3705 = vmatprep.subr.bf16.mxu0 %v9342_v60  ;;  %3910 = vmatprep.subr.bf16.mxu1 %v9344_v61  ;;  %v9391_v60 = vcombine.low %v545_v46, %v549_v47  ;;  %v9398_v61 = vcombine.high %v552_v52, %v556_v54  ;;  %v9400_v62 = vcombine.high %v553_v56, %v557_v58  ;;  %v604_v46 = vld [vmem:[%s14067_s1 + $0x11e0] sm:$0xff]  ;;  %v601_v47 = vld [vmem:[%s14067_s1 + $0x11c8] sm:$0xff] }
  0xee   :  { %3706 = vmatpush1.bf16.msra.mxu0 %v9341_v2  ;;  %3911 = vmatpush1.bf16.msra.mxu1 %v9343_v3  ;;  %v9397_v2 = vcombine.low %v552_v52, %v556_v54  ;;  %v9399_v3 = vcombine.low %v553_v56, %v557_v58  ;;  %v34_v54 = vld [vmem:[%s14067_s1 + $0x10] sm:$0xff]  ;;  %v35_v58 = vld [vmem:[%s14067_s1 + $0x18] sm:$0xff] }
  0xef   :  { %3707 = vmatprep.subr.bf16.mxu0 %v9350_v4  ;;  %3912 = vmatprep.subr.bf16.mxu1 %v9352_v5  ;;  %v9406_v4 = vcombine.high %v560_v39, %v564_v63  ;;  %v9408_v5 = vcombine.high %v561_v0, %v565_v1  ;;  %v38_v56 = vld [vmem:[%s14067_s1 + $0x30] sm:$0xff] }
  0xf2   :  { %3708 = vmatpush1.bf16.msra.mxu0 %v9349_v10  ;;  %3913 = vmatpush1.bf16.msra.mxu1 %v9351_v11  ;;  %v573_v10 = vld [vmem:[%s14067_s1 + $0x10e8] sm:$0xff]  ;;  %v9405_v11 = vcombine.low %v560_v39, %v564_v63  ;;  %v42_v63 = vld [vmem:[%s14067_s1 + $0x50] sm:$0xff] }
  0xf3   :  { %3709 = vmatprep.subr.bf16.mxu0 %v9358_v13  ;;  %3914 = vmatprep.subr.bf16.mxu1 %v9360_v14  ;;  %v9407_v13 = vcombine.low %v561_v0, %v565_v1  ;;  %v9414_v14 = vcombine.high %v568_v6, %v572_v7  ;;  %v9416_v16 = vcombine.high %v569_v9, %v573_v10  ;;  %v46_v0 = vld [vmem:[%s14067_s1 + $0x70] sm:$0xff]  ;;  %v10255_v1 = vld [vmem:[%s14068_s0 + $0x20] ss:$0 sps:$4 sm:$0xff]  }
  0xf6   :  { %3710 = vmatpush1.bf16.msra.mxu0 %v9357_v19  ;;  %3915 = vmatpush1.bf16.msra.mxu1 %v9359_v20  ;;  %v581_v19 = vld [vmem:[%s14067_s1 + $0x1128] sm:$0xff]  ;;  %v9413_v20 = vcombine.low %v568_v6, %v572_v7  ;;  %v8890_v6 = vcombine.high %v42_v63, %v46_v0 }
  0xf7   :  { %3711 = vmatprep.subr.bf16.mxu0 %v9366_v23  ;;  %3916 = vmatprep.subr.bf16.mxu1 %v9368_v24  ;;  %v9415_v23 = vcombine.low %v569_v9, %v573_v10  ;;  %v9422_v24 = vcombine.high %v576_v17, %v580_v53  ;;  %v9424_v26 = vcombine.high %v577_v18, %v581_v19  ;;  %v50_v9 = vld [vmem:[%s14067_s1 + $0x90] sm:$0xff] }
  0xf8   :  { %v54_v10 = vld [vmem:[%s14067_s1 + $0xb0] sm:$0xff] }
  0xfa   :  { %3712 = vmatpush1.bf16.msra.mxu0 %v9365_v29  ;;  %3917 = vmatpush1.bf16.msra.mxu1 %v9367_v30  ;;  %v589_v29 = vld [vmem:[%s14067_s1 + $0x1168] sm:$0xff]  ;;  %v9421_v30 = vcombine.low %v576_v17, %v580_v53  ;;  %v8898_v17 = vcombine.high %v50_v9, %v54_v10 }
  0xfb   :  { %3713 = vmatprep.subr.bf16.mxu0 %v9374_v32  ;;  %3918 = vmatprep.subr.bf16.mxu1 %v9376_v33  ;;  %v9423_v32 = vcombine.low %v577_v18, %v581_v19  ;;  %v9430_v33 = vcombine.high %v584_v27, %v588_v15  ;;  %v9432_v34 = vcombine.high %v585_v28, %v589_v29  ;;  %v58_v18 = vld [vmem:[%s14067_s1 + $0xd0] sm:$0xff] }
  0xfc   :  { %v62_v19 = vld [vmem:[%s14067_s1 + $0xf0] sm:$0xff] }
  0xfe   :  { %3714 = vmatpush1.bf16.msra.mxu0 %v9373_v40  ;;  %3919 = vmatpush1.bf16.msra.mxu1 %v9375_v41  ;;  %v597_v40 = vld [vmem:[%s14067_s1 + $0x11a8] sm:$0xff]  ;;  %v9429_v41 = vcombine.low %v584_v27, %v588_v15  ;;  %v8906_v27 = vcombine.high %v58_v18, %v62_v19 }
  0xff   :  { %3715 = vmatprep.subr.bf16.mxu0 %v9382_v25  ;;  %3920 = vmatprep.subr.bf16.mxu1 %v9384_v42  ;;  %v9431_v25 = vcombine.low %v585_v28, %v589_v29  ;;  %v9438_v42 = vcombine.high %v592_v35, %v596_v37  ;;  %v9440_v43 = vcombine.high %v593_v38, %v597_v40  ;;  %v66_v28 = vld [vmem:[%s14067_s1 + $0x110] sm:$0xff] }
 0x100   :  { %v70_v29 = vld [vmem:[%s14067_s1 + $0x130] sm:$0xff] }
 0x102   :  { %3716 = vmatpush1.bf16.msra.mxu0 %v9381_v48  ;;  %3921 = vmatpush1.bf16.msra.mxu1 %v9383_v49  ;;  %v605_v48 = vld [vmem:[%s14067_s1 + $0x11e8] sm:$0xff]  ;;  %v9437_v49 = vcombine.low %v592_v35, %v596_v37  ;;  %v74_v37 = vld [vmem:[%s14067_s1 + $0x150] sm:$0xff] }
 0x103   :  { %3726 = vmatprep.subr.bf16.mxu0 %v9390_v50  ;;  %3931 = vmatprep.subr.bf16.mxu1 %v9392_v51  ;;  %v9439_v50 = vcombine.low %v593_v38, %v597_v40  ;;  %v9446_v51 = vcombine.high %v600_v44, %v604_v46  ;;  %v9448_v52 = vcombine.high %v601_v47, %v605_v48  ;;  %v78_v38 = vld [vmem:[%s14067_s1 + $0x170] sm:$0xff]  ;;  %v75_v40 = vld [vmem:[%s14067_s1 + $0x158] sm:$0xff] }
 0x105   :  { %3718 = vmatmul.mubr.bf16.vlgmr.msra.gmra.mrb[0].mxu0 %v11213_v55  ;;  %3923 = vmatmul.mubr.bf16.vlgmr.msra.gmra.mrb[0].mxu1 %v11213_v55 }
 0x106   :  { %3727 = vmatpush1.bf16.msra.mxu0 %v9389_v59  ;;  %3932 = vmatpush1.bf16.msra.mxu1 %v9391_v60  ;;  %v39_v59 = vld [vmem:[%s14067_s1 + $0x38] sm:$0xff]  ;;  %v9445_v60 = vcombine.low %v600_v44, %v604_v46  ;;  %v82_v46 = vld [vmem:[%s14067_s1 + $0x190] sm:$0xff] }
 0x107   :  { %3728 = vmatprep.subr.bf16.mxu0 %v9398_v61  ;;  %3933 = vmatprep.subr.bf16.mxu1 %v9400_v62  ;;  %v9447_v61 = vcombine.low %v601_v47, %v605_v48  ;;  %v8882_v62 = vcombine.high %v34_v54, %v38_v56  ;;  %v8884_v39 = vcombine.high %v35_v58, %v39_v59  ;;  %v86_v47 = vld [vmem:[%s14067_s1 + $0x1b0] sm:$0xff]  ;;  %v83_v48 = vld [vmem:[%s14067_s1 + $0x198] sm:$0xff] }
 0x108   :  { %3758 = vmatprep.mubr.bf16.mxu0 %v10322_v8  ;;  %3963 = vmatprep.mubr.bf16.mxu1 %v10322_v8 }
 0x10a   :  { %3729 = vmatpush1.bf16.msra.mxu0 %v9397_v2  ;;  %3934 = vmatpush1.bf16.msra.mxu1 %v9399_v3  ;;  %v43_v2 = vld [vmem:[%s14067_s1 + $0x58] sm:$0xff] }
 0x10b   :  { %3730 = vmatprep.subr.bf16.mxu0 %v9406_v4  ;;  %3935 = vmatprep.subr.bf16.mxu1 %v9408_v5  ;;  %v47_v3 = vld [vmem:[%s14067_s1 + $0x78] sm:$0xff]  ;;  %v8881_v4 = vcombine.low %v34_v54, %v38_v56  ;;  %v8883_v5 = vcombine.low %v35_v58, %v39_v59  ;;  %v90_v56 = vld [vmem:[%s14067_s1 + $0x1d0] sm:$0xff] }
 0x10c   :  { %v8892_v7 = vcombine.high %v43_v2, %v47_v3  ;;  %v94_v58 = vld [vmem:[%s14067_s1 + $0x1f0] sm:$0xff]  ;;  %v91_v59 = vld [vmem:[%s14067_s1 + $0x1d8] sm:$0xff] }
 0x10e   :  { %3731 = vmatpush1.bf16.msra.mxu0 %v9405_v11  ;;  %3936 = vmatpush1.bf16.msra.mxu1 %v9407_v13  ;;  %v51_v11 = vld [vmem:[%s14067_s1 + $0x98] sm:$0xff] }
 0x10f   :  { %3732 = vmatprep.subr.bf16.mxu0 %v9414_v14  ;;  %3937 = vmatprep.subr.bf16.mxu1 %v9416_v16  ;;  %v55_v13 = vld [vmem:[%s14067_s1 + $0xb8] sm:$0xff]  ;;  %v8889_v14 = vcombine.low %v42_v63, %v46_v0  ;;  %v8891_v16 = vcombine.low %v43_v2, %v47_v3  ;;  %v98_v0 = vld [vmem:[%s14067_s1 + $0x210] sm:$0xff] }
 0x110   :  { %v8900_v53 = vcombine.high %v51_v11, %v55_v13  ;;  %v99_v2 = vld [vmem:[%s14067_s1 + $0x218] sm:$0xff] }
 0x111   :  { %v103_v3 = vld [vmem:[%s14067_s1 + $0x238] sm:$0xff] }
 0x112   :  { %3733 = vmatpush1.bf16.msra.mxu0 %v9413_v20  ;;  %3938 = vmatpush1.bf16.msra.mxu1 %v9415_v23  ;;  %v59_v20 = vld [vmem:[%s14067_s1 + $0xd8] sm:$0xff] }
 0x113   :  { %3734 = vmatprep.subr.bf16.mxu0 %v9422_v24  ;;  %3939 = vmatprep.subr.bf16.mxu1 %v9424_v26  ;;  %v63_v23 = vld [vmem:[%s14067_s1 + $0xf8] sm:$0xff]  ;;  %v8897_v24 = vcombine.low %v50_v9, %v54_v10  ;;  %v8899_v26 = vcombine.low %v51_v11, %v55_v13  ;;  %v106_v9 = vld [vmem:[%s14067_s1 + $0x250] sm:$0xff] }
 0x114   :  { %v8908_v15 = vcombine.high %v59_v20, %v63_v23  ;;  %v110_v10 = vld [vmem:[%s14067_s1 + $0x270] sm:$0xff]  ;;  %v107_v11 = vld [vmem:[%s14067_s1 + $0x258] sm:$0xff] }
 0x115   :  { %v111_v13 = vld [vmem:[%s14067_s1 + $0x278] sm:$0xff] }
 0x116   :  { %3735 = vmatpush1.bf16.msra.mxu0 %v9421_v30  ;;  %3940 = vmatpush1.bf16.msra.mxu1 %v9423_v32  ;;  %v71_v30 = vld [vmem:[%s14067_s1 + $0x138] sm:$0xff]  ;;  %v8905_v32 = vcombine.low %v58_v18, %v62_v19  ;;  %v114_v18 = vld [vmem:[%s14067_s1 + $0x290] sm:$0xff] }
 0x117   :  { %3736 = vmatprep.subr.bf16.mxu0 %v9430_v33  ;;  %3941 = vmatprep.subr.bf16.mxu1 %v9432_v34  ;;  %v8907_v33 = vcombine.low %v59_v20, %v63_v23  ;;  %v8914_v34 = vcombine.high %v66_v28, %v70_v29  ;;  %v118_v19 = vld [vmem:[%s14067_s1 + $0x2b0] sm:$0xff]  ;;  %v115_v20 = vld [vmem:[%s14067_s1 + $0x298] sm:$0xff] }
 0x118   :  { %v119_v23 = vld [vmem:[%s14067_s1 + $0x2b8] sm:$0xff] }
 0x11a   :  { %3737 = vmatpush1.bf16.msra.mxu0 %v9429_v41  ;;  %3942 = vmatpush1.bf16.msra.mxu1 %v9431_v25  ;;  %v79_v41 = vld [vmem:[%s14067_s1 + $0x178] sm:$0xff]  ;;  %v8913_v25 = vcombine.low %v66_v28, %v70_v29  ;;  %v122_v28 = vld [vmem:[%s14067_s1 + $0x2d0] sm:$0xff] }
 0x11b   :  { %3738 = vmatprep.subr.bf16.mxu0 %v9438_v42  ;;  %3943 = vmatprep.subr.bf16.mxu1 %v9440_v43  ;;  %v8922_v43 = vcombine.high %v74_v37, %v78_v38  ;;  %v8924_v44 = vcombine.high %v75_v40, %v79_v41  ;;  %v126_v29 = vld [vmem:[%s14067_s1 + $0x2f0] sm:$0xff] }
 0x11e   :  { %3739 = vmatpush1.bf16.msra.mxu0 %v9437_v49  ;;  %3944 = vmatpush1.bf16.msra.mxu1 %v9439_v50  ;;  %v87_v49 = vld [vmem:[%s14067_s1 + $0x1b8] sm:$0xff]  ;;  %v8921_v50 = vcombine.low %v74_v37, %v78_v38  ;;  %v130_v37 = vld [vmem:[%s14067_s1 + $0x310] sm:$0xff] }
 0x11f   :  { %3740 = vmatprep.subr.bf16.mxu0 %v9446_v51  ;;  %3945 = vmatprep.subr.bf16.mxu1 %v9448_v52  ;;  %v8923_v51 = vcombine.low %v75_v40, %v79_v41  ;;  %v8930_v52 = vcombine.high %v82_v46, %v86_v47  ;;  %v8932_v54 = vcombine.high %v83_v48, %v87_v49  ;;  %v134_v38 = vld [vmem:[%s14067_s1 + $0x330] sm:$0xff]  ;;  %v131_v40 = vld [vmem:[%s14067_s1 + $0x318] sm:$0xff] }
 0x120   :  { %v135_v41 = vld [vmem:[%s14067_s1 + $0x338] sm:$0xff] }
 0x122   :  { %3741 = vmatpush1.bf16.msra.mxu0 %v9445_v60  ;;  %3946 = vmatpush1.bf16.msra.mxu1 %v9447_v61  ;;  %v95_v60 = vld [vmem:[%s14067_s1 + $0x1f8] sm:$0xff]  ;;  %v8929_v61 = vcombine.low %v82_v46, %v86_v47  ;;  %v138_v46 = vld [vmem:[%s14067_s1 + $0x350] sm:$0xff] }
 0x123   :  { %3972 = vmatprep.subr.bf16.mxu0 %v8882_v62  ;;  %4177 = vmatprep.subr.bf16.mxu1 %v8884_v39  ;;  %v8931_v62 = vcombine.low %v83_v48, %v87_v49  ;;  %v8938_v39 = vcombine.high %v90_v56, %v94_v58  ;;  %v8940_v63 = vcombine.high %v91_v59, %v95_v60  ;;  %v142_v47 = vld [vmem:[%s14067_s1 + $0x370] sm:$0xff]  ;;  %v139_v48 = vld [vmem:[%s14067_s1 + $0x358] sm:$0xff] }
 0x124   :  { %v143_v49 = vld [vmem:[%s14067_s1 + $0x378] sm:$0xff] }
 0x125   :  { %3759 = vmatmul.mubr.bf16.vlgmr.msra.gmra.mrb[0].mxu0 %v10255_v1  ;;  %3964 = vmatmul.mubr.bf16.vlgmr.msra.gmra.mrb[0].mxu1 %v10255_v1  ;;  %v102_v1 = vld [vmem:[%s14067_s1 + $0x230] sm:$0xff] }
 0x126   :  { %3973 = vmatpush1.bf16.msra.mxu0 %v8881_v4  ;;  %4178 = vmatpush1.bf16.msra.mxu1 %v8883_v5  ;;  %v8937_v4 = vcombine.low %v90_v56, %v94_v58  ;;  %v8939_v5 = vcombine.low %v91_v59, %v95_v60  ;;  %v146_v56 = vld [vmem:[%s14067_s1 + $0x390] sm:$0xff]  ;;  %v147_v59 = vld [vmem:[%s14067_s1 + $0x398] sm:$0xff] }
 0x127   :  { %3974 = vmatprep.subr.bf16.mxu0 %v8890_v6  ;;  %4179 = vmatprep.subr.bf16.mxu1 %v8892_v7  ;;  %v8946_v6 = vcombine.high %v98_v0, %v102_v1  ;;  %v8948_v7 = vcombine.high %v99_v2, %v103_v3  ;;  %v150_v58 = vld [vmem:[%s14067_s1 + $0x3b0] sm:$0xff]  ;;  %v151_v60 = vld [vmem:[%s14067_s1 + $0x3b8] sm:$0xff] }
 0x128   :  { %4004 = vmatprep.mubr.bf16.mxu0 %v10460_v57  ;;  %4209 = vmatprep.mubr.bf16.mxu1 %v10460_v57  ;;  %v67_v57 = vld [vmem:[%s14067_s1 + $0x118] sm:$0xff] }
 0x129   :  { %v8916_v35 = vcombine.high %v67_v57, %v71_v30  ;;  %v8915_v42 = vcombine.low %v67_v57, %v71_v30  ;;  %v123_v57 = vld [vmem:[%s14067_s1 + $0x2d8] sm:$0xff] }
 0x12a   :  { %3975 = vmatpush1.bf16.msra.mxu0 %v8889_v14  ;;  %4180 = vmatpush1.bf16.msra.mxu1 %v8891_v16  ;;  %v8945_v14 = vcombine.low %v98_v0, %v102_v1  ;;  %v8947_v16 = vcombine.low %v99_v2, %v103_v3  ;;  %v127_v30 = vld [vmem:[%s14067_s1 + $0x2f8] sm:$0xff]  ;;  %v154_v0 = vld [vmem:[%s14067_s1 + $0x3d0] sm:$0xff] }
 0x12b   :  { %3976 = vmatprep.subr.bf16.mxu0 %v8898_v17  ;;  %4181 = vmatprep.subr.bf16.mxu1 %v8900_v53  ;;  %v8954_v17 = vcombine.high %v106_v9, %v110_v10  ;;  %v8956_v53 = vcombine.high %v107_v11, %v111_v13  ;;  %v158_v1 = vld [vmem:[%s14067_s1 + $0x3f0] sm:$0xff]  ;;  %v155_v2 = vld [vmem:[%s14067_s1 + $0x3d8] sm:$0xff] }
 0x12c   :  { %v159_v3 = vld [vmem:[%s14067_s1 + $0x3f8] sm:$0xff] }
 0x12e   :  { %3977 = vmatpush1.bf16.msra.mxu0 %v8897_v24  ;;  %4182 = vmatpush1.bf16.msra.mxu1 %v8899_v26  ;;  %v8953_v24 = vcombine.low %v106_v9, %v110_v10  ;;  %v8955_v26 = vcombine.low %v107_v11, %v111_v13  ;;  %v162_v9 = vld [vmem:[%s14067_s1 + $0x410] sm:$0xff]  ;;  %v163_v11 = vld [vmem:[%s14067_s1 + $0x418] sm:$0xff] }
 0x12f   :  { %3978 = vmatprep.subr.bf16.mxu0 %v8906_v27  ;;  %4183 = vmatprep.subr.bf16.mxu1 %v8908_v15  ;;  %v8962_v27 = vcombine.high %v114_v18, %v118_v19  ;;  %v8964_v15 = vcombine.high %v115_v20, %v119_v23  ;;  %v166_v10 = vld [vmem:[%s14067_s1 + $0x430] sm:$0xff]  ;;  %v167_v13 = vld [vmem:[%s14067_s1 + $0x438] sm:$0xff] }
 0x132   :  { %3979 = vmatpush1.bf16.msra.mxu0 %v8905_v32  ;;  %4184 = vmatpush1.bf16.msra.mxu1 %v8907_v33  ;;  %v8961_v32 = vcombine.low %v114_v18, %v118_v19  ;;  %v8963_v33 = vcombine.low %v115_v20, %v119_v23  ;;  %v170_v18 = vld [vmem:[%s14067_s1 + $0x450] sm:$0xff]  ;;  %v171_v20 = vld [vmem:[%s14067_s1 + $0x458] sm:$0xff] }
 0x133   :  { %3980 = vmatprep.subr.bf16.mxu0 %v8914_v34  ;;  %4185 = vmatprep.subr.bf16.mxu1 %v8916_v35  ;;  %v8970_v34 = vcombine.high %v122_v28, %v126_v29  ;;  %v8972_v35 = vcombine.high %v123_v57, %v127_v30  ;;  %v174_v19 = vld [vmem:[%s14067_s1 + $0x470] sm:$0xff]  ;;  %v175_v23 = vld [vmem:[%s14067_s1 + $0x478] sm:$0xff] }
 0x136   :  { %3981 = vmatpush1.bf16.msra.mxu0 %v8913_v25  ;;  %4186 = vmatpush1.bf16.msra.mxu1 %v8915_v42  ;;  %v8969_v25 = vcombine.low %v122_v28, %v126_v29  ;;  %v8971_v42 = vcombine.low %v123_v57, %v127_v30  ;;  %v178_v28 = vld [vmem:[%s14067_s1 + $0x490] sm:$0xff]  ;;  %v179_v57 = vld [vmem:[%s14067_s1 + $0x498] sm:$0xff] }
 0x137   :  { %3982 = vmatprep.subr.bf16.mxu0 %v8922_v43  ;;  %4187 = vmatprep.subr.bf16.mxu1 %v8924_v44  ;;  %v8978_v43 = vcombine.high %v130_v37, %v134_v38  ;;  %v8980_v44 = vcombine.high %v131_v40, %v135_v41  ;;  %v182_v29 = vld [vmem:[%s14067_s1 + $0x4b0] sm:$0xff]  ;;  %v183_v30 = vld [vmem:[%s14067_s1 + $0x4b8] sm:$0xff] }
 0x13a   :  { %3983 = vmatpush1.bf16.msra.mxu0 %v8921_v50  ;;  %4188 = vmatpush1.bf16.msra.mxu1 %v8923_v51  ;;  %v8977_v50 = vcombine.low %v130_v37, %v134_v38  ;;  %v8979_v51 = vcombine.low %v131_v40, %v135_v41  ;;  %v186_v37 = vld [vmem:[%s14067_s1 + $0x4d0] sm:$0xff]  ;;  %v191_v40 = vld [vmem:[%s14067_s1 + $0x4f8] sm:$0xff]  ;;  %v9025_v41 = vcombine.low %v178_v28, %v182_v29 }
 0x13b   :  { %3984 = vmatprep.subr.bf16.mxu0 %v8930_v52  ;;  %4189 = vmatprep.subr.bf16.mxu1 %v8932_v54  ;;  %v8986_v52 = vcombine.high %v138_v46, %v142_v47  ;;  %v8988_v54 = vcombine.high %v139_v48, %v143_v49  ;;  %v190_v38 = vld [vmem:[%s14067_s1 + $0x4f0] sm:$0xff] }
 0x13e   :  { %3985 = vmatpush1.bf16.msra.mxu0 %v8929_v61  ;;  %4190 = vmatpush1.bf16.msra.mxu1 %v8931_v62  ;;  %v8985_v61 = vcombine.low %v138_v46, %v142_v47  ;;  %v8987_v62 = vcombine.low %v139_v48, %v143_v49  ;;  %v198_v46 = vld [vmem:[%s14067_s1 + $0x530] sm:$0xff]  ;;  %v199_v47 = vld [vmem:[%s14067_s1 + $0x538] sm:$0xff]  ;;  %v9033_v48 = vcombine.low %v186_v37, %v190_v38 }
 0x13f   :  { %3986 = vmatprep.subr.bf16.mxu0 %v8938_v39  ;;  %4191 = vmatprep.subr.bf16.mxu1 %v8940_v63  ;;  %v8994_v39 = vcombine.high %v146_v56, %v150_v58  ;;  %v8996_v63 = vcombine.high %v147_v59, %v151_v60 }
 0x142   :  { %3987 = vmatpush1.bf16.msra.mxu0 %v8937_v4  ;;  %4192 = vmatpush1.bf16.msra.mxu1 %v8939_v5  ;;  %v8993_v4 = vcombine.low %v146_v56, %v150_v58  ;;  %v8995_v5 = vcombine.low %v147_v59, %v151_v60  ;;  %v203_v56 = vld [vmem:[%s14067_s1 + $0x558] sm:$0xff] }
 0x143   :  { %3988 = vmatprep.subr.bf16.mxu0 %v8946_v6  ;;  %4193 = vmatprep.subr.bf16.mxu1 %v8948_v7  ;;  %v9002_v6 = vcombine.high %v154_v0, %v158_v1  ;;  %v9004_v7 = vcombine.high %v155_v2, %v159_v3  ;;  %v207_v58 = vld [vmem:[%s14067_s1 + $0x578] sm:$0xff] }
 0x146   :  { %3989 = vmatpush1.bf16.msra.mxu0 %v8945_v14  ;;  %4194 = vmatpush1.bf16.msra.mxu1 %v8947_v16  ;;  %v9001_v14 = vcombine.low %v154_v0, %v158_v1  ;;  %v9003_v16 = vcombine.low %v155_v2, %v159_v3  ;;  %v211_v0 = vld [vmem:[%s14067_s1 + $0x598] sm:$0xff]  ;;  %v9051_v3 = vcombine.low %v203_v56, %v207_v58 }
 0x147   :  { %3990 = vmatprep.subr.bf16.mxu0 %v8954_v17  ;;  %4195 = vmatprep.subr.bf16.mxu1 %v8956_v53  ;;  %v9010_v17 = vcombine.high %v162_v9, %v166_v10  ;;  %v9012_v53 = vcombine.high %v163_v11, %v167_v13  ;;  %v215_v1 = vld [vmem:[%s14067_s1 + $0x5b8] sm:$0xff] }
 0x14a   :  { %3991 = vmatpush1.bf16.msra.mxu0 %v8953_v24  ;;  %4196 = vmatpush1.bf16.msra.mxu1 %v8955_v26  ;;  %v9009_v24 = vcombine.low %v162_v9, %v166_v10  ;;  %v9011_v26 = vcombine.low %v163_v11, %v167_v13  ;;  %v219_v9 = vld [vmem:[%s14067_s1 + $0x5d8] sm:$0xff]  ;;  %v9059_v13 = vcombine.low %v211_v0, %v215_v1 }
 0x14b   :  { %3992 = vmatprep.subr.bf16.mxu0 %v8962_v27  ;;  %4197 = vmatprep.subr.bf16.mxu1 %v8964_v15  ;;  %v9018_v27 = vcombine.high %v170_v18, %v174_v19  ;;  %v9020_v15 = vcombine.high %v171_v20, %v175_v23  ;;  %v223_v10 = vld [vmem:[%s14067_s1 + $0x5f8] sm:$0xff] }
 0x14e   :  { %3993 = vmatpush1.bf16.msra.mxu0 %v8961_v32  ;;  %4198 = vmatpush1.bf16.msra.mxu1 %v8963_v33  ;;  %v9017_v32 = vcombine.low %v170_v18, %v174_v19  ;;  %v9019_v33 = vcombine.low %v171_v20, %v175_v23  ;;  %v227_v18 = vld [vmem:[%s14067_s1 + $0x618] sm:$0xff]  ;;  %v9067_v23 = vcombine.low %v219_v9, %v223_v10 }
 0x14f   :  { %3994 = vmatprep.subr.bf16.mxu0 %v8970_v34  ;;  %4199 = vmatprep.subr.bf16.mxu1 %v8972_v35  ;;  %v9026_v34 = vcombine.high %v178_v28, %v182_v29  ;;  %v9028_v35 = vcombine.high %v179_v57, %v183_v30  ;;  %v231_v19 = vld [vmem:[%s14067_s1 + $0x638] sm:$0xff] }
 0x150   :  { %v235_v28 = vld [vmem:[%s14067_s1 + $0x658] sm:$0xff] }
 0x151   :  { %v239_v29 = vld [vmem:[%s14067_s1 + $0x678] sm:$0xff] }
 0x152   :  { %3995 = vmatpush1.bf16.msra.mxu0 %v8969_v25  ;;  %4200 = vmatpush1.bf16.msra.mxu1 %v8971_v42  ;;  %v9027_v25 = vcombine.low %v179_v57, %v183_v30  ;;  %v9034_v42 = vcombine.high %v186_v37, %v190_v38  ;;  %v9075_v30 = vcombine.low %v227_v18, %v231_v19  ;;  %v243_v37 = vld [vmem:[%s14067_s1 + $0x698] sm:$0xff] }
 0x153   :  { %3996 = vmatprep.subr.bf16.mxu0 %v8978_v43  ;;  %4201 = vmatprep.subr.bf16.mxu1 %v8980_v44  ;;  %v194_v44 = vld [vmem:[%s14067_s1 + $0x510] sm:$0xff]  ;;  %v247_v38 = vld [vmem:[%s14067_s1 + $0x6b8] sm:$0xff] }
 0x154   :  { %v9041_v59 = vcombine.low %v194_v44, %v198_v46 }
 0x156   :  { %3997 = vmatpush1.bf16.msra.mxu0 %v8977_v50  ;;  %4202 = vmatpush1.bf16.msra.mxu1 %v8979_v51  ;;  %v9042_v50 = vcombine.high %v194_v44, %v198_v46  ;;  %v251_v44 = vld [vmem:[%s14067_s1 + $0x6d8] sm:$0xff] }
 0x157   :  { %3998 = vmatprep.subr.bf16.mxu0 %v8986_v52  ;;  %4203 = vmatprep.subr.bf16.mxu1 %v8988_v54  ;;  %v202_v52 = vld [vmem:[%s14067_s1 + $0x550] sm:$0xff]  ;;  %v255_v46 = vld [vmem:[%s14067_s1 + $0x6f8] sm:$0xff] }
 0x158   :  { %v206_v54 = vld [vmem:[%s14067_s1 + $0x570] sm:$0xff] }
 0x159   :  { %v9049_v2 = vcombine.low %v202_v52, %v206_v54 }
 0x15a   :  { %3999 = vmatpush1.bf16.msra.mxu0 %v8985_v61  ;;  %4204 = vmatpush1.bf16.msra.mxu1 %v8987_v62  ;;  %v9050_v61 = vcombine.high %v202_v52, %v206_v54  ;;  %v9052_v62 = vcombine.high %v203_v56, %v207_v58  ;;  %v259_v52 = vld [vmem:[%s14067_s1 + $0x718] sm:$0xff]  ;;  %v9099_v58 = vcombine.low %v251_v44, %v255_v46 }
 0x15b   :  { %4000 = vmatprep.subr.bf16.mxu0 %v8994_v39  ;;  %4205 = vmatprep.subr.bf16.mxu1 %v8996_v63  ;;  %v210_v39 = vld [vmem:[%s14067_s1 + $0x590] sm:$0xff]  ;;  %v263_v54 = vld [vmem:[%s14067_s1 + $0x738] sm:$0xff] }
 0x15c   :  { %v214_v63 = vld [vmem:[%s14067_s1 + $0x5b0] sm:$0xff] }
 0x15d   :  { %v9057_v11 = vcombine.low %v210_v39, %v214_v63 }
 0x15e   :  { %4001 = vmatpush1.bf16.msra.mxu0 %v8993_v4  ;;  %4206 = vmatpush1.bf16.msra.mxu1 %v8995_v5  ;;  %v9058_v4 = vcombine.high %v210_v39, %v214_v63  ;;  %v9060_v5 = vcombine.high %v211_v0, %v215_v1  ;;  %v267_v39 = vld [vmem:[%s14067_s1 + $0x758] sm:$0xff]  ;;  %v9107_v1 = vcombine.low %v259_v52, %v263_v54 }
 0x15f   :  { %4002 = vmatprep.subr.bf16.mxu0 %v9002_v6  ;;  %4207 = vmatprep.subr.bf16.mxu1 %v9004_v7  ;;  %v218_v6 = vld [vmem:[%s14067_s1 + $0x5d0] sm:$0xff]  ;;  %v271_v63 = vld [vmem:[%s14067_s1 + $0x778] sm:$0xff] }
 0x160   :  { %v222_v7 = vld [vmem:[%s14067_s1 + $0x5f0] sm:$0xff] }
 0x161   :  { %v9065_v20 = vcombine.low %v218_v6, %v222_v7 }
 0x162   :  { %4003 = vmatpush1.bf16.msra.mxu0 %v9001_v14  ;;  %4208 = vmatpush1.bf16.msra.mxu1 %v9003_v16  ;;  %v9066_v14 = vcombine.high %v218_v6, %v222_v7  ;;  %v9068_v16 = vcombine.high %v219_v9, %v223_v10  ;;  %v275_v6 = vld [vmem:[%s14067_s1 + $0x798] sm:$0xff]  ;;  %v9115_v10 = vcombine.low %v267_v39, %v271_v63 }
 0x163   :  { %4013 = vmatprep.subr.bf16.mxu0 %v9010_v17  ;;  %4218 = vmatprep.subr.bf16.mxu1 %v9012_v53  ;;  %v226_v17 = vld [vmem:[%s14067_s1 + $0x610] sm:$0xff]  ;;  %v279_v7 = vld [vmem:[%s14067_s1 + $0x7b8] sm:$0xff] }
 0x164   :  { %v230_v53 = vld [vmem:[%s14067_s1 + $0x630] sm:$0xff] }
 0x165   :  { %4005 = vmatmul.mubr.bf16.vlgmr.msra.gmra.mrb[4].mxu0 %v10586_v12  ;;  %4210 = vmatmul.mubr.bf16.vlgmr.msra.gmra.mrb[4].mxu1 %v10586_v12  ;;  %v187_v12 = vld [vmem:[%s14067_s1 + $0x4d8] sm:$0xff]  ;;  %v9073_v57 = vcombine.low %v226_v17, %v230_v53 }
 0x166   :  { %4014 = vmatpush1.bf16.msra.mxu0 %v9009_v24  ;;  %4219 = vmatpush1.bf16.msra.mxu1 %v9011_v26  ;;  %v9036_v43 = vcombine.high %v187_v12, %v191_v40  ;;  %v9035_v49 = vcombine.low %v187_v12, %v191_v40  ;;  %v9074_v24 = vcombine.high %v226_v17, %v230_v53  ;;  %v283_v17 = vld [vmem:[%s14067_s1 + $0x7d8] sm:$0xff] }
 0x167   :  { %4015 = vmatprep.subr.bf16.mxu0 %v9018_v27  ;;  %4220 = vmatprep.subr.bf16.mxu1 %v9020_v15  ;;  %v9076_v26 = vcombine.high %v227_v18, %v231_v19  ;;  %v234_v27 = vld [vmem:[%s14067_s1 + $0x650] sm:$0xff]  ;;  %v9083_v40 = vcombine.low %v235_v28, %v239_v29  ;;  %v287_v53 = vld [vmem:[%s14067_s1 + $0x7f8] sm:$0xff]  ;;  %v9123_v19 = vcombine.low %v275_v6, %v279_v7 }
 0x168   :  { %4045 = vmatprep.mubr.bf16.mxu0 %v10607_v21  ;;  %4250 = vmatprep.mubr.bf16.mxu1 %v10607_v21  ;;  %v195_v21 = vld [vmem:[%s14067_s1 + $0x518] sm:$0xff]  ;;  %v238_v15 = vld [vmem:[%s14067_s1 + $0x670] sm:$0xff] }
 0x169   :  { %v9044_v51 = vcombine.high %v195_v21, %v199_v47  ;;  %v9043_v60 = vcombine.low %v195_v21, %v199_v47  ;;  %v9081_v12 = vcombine.low %v234_v27, %v238_v15  ;;  %v9091_v47 = vcombine.low %v243_v37, %v247_v38 }
 0x16a   :  { %4016 = vmatpush1.bf16.msra.mxu0 %v9017_v32  ;;  %4221 = vmatpush1.bf16.msra.mxu1 %v9019_v33  ;;  %v9082_v32 = vcombine.high %v234_v27, %v238_v15  ;;  %v9084_v33 = vcombine.high %v235_v28, %v239_v29  ;;  %v291_v27 = vld [vmem:[%s14067_s1 + $0x818] sm:$0xff]  ;;  %v9131_v29 = vcombine.low %v283_v17, %v287_v53 }
 0x16b   :  { %4017 = vmatprep.subr.bf16.mxu0 %v9026_v34  ;;  %4222 = vmatprep.subr.bf16.mxu1 %v9028_v35  ;;  %v242_v34 = vld [vmem:[%s14067_s1 + $0x690] sm:$0xff]  ;;  %v295_v15 = vld [vmem:[%s14067_s1 + $0x838] sm:$0xff] }
 0x16c   :  { %v246_v35 = vld [vmem:[%s14067_s1 + $0x6b0] sm:$0xff] }
 0x16d   :  { %v9089_v21 = vcombine.low %v242_v34, %v246_v35 }
 0x16e   :  { %4018 = vmatpush1.bf16.msra.mxu0 %v9025_v41  ;;  %4223 = vmatpush1.bf16.msra.mxu1 %v9027_v25  ;;  %v9090_v41 = vcombine.high %v242_v34, %v246_v35  ;;  %v9092_v25 = vcombine.high %v243_v37, %v247_v38  ;;  %v299_v34 = vld [vmem:[%s14067_s1 + $0x858] sm:$0xff]  ;;  %v9139_v38 = vcombine.low %v291_v27, %v295_v15 }
 0x16f   :  { %4019 = vmatprep.subr.bf16.mxu0 %v9034_v42  ;;  %4224 = vmatprep.subr.bf16.mxu1 %v9036_v43  ;;  %v250_v42 = vld [vmem:[%s14067_s1 + $0x6d0] sm:$0xff]  ;;  %v303_v35 = vld [vmem:[%s14067_s1 + $0x878] sm:$0xff] }
 0x170   :  { %v254_v43 = vld [vmem:[%s14067_s1 + $0x6f0] sm:$0xff] }
 0x171   :  { %v9097_v56 = vcombine.low %v250_v42, %v254_v43 }
 0x172   :  { %4020 = vmatpush1.bf16.msra.mxu0 %v9033_v48  ;;  %4225 = vmatpush1.bf16.msra.mxu1 %v9035_v49  ;;  %v9098_v48 = vcombine.high %v250_v42, %v254_v43  ;;  %v9100_v49 = vcombine.high %v251_v44, %v255_v46  ;;  %v307_v42 = vld [vmem:[%s14067_s1 + $0x898] sm:$0xff]  ;;  %v9147_v46 = vcombine.low %v299_v34, %v303_v35 }
 0x173   :  { %4021 = vmatprep.subr.bf16.mxu0 %v9042_v50  ;;  %4226 = vmatprep.subr.bf16.mxu1 %v9044_v51  ;;  %v258_v50 = vld [vmem:[%s14067_s1 + $0x710] sm:$0xff]  ;;  %v311_v43 = vld [vmem:[%s14067_s1 + $0x8b8] sm:$0xff] }
 0x174   :  { %v262_v51 = vld [vmem:[%s14067_s1 + $0x730] sm:$0xff] }
 0x175   :  { %v9105_v0 = vcombine.low %v258_v50, %v262_v51 }
 0x176   :  { %4022 = vmatpush1.bf16.msra.mxu0 %v9041_v59  ;;  %4227 = vmatpush1.bf16.msra.mxu1 %v9043_v60  ;;  %v9106_v59 = vcombine.high %v258_v50, %v262_v51  ;;  %v9108_v60 = vcombine.high %v259_v52, %v263_v54  ;;  %v319_v50 = vld [vmem:[%s14067_s1 + $0x8f8] sm:$0xff]  ;;  %v9155_v52 = vcombine.low %v307_v42, %v311_v43 }
 0x177   :  { %4023 = vmatprep.subr.bf16.mxu0 %v9050_v61  ;;  %4228 = vmatprep.subr.bf16.mxu1 %v9052_v62  ;;  %v266_v61 = vld [vmem:[%s14067_s1 + $0x750] sm:$0xff] }
 0x178   :  { %v270_v62 = vld [vmem:[%s14067_s1 + $0x770] sm:$0xff] }
 0x179   :  { %v9113_v9 = vcombine.low %v266_v61, %v270_v62 }
 0x17a   :  { %4024 = vmatpush1.bf16.msra.mxu0 %v9049_v2  ;;  %4229 = vmatpush1.bf16.msra.mxu1 %v9051_v3  ;;  %v9114_v2 = vcombine.high %v266_v61, %v270_v62  ;;  %v9116_v3 = vcombine.high %v267_v39, %v271_v63 }
 0x17b   :  { %4025 = vmatprep.subr.bf16.mxu0 %v9058_v4  ;;  %4230 = vmatprep.subr.bf16.mxu1 %v9060_v5  ;;  %v274_v4 = vld [vmem:[%s14067_s1 + $0x790] sm:$0xff] }
 0x17c   :  { %v278_v5 = vld [vmem:[%s14067_s1 + $0x7b0] sm:$0xff] }
 0x17d   :  { %v9121_v18 = vcombine.low %v274_v4, %v278_v5 }
 0x17e   :  { %4026 = vmatpush1.bf16.msra.mxu0 %v9057_v11  ;;  %4231 = vmatpush1.bf16.msra.mxu1 %v9059_v13  ;;  %v9122_v11 = vcombine.high %v274_v4, %v278_v5  ;;  %v9124_v13 = vcombine.high %v275_v6, %v279_v7 }
 0x17f   :  { %4027 = vmatprep.subr.bf16.mxu0 %v9066_v14  ;;  %4232 = vmatprep.subr.bf16.mxu1 %v9068_v16  ;;  %v282_v14 = vld [vmem:[%s14067_s1 + $0x7d0] sm:$0xff] }
 0x180   :  { %v286_v16 = vld [vmem:[%s14067_s1 + $0x7f0] sm:$0xff] }
 0x181   :  { %v9129_v28 = vcombine.low %v282_v14, %v286_v16 }
 0x182   :  { %4028 = vmatpush1.bf16.msra.mxu0 %v9065_v20  ;;  %4233 = vmatpush1.bf16.msra.mxu1 %v9067_v23  ;;  %v9130_v20 = vcombine.high %v282_v14, %v286_v16  ;;  %v9132_v23 = vcombine.high %v283_v17, %v287_v53 }
 0x183   :  { %4029 = vmatprep.subr.bf16.mxu0 %v9074_v24  ;;  %4234 = vmatprep.subr.bf16.mxu1 %v9076_v26  ;;  %v290_v24 = vld [vmem:[%s14067_s1 + $0x810] sm:$0xff] }
 0x184   :  { %v294_v26 = vld [vmem:[%s14067_s1 + $0x830] sm:$0xff] }
 0x185   :  { %v9137_v37 = vcombine.low %v290_v24, %v294_v26 }
 0x186   :  { %4030 = vmatpush1.bf16.msra.mxu0 %v9073_v57  ;;  %4235 = vmatpush1.bf16.msra.mxu1 %v9075_v30  ;;  %v9138_v57 = vcombine.high %v290_v24, %v294_v26  ;;  %v9140_v30 = vcombine.high %v291_v27, %v295_v15 }
 0x187   :  { %4031 = vmatprep.subr.bf16.mxu0 %v9082_v32  ;;  %4236 = vmatprep.subr.bf16.mxu1 %v9084_v33  ;;  %v298_v32 = vld [vmem:[%s14067_s1 + $0x850] sm:$0xff] }
 0x188   :  { %v302_v33 = vld [vmem:[%s14067_s1 + $0x870] sm:$0xff] }
 0x189   :  { %v9145_v44 = vcombine.low %v298_v32, %v302_v33 }
 0x18a   :  { %4032 = vmatpush1.bf16.msra.mxu0 %v9081_v12  ;;  %4237 = vmatpush1.bf16.msra.mxu1 %v9083_v40  ;;  %v9146_v12 = vcombine.high %v298_v32, %v302_v33  ;;  %v9148_v40 = vcombine.high %v299_v34, %v303_v35 }
 0x18b   :  { %4033 = vmatprep.subr.bf16.mxu0 %v9090_v41  ;;  %4238 = vmatprep.subr.bf16.mxu1 %v9092_v25  ;;  %v306_v41 = vld [vmem:[%s14067_s1 + $0x890] sm:$0xff] }
 0x18c   :  { %v310_v25 = vld [vmem:[%s14067_s1 + $0x8b0] sm:$0xff] }
 0x18d   :  { %v9153_v51 = vcombine.low %v306_v41, %v310_v25 }
 0x18e   :  { %4034 = vmatpush1.bf16.msra.mxu0 %v9089_v21  ;;  %4239 = vmatpush1.bf16.msra.mxu1 %v9091_v47  ;;  %v9154_v21 = vcombine.high %v306_v41, %v310_v25  ;;  %v9156_v47 = vcombine.high %v307_v42, %v311_v43 }
 0x18f   :  { %4035 = vmatprep.subr.bf16.mxu0 %v9098_v48  ;;  %4240 = vmatprep.subr.bf16.mxu1 %v9100_v49  ;;  %v314_v48 = vld [vmem:[%s14067_s1 + $0x8d0] sm:$0xff] }
 0x190   :  { %v318_v49 = vld [vmem:[%s14067_s1 + $0x8f0] sm:$0xff] }
 0x191   :  { %v9162_v54 = vcombine.high %v314_v48, %v318_v49  ;;  %v9161_v61 = vcombine.low %v314_v48, %v318_v49 }
 0x192   :  { %4036 = vmatpush1.bf16.msra.mxu0 %v9097_v56  ;;  %4241 = vmatpush1.bf16.msra.mxu1 %v9099_v58  ;;  %v322_v58 = vld [vmem:[%s14067_s1 + $0x910] sm:$0xff] }
 0x193   :  { %4037 = vmatprep.subr.bf16.mxu0 %v9106_v59  ;;  %4242 = vmatprep.subr.bf16.mxu1 %v9108_v60  ;;  %v326_v59 = vld [vmem:[%s14067_s1 + $0x930] sm:$0xff]  ;;  %v327_v60 = vld [vmem:[%s14067_s1 + $0x938] sm:$0xff] }
 0x194   :  { %v9170_v39 = vcombine.high %v322_v58, %v326_v59  ;;  %v9169_v4 = vcombine.low %v322_v58, %v326_v59 }
 0x196   :  { %4038 = vmatpush1.bf16.msra.mxu0 %v9105_v0  ;;  %4243 = vmatpush1.bf16.msra.mxu1 %v9107_v1  ;;  %v330_v0 = vld [vmem:[%s14067_s1 + $0x950] sm:$0xff] }
 0x197   :  { %4039 = vmatprep.subr.bf16.mxu0 %v9114_v2  ;;  %4244 = vmatprep.subr.bf16.mxu1 %v9116_v3  ;;  %v334_v1 = vld [vmem:[%s14067_s1 + $0x970] sm:$0xff]  ;;  %v331_v2 = vld [vmem:[%s14067_s1 + $0x958] sm:$0xff] }
 0x198   :  { %v335_v3 = vld [vmem:[%s14067_s1 + $0x978] sm:$0xff]  ;;  %v9178_v6 = vcombine.high %v330_v0, %v334_v1  ;;  %v9177_v14 = vcombine.low %v330_v0, %v334_v1 }
 0x199   :  { %v9180_v7 = vcombine.high %v331_v2, %v335_v3  ;;  %v9179_v16 = vcombine.low %v331_v2, %v335_v3 }
 0x19a   :  { %4040 = vmatpush1.bf16.msra.mxu0 %v9113_v9  ;;  %4245 = vmatpush1.bf16.msra.mxu1 %v9115_v10  ;;  %v338_v9 = vld [vmem:[%s14067_s1 + $0x990] sm:$0xff] }
 0x19b   :  { %4041 = vmatprep.subr.bf16.mxu0 %v9122_v11  ;;  %4246 = vmatprep.subr.bf16.mxu1 %v9124_v13  ;;  %v342_v10 = vld [vmem:[%s14067_s1 + $0x9b0] sm:$0xff]  ;;  %v339_v11 = vld [vmem:[%s14067_s1 + $0x998] sm:$0xff] }
 0x19c   :  { %v343_v13 = vld [vmem:[%s14067_s1 + $0x9b8] sm:$0xff]  ;;  %v9186_v17 = vcombine.high %v338_v9, %v342_v10  ;;  %v9185_v24 = vcombine.low %v338_v9, %v342_v10 }
 0x19d   :  { %v9188_v53 = vcombine.high %v339_v11, %v343_v13  ;;  %v9187_v26 = vcombine.low %v339_v11, %v343_v13 }
 0x19e   :  { %4042 = vmatpush1.bf16.msra.mxu0 %v9121_v18  ;;  %4247 = vmatpush1.bf16.msra.mxu1 %v9123_v19  ;;  %v346_v18 = vld [vmem:[%s14067_s1 + $0x9d0] sm:$0xff] }
 0x19f   :  { %4043 = vmatprep.subr.bf16.mxu0 %v9130_v20  ;;  %4248 = vmatprep.subr.bf16.mxu1 %v9132_v23  ;;  %v350_v19 = vld [vmem:[%s14067_s1 + $0x9f0] sm:$0xff]  ;;  %v347_v20 = vld [vmem:[%s14067_s1 + $0x9d8] sm:$0xff] }
 0x1a0   :  { %v351_v23 = vld [vmem:[%s14067_s1 + $0x9f8] sm:$0xff]  ;;  %v9194_v27 = vcombine.high %v346_v18, %v350_v19  ;;  %v9193_v32 = vcombine.low %v346_v18, %v350_v19 }
 0x1a1   :  { %v9196_v15 = vcombine.high %v347_v20, %v351_v23  ;;  %v9195_v33 = vcombine.low %v347_v20, %v351_v23 }
 0x1a2   :  { %4044 = vmatpush1.bf16.msra.mxu0 %v9129_v28  ;;  %4249 = vmatpush1.bf16.msra.mxu1 %v9131_v29  ;;  %v354_v28 = vld [vmem:[%s14067_s1 + $0xa10] sm:$0xff] }
 0x1a3   :  { %4054 = vmatprep.subr.bf16.mxu0 %v9138_v57  ;;  %4259 = vmatprep.subr.bf16.mxu1 %v9140_v30  ;;  %v358_v29 = vld [vmem:[%s14067_s1 + $0xa30] sm:$0xff]  ;;  %v355_v57 = vld [vmem:[%s14067_s1 + $0xa18] sm:$0xff] }
 0x1a4   :  { %v359_v30 = vld [vmem:[%s14067_s1 + $0xa38] sm:$0xff]  ;;  %v9202_v34 = vcombine.high %v354_v28, %v358_v29  ;;  %v9201_v41 = vcombine.low %v354_v28, %v358_v29 }
 0x1a5   :  { %4046 = vmatmul.mubr.bf16.vlgmr.msra.gmra.mrb[4].mxu0 %v10795_v22  ;;  %4251 = vmatmul.mubr.bf16.vlgmr.msra.gmra.mrb[4].mxu1 %v10795_v22  ;;  %v315_v22 = vld [vmem:[%s14067_s1 + $0x8d8] sm:$0xff]  ;;  %v9204_v35 = vcombine.high %v355_v57, %v359_v30  ;;  %v9203_v25 = vcombine.low %v355_v57, %v359_v30 }
 0x1a6   :  { %4055 = vmatpush1.bf16.msra.mxu0 %v9137_v37  ;;  %4260 = vmatpush1.bf16.msra.mxu1 %v9139_v38  ;;  %v9164_v56 = vcombine.high %v315_v22, %v319_v50  ;;  %v9163_v62 = vcombine.low %v315_v22, %v319_v50  ;;  %v362_v37 = vld [vmem:[%s14067_s1 + $0xa50] sm:$0xff] }
 0x1a7   :  { %4056 = vmatprep.subr.bf16.mxu0 %v9146_v12  ;;  %4261 = vmatprep.subr.bf16.mxu1 %v9148_v40  ;;  %v366_v38 = vld [vmem:[%s14067_s1 + $0xa70] sm:$0xff]  ;;  %v363_v12 = vld [vmem:[%s14067_s1 + $0xa58] sm:$0xff] }
 0x1a8   :  { %4086 = vmatprep.mubr.bf16.mxu0 %v10816_v31  ;;  %4291 = vmatprep.mubr.bf16.mxu1 %v10816_v31  ;;  %v323_v31 = vld [vmem:[%s14067_s1 + $0x918] sm:$0xff]  ;;  %v9210_v42 = vcombine.high %v362_v37, %v366_v38  ;;  %v9209_v48 = vcombine.low %v362_v37, %v366_v38 }
 0x1a9   :  { %v9172_v63 = vcombine.high %v323_v31, %v327_v60  ;;  %v9171_v5 = vcombine.low %v323_v31, %v327_v60  ;;  %v367_v40 = vld [vmem:[%s14067_s1 + $0xa78] sm:$0xff] }
 0x1aa   :  { %4057 = vmatpush1.bf16.msra.mxu0 %v9145_v44  ;;  %4262 = vmatpush1.bf16.msra.mxu1 %v9147_v46  ;;  %v9212_v43 = vcombine.high %v363_v12, %v367_v40  ;;  %v370_v44 = vld [vmem:[%s14067_s1 + $0xa90] sm:$0xff]  ;;  %v9211_v49 = vcombine.low %v363_v12, %v367_v40 }
 0x1ab   :  { %4058 = vmatprep.subr.bf16.mxu0 %v9154_v21  ;;  %4263 = vmatprep.subr.bf16.mxu1 %v9156_v47  ;;  %v374_v46 = vld [vmem:[%s14067_s1 + $0xab0] sm:$0xff]  ;;  %v371_v21 = vld [vmem:[%s14067_s1 + $0xa98] sm:$0xff] }
 0x1ac   :  { %v375_v47 = vld [vmem:[%s14067_s1 + $0xab8] sm:$0xff]  ;;  %v9218_v22 = vcombine.high %v370_v44, %v374_v46  ;;  %v9217_v58 = vcombine.low %v370_v44, %v374_v46 }
 0x1ad   :  { %v9220_v50 = vcombine.high %v371_v21, %v375_v47  ;;  %v9219_v59 = vcombine.low %v371_v21, %v375_v47 }
 0x1ae   :  { %4059 = vmatpush1.bf16.msra.mxu0 %v9153_v51  ;;  %4264 = vmatpush1.bf16.msra.mxu1 %v9155_v52  ;;  %v378_v51 = vld [vmem:[%s14067_s1 + $0xad0] sm:$0xff] }
 0x1af   :  { %4060 = vmatprep.subr.bf16.mxu0 %v9162_v54  ;;  %4265 = vmatprep.subr.bf16.mxu1 %v9164_v56  ;;  %v382_v52 = vld [vmem:[%s14067_s1 + $0xaf0] sm:$0xff]  ;;  %v379_v54 = vld [vmem:[%s14067_s1 + $0xad8] sm:$0xff] }
 0x1b0   :  { %v383_v56 = vld [vmem:[%s14067_s1 + $0xaf8] sm:$0xff]  ;;  %v9226_v31 = vcombine.high %v378_v51, %v382_v52  ;;  %v9225_v0 = vcombine.low %v378_v51, %v382_v52 }
 0x1b1   :  { %v9228_v60 = vcombine.high %v379_v54, %v383_v56  ;;  %v9227_v1 = vcombine.low %v379_v54, %v383_v56 }
 0x1b2   :  { %4061 = vmatpush1.bf16.msra.mxu0 %v9161_v61  ;;  %4266 = vmatpush1.bf16.msra.mxu1 %v9163_v62  ;;  %v386_v61 = vld [vmem:[%s14067_s1 + $0xb10] sm:$0xff] }
 0x1b3   :  { %4062 = vmatprep.subr.bf16.mxu0 %v9170_v39  ;;  %4267 = vmatprep.subr.bf16.mxu1 %v9172_v63  ;;  %v390_v62 = vld [vmem:[%s14067_s1 + $0xb30] sm:$0xff]  ;;  %v387_v39 = vld [vmem:[%s14067_s1 + $0xb18] sm:$0xff] }
 0x1b4   :  { %v391_v63 = vld [vmem:[%s14067_s1 + $0xb38] sm:$0xff]  ;;  %v9234_v2 = vcombine.high %v386_v61, %v390_v62  ;;  %v9233_v9 = vcombine.low %v386_v61, %v390_v62 }
 0x1b5   :  { %v9236_v3 = vcombine.high %v387_v39, %v391_v63  ;;  %v9235_v10 = vcombine.low %v387_v39, %v391_v63  ;;  %v450_v63 = vld [vmem:[%s14067_s1 + $0xd10] sm:$0xff] }
 0x1b6   :  { %4063 = vmatpush1.bf16.msra.mxu0 %v9169_v4  ;;  %4268 = vmatpush1.bf16.msra.mxu1 %v9171_v5  ;;  %v394_v4 = vld [vmem:[%s14067_s1 + $0xb50] sm:$0xff] }
 0x1b7   :  { %4064 = vmatprep.subr.bf16.mxu0 %v9178_v6  ;;  %4269 = vmatprep.subr.bf16.mxu1 %v9180_v7  ;;  %v398_v5 = vld [vmem:[%s14067_s1 + $0xb70] sm:$0xff]  ;;  %v395_v6 = vld [vmem:[%s14067_s1 + $0xb58] sm:$0xff] }
 0x1b8   :  { %v399_v7 = vld [vmem:[%s14067_s1 + $0xb78] sm:$0xff]  ;;  %v9242_v11 = vcombine.high %v394_v4, %v398_v5  ;;  %v9241_v18 = vcombine.low %v394_v4, %v398_v5 }
 0x1b9   :  { %v9244_v13 = vcombine.high %v395_v6, %v399_v7  ;;  %v9243_v19 = vcombine.low %v395_v6, %v399_v7  ;;  %v458_v6 = vld [vmem:[%s14067_s1 + $0xd50] sm:$0xff] }
 0x1ba   :  { %4065 = vmatpush1.bf16.msra.mxu0 %v9177_v14  ;;  %4270 = vmatpush1.bf16.msra.mxu1 %v9179_v16  ;;  %v402_v14 = vld [vmem:[%s14067_s1 + $0xb90] sm:$0xff] }
 0x1bb   :  { %4066 = vmatprep.subr.bf16.mxu0 %v9186_v17  ;;  %4271 = vmatprep.subr.bf16.mxu1 %v9188_v53  ;;  %v406_v16 = vld [vmem:[%s14067_s1 + $0xbb0] sm:$0xff]  ;;  %v403_v17 = vld [vmem:[%s14067_s1 + $0xb98] sm:$0xff] }
 0x1bc   :  { %v407_v53 = vld [vmem:[%s14067_s1 + $0xbb8] sm:$0xff]  ;;  %v9250_v20 = vcombine.high %v402_v14, %v406_v16  ;;  %v9249_v28 = vcombine.low %v402_v14, %v406_v16  ;;  %v462_v7 = vld [vmem:[%s14067_s1 + $0xd70] sm:$0xff] }
 0x1bd   :  { %v9252_v23 = vcombine.high %v403_v17, %v407_v53  ;;  %v9251_v29 = vcombine.low %v403_v17, %v407_v53  ;;  %v9306_v14 = vcombine.high %v458_v6, %v462_v7  ;;  %v466_v17 = vld [vmem:[%s14067_s1 + $0xd90] sm:$0xff] }
 0x1be   :  { %4067 = vmatpush1.bf16.msra.mxu0 %v9185_v24  ;;  %4272 = vmatpush1.bf16.msra.mxu1 %v9187_v26  ;;  %v410_v24 = vld [vmem:[%s14067_s1 + $0xbd0] sm:$0xff] }
 0x1bf   :  { %4068 = vmatprep.subr.bf16.mxu0 %v9194_v27  ;;  %4273 = vmatprep.subr.bf16.mxu1 %v9196_v15  ;;  %v414_v26 = vld [vmem:[%s14067_s1 + $0xbf0] sm:$0xff]  ;;  %v411_v27 = vld [vmem:[%s14067_s1 + $0xbd8] sm:$0xff] }
 0x1c0   :  { %v415_v15 = vld [vmem:[%s14067_s1 + $0xbf8] sm:$0xff]  ;;  %v9258_v57 = vcombine.high %v410_v24, %v414_v26  ;;  %v9257_v37 = vcombine.low %v410_v24, %v414_v26  ;;  %v470_v53 = vld [vmem:[%s14067_s1 + $0xdb0] sm:$0xff] }
 0x1c1   :  { %v9260_v30 = vcombine.high %v411_v27, %v415_v15  ;;  %v9259_v38 = vcombine.low %v411_v27, %v415_v15  ;;  %v9314_v24 = vcombine.high %v466_v17, %v470_v53  ;;  %v474_v15 = vld [vmem:[%s14067_s1 + $0xdd0] sm:$0xff] }
 0x1c2   :  { %4069 = vmatpush1.bf16.msra.mxu0 %v9193_v32  ;;  %4274 = vmatpush1.bf16.msra.mxu1 %v9195_v33  ;;  %v418_v32 = vld [vmem:[%s14067_s1 + $0xc10] sm:$0xff] }
 0x1c3   :  { %4070 = vmatprep.subr.bf16.mxu0 %v9202_v34  ;;  %4275 = vmatprep.subr.bf16.mxu1 %v9204_v35  ;;  %v422_v33 = vld [vmem:[%s14067_s1 + $0xc30] sm:$0xff]  ;;  %v419_v34 = vld [vmem:[%s14067_s1 + $0xc18] sm:$0xff] }
 0x1c4   :  { %v423_v35 = vld [vmem:[%s14067_s1 + $0xc38] sm:$0xff]  ;;  %v9266_v12 = vcombine.high %v418_v32, %v422_v33  ;;  %v9265_v44 = vcombine.low %v418_v32, %v422_v33 }
 0x1c5   :  { %v9268_v40 = vcombine.high %v419_v34, %v423_v35  ;;  %v9267_v46 = vcombine.low %v419_v34, %v423_v35  ;;  %v479_v32 = vld [vmem:[%s14067_s1 + $0xdf8] sm:$0xff]  ;;  %v9313_v35 = vcombine.low %v466_v17, %v470_v53 }
 0x1c6   :  { %4071 = vmatpush1.bf16.msra.mxu0 %v9201_v41  ;;  %4276 = vmatpush1.bf16.msra.mxu1 %v9203_v25  ;;  %v426_v41 = vld [vmem:[%s14067_s1 + $0xc50] sm:$0xff] }
 0x1c7   :  { %4072 = vmatprep.subr.bf16.mxu0 %v9210_v42  ;;  %4277 = vmatprep.subr.bf16.mxu1 %v9212_v43  ;;  %v430_v25 = vld [vmem:[%s14067_s1 + $0xc70] sm:$0xff]  ;;  %v427_v42 = vld [vmem:[%s14067_s1 + $0xc58] sm:$0xff] }
 0x1c8   :  { %v431_v43 = vld [vmem:[%s14067_s1 + $0xc78] sm:$0xff]  ;;  %v9274_v21 = vcombine.high %v426_v41, %v430_v25  ;;  %v9273_v51 = vcombine.low %v426_v41, %v430_v25 }
 0x1c9   :  { %v9276_v47 = vcombine.high %v427_v42, %v431_v43  ;;  %v9275_v52 = vcombine.low %v427_v42, %v431_v43  ;;  %v482_v42 = vld [vmem:[%s14067_s1 + $0xe10] sm:$0xff] }
 0x1ca   :  { %4073 = vmatpush1.bf16.msra.mxu0 %v9209_v48  ;;  %4278 = vmatpush1.bf16.msra.mxu1 %v9211_v49  ;;  %v434_v48 = vld [vmem:[%s14067_s1 + $0xc90] sm:$0xff] }
 0x1cb   :  { %4074 = vmatprep.subr.bf16.mxu0 %v9218_v22  ;;  %4279 = vmatprep.subr.bf16.mxu1 %v9220_v50  ;;  %v438_v49 = vld [vmem:[%s14067_s1 + $0xcb0] sm:$0xff]  ;;  %v435_v22 = vld [vmem:[%s14067_s1 + $0xc98] sm:$0xff] }
 0x1cc   :  { %v439_v50 = vld [vmem:[%s14067_s1 + $0xcb8] sm:$0xff]  ;;  %v9282_v54 = vcombine.high %v434_v48, %v438_v49  ;;  %v486_v43 = vld [vmem:[%s14067_s1 + $0xe30] sm:$0xff] }
 0x1cd   :  { %v9284_v56 = vcombine.high %v435_v22, %v439_v50  ;;  %v9283_v61 = vcombine.low %v435_v22, %v439_v50  ;;  %v490_v22 = vld [vmem:[%s14067_s1 + $0xe50] sm:$0xff] }
 0x1ce   :  { %4075 = vmatpush1.bf16.msra.mxu0 %v9217_v58  ;;  %4280 = vmatpush1.bf16.msra.mxu1 %v9219_v59  ;;  %v442_v58 = vld [vmem:[%s14067_s1 + $0xcd0] sm:$0xff] }
 0x1cf   :  { %4076 = vmatprep.subr.bf16.mxu0 %v9226_v31  ;;  %4281 = vmatprep.subr.bf16.mxu1 %v9228_v60  ;;  %v446_v59 = vld [vmem:[%s14067_s1 + $0xcf0] sm:$0xff]  ;;  %v447_v31 = vld [vmem:[%s14067_s1 + $0xcf8] sm:$0xff]  ;;  %v9281_v60 = vcombine.low %v434_v48, %v438_v49  ;;  %v9330_v48 = vcombine.high %v482_v42, %v486_v43 }
 0x1d0   :  { %v9290_v62 = vcombine.high %v442_v58, %v446_v59  ;;  %v494_v50 = vld [vmem:[%s14067_s1 + $0xe70] sm:$0xff] }
 0x1d2   :  { %4077 = vmatpush1.bf16.msra.mxu0 %v9225_v0  ;;  %4282 = vmatpush1.bf16.msra.mxu1 %v9227_v1  ;;  %v454_v0 = vld [vmem:[%s14067_s1 + $0xd30] sm:$0xff]  ;;  %v455_v1 = vld [vmem:[%s14067_s1 + $0xd38] sm:$0xff] }
 0x1d3   :  { %4078 = vmatprep.subr.bf16.mxu0 %v9234_v2  ;;  %4283 = vmatprep.subr.bf16.mxu1 %v9236_v3  ;;  %v9289_v2 = vcombine.low %v442_v58, %v446_v59  ;;  %v9298_v4 = vcombine.high %v450_v63, %v454_v0  ;;  %v9338_v58 = vcombine.high %v490_v22, %v494_v50 }
 0x1d6   :  { %4079 = vmatpush1.bf16.msra.mxu0 %v9233_v9  ;;  %4284 = vmatpush1.bf16.msra.mxu1 %v9235_v10  ;;  %v459_v9 = vld [vmem:[%s14067_s1 + $0xd58] sm:$0xff] }
 0x1d7   :  { %4080 = vmatprep.subr.bf16.mxu0 %v9242_v11  ;;  %4285 = vmatprep.subr.bf16.mxu1 %v9244_v13  ;;  %v463_v10 = vld [vmem:[%s14067_s1 + $0xd78] sm:$0xff]  ;;  %v9297_v11 = vcombine.low %v450_v63, %v454_v0 }
 0x1d8   :  { %v9308_v16 = vcombine.high %v459_v9, %v463_v10 }
 0x1da   :  { %4081 = vmatpush1.bf16.msra.mxu0 %v9241_v18  ;;  %4286 = vmatpush1.bf16.msra.mxu1 %v9243_v19  ;;  %v467_v18 = vld [vmem:[%s14067_s1 + $0xd98] sm:$0xff] }
 0x1db   :  { %4082 = vmatprep.subr.bf16.mxu0 %v9250_v20  ;;  %4287 = vmatprep.subr.bf16.mxu1 %v9252_v23  ;;  %v471_v19 = vld [vmem:[%s14067_s1 + $0xdb8] sm:$0xff]  ;;  %v9305_v20 = vcombine.low %v458_v6, %v462_v7  ;;  %v9307_v23 = vcombine.low %v459_v9, %v463_v10  ;;  %v514_v9 = vld [vmem:[%s14067_s1 + $0xf10] sm:$0xff] }
 0x1dc   :  { %v9316_v27 = vcombine.high %v467_v18, %v471_v19  ;;  %v518_v10 = vld [vmem:[%s14067_s1 + $0xf30] sm:$0xff] }
 0x1dd   :  { %v9362_v17 = vcombine.high %v514_v9, %v518_v10 }
 0x1de   :  { %4083 = vmatpush1.bf16.msra.mxu0 %v9249_v28  ;;  %4288 = vmatpush1.bf16.msra.mxu1 %v9251_v29  ;;  %v478_v28 = vld [vmem:[%s14067_s1 + $0xdf0] sm:$0xff] }
 0x1df   :  { %4084 = vmatprep.subr.bf16.mxu0 %v9258_v57  ;;  %4289 = vmatprep.subr.bf16.mxu1 %v9260_v30  ;;  %v475_v30 = vld [vmem:[%s14067_s1 + $0xdd8] sm:$0xff] }
 0x1e0   :  { %v9324_v25 = vcombine.high %v475_v30, %v479_v32 }
 0x1e2   :  { %4085 = vmatpush1.bf16.msra.mxu0 %v9257_v37  ;;  %4290 = vmatpush1.bf16.msra.mxu1 %v9259_v38 }
 0x1e3   :  { %4095 = vmatprep.subr.bf16.mxu0 %v9266_v12  ;;  %4300 = vmatprep.subr.bf16.mxu1 %v9268_v40  ;;  %v9315_v12 = vcombine.low %v467_v18, %v471_v19  ;;  %v9322_v40 = vcombine.high %v474_v15, %v478_v28  ;;  %v522_v18 = vld [vmem:[%s14067_s1 + $0xf50] sm:$0xff] }
 0x1e4   :  { %v526_v19 = vld [vmem:[%s14067_s1 + $0xf70] sm:$0xff] }
 0x1e5   :  { %4087 = vmatmul.mubr.bf16.vlgmr.msra.gmra.mrb[4].mxu0 %v11004_v36  ;;  %4292 = vmatmul.mubr.bf16.vlgmr.msra.gmra.mrb[4].mxu1 %v11004_v36  ;;  %v443_v36 = vld [vmem:[%s14067_s1 + $0xcd8] sm:$0xff] }
 0x1e6   :  { %4096 = vmatpush1.bf16.msra.mxu0 %v9265_v44  ;;  %4301 = vmatpush1.bf16.msra.mxu1 %v9267_v46  ;;  %v9292_v39 = vcombine.high %v443_v36, %v447_v31  ;;  %v9291_v3 = vcombine.low %v443_v36, %v447_v31  ;;  %v483_v44 = vld [vmem:[%s14067_s1 + $0xe18] sm:$0xff]  ;;  %v498_v36 = vld [vmem:[%s14067_s1 + $0xe90] sm:$0xff] }
 0x1e7   :  { %4097 = vmatprep.subr.bf16.mxu0 %v9274_v21  ;;  %4302 = vmatprep.subr.bf16.mxu1 %v9276_v47  ;;  %v487_v46 = vld [vmem:[%s14067_s1 + $0xe38] sm:$0xff]  ;;  %v9321_v21 = vcombine.low %v474_v15, %v478_v28  ;;  %v9323_v47 = vcombine.low %v475_v30, %v479_v32  ;;  %v502_v31 = vld [vmem:[%s14067_s1 + $0xeb0] sm:$0xff]  ;;  %v9370_v15 = vcombine.high %v522_v18, %v526_v19 }
 0x1e8   :  { %4127 = vmatprep.mubr.bf16.mxu0 %v11025_v45  ;;  %4332 = vmatprep.mubr.bf16.mxu1 %v11025_v45  ;;  %v451_v45 = vld [vmem:[%s14067_s1 + $0xd18] sm:$0xff]  ;;  %v9332_v49 = vcombine.high %v483_v44, %v487_v46  ;;  %v9346_v63 = vcombine.high %v498_v36, %v502_v31  ;;  %v530_v30 = vld [vmem:[%s14067_s1 + $0xf90] sm:$0xff] }
 0x1e9   :  { %v9300_v5 = vcombine.high %v451_v45, %v455_v1  ;;  %v9299_v13 = vcombine.low %v451_v45, %v455_v1  ;;  %v506_v45 = vld [vmem:[%s14067_s1 + $0xed0] sm:$0xff] }
 0x1ea   :  { %4098 = vmatpush1.bf16.msra.mxu0 %v9273_v51  ;;  %4303 = vmatpush1.bf16.msra.mxu1 %v9275_v52  ;;  %v491_v51 = vld [vmem:[%s14067_s1 + $0xe58] sm:$0xff]  ;;  %v510_v1 = vld [vmem:[%s14067_s1 + $0xef0] sm:$0xff] }
 0x1eb   :  { %4099 = vmatprep.subr.bf16.mxu0 %v9282_v54  ;;  %4304 = vmatprep.subr.bf16.mxu1 %v9284_v56  ;;  %v495_v52 = vld [vmem:[%s14067_s1 + $0xe78] sm:$0xff]  ;;  %v9329_v54 = vcombine.low %v482_v42, %v486_v43  ;;  %v9331_v56 = vcombine.low %v483_v44, %v487_v46  ;;  %v9354_v6 = vcombine.high %v506_v45, %v510_v1  ;;  %v534_v32 = vld [vmem:[%s14067_s1 + $0xfb0] sm:$0xff] }
 0x1ec   :  { %v9340_v59 = vcombine.high %v491_v51, %v495_v52  ;;  %v539_v42 = vld [vmem:[%s14067_s1 + $0xfd8] sm:$0xff]  ;;  %v9377_v44 = vcombine.low %v530_v30, %v534_v32 }
 0x1ed   :  { %v543_v43 = vld [vmem:[%s14067_s1 + $0xff8] sm:$0xff] }
 0x1ee   :  { %4100 = vmatpush1.bf16.msra.mxu0 %v9281_v60  ;;  %4305 = vmatpush1.bf16.msra.mxu1 %v9283_v61  ;;  %v499_v60 = vld [vmem:[%s14067_s1 + $0xe98] sm:$0xff] }
 0x1ef   :  { %4101 = vmatprep.subr.bf16.mxu0 %v9290_v62  ;;  %4306 = vmatprep.subr.bf16.mxu1 %v9292_v39  ;;  %v503_v61 = vld [vmem:[%s14067_s1 + $0xeb8] sm:$0xff]  ;;  %v9337_v62 = vcombine.low %v490_v22, %v494_v50  ;;  %v9339_v39 = vcombine.low %v491_v51, %v495_v52  ;;  %v9387_v52 = vcombine.low %v539_v42, %v543_v43 }
 0x1f0   :  { %v9348_v0 = vcombine.high %v499_v60, %v503_v61  ;;  %v547_v22 = vld [vmem:[%s14067_s1 + $0x1018] sm:$0xff] }
 0x1f1   :  { %v551_v50 = vld [vmem:[%s14067_s1 + $0x1038] sm:$0xff] }
 0x1f2   :  { %4102 = vmatpush1.bf16.msra.mxu0 %v9289_v2  ;;  %4307 = vmatpush1.bf16.msra.mxu1 %v9291_v3  ;;  %v507_v2 = vld [vmem:[%s14067_s1 + $0xed8] sm:$0xff] }
 0x1f3   :  { %4103 = vmatprep.subr.bf16.mxu0 %v9298_v4  ;;  %4308 = vmatprep.subr.bf16.mxu1 %v9300_v5  ;;  %v511_v3 = vld [vmem:[%s14067_s1 + $0xef8] sm:$0xff]  ;;  %v9345_v4 = vcombine.low %v498_v36, %v502_v31  ;;  %v9347_v5 = vcombine.low %v499_v60, %v503_v61  ;;  %v9395_v61 = vcombine.low %v547_v22, %v551_v50 }
 0x1f4   :  { %v9356_v7 = vcombine.high %v507_v2, %v511_v3  ;;  %v555_v36 = vld [vmem:[%s14067_s1 + $0x1058] sm:$0xff] }
 0x1f5   :  { %v559_v31 = vld [vmem:[%s14067_s1 + $0x1078] sm:$0xff] }
 0x1f6   :  { %4104 = vmatpush1.bf16.msra.mxu0 %v9297_v11  ;;  %4309 = vmatpush1.bf16.msra.mxu1 %v9299_v13  ;;  %v515_v11 = vld [vmem:[%s14067_s1 + $0xf18] sm:$0xff] }
 0x1f7   :  { %4105 = vmatprep.subr.bf16.mxu0 %v9306_v14  ;;  %4310 = vmatprep.subr.bf16.mxu1 %v9308_v16  ;;  %v519_v13 = vld [vmem:[%s14067_s1 + $0xf38] sm:$0xff]  ;;  %v9353_v14 = vcombine.low %v506_v45, %v510_v1  ;;  %v9355_v16 = vcombine.low %v507_v2, %v511_v3  ;;  %v9403_v3 = vcombine.low %v555_v36, %v559_v31 }
 0x1f8   :  { %v11974_v26 = vpop.f32.mrb[0].mxu0  ;;  %v11982_v29 = vpop.f32.mrb[0].mxu1  ;;  %v9364_v53 = vcombine.high %v515_v11, %v519_v13  ;;  %v563_v45 = vld [vmem:[%s14067_s1 + $0x1098] sm:$0xff] }
 0x1f9   :  { %v11984_v57 = vpop.f32.mrb[1].mxu0  ;;  %v11992_v33 = vpop.f32.mrb[1].mxu1  ;;  %v567_v1 = vld [vmem:[%s14067_s1 + $0x10b8] sm:$0xff] }
 0x1fa   :  { %v3764_v34 = vpop.f32.mrb[2].mxu0  ;;  %4106 = vmatpush1.bf16.msra.mxu0 %v9305_v20  ;;  %v3969_v37 = vpop.f32.mrb[2].mxu1  ;;  %4311 = vmatpush1.bf16.msra.mxu1 %v9307_v23  ;;  %v523_v20 = vld [vmem:[%s14067_s1 + $0xf58] sm:$0xff] }
 0x1fb   :  { %v3765_v38 = vpop.f32.mrb[3].mxu0  ;;  %4107 = vmatprep.subr.bf16.mxu0 %v9314_v24  ;;  %v3970_v41 = vpop.f32.mrb[3].mxu1  ;;  %4312 = vmatprep.subr.bf16.mxu1 %v9316_v27  ;;  %v527_v23 = vld [vmem:[%s14067_s1 + $0xf78] sm:$0xff]  ;;  %v9361_v24 = vcombine.low %v514_v9, %v518_v10  ;;  %v9363_v27 = vcombine.low %v515_v11, %v519_v13  ;;  %v9369_v37 = vcombine.low %v522_v18, %v526_v19 }
 0x1fc   :  { %v9372_v28 = vcombine.high %v523_v20, %v527_v23  ;;  %v531_v34 = vld [vmem:[%s14067_s1 + $0xf98] sm:$0xff]  ;;  %v9371_v38 = vcombine.low %v523_v20, %v527_v23  ;;  %v538_v41 = vld [vmem:[%s14067_s1 + $0xfd0] sm:$0xff]  ;;  %v9411_v11 = vcombine.low %v563_v45, %v567_v1 }
 0x1fd   :  { %v575_v9 = vld [vmem:[%s14067_s1 + $0x10f8] sm:$0xff] }
 0x1fe   :  { %4108 = vmatpush1.bf16.msra.mxu0 %v9313_v35  ;;  %4313 = vmatpush1.bf16.msra.mxu1 %v9315_v12  ;;  %v535_v35 = vld [vmem:[%s14067_s1 + $0xfb8] sm:$0xff]  ;;  %v9378_v12 = vcombine.high %v530_v30, %v534_v32 }
 0x1ff   :  { %4109 = vmatprep.subr.bf16.mxu0 %v9322_v40  ;;  %4314 = vmatprep.subr.bf16.mxu1 %v9324_v25  ;;  %v9380_v40 = vcombine.high %v531_v34, %v535_v35  ;;  %v542_v25 = vld [vmem:[%s14067_s1 + $0xff0] sm:$0xff]  ;;  %v9379_v46 = vcombine.low %v531_v34, %v535_v35  ;;  %v583_v18 = vld [vmem:[%s14067_s1 + $0x1138] sm:$0xff] }
 0x200   :  { %v9385_v51 = vcombine.low %v538_v41, %v542_v25  ;;  %v587_v30 = vld [vmem:[%s14067_s1 + $0x1158] sm:$0xff] }
 0x201   :  { %v591_v32 = vld [vmem:[%s14067_s1 + $0x1178] sm:$0xff] }
 0x202   :  { %4110 = vmatpush1.bf16.msra.mxu0 %v9321_v21  ;;  %4315 = vmatpush1.bf16.msra.mxu1 %v9323_v47  ;;  %v9386_v21 = vcombine.high %v538_v41, %v542_v25  ;;  %v9388_v47 = vcombine.high %v539_v42, %v543_v43  ;;  %v595_v25 = vld [vmem:[%s14067_s1 + $0x1198] sm:$0xff]  ;;  %v12184_v43 = vld [vmem:[%s14069_s2] sm:$0xff] }
 0x203   :  { %4111 = vmatprep.subr.bf16.mxu0 %v9330_v48  ;;  %4316 = vmatprep.subr.bf16.mxu1 %v9332_v49  ;;  %v546_v48 = vld [vmem:[%s14067_s1 + $0x1010] sm:$0xff]  ;;  %v599_v42 = vld [vmem:[%s14067_s1 + $0x11b8] sm:$0xff] }
 0x204   :  { %v550_v49 = vld [vmem:[%s14067_s1 + $0x1030] sm:$0xff] }
 0x205   :  { %v9393_v60 = vcombine.low %v546_v48, %v550_v49 }
 0x206   :  { %4112 = vmatpush1.bf16.msra.mxu0 %v9329_v54  ;;  %4317 = vmatpush1.bf16.msra.mxu1 %v9331_v56  ;;  %v9394_v54 = vcombine.high %v546_v48, %v550_v49  ;;  %v9396_v56 = vcombine.high %v547_v22, %v551_v50  ;;  %v602_v48 = vld [vmem:[%s14067_s1 + $0x11d0] sm:$0xff]  ;;  %v603_v50 = vld [vmem:[%s14067_s1 + $0x11d8] sm:$0xff] }
 0x207   :  { %4113 = vmatprep.subr.bf16.mxu0 %v9338_v58  ;;  %4318 = vmatprep.subr.bf16.mxu1 %v9340_v59  ;;  %v554_v58 = vld [vmem:[%s14067_s1 + $0x1050] sm:$0xff] }
 0x208   :  { %v558_v59 = vld [vmem:[%s14067_s1 + $0x1070] sm:$0xff] }
 0x209   :  { %v9401_v2 = vcombine.low %v554_v58, %v558_v59  ;;  %v606_v49 = vld [vmem:[%s14067_s1 + $0x11f0] sm:$0xff] }
 0x20a   :  { %4114 = vmatpush1.bf16.msra.mxu0 %v9337_v62  ;;  %4319 = vmatpush1.bf16.msra.mxu1 %v9339_v39  ;;  %v9402_v62 = vcombine.high %v554_v58, %v558_v59  ;;  %v9404_v39 = vcombine.high %v555_v36, %v559_v31  ;;  %v4398_v59 = vld [vmem:[%s14070_s3] sm:$0xff] }
 0x20b   :  { %4115 = vmatprep.subr.bf16.mxu0 %v9346_v63  ;;  %4320 = vmatprep.subr.bf16.mxu1 %v9348_v0  ;;  %v562_v63 = vld [vmem:[%s14067_s1 + $0x1090] sm:$0xff]  ;;  %v4402_v36 = vld [vmem:[%s14070_s3 + $0x20] sm:$0xff] }
 0x20c   :  { %v566_v0 = vld [vmem:[%s14067_s1 + $0x10b0] sm:$0xff] }
 0x20d   :  { %v9409_v10 = vcombine.low %v562_v63, %v566_v0 }
 0x20e   :  { %4116 = vmatpush1.bf16.msra.mxu0 %v9345_v4  ;;  %4321 = vmatpush1.bf16.msra.mxu1 %v9347_v5  ;;  %v9410_v4 = vcombine.high %v562_v63, %v566_v0  ;;  %v9412_v5 = vcombine.high %v563_v45, %v567_v1  ;;  %v9454_v63 = vcombine.high %v4398_v59, %v4402_v36  ;;  %v4410_v1 = vld [vmem:[%s14070_s3 + $0x60] sm:$0xff] }
 0x20f   :  { %4117 = vmatprep.subr.bf16.mxu0 %v9354_v6  ;;  %4322 = vmatprep.subr.bf16.mxu1 %v9356_v7  ;;  %v570_v6 = vld [vmem:[%s14067_s1 + $0x10d0] sm:$0xff] }
 0x210   :  { %v574_v7 = vld [vmem:[%s14067_s1 + $0x10f0] sm:$0xff] }
 0x211   :  { %v9418_v13 = vcombine.high %v570_v6, %v574_v7  ;;  %v9417_v19 = vcombine.low %v570_v6, %v574_v7  ;;  %v4414_v7 = vld [vmem:[%s14070_s3 + $0x80] sm:$0xff] }
 0x212   :  { %4118 = vmatpush1.bf16.msra.mxu0 %v9353_v14  ;;  %4323 = vmatpush1.bf16.msra.mxu1 %v9355_v16  ;;  %v578_v16 = vld [vmem:[%s14067_s1 + $0x1110] sm:$0xff] }
 0x213   :  { %4119 = vmatprep.subr.bf16.mxu0 %v9362_v17  ;;  %4324 = vmatprep.subr.bf16.mxu1 %v9364_v53  ;;  %v582_v17 = vld [vmem:[%s14067_s1 + $0x1130] sm:$0xff]  ;;  %v610_v53 = vlaneseq }
 0x214   :  { %v9426_v23 = vcombine.high %v578_v16, %v582_v17  ;;  %v9425_v34 = vcombine.low %v578_v16, %v582_v17 }
 0x216   :  { %4120 = vmatpush1.bf16.msra.mxu0 %v9361_v24  ;;  %4325 = vmatpush1.bf16.msra.mxu1 %v9363_v27  ;;  %v586_v27 = vld [vmem:[%s14067_s1 + $0x1150] sm:$0xff] }
 0x217   :  { %4121 = vmatprep.subr.bf16.mxu0 %v9370_v15  ;;  %4326 = vmatprep.subr.bf16.mxu1 %v9372_v28  ;;  %v590_v15 = vld [vmem:[%s14067_s1 + $0x1170] sm:$0xff]  ;;  %v12160_v28 = vshrl.u32 %v610_v53, 7 }
 0x219   :  { %v616_v41 = vsub.s32 1, %v12160_v28 }
 0x21a   :  { %4122 = vmatpush1.bf16.msra.mxu0 %v9369_v37  ;;  %4327 = vmatpush1.bf16.msra.mxu1 %v9371_v38  ;;  %v9434_v37 = vcombine.high %v586_v27, %v590_v15  ;;  %v9436_v38 = vcombine.high %v587_v30, %v591_v32 }
 0x21b   :  { %4123 = vmatprep.subr.bf16.mxu0 %v9378_v12  ;;  %4328 = vmatprep.subr.bf16.mxu1 %v9380_v40  ;;  %v594_v12 = vld [vmem:[%s14067_s1 + $0x1190] sm:$0xff]  ;;  %v617_v22 = vrot.slane %v12184_v43, %v616_v41 }
 0x21c   :  { %v598_v40 = vld [vmem:[%s14067_s1 + $0x11b0] sm:$0xff] }
 0x21d   :  { %v10119_v31 = vadd.f32 %v11984_v57, %v617_v22  ;;  %v4406_v57 = vld [vmem:[%s14070_s3 + $0x40] sm:$0xff] }
 0x21e   :  { %4124 = vmatpush1.bf16.msra.mxu0 %v9377_v44  ;;  %4329 = vmatpush1.bf16.msra.mxu1 %v9379_v46  ;;  %v9433_v44 = vcombine.low %v586_v27, %v590_v15  ;;  %v9435_v46 = vcombine.low %v587_v30, %v591_v32  ;;  %v9462_v6 = vcombine.high %v4406_v57, %v4410_v1  ;;  %v4430_v32 = vld [vmem:[%s14070_s3 + $0x100] sm:$0xff] }
 0x21f   :  { %4125 = vmatprep.subr.bf16.mxu0 %v9386_v21  ;;  %4330 = vmatprep.subr.bf16.mxu1 %v9388_v47  ;;  %v9442_v21 = vcombine.high %v594_v12, %v598_v40  ;;  %v9444_v47 = vcombine.high %v595_v25, %v599_v42  ;;  %v4383_v45 = vmax.f32 %v10119_v31, 0.0  ;;  %v9461_v16 = vcombine.low %v4406_v57, %v4410_v1  ;;  %v4454_v31 = vld [vmem:[%s14070_s3 + $0x1c0] sm:$0xff] }
 0x220   :  { %v4462_v57 = vld [vmem:[%s14070_s3 + $0x200] sm:$0xff] }
 0x221   :  { %v4466_v1 = vld [vmem:[%s14070_s3 + $0x220] sm:$0xff] }
 0x222   :  { %4126 = vmatpush1.bf16.msra.mxu0 %v9385_v51  ;;  %4331 = vmatpush1.bf16.msra.mxu1 %v9387_v52  ;;  %v607_v51 = vld [vmem:[%s14067_s1 + $0x11f8] sm:$0xff]  ;;  %v9441_v52 = vcombine.low %v594_v12, %v598_v40 }
 0x223   :  { %4136 = vmatprep.subr.bf16.mxu0 %v9394_v54  ;;  %4341 = vmatprep.subr.bf16.mxu1 %v9396_v56  ;;  %v9443_v54 = vcombine.low %v595_v25, %v599_v42  ;;  %v9450_v56 = vcombine.high %v602_v48, %v606_v49  ;;  %v9452_v58 = vcombine.high %v603_v50, %v607_v51  ;;  %v4438_v42 = vld [vmem:[%s14070_s3 + $0x140] sm:$0xff] }
 0x225   :  { %4128 = vmatmul.mubr.bf16.vlgmr.msra.gmra.mrb[4].mxu0 %v11213_v55  ;;  %4333 = vmatmul.mubr.bf16.vlgmr.msra.gmra.mrb[4].mxu1 %v11213_v55  ;;  %v571_v55 = vld [vmem:[%s14067_s1 + $0x10d8] sm:$0xff] }
 0x226   :  { %4137 = vmatpush1.bf16.msra.mxu0 %v9393_v60  ;;  %4342 = vmatpush1.bf16.msra.mxu1 %v9395_v61  ;;  %v9420_v14 = vcombine.high %v571_v55, %v575_v9  ;;  %v9419_v20 = vcombine.low %v571_v55, %v575_v9  ;;  %v4399_v60 = vld [vmem:[%s14070_s3 + $0x8] sm:$0xff]  ;;  %v4418_v55 = vld [vmem:[%s14070_s3 + $0xa0] sm:$0xff]  ;;  %v12232_v9 = vpack.c.bf16 %v4383_v45, %v4383_v45 }
 0x227   :  { %4138 = vmatprep.subr.bf16.mxu0 %v9402_v62  ;;  %4343 = vmatprep.subr.bf16.mxu1 %v9404_v39  ;;  %v4403_v61 = vld [vmem:[%s14070_s3 + $0x28] sm:$0xff]  ;;  %v9449_v62 = vcombine.low %v602_v48, %v606_v49  ;;  %v9451_v39 = vcombine.low %v603_v50, %v607_v51  ;;  %v9470_v53 = vcombine.high %v4414_v7, %v4418_v55  ;;  %v4446_v50 = vld [vmem:[%s14070_s3 + $0x180] sm:$0xff] }
 0x228   :  { %4168 = vmatprep.mubr.bf16.mxu0 %v10322_v8  ;;  %4373 = vmatprep.mubr.bf16.mxu1 %v10322_v8  ;;  %v579_v8 = vld [vmem:[%s14067_s1 + $0x1118] sm:$0xff]  ;;  %v9456_v0 = vcombine.high %v4399_v60, %v4403_v61  ;;  %v4450_v51 = vld [vmem:[%s14070_s3 + $0x1a0] sm:$0xff] }
 0x229   :  { %v9428_v24 = vcombine.high %v579_v8, %v583_v18  ;;  %v9427_v35 = vcombine.low %v579_v8, %v583_v18  ;;  %v4422_v18 = vld [vmem:[%s14070_s3 + $0xc0] sm:$0xff] }
 0x22a   :  { %4139 = vmatpush1.bf16.msra.mxu0 %v9401_v2  ;;  %4344 = vmatpush1.bf16.msra.mxu1 %v9403_v3  ;;  %v9453_v2 = vcombine.low %v4398_v59, %v4402_v36  ;;  %v4407_v3 = vld [vmem:[%s14070_s3 + $0x48] sm:$0xff]  ;;  %v9502_v59 = vcombine.high %v4446_v50, %v4450_v51 }
 0x22b   :  { %4140 = vmatprep.subr.bf16.mxu0 %v9410_v4  ;;  %4345 = vmatprep.subr.bf16.mxu1 %v9412_v5  ;;  %v4411_v4 = vld [vmem:[%s14070_s3 + $0x68] sm:$0xff]  ;;  %v9455_v5 = vcombine.low %v4399_v60, %v4403_v61  ;;  %v4458_v60 = vld [vmem:[%s14070_s3 + $0x1e0] sm:$0xff] }
 0x22c   :  { %v9463_v17 = vcombine.low %v4407_v3, %v4411_v4  ;;  %v4455_v61 = vld [vmem:[%s14070_s3 + $0x1c8] sm:$0xff] }
 0x22e   :  { %4141 = vmatpush1.bf16.msra.mxu0 %v9409_v10  ;;  %4346 = vmatpush1.bf16.msra.mxu1 %v9411_v11  ;;  %v10320_v10 = vld [vmem:[%s14068_s0 + $0x20] ss:$0 sps:$4 sm:$0xff]   ;;  %v9464_v11 = vcombine.high %v4407_v3, %v4411_v4  ;;  %v4467_v3 = vld [vmem:[%s14070_s3 + $0x228] sm:$0xff]  ;;  %v9509_v4 = vcombine.low %v4454_v31, %v4458_v60 }
 0x22f   :  { %4142 = vmatprep.subr.bf16.mxu0 %v9418_v13  ;;  %4347 = vmatprep.subr.bf16.mxu1 %v9420_v14  ;;  %v4415_v13 = vld [vmem:[%s14070_s3 + $0x88] sm:$0xff] }
 0x230   :  { %v4419_v14 = vld [vmem:[%s14070_s3 + $0xa8] sm:$0xff] }
 0x231   :  { %v9472_v8 = vcombine.high %v4415_v13, %v4419_v14  ;;  %v9471_v27 = vcombine.low %v4415_v13, %v4419_v14  ;;  %v4475_v13 = vld [vmem:[%s14070_s3 + $0x268] sm:$0xff]  ;;  %v9517_v14 = vcombine.low %v4462_v57, %v4466_v1 }
 0x232   :  { %4143 = vmatpush1.bf16.msra.mxu0 %v9417_v19  ;;  %4348 = vmatpush1.bf16.msra.mxu1 %v9419_v20  ;;  %v4426_v19 = vld [vmem:[%s14070_s3 + $0xe0] sm:$0xff]  ;;  %v4423_v20 = vld [vmem:[%s14070_s3 + $0xc8] sm:$0xff] }
 0x233   :  { %4144 = vmatprep.subr.bf16.mxu0 %v9426_v23  ;;  %4349 = vmatprep.subr.bf16.mxu1 %v9428_v24  ;;  %v4427_v23 = vld [vmem:[%s14070_s3 + $0xe8] sm:$0xff]  ;;  %v9469_v24 = vcombine.low %v4414_v7, %v4418_v55  ;;  %v9478_v15 = vcombine.high %v4422_v18, %v4426_v19  ;;  %v4470_v55 = vld [vmem:[%s14070_s3 + $0x240] sm:$0xff] }
 0x234   :  { %v9480_v30 = vcombine.high %v4423_v20, %v4427_v23  ;;  %v9479_v12 = vcombine.low %v4423_v20, %v4427_v23  ;;  %v4483_v20 = vld [vmem:[%s14070_s3 + $0x2a8] sm:$0xff] }
 0x236   :  { %4145 = vmatpush1.bf16.msra.mxu0 %v9425_v34  ;;  %4350 = vmatpush1.bf16.msra.mxu1 %v9427_v35  ;;  %v4434_v34 = vld [vmem:[%s14070_s3 + $0x120] sm:$0xff]  ;;  %v4431_v35 = vld [vmem:[%s14070_s3 + $0x108] sm:$0xff] }
 0x237   :  { %4146 = vmatprep.subr.bf16.mxu0 %v9434_v37  ;;  %4351 = vmatprep.subr.bf16.mxu1 %v9436_v38  ;;  %v4435_v37 = vld [vmem:[%s14070_s3 + $0x128] sm:$0xff]  ;;  %v9477_v38 = vcombine.low %v4422_v18, %v4426_v19  ;;  %v9486_v40 = vcombine.high %v4430_v32, %v4434_v34  ;;  %v4482_v18 = vld [vmem:[%s14070_s3 + $0x2a0] sm:$0xff] }
 0x238   :  { %v9488_v25 = vcombine.high %v4431_v35, %v4435_v37  ;;  %v9487_v48 = vcombine.low %v4431_v35, %v4435_v37  ;;  %v4479_v19 = vld [vmem:[%s14070_s3 + $0x288] sm:$0xff] }
 0x239   :  { %v4491_v35 = vld [vmem:[%s14070_s3 + $0x2e8] sm:$0xff] }
 0x23a   :  { %4147 = vmatpush1.bf16.msra.mxu0 %v9433_v44  ;;  %4352 = vmatpush1.bf16.msra.mxu1 %v9435_v46  ;;  %v4442_v44 = vld [vmem:[%s14070_s3 + $0x160] sm:$0xff]  ;;  %v4439_v46 = vld [vmem:[%s14070_s3 + $0x148] sm:$0xff] }
 0x23b   :  { %4148 = vmatprep.subr.bf16.mxu0 %v9442_v21  ;;  %4353 = vmatprep.subr.bf16.mxu1 %v9444_v47  ;;  %v4443_v21 = vld [vmem:[%s14070_s3 + $0x168] sm:$0xff]  ;;  %v9485_v47 = vcombine.low %v4430_v32, %v4434_v34  ;;  %v9494_v49 = vcombine.high %v4438_v42, %v4442_v44  ;;  %v4490_v32 = vld [vmem:[%s14070_s3 + $0x2e0] sm:$0xff] }
 0x23c   :  { %v9496_v22 = vcombine.high %v4439_v46, %v4443_v21  ;;  %v4487_v34 = vld [vmem:[%s14070_s3 + $0x2c8] sm:$0xff] }
 0x23e   :  { %4149 = vmatpush1.bf16.msra.mxu0 %v9441_v52  ;;  %4354 = vmatpush1.bf16.msra.mxu1 %v9443_v54  ;;  %v4447_v52 = vld [vmem:[%s14070_s3 + $0x188] sm:$0xff] }
 0x23f   :  { %4150 = vmatprep.subr.bf16.mxu0 %v9450_v56  ;;  %4355 = vmatprep.subr.bf16.mxu1 %v9452_v58  ;;  %v4451_v54 = vld [vmem:[%s14070_s3 + $0x1a8] sm:$0xff]  ;;  %v9493_v56 = vcombine.low %v4438_v42, %v4442_v44  ;;  %v9495_v58 = vcombine.low %v4439_v46, %v4443_v21  ;;  %v4498_v42 = vld [vmem:[%s14070_s3 + $0x320] sm:$0xff] }
 0x240   :  { %v9504_v36 = vcombine.high %v4447_v52, %v4451_v54  ;;  %v4495_v44 = vld [vmem:[%s14070_s3 + $0x308] sm:$0xff] }
 0x241   :  { %v4499_v46 = vld [vmem:[%s14070_s3 + $0x328] sm:$0xff] }
 0x242   :  { %4151 = vmatpush1.bf16.msra.mxu0 %v9449_v62  ;;  %4356 = vmatpush1.bf16.msra.mxu1 %v9451_v39  ;;  %v4459_v62 = vld [vmem:[%s14070_s3 + $0x1e8] sm:$0xff]  ;;  %v9501_v39 = vcombine.low %v4446_v50, %v4450_v51  ;;  %v4506_v50 = vld [vmem:[%s14070_s3 + $0x360] sm:$0xff] }
 0x243   :  { %7512 = vmatprep.subr.bf16.mxu0 %v9454_v63  ;;  %7676 = vmatprep.subr.bf16.mxu1 %v9456_v0  ;;  %v9503_v63 = vcombine.low %v4447_v52, %v4451_v54  ;;  %v9510_v0 = vcombine.high %v4454_v31, %v4458_v60  ;;  %v9512_v45 = vcombine.high %v4455_v61, %v4459_v62  ;;  %v4503_v51 = vld [vmem:[%s14070_s3 + $0x348] sm:$0xff]  ;;  %v4510_v31 = vld [vmem:[%s14070_s3 + $0x380] sm:$0xff] }
 0x244   :  { %v4507_v52 = vld [vmem:[%s14070_s3 + $0x368] sm:$0xff]  ;;  %v4514_v60 = vld [vmem:[%s14070_s3 + $0x3a0] sm:$0xff] }
 0x245   :  { %4169 = vmatmul.mubr.bf16.vlgmr.msra.gmra.mrb[4].mxu0 %v10320_v10  ;;  %4374 = vmatmul.mubr.bf16.vlgmr.msra.gmra.mrb[4].mxu1 %v10320_v10  ;;  %v4474_v10 = vld [vmem:[%s14070_s3 + $0x260] sm:$0xff] }
 0x246   :  { %7513 = vmatpush1.bf16.msra.mxu0 %v9453_v2  ;;  %7544 = vmatprep.mubr.bf16.mxu0 %v12232_v9  ;;  %v4463_v2 = vld [vmem:[%s14070_s3 + $0x208] sm:$0xff]  ;;  %v9525_v23 = vcombine.low %v4470_v55, %v4474_v10 }
 0x247   :  { %7677 = vmatpush1.bf16.msra.mxu1 %v9455_v5  ;;  %7708 = vmatprep.mubr.bf16.mxu1 %v12232_v9  ;;  %v9511_v5 = vcombine.low %v4455_v61, %v4459_v62  ;;  %v9520_v7 = vcombine.high %v4463_v2, %v4467_v3  ;;  %v624_v61 = vsub.s32 3, %v12160_v28  ;;  %v4511_v62 = vld [vmem:[%s14070_s3 + $0x388] sm:$0xff] }
 0x248   :  { %7514 = vmatprep.subr.bf16.mxu0 %v9462_v6  ;;  %7678 = vmatprep.subr.bf16.mxu1 %v9464_v11  ;;  %v9518_v6 = vcombine.high %v4462_v57, %v4466_v1  ;;  %v4471_v11 = vld [vmem:[%s14070_s3 + $0x248] sm:$0xff]  ;;  %v9566_v57 = vcombine.high %v4510_v31, %v4514_v60 }
 0x24a   :  { %7515 = vmatpush1.bf16.msra.mxu0 %v9461_v16  ;;  %v9519_v16 = vcombine.low %v4463_v2, %v4467_v3  ;;  %v4518_v2 = vld [vmem:[%s14070_s3 + $0x3c0] sm:$0xff] }
 0x24b   :  { %7679 = vmatpush1.bf16.msra.mxu1 %v9463_v17  ;;  %7516 = vmatprep.subr.bf16.mxu0 %v9470_v53  ;;  %v9526_v17 = vcombine.high %v4470_v55, %v4474_v10  ;;  %v9528_v53 = vcombine.high %v4471_v11, %v4475_v13  ;;  %v4522_v3 = vld [vmem:[%s14070_s3 + $0x3e0] sm:$0xff] }
 0x24c   :  { %7680 = vmatprep.subr.bf16.mxu1 %v9472_v8  ;;  %v4478_v8 = vld [vmem:[%s14070_s3 + $0x280] sm:$0xff] }
 0x24d   :  { %v9533_v37 = vcombine.low %v4478_v8, %v4482_v18 }
 0x24e   :  { %7517 = vmatpush1.bf16.msra.mxu0 %v9469_v24  ;;  %v9527_v24 = vcombine.low %v4471_v11, %v4475_v13  ;;  %v9574_v11 = vcombine.high %v4518_v2, %v4522_v3 }
 0x24f   :  { %7681 = vmatpush1.bf16.msra.mxu1 %v9471_v27  ;;  %7518 = vmatprep.subr.bf16.mxu0 %v9478_v15  ;;  %v9534_v27 = vcombine.high %v4478_v8, %v4482_v18  ;;  %v9536_v15 = vcombine.high %v4479_v19, %v4483_v20  ;;  %v9573_v8 = vcombine.low %v4518_v2, %v4522_v3  ;;  %v4567_v2 = vld [vmem:[%s14070_s3 + $0x548] sm:$0xff] }
 0x250   :  { %7682 = vmatprep.subr.bf16.mxu1 %v9480_v30  ;;  %v4486_v30 = vld [vmem:[%s14070_s3 + $0x2c0] sm:$0xff]  ;;  %v4571_v3 = vld [vmem:[%s14070_s3 + $0x568] sm:$0xff] }
 0x251   :  { %v9541_v21 = vcombine.low %v4486_v30, %v4490_v32 }
 0x252   :  { %7519 = vmatpush1.bf16.msra.mxu0 %v9477_v38  ;;  %v9535_v38 = vcombine.low %v4479_v19, %v4483_v20 }
 0x253   :  { %7683 = vmatpush1.bf16.msra.mxu1 %v9479_v12  ;;  %7520 = vmatprep.subr.bf16.mxu0 %v9486_v40  ;;  %v9542_v12 = vcombine.high %v4486_v30, %v4490_v32  ;;  %v9544_v40 = vcombine.high %v4487_v34, %v4491_v35  ;;  %v4535_v30 = vld [vmem:[%s14070_s3 + $0x448] sm:$0xff] }
 0x254   :  { %7684 = vmatprep.subr.bf16.mxu1 %v9488_v25  ;;  %v4494_v25 = vld [vmem:[%s14070_s3 + $0x300] sm:$0xff]  ;;  %v4539_v32 = vld [vmem:[%s14070_s3 + $0x468] sm:$0xff] }
 0x255   :  { %v9549_v54 = vcombine.low %v4494_v25, %v4498_v42 }
 0x256   :  { %7521 = vmatpush1.bf16.msra.mxu0 %v9485_v47  ;;  %v9543_v47 = vcombine.low %v4487_v34, %v4491_v35 }
 0x257   :  { %7685 = vmatpush1.bf16.msra.mxu1 %v9487_v48  ;;  %7522 = vmatprep.subr.bf16.mxu0 %v9494_v49  ;;  %v9550_v48 = vcombine.high %v4494_v25, %v4498_v42  ;;  %v9552_v49 = vcombine.high %v4495_v44, %v4499_v46  ;;  %v9592_v25 = vcombine.high %v4535_v30, %v4539_v32  ;;  %v4543_v42 = vld [vmem:[%s14070_s3 + $0x488] sm:$0xff] }
 0x258   :  { %7686 = vmatprep.subr.bf16.mxu1 %v9496_v22  ;;  %v4502_v22 = vld [vmem:[%s14070_s3 + $0x340] sm:$0xff] }
 0x25a   :  { %7523 = vmatpush1.bf16.msra.mxu0 %v9493_v56  ;;  %v612_v56 = vsub.s32 0, %v12160_v28 }
 0x25b   :  { %7687 = vmatpush1.bf16.msra.mxu1 %v9495_v58  ;;  %7524 = vmatprep.subr.bf16.mxu0 %v9502_v59  ;;  %v9551_v58 = vcombine.low %v4495_v44, %v4499_v46  ;;  %v9558_v59 = vcombine.high %v4502_v22, %v4506_v50  ;;  %v4547_v44 = vld [vmem:[%s14070_s3 + $0x4a8] sm:$0xff] }
 0x25c   :  { %7688 = vmatprep.subr.bf16.mxu1 %v9504_v36  ;;  %v9560_v36 = vcombine.high %v4503_v51, %v4507_v52 }
 0x25e   :  { %7525 = vmatpush1.bf16.msra.mxu0 %v9501_v39  ;;  %v4515_v39 = vld [vmem:[%s14070_s3 + $0x3a8] sm:$0xff] }
 0x25f   :  { %7689 = vmatpush1.bf16.msra.mxu1 %v9503_v63  ;;  %7526 = vmatprep.subr.bf16.mxu0 %v9510_v0  ;;  %v9557_v63 = vcombine.low %v4502_v22, %v4506_v50  ;;  %v613_v0 = vrot.slane %v12184_v43, %v612_v56  ;;  %v9568_v1 = vcombine.high %v4511_v62, %v4515_v39  ;;  %v4554_v22 = vld [vmem:[%s14070_s3 + $0x4e0] sm:$0xff]  ;;  %v4551_v50 = vld [vmem:[%s14070_s3 + $0x4c8] sm:$0xff] }
 0x260   :  { %7690 = vmatprep.subr.bf16.mxu1 %v9512_v45  ;;  %v9559_v45 = vcombine.low %v4503_v51, %v4507_v52  ;;  %v9567_v10 = vcombine.low %v4511_v62, %v4515_v39  ;;  %v4555_v51 = vld [vmem:[%s14070_s3 + $0x4e8] sm:$0xff] }
 0x261   :  { %v10118_v55 = vadd.f32 %v11974_v26, %v613_v0  ;;  %v4527_v26 = vld [vmem:[%s14070_s3 + $0x408] sm:$0xff] }
 0x262   :  { %7527 = vmatpush1.bf16.msra.mxu0 %v9509_v4  ;;  %v625_v4 = vrot.slane %v12184_v43, %v624_v61  ;;  %v4563_v62 = vld [vmem:[%s14070_s3 + $0x528] sm:$0xff] }
 0x263   :  { %7691 = vmatpush1.bf16.msra.mxu1 %v9511_v5  ;;  %7528 = vmatprep.subr.bf16.mxu0 %v9518_v6  ;;  %v4519_v5 = vld [vmem:[%s14070_s3 + $0x3c8] sm:$0xff]  ;;  %v4382_v18 = vmax.f32 %v10118_v55, 0.0  ;;  %v4574_v55 = vld [vmem:[%s14070_s3 + $0x580] sm:$0xff] }
 0x264   :  { %7692 = vmatprep.subr.bf16.mxu1 %v9520_v7  ;;  %v4523_v6 = vld [vmem:[%s14070_s3 + $0x3e8] sm:$0xff]  ;;  %v9565_v7 = vcombine.low %v4510_v31, %v4514_v60  ;;  %v4562_v31 = vld [vmem:[%s14070_s3 + $0x520] sm:$0xff] }
 0x265   :  { %v9576_v13 = vcombine.high %v4519_v5, %v4523_v6  ;;  %v9575_v19 = vcombine.low %v4519_v5, %v4523_v6  ;;  %v12435_v34 = vpack.c.bf16 %v4382_v18, %v4382_v18  ;;  %v4559_v60 = vld [vmem:[%s14070_s3 + $0x508] sm:$0xff] }
 0x266   :  { %7529 = vmatpush1.bf16.msra.mxu0 %v9517_v14  ;;  %v4526_v14 = vld [vmem:[%s14070_s3 + $0x400] sm:$0xff]  ;;  %v9615_v5 = vcombine.low %v4559_v60, %v4563_v62  ;;  %v4583_v18 = vld [vmem:[%s14070_s3 + $0x5c8] sm:$0xff] }
 0x267   :  { %7693 = vmatpush1.bf16.msra.mxu1 %v9519_v16  ;;  %7530 = vmatprep.subr.bf16.mxu0 %v9526_v17  ;;  %v4530_v16 = vld [vmem:[%s14070_s3 + $0x420] sm:$0xff]  ;;  %v10121_v17 = vadd.f32 %v11992_v33, %v625_v4 }
 0x268   :  { %7694 = vmatprep.subr.bf16.mxu1 %v9528_v53  ;;  %v4531_v53 = vld [vmem:[%s14070_s3 + $0x428] sm:$0xff]  ;;  %v9582_v20 = vcombine.high %v4526_v14, %v4530_v16  ;;  %v4534_v33 = vld [vmem:[%s14070_s3 + $0x440] sm:$0xff] }
 0x269   :  { %v9583_v35 = vcombine.low %v4527_v26, %v4531_v53 }
 0x26a   :  { %7531 = vmatpush1.bf16.msra.mxu0 %v9525_v23  ;;  %v9584_v23 = vcombine.high %v4527_v26, %v4531_v53  ;;  %v4582_v53 = vld [vmem:[%s14070_s3 + $0x5c0] sm:$0xff] }
 0x26b   :  { %7695 = vmatpush1.bf16.msra.mxu1 %v9527_v24  ;;  %7532 = vmatprep.subr.bf16.mxu0 %v9534_v27  ;;  %v4385_v24 = vmax.f32 %v10121_v17, 0.0  ;;  %v4538_v27 = vld [vmem:[%s14070_s3 + $0x460] sm:$0xff] }
 0x26c   :  { %7696 = vmatprep.subr.bf16.mxu1 %v9536_v15  ;;  %v9581_v15 = vcombine.low %v4526_v14, %v4530_v16  ;;  %v9589_v46 = vcombine.low %v4534_v33, %v4538_v27  ;;  %v9623_v16 = vcombine.low %v4567_v2, %v4571_v3 }
 0x26e   :  { %7533 = vmatpush1.bf16.msra.mxu0 %v9533_v37  ;;  %v9590_v37 = vcombine.high %v4534_v33, %v4538_v27  ;;  %v4590_v27 = vld [vmem:[%s14070_s3 + $0x600] sm:$0xff] }
 0x26f   :  { %7697 = vmatpush1.bf16.msra.mxu1 %v9535_v38  ;;  %7534 = vmatprep.subr.bf16.mxu0 %v9542_v12  ;;  %v4542_v38 = vld [vmem:[%s14070_s3 + $0x480] sm:$0xff] }
 0x270   :  { %7698 = vmatprep.subr.bf16.mxu1 %v9544_v40  ;;  %v4546_v12 = vld [vmem:[%s14070_s3 + $0x4a0] sm:$0xff]  ;;  %v12443_v40 = vpack.c.bf16 %v4385_v24, %v4385_v24 }
 0x271   :  { %v9597_v52 = vcombine.low %v4542_v38, %v4546_v12 }
 0x272   :  { %7535 = vmatpush1.bf16.msra.mxu0 %v9541_v21  ;;  %v9591_v21 = vcombine.low %v4535_v30, %v4539_v32  ;;  %v4591_v30 = vld [vmem:[%s14070_s3 + $0x608] sm:$0xff] }
 0x273   :  { %7699 = vmatpush1.bf16.msra.mxu1 %v9543_v47  ;;  %7536 = vmatprep.subr.bf16.mxu0 %v9550_v48  ;;  %v9598_v47 = vcombine.high %v4542_v38, %v4546_v12  ;;  %v9600_v48 = vcombine.high %v4543_v42, %v4547_v44  ;;  %v4595_v32 = vld [vmem:[%s14070_s3 + $0x628] sm:$0xff] }
 0x274   :  { %7700 = vmatprep.subr.bf16.mxu1 %v9552_v49  ;;  %v4550_v49 = vld [vmem:[%s14070_s3 + $0x4c0] sm:$0xff]  ;;  %v9648_v12 = vcombine.high %v4591_v30, %v4595_v32 }
 0x275   :  { %v9605_v39 = vcombine.low %v4550_v49, %v4554_v22 }
 0x276   :  { %7537 = vmatpush1.bf16.msra.mxu0 %v9549_v54  ;;  %v9599_v54 = vcombine.low %v4543_v42, %v4547_v44  ;;  %v4602_v42 = vld [vmem:[%s14070_s3 + $0x660] sm:$0xff]  ;;  %v4599_v44 = vld [vmem:[%s14070_s3 + $0x648] sm:$0xff] }
 0x277   :  { %7701 = vmatpush1.bf16.msra.mxu1 %v9551_v58  ;;  %7538 = vmatprep.subr.bf16.mxu0 %v9558_v59  ;;  %v9606_v58 = vcombine.high %v4550_v49, %v4554_v22  ;;  %v9608_v59 = vcombine.high %v4551_v50, %v4555_v51  ;;  %v4606_v22 = vld [vmem:[%s14070_s3 + $0x680] sm:$0xff] }
 0x278   :  { %7702 = vmatprep.subr.bf16.mxu1 %v9560_v36  ;;  %v4558_v36 = vld [vmem:[%s14070_s3 + $0x500] sm:$0xff] }
 0x279   :  { %v9614_v0 = vcombine.high %v4558_v36, %v4562_v31  ;;  %v9613_v4 = vcombine.low %v4558_v36, %v4562_v31  ;;  %v4614_v31 = vld [vmem:[%s14070_s3 + $0x6c0] sm:$0xff] }
 0x27a   :  { %7539 = vmatpush1.bf16.msra.mxu0 %v9557_v63  ;;  %v9607_v63 = vcombine.low %v4551_v50, %v4555_v51  ;;  %v4610_v50 = vld [vmem:[%s14070_s3 + $0x6a0] sm:$0xff]  ;;  %v4607_v51 = vld [vmem:[%s14070_s3 + $0x688] sm:$0xff] }
 0x27b   :  { %7703 = vmatpush1.bf16.msra.mxu1 %v9559_v45  ;;  %7540 = vmatprep.subr.bf16.mxu0 %v9566_v57  ;;  %v9616_v45 = vcombine.high %v4559_v60, %v4563_v62  ;;  %v4566_v57 = vld [vmem:[%s14070_s3 + $0x540] sm:$0xff]  ;;  %v4615_v62 = vld [vmem:[%s14070_s3 + $0x6c8] sm:$0xff] }
 0x27c   :  { %7704 = vmatprep.subr.bf16.mxu1 %v9568_v1  ;;  %v4570_v1 = vld [vmem:[%s14070_s3 + $0x560] sm:$0xff] }
 0x27d   :  { %v9622_v6 = vcombine.high %v4566_v57, %v4570_v1  ;;  %v9621_v14 = vcombine.low %v4566_v57, %v4570_v1  ;;  %v4618_v60 = vld [vmem:[%s14070_s3 + $0x6e0] sm:$0xff] }
 0x27e   :  { %7541 = vmatpush1.bf16.msra.mxu0 %v9565_v7  ;;  %v9624_v7 = vcombine.high %v4567_v2, %v4571_v3  ;;  %v4622_v1 = vld [vmem:[%s14070_s3 + $0x700] sm:$0xff]  ;;  %v4623_v3 = vld [vmem:[%s14070_s3 + $0x708] sm:$0xff] }
 0x27f   :  { %7705 = vmatpush1.bf16.msra.mxu1 %v9567_v10  ;;  %7542 = vmatprep.subr.bf16.mxu0 %v9574_v11  ;;  %v4578_v10 = vld [vmem:[%s14070_s3 + $0x5a0] sm:$0xff]  ;;  %v4575_v11 = vld [vmem:[%s14070_s3 + $0x588] sm:$0xff] }
 0x280   :  { %7706 = vmatprep.subr.bf16.mxu1 %v9576_v13  ;;  %v4579_v13 = vld [vmem:[%s14070_s3 + $0x5a8] sm:$0xff]  ;;  %v9630_v17 = vcombine.high %v4574_v55, %v4578_v10  ;;  %v4626_v2 = vld [vmem:[%s14070_s3 + $0x720] sm:$0xff] }
 0x281   :  { %v9632_v26 = vcombine.high %v4575_v11, %v4579_v13 }
 0x282   :  { %7543 = vmatpush1.bf16.msra.mxu0 %v9573_v8  ;;  %v4586_v8 = vld [vmem:[%s14070_s3 + $0x5e0] sm:$0xff] }
 0x283   :  { %7707 = vmatpush1.bf16.msra.mxu1 %v9575_v19  ;;  %7553 = vmatprep.subr.bf16.mxu0 %v9582_v20  ;;  %v4587_v19 = vld [vmem:[%s14070_s3 + $0x5e8] sm:$0xff]  ;;  %v9629_v20 = vcombine.low %v4574_v55, %v4578_v10  ;;  %v9638_v24 = vcombine.high %v4582_v53, %v4586_v8  ;;  %v4630_v10 = vld [vmem:[%s14070_s3 + $0x740] sm:$0xff] }
 0x284   :  { %7717 = vmatprep.subr.bf16.mxu1 %v9584_v23  ;;  %v9631_v23 = vcombine.low %v4575_v11, %v4579_v13  ;;  %v9640_v33 = vcombine.high %v4583_v18, %v4587_v19  ;;  %v4634_v11 = vld [vmem:[%s14070_s3 + $0x760] sm:$0xff]  ;;  %v4631_v13 = vld [vmem:[%s14070_s3 + $0x748] sm:$0xff] }
 0x285   :  { %7545 = vmatmul.mubr.bf16.vlgmr.msra.gmra.mrb[8].mxu0 %v12435_v34 }
 0x286   :  { %7709 = vmatmul.mubr.bf16.vlgmr.msra.gmra.mrb[8].mxu1 %v12435_v34  ;;  %7554 = vmatpush1.bf16.msra.mxu0 %v9581_v15  ;;  %v4594_v15 = vld [vmem:[%s14070_s3 + $0x620] sm:$0xff] }
 0x287   :  { %7585 = vmatprep.mubr.bf16.mxu0 %v12443_v40  ;;  %7718 = vmatpush1.bf16.msra.mxu1 %v9583_v35  ;;  %v9637_v35 = vcombine.low %v4582_v53, %v4586_v8  ;;  %v9646_v38 = vcombine.high %v4590_v27, %v4594_v15  ;;  %v9686_v53 = vcombine.high %v4630_v10, %v4634_v11 }
 0x288   :  { %7749 = vmatprep.mubr.bf16.mxu1 %v12443_v40  ;;  %7555 = vmatprep.subr.bf16.mxu0 %v9590_v37  ;;  %v9639_v37 = vcombine.low %v4583_v18, %v4587_v19  ;;  %v4638_v18 = vld [vmem:[%s14070_s3 + $0x780] sm:$0xff] }
 0x289   :  { %7719 = vmatprep.subr.bf16.mxu1 %v9592_v25  ;;  %v4598_v25 = vld [vmem:[%s14070_s3 + $0x640] sm:$0xff] }
 0x28a   :  { %7556 = vmatpush1.bf16.msra.mxu0 %v9589_v46  ;;  %v4603_v46 = vld [vmem:[%s14070_s3 + $0x668] sm:$0xff]  ;;  %v4642_v19 = vld [vmem:[%s14070_s3 + $0x7a0] sm:$0xff] }
 0x28b   :  { %7720 = vmatpush1.bf16.msra.mxu1 %v9591_v21  ;;  %7557 = vmatprep.subr.bf16.mxu0 %v9598_v47  ;;  %v9645_v21 = vcombine.low %v4590_v27, %v4594_v15  ;;  %v9647_v47 = vcombine.low %v4591_v30, %v4595_v32  ;;  %v9656_v49 = vcombine.high %v4599_v44, %v4603_v46  ;;  %v4646_v32 = vld [vmem:[%s14070_s3 + $0x7c0] sm:$0xff] }
 0x28c   :  { %7721 = vmatprep.subr.bf16.mxu1 %v9600_v48  ;;  %v9654_v48 = vcombine.high %v4598_v25, %v4602_v42  ;;  %v9694_v15 = vcombine.high %v4638_v18, %v4642_v19 }
 0x28e   :  { %7558 = vmatpush1.bf16.msra.mxu0 %v9597_v52  ;;  %v4611_v52 = vld [vmem:[%s14070_s3 + $0x6a8] sm:$0xff] }
 0x28f   :  { %7722 = vmatpush1.bf16.msra.mxu1 %v9599_v54  ;;  %7559 = vmatprep.subr.bf16.mxu0 %v9606_v58  ;;  %v9653_v54 = vcombine.low %v4598_v25, %v4602_v42  ;;  %v9655_v58 = vcombine.low %v4599_v44, %v4603_v46  ;;  %v9664_v36 = vcombine.high %v4607_v51, %v4611_v52  ;;  %v4654_v46 = vld [vmem:[%s14070_s3 + $0x800] sm:$0xff] }
 0x290   :  { %7723 = vmatprep.subr.bf16.mxu1 %v9608_v59  ;;  %v9662_v59 = vcombine.high %v4606_v22, %v4610_v50 }
 0x292   :  { %7560 = vmatpush1.bf16.msra.mxu0 %v9605_v39  ;;  %v4619_v39 = vld [vmem:[%s14070_s3 + $0x6e8] sm:$0xff] }
 0x293   :  { %7724 = vmatpush1.bf16.msra.mxu1 %v9607_v63  ;;  %7561 = vmatprep.subr.bf16.mxu0 %v9614_v0  ;;  %v9661_v63 = vcombine.low %v4606_v22, %v4610_v50  ;;  %v9663_v0 = vcombine.low %v4607_v51, %v4611_v52  ;;  %v9672_v57 = vcombine.high %v4615_v62, %v4619_v39  ;;  %v4662_v52 = vld [vmem:[%s14070_s3 + $0x840] sm:$0xff] }
 0x294   :  { %7725 = vmatprep.subr.bf16.mxu1 %v9616_v45  ;;  %v9670_v45 = vcombine.high %v4614_v31, %v4618_v60 }
 0x296   :  { %7562 = vmatpush1.bf16.msra.mxu0 %v9613_v4  ;;  %v4627_v4 = vld [vmem:[%s14070_s3 + $0x728] sm:$0xff] }
 0x297   :  { %7726 = vmatpush1.bf16.msra.mxu1 %v9615_v5  ;;  %7563 = vmatprep.subr.bf16.mxu0 %v9622_v6  ;;  %v9669_v5 = vcombine.low %v4614_v31, %v4618_v60  ;;  %v9671_v6 = vcombine.low %v4615_v62, %v4619_v39  ;;  %v9680_v55 = vcombine.high %v4623_v3, %v4627_v4 }
 0x298   :  { %7727 = vmatprep.subr.bf16.mxu1 %v9624_v7  ;;  %v9678_v7 = vcombine.high %v4622_v1, %v4626_v2 }
 0x29a   :  { %7564 = vmatpush1.bf16.msra.mxu0 %v9621_v14  ;;  %v4635_v14 = vld [vmem:[%s14070_s3 + $0x768] sm:$0xff] }
 0x29b   :  { %7728 = vmatpush1.bf16.msra.mxu1 %v9623_v16  ;;  %7565 = vmatprep.subr.bf16.mxu0 %v9630_v17  ;;  %v9677_v16 = vcombine.low %v4622_v1, %v4626_v2  ;;  %v620_v17 = vsub.s32 2, %v12160_v28  ;;  %v9688_v8 = vcombine.high %v4631_v13, %v4635_v14  ;;  %v9687_v27 = vcombine.low %v4631_v13, %v4635_v14 }
 0x29c   :  { %7729 = vmatprep.subr.bf16.mxu1 %v9632_v26  ;;  %v9679_v26 = vcombine.low %v4623_v3, %v4627_v4 }
 0x29e   :  { %7566 = vmatpush1.bf16.msra.mxu0 %v9629_v20  ;;  %v4639_v20 = vld [vmem:[%s14070_s3 + $0x788] sm:$0xff] }
 0x29f   :  { %7730 = vmatpush1.bf16.msra.mxu1 %v9631_v23  ;;  %7567 = vmatprep.subr.bf16.mxu0 %v9638_v24  ;;  %v4643_v23 = vld [vmem:[%s14070_s3 + $0x7a8] sm:$0xff]  ;;  %v9685_v24 = vcombine.low %v4630_v10, %v4634_v11 }
 0x2a0   :  { %7731 = vmatprep.subr.bf16.mxu1 %v9640_v33  ;;  %v621_v33 = vrot.slane %v12184_v43, %v620_v17  ;;  %v9696_v30 = vcombine.high %v4639_v20, %v4643_v23  ;;  %v4651_v43 = vld [vmem:[%s14070_s3 + $0x7e8] sm:$0xff]  ;;  %v9695_v25 = vcombine.low %v4639_v20, %v4643_v23 }
 0x2a2   :  { %7568 = vmatpush1.bf16.msra.mxu0 %v9637_v35  ;;  %v4650_v35 = vld [vmem:[%s14070_s3 + $0x7e0] sm:$0xff] }
 0x2a3   :  { %7732 = vmatpush1.bf16.msra.mxu1 %v9639_v37  ;;  %7569 = vmatprep.subr.bf16.mxu0 %v9646_v38  ;;  %v4647_v37 = vld [vmem:[%s14070_s3 + $0x7c8] sm:$0xff]  ;;  %v9693_v38 = vcombine.low %v4638_v18, %v4642_v19  ;;  %v9702_v42 = vcombine.high %v4646_v32, %v4650_v35 }
 0x2a4   :  { %7733 = vmatprep.subr.bf16.mxu1 %v9648_v12  ;;  %v10120_v12 = vadd.f32 %v11982_v29, %v621_v33  ;;  %v9704_v44 = vcombine.high %v4647_v37, %v4651_v43  ;;  %v4659_v29 = vld [vmem:[%s14070_s3 + $0x828] sm:$0xff]  ;;  %v9703_v22 = vcombine.low %v4647_v37, %v4651_v43  ;;  %v4698_v33 = vld [vmem:[%s14070_s3 + $0x960] sm:$0xff] }
 0x2a5   :  { %v4702_v43 = vld [vmem:[%s14070_s3 + $0x980] sm:$0xff] }
 0x2a6   :  { %7570 = vmatpush1.bf16.msra.mxu0 %v9645_v21  ;;  %v4658_v21 = vld [vmem:[%s14070_s3 + $0x820] sm:$0xff] }
 0x2a7   :  { %7734 = vmatpush1.bf16.msra.mxu1 %v9647_v47  ;;  %7571 = vmatprep.subr.bf16.mxu0 %v9654_v48  ;;  %v4655_v47 = vld [vmem:[%s14070_s3 + $0x808] sm:$0xff]  ;;  %v9701_v48 = vcombine.low %v4646_v32, %v4650_v35  ;;  %v9710_v50 = vcombine.high %v4654_v46, %v4658_v21 }
 0x2a8   :  { %7735 = vmatprep.subr.bf16.mxu1 %v9656_v49  ;;  %v4384_v49 = vmax.f32 %v10120_v12, 0.0  ;;  %v9712_v51 = vcombine.high %v4655_v47, %v4659_v29  ;;  %v9711_v60 = vcombine.low %v4655_v47, %v4659_v29  ;;  %v4703_v12 = vld [vmem:[%s14070_s3 + $0x988] sm:$0xff]  ;;  %v4710_v47 = vld [vmem:[%s14070_s3 + $0x9c0] sm:$0xff] }
 0x2a9   :  { %v4714_v29 = vld [vmem:[%s14070_s3 + $0x9e0] sm:$0xff] }
 0x2aa   :  { %7572 = vmatpush1.bf16.msra.mxu0 %v9653_v54  ;;  %v4666_v54 = vld [vmem:[%s14070_s3 + $0x860] sm:$0xff]  ;;  %v12640_v31 = vpack.c.bf16 %v4384_v49, %v4384_v49  ;;  %v4715_v49 = vld [vmem:[%s14070_s3 + $0x9e8] sm:$0xff] }
 0x2ab   :  { %7736 = vmatpush1.bf16.msra.mxu1 %v9655_v58  ;;  %7573 = vmatprep.subr.bf16.mxu0 %v9662_v59  ;;  %v4663_v58 = vld [vmem:[%s14070_s3 + $0x848] sm:$0xff]  ;;  %v9718_v62 = vcombine.high %v4662_v52, %v4666_v54  ;;  %v9717_v1 = vcombine.low %v4662_v52, %v4666_v54  ;;  %v4718_v54 = vld [vmem:[%s14070_s3 + $0xa00] sm:$0xff] }
 0x2ac   :  { %7737 = vmatprep.subr.bf16.mxu1 %v9664_v36  ;;  %v4667_v59 = vld [vmem:[%s14070_s3 + $0x868] sm:$0xff]  ;;  %v9709_v36 = vcombine.low %v4654_v46, %v4658_v21 }
 0x2ad   :  { %v9720_v39 = vcombine.high %v4663_v58, %v4667_v59  ;;  %v9719_v2 = vcombine.low %v4663_v58, %v4667_v59  ;;  %v4722_v58 = vld [vmem:[%s14070_s3 + $0xa20] sm:$0xff]  ;;  %v4719_v59 = vld [vmem:[%s14070_s3 + $0xa08] sm:$0xff] }
 0x2ae   :  { %7574 = vmatpush1.bf16.msra.mxu0 %v9661_v63  ;;  %v4670_v63 = vld [vmem:[%s14070_s3 + $0x880] sm:$0xff] }
 0x2af   :  { %7738 = vmatpush1.bf16.msra.mxu1 %v9663_v0  ;;  %7575 = vmatprep.subr.bf16.mxu0 %v9670_v45  ;;  %v4674_v0 = vld [vmem:[%s14070_s3 + $0x8a0] sm:$0xff]  ;;  %v4671_v45 = vld [vmem:[%s14070_s3 + $0x888] sm:$0xff] }
 0x2b0   :  { %7739 = vmatprep.subr.bf16.mxu1 %v9672_v57  ;;  %v4675_v57 = vld [vmem:[%s14070_s3 + $0x8a8] sm:$0xff]  ;;  %v9726_v3 = vcombine.high %v4670_v63, %v4674_v0  ;;  %v9725_v10 = vcombine.low %v4670_v63, %v4674_v0  ;;  %v4726_v0 = vld [vmem:[%s14070_s3 + $0xa40] sm:$0xff] }
 0x2b1   :  { %v9728_v4 = vcombine.high %v4671_v45, %v4675_v57  ;;  %v9727_v11 = vcombine.low %v4671_v45, %v4675_v57  ;;  %v4730_v45 = vld [vmem:[%s14070_s3 + $0xa60] sm:$0xff]  ;;  %v4727_v57 = vld [vmem:[%s14070_s3 + $0xa48] sm:$0xff] }
 0x2b2   :  { %7576 = vmatpush1.bf16.msra.mxu0 %v9669_v5  ;;  %v4678_v5 = vld [vmem:[%s14070_s3 + $0x8c0] sm:$0xff] }
 0x2b3   :  { %7740 = vmatpush1.bf16.msra.mxu1 %v9671_v6  ;;  %7577 = vmatprep.subr.bf16.mxu0 %v9678_v7  ;;  %v4682_v6 = vld [vmem:[%s14070_s3 + $0x8e0] sm:$0xff]  ;;  %v4679_v7 = vld [vmem:[%s14070_s3 + $0x8c8] sm:$0xff] }
 0x2b4   :  { %7741 = vmatprep.subr.bf16.mxu1 %v9680_v55  ;;  %v4683_v55 = vld [vmem:[%s14070_s3 + $0x8e8] sm:$0xff]  ;;  %v9734_v13 = vcombine.high %v4678_v5, %v4682_v6  ;;  %v9733_v18 = vcombine.low %v4678_v5, %v4682_v6  ;;  %v4734_v6 = vld [vmem:[%s14070_s3 + $0xa80] sm:$0xff] }
 0x2b5   :  { %v9736_v14 = vcombine.high %v4679_v7, %v4683_v55  ;;  %v9735_v19 = vcombine.low %v4679_v7, %v4683_v55  ;;  %v4738_v7 = vld [vmem:[%s14070_s3 + $0xaa0] sm:$0xff]  ;;  %v4735_v55 = vld [vmem:[%s14070_s3 + $0xa88] sm:$0xff] }
 0x2b6   :  { %7578 = vmatpush1.bf16.msra.mxu0 %v9677_v16  ;;  %v4686_v16 = vld [vmem:[%s14070_s3 + $0x900] sm:$0xff] }
 0x2b7   :  { %7742 = vmatpush1.bf16.msra.mxu1 %v9679_v26  ;;  %7579 = vmatprep.subr.bf16.mxu0 %v9686_v53  ;;  %v4690_v26 = vld [vmem:[%s14070_s3 + $0x920] sm:$0xff]  ;;  %v4687_v53 = vld [vmem:[%s14070_s3 + $0x908] sm:$0xff] }
 0x2b8   :  { %7743 = vmatprep.subr.bf16.mxu1 %v9688_v8  ;;  %v4691_v8 = vld [vmem:[%s14070_s3 + $0x928] sm:$0xff]  ;;  %v9742_v20 = vcombine.high %v4686_v16, %v4690_v26 }
 0x2b9   :  { %v9744_v23 = vcombine.high %v4687_v53, %v4691_v8  ;;  %v9743_v32 = vcombine.low %v4687_v53, %v4691_v8  ;;  %v4746_v53 = vld [vmem:[%s14070_s3 + $0xae0] sm:$0xff]  ;;  %v4743_v8 = vld [vmem:[%s14070_s3 + $0xac8] sm:$0xff] }
 0x2ba   :  { %7580 = vmatpush1.bf16.msra.mxu0 %v9685_v24  ;;  %v4694_v24 = vld [vmem:[%s14070_s3 + $0x940] sm:$0xff] }
 0x2bb   :  { %7744 = vmatpush1.bf16.msra.mxu1 %v9687_v27  ;;  %7581 = vmatprep.subr.bf16.mxu0 %v9694_v15  ;;  %v4695_v27 = vld [vmem:[%s14070_s3 + $0x948] sm:$0xff]  ;;  %v9750_v35 = vcombine.high %v4694_v24, %v4698_v33 }
 0x2bc   :  { %7745 = vmatprep.subr.bf16.mxu1 %v9696_v30  ;;  %v4699_v15 = vld [vmem:[%s14070_s3 + $0x968] sm:$0xff]  ;;  %v9741_v30 = vcombine.low %v4686_v16, %v4690_v26  ;;  %v4742_v26 = vld [vmem:[%s14070_s3 + $0xac0] sm:$0xff] }
 0x2bd   :  { %v9752_v37 = vcombine.high %v4695_v27, %v4699_v15 }
 0x2be   :  { %7582 = vmatpush1.bf16.msra.mxu0 %v9693_v38  ;;  %v4706_v38 = vld [vmem:[%s14070_s3 + $0x9a0] sm:$0xff] }
 0x2bf   :  { %7746 = vmatpush1.bf16.msra.mxu1 %v9695_v25  ;;  %7583 = vmatprep.subr.bf16.mxu0 %v9702_v42  ;;  %v4707_v25 = vld [vmem:[%s14070_s3 + $0x9a8] sm:$0xff]  ;;  %v9749_v42 = vcombine.low %v4694_v24, %v4698_v33  ;;  %v9758_v46 = vcombine.high %v4702_v43, %v4706_v38  ;;  %v4750_v33 = vld [vmem:[%s14070_s3 + $0xb00] sm:$0xff] }
 0x2c0   :  { %7747 = vmatprep.subr.bf16.mxu1 %v9704_v44  ;;  %v9751_v44 = vcombine.low %v4695_v27, %v4699_v15  ;;  %v9760_v21 = vcombine.high %v4703_v12, %v4707_v25  ;;  %v4754_v27 = vld [vmem:[%s14070_s3 + $0xb20] sm:$0xff]  ;;  %v4751_v15 = vld [vmem:[%s14070_s3 + $0xb08] sm:$0xff] }
 0x2c2   :  { %7584 = vmatpush1.bf16.msra.mxu0 %v9701_v48  ;;  %v4711_v48 = vld [vmem:[%s14070_s3 + $0x9c8] sm:$0xff] }
 0x2c3   :  { %7748 = vmatpush1.bf16.msra.mxu1 %v9703_v22  ;;  %7594 = vmatprep.subr.bf16.mxu0 %v9710_v50  ;;  %v9757_v22 = vcombine.low %v4702_v43, %v4706_v38  ;;  %v9759_v50 = vcombine.low %v4703_v12, %v4707_v25  ;;  %v9768_v52 = vcombine.high %v4711_v48, %v4715_v49  ;;  %v4758_v38 = vld [vmem:[%s14070_s3 + $0xb40] sm:$0xff]  ;;  %v4759_v25 = vld [vmem:[%s14070_s3 + $0xb48] sm:$0xff] }
 0x2c4   :  { %7758 = vmatprep.subr.bf16.mxu1 %v9712_v51  ;;  %v9766_v51 = vcombine.high %v4710_v47, %v4714_v29  ;;  %v4762_v12 = vld [vmem:[%s14070_s3 + $0xb60] sm:$0xff] }
 0x2c5   :  { %7586 = vmatmul.mubr.bf16.vlgmr.msra.gmra.mrb[8].mxu0 %v12640_v31 }
 0x2c6   :  { %7750 = vmatmul.mubr.bf16.vlgmr.msra.gmra.mrb[8].mxu1 %v12640_v31  ;;  %7595 = vmatpush1.bf16.msra.mxu0 %v9709_v36  ;;  %v4723_v36 = vld [vmem:[%s14070_s3 + $0xa28] sm:$0xff] }
 0x2c7   :  { %7759 = vmatpush1.bf16.msra.mxu1 %v9711_v60  ;;  %7596 = vmatprep.subr.bf16.mxu0 %v9718_v62  ;;  %v9765_v60 = vcombine.low %v4710_v47, %v4714_v29  ;;  %v9767_v62 = vcombine.low %v4711_v48, %v4715_v49  ;;  %v9776_v63 = vcombine.high %v4719_v59, %v4723_v36  ;;  %v4766_v29 = vld [vmem:[%s14070_s3 + $0xb80] sm:$0xff]  ;;  %v4767_v49 = vld [vmem:[%s14070_s3 + $0xb88] sm:$0xff] }
 0x2c8   :  { %7760 = vmatprep.subr.bf16.mxu1 %v9720_v39  ;;  %v9774_v39 = vcombine.high %v4718_v54, %v4722_v58  ;;  %v4770_v48 = vld [vmem:[%s14070_s3 + $0xba0] sm:$0xff] }
 0x2ca   :  { %7597 = vmatpush1.bf16.msra.mxu0 %v9717_v1  ;;  %v4731_v1 = vld [vmem:[%s14070_s3 + $0xa68] sm:$0xff] }
 0x2cb   :  { %7761 = vmatpush1.bf16.msra.mxu1 %v9719_v2  ;;  %7598 = vmatprep.subr.bf16.mxu0 %v9726_v3  ;;  %v9773_v2 = vcombine.low %v4718_v54, %v4722_v58  ;;  %v9775_v3 = vcombine.low %v4719_v59, %v4723_v36  ;;  %v9784_v5 = vcombine.high %v4727_v57, %v4731_v1  ;;  %v4774_v58 = vld [vmem:[%s14070_s3 + $0xbc0] sm:$0xff]  ;;  %v4775_v36 = vld [vmem:[%s14070_s3 + $0xbc8] sm:$0xff] }
 0x2cc   :  { %7762 = vmatprep.subr.bf16.mxu1 %v9728_v4  ;;  %v9782_v4 = vcombine.high %v4726_v0, %v4730_v45  ;;  %v4778_v59 = vld [vmem:[%s14070_s3 + $0xbe0] sm:$0xff] }
 0x2ce   :  { %7599 = vmatpush1.bf16.msra.mxu0 %v9725_v10  ;;  %v4739_v10 = vld [vmem:[%s14070_s3 + $0xaa8] sm:$0xff] }
 0x2cf   :  { %7763 = vmatpush1.bf16.msra.mxu1 %v9727_v11  ;;  %7600 = vmatprep.subr.bf16.mxu0 %v9734_v13  ;;  %v9781_v11 = vcombine.low %v4726_v0, %v4730_v45  ;;  %v9783_v13 = vcombine.low %v4727_v57, %v4731_v1  ;;  %v9792_v16 = vcombine.high %v4735_v55, %v4739_v10  ;;  %v4782_v45 = vld [vmem:[%s14070_s3 + $0xc00] sm:$0xff]  ;;  %v4783_v1 = vld [vmem:[%s14070_s3 + $0xc08] sm:$0xff] }
 0x2d0   :  { %7764 = vmatprep.subr.bf16.mxu1 %v9736_v14  ;;  %v9790_v14 = vcombine.high %v4734_v6, %v4738_v7  ;;  %v4786_v57 = vld [vmem:[%s14070_s3 + $0xc20] sm:$0xff] }
 0x2d2   :  { %7601 = vmatpush1.bf16.msra.mxu0 %v9733_v18  ;;  %v4747_v18 = vld [vmem:[%s14070_s3 + $0xae8] sm:$0xff] }
 0x2d3   :  { %7765 = vmatpush1.bf16.msra.mxu1 %v9735_v19  ;;  %7602 = vmatprep.subr.bf16.mxu0 %v9742_v20  ;;  %v9789_v19 = vcombine.low %v4734_v6, %v4738_v7  ;;  %v9791_v20 = vcombine.low %v4735_v55, %v4739_v10  ;;  %v9800_v24 = vcombine.high %v4743_v8, %v4747_v18  ;;  %v628_v7 = vsub.s32 4, %v12160_v28 }
 0x2d4   :  { %7766 = vmatprep.subr.bf16.mxu1 %v9744_v23  ;;  %v9798_v23 = vcombine.high %v4742_v26, %v4746_v53  ;;  %v632_v55 = vsub.s32 5, %v12160_v28  ;;  %v640_v10 = vsub.s32 7, %v12160_v28 }
 0x2d6   :  { %7603 = vmatpush1.bf16.msra.mxu0 %v9741_v30  ;;  %v4755_v30 = vld [vmem:[%s14070_s3 + $0xb28] sm:$0xff] }
 0x2d7   :  { %7767 = vmatpush1.bf16.msra.mxu1 %v9743_v32  ;;  %7604 = vmatprep.subr.bf16.mxu0 %v9750_v35  ;;  %v9797_v32 = vcombine.low %v4742_v26, %v4746_v53  ;;  %v9799_v35 = vcombine.low %v4743_v8, %v4747_v18  ;;  %v9808_v43 = vcombine.high %v4751_v15, %v4755_v30 }
 0x2d8   :  { %7768 = vmatprep.subr.bf16.mxu1 %v9752_v37  ;;  %v9806_v37 = vcombine.high %v4750_v33, %v4754_v27 }
 0x2da   :  { %7605 = vmatpush1.bf16.msra.mxu0 %v9749_v42  ;;  %v4763_v42 = vld [vmem:[%s14070_s3 + $0xb68] sm:$0xff] }
 0x2db   :  { %7769 = vmatpush1.bf16.msra.mxu1 %v9751_v44  ;;  %7606 = vmatprep.subr.bf16.mxu0 %v9758_v46  ;;  %v9805_v44 = vcombine.low %v4750_v33, %v4754_v27  ;;  %v9807_v46 = vcombine.low %v4751_v15, %v4755_v30  ;;  %v9816_v47 = vcombine.high %v4759_v25, %v4763_v42 }
 0x2dc   :  { %7770 = vmatprep.subr.bf16.mxu1 %v9760_v21  ;;  %v9814_v21 = vcombine.high %v4758_v38, %v4762_v12 }
 0x2de   :  { %7607 = vmatpush1.bf16.msra.mxu0 %v9757_v22  ;;  %v4771_v22 = vld [vmem:[%s14070_s3 + $0xba8] sm:$0xff] }
 0x2df   :  { %7771 = vmatpush1.bf16.msra.mxu1 %v9759_v50  ;;  %7608 = vmatprep.subr.bf16.mxu0 %v9766_v51  ;;  %v9813_v50 = vcombine.low %v4758_v38, %v4762_v12  ;;  %v9815_v51 = vcombine.low %v4759_v25, %v4763_v42  ;;  %v9824_v54 = vcombine.high %v4767_v49, %v4771_v22  ;;  %v4791_v38 = vld [vmem:[%s14070_s3 + $0xc48] sm:$0xff] }
 0x2e0   :  { %7772 = vmatprep.subr.bf16.mxu1 %v9768_v52  ;;  %v9822_v52 = vcombine.high %v4766_v29, %v4770_v48  ;;  %v4795_v12 = vld [vmem:[%s14070_s3 + $0xc68] sm:$0xff]  ;;  %v9837_v42 = vcombine.low %v4782_v45, %v4786_v57 }
 0x2e2   :  { %7609 = vmatpush1.bf16.msra.mxu0 %v9765_v60  ;;  %v4779_v60 = vld [vmem:[%s14070_s3 + $0xbe8] sm:$0xff] }
 0x2e3   :  { %7773 = vmatpush1.bf16.msra.mxu1 %v9767_v62  ;;  %7610 = vmatprep.subr.bf16.mxu0 %v9774_v39  ;;  %v9821_v62 = vcombine.low %v4766_v29, %v4770_v48  ;;  %v9823_v39 = vcombine.low %v4767_v49, %v4771_v22  ;;  %v9832_v0 = vcombine.high %v4775_v36, %v4779_v60  ;;  %v4802_v48 = vld [vmem:[%s14070_s3 + $0xca0] sm:$0xff]  ;;  %v4799_v49 = vld [vmem:[%s14070_s3 + $0xc88] sm:$0xff] }
 0x2e4   :  { %7774 = vmatprep.subr.bf16.mxu1 %v9776_v63  ;;  %v9830_v63 = vcombine.high %v4774_v58, %v4778_v59  ;;  %v9848_v29 = vcombine.high %v4791_v38, %v4795_v12  ;;  %v4803_v22 = vld [vmem:[%s14070_s3 + $0xca8] sm:$0xff] }
 0x2e6   :  { %7611 = vmatpush1.bf16.msra.mxu0 %v9773_v2  ;;  %v4787_v2 = vld [vmem:[%s14070_s3 + $0xc28] sm:$0xff] }
 0x2e7   :  { %7775 = vmatpush1.bf16.msra.mxu1 %v9775_v3  ;;  %7612 = vmatprep.subr.bf16.mxu0 %v9782_v4  ;;  %v9829_v3 = vcombine.low %v4774_v58, %v4778_v59  ;;  %v9831_v4 = vcombine.low %v4775_v36, %v4779_v60  ;;  %v9840_v6 = vcombine.high %v4783_v1, %v4787_v2  ;;  %v4806_v59 = vld [vmem:[%s14070_s3 + $0xcc0] sm:$0xff]  ;;  %v4807_v60 = vld [vmem:[%s14070_s3 + $0xcc8] sm:$0xff] }
 0x2e8   :  { %7776 = vmatprep.subr.bf16.mxu1 %v9784_v5  ;;  %v9838_v5 = vcombine.high %v4782_v45, %v4786_v57  ;;  %v9856_v58 = vcombine.high %v4799_v49, %v4803_v22  ;;  %v4810_v36 = vld [vmem:[%s14070_s3 + $0xce0] sm:$0xff] }
 0x2e9   :  { %v4814_v57 = vld [vmem:[%s14070_s3 + $0xd00] sm:$0xff] }
 0x2ea   :  { %7613 = vmatpush1.bf16.msra.mxu0 %v9781_v11  ;;  %v12830_v11 = vld [vmem:[%s14069_s2] sm:$0xff] }
 0x2eb   :  { %7777 = vmatpush1.bf16.msra.mxu1 %v9783_v13  ;;  %7614 = vmatprep.subr.bf16.mxu0 %v9790_v14  ;;  %v629_v13 = vrot.slane %v12830_v11, %v628_v7  ;;  %v633_v14 = vrot.slane %v12830_v11, %v632_v55 }
 0x2ec   :  { %7778 = vmatprep.subr.bf16.mxu1 %v9792_v16  ;;  %v641_v16 = vrot.slane %v12830_v11, %v640_v10 }
 0x2ee   :  { %7615 = vmatpush1.bf16.msra.mxu0 %v9789_v19 }
 0x2ef   :  { %7779 = vmatpush1.bf16.msra.mxu1 %v9791_v20  ;;  %7616 = vmatprep.subr.bf16.mxu0 %v9798_v23 }
 0x2f0   :  { %7780 = vmatprep.subr.bf16.mxu1 %v9800_v24 }
 0x2f2   :  { %7617 = vmatpush1.bf16.msra.mxu0 %v9797_v32 }
 0x2f3   :  { %7781 = vmatpush1.bf16.msra.mxu1 %v9799_v35  ;;  %7618 = vmatprep.subr.bf16.mxu0 %v9806_v37  ;;  %v4790_v35 = vld [vmem:[%s14070_s3 + $0xc40] sm:$0xff] }
 0x2f4   :  { %7782 = vmatprep.subr.bf16.mxu1 %v9808_v43  ;;  %v4794_v43 = vld [vmem:[%s14070_s3 + $0xc60] sm:$0xff] }
 0x2f6   :  { %7619 = vmatpush1.bf16.msra.mxu0 %v9805_v44  ;;  %v9839_v44 = vcombine.low %v4783_v1, %v4787_v2  ;;  %v4818_v1 = vld [vmem:[%s14070_s3 + $0xd20] sm:$0xff]  ;;  %v4815_v2 = vld [vmem:[%s14070_s3 + $0xd08] sm:$0xff] }
 0x2f7   :  { %7783 = vmatpush1.bf16.msra.mxu1 %v9807_v46  ;;  %7620 = vmatprep.subr.bf16.mxu0 %v9814_v21  ;;  %v4798_v21 = vld [vmem:[%s14070_s3 + $0xc80] sm:$0xff] }
 0x2f8   :  { %7784 = vmatprep.subr.bf16.mxu1 %v9816_v47  ;;  %v9846_v47 = vcombine.high %v4790_v35, %v4794_v43 }
 0x2fa   :  { %7621 = vmatpush1.bf16.msra.mxu0 %v9813_v50 }
 0x2fb   :  { %7785 = vmatpush1.bf16.msra.mxu1 %v9815_v51  ;;  %7622 = vmatprep.subr.bf16.mxu0 %v9822_v52  ;;  %v9845_v51 = vcombine.low %v4790_v35, %v4794_v43  ;;  %v9847_v52 = vcombine.low %v4791_v38, %v4795_v12  ;;  %v4838_v43 = vld [vmem:[%s14070_s3 + $0xdc0] sm:$0xff]  ;;  %v4839_v12 = vld [vmem:[%s14070_s3 + $0xdc8] sm:$0xff] }
 0x2fc   :  { %7786 = vmatprep.subr.bf16.mxu1 %v9824_v54  ;;  %v9854_v54 = vcombine.high %v4798_v21, %v4802_v48  ;;  %v4842_v38 = vld [vmem:[%s14070_s3 + $0xde0] sm:$0xff] }
 0x2fe   :  { %7623 = vmatpush1.bf16.msra.mxu0 %v9821_v62  ;;  %v4811_v62 = vld [vmem:[%s14070_s3 + $0xce8] sm:$0xff] }
 0x2ff   :  { %7787 = vmatpush1.bf16.msra.mxu1 %v9823_v39  ;;  %7624 = vmatprep.subr.bf16.mxu0 %v9830_v63  ;;  %v9853_v39 = vcombine.low %v4798_v21, %v4802_v48  ;;  %v9855_v63 = vcombine.low %v4799_v49, %v4803_v22  ;;  %v9864_v45 = vcombine.high %v4807_v60, %v4811_v62  ;;  %v4846_v48 = vld [vmem:[%s14070_s3 + $0xe00] sm:$0xff]  ;;  %v4847_v22 = vld [vmem:[%s14070_s3 + $0xe08] sm:$0xff] }
 0x300   :  { %7788 = vmatprep.subr.bf16.mxu1 %v9832_v0  ;;  %v9862_v0 = vcombine.high %v4806_v59, %v4810_v36  ;;  %v4850_v49 = vld [vmem:[%s14070_s3 + $0xe20] sm:$0xff] }
 0x302   :  { %7625 = vmatpush1.bf16.msra.mxu0 %v9829_v3  ;;  %v4819_v3 = vld [vmem:[%s14070_s3 + $0xd28] sm:$0xff] }
 0x303   :  { %7789 = vmatpush1.bf16.msra.mxu1 %v9831_v4  ;;  %7635 = vmatprep.subr.bf16.mxu0 %v9838_v5  ;;  %v9861_v4 = vcombine.low %v4806_v59, %v4810_v36  ;;  %v9863_v5 = vcombine.low %v4807_v60, %v4811_v62  ;;  %v4854_v36 = vld [vmem:[%s14070_s3 + $0xe40] sm:$0xff]  ;;  %v4855_v62 = vld [vmem:[%s14070_s3 + $0xe48] sm:$0xff] }
 0x304   :  { %7799 = vmatprep.subr.bf16.mxu1 %v9840_v6  ;;  %v9870_v6 = vcombine.high %v4814_v57, %v4818_v1  ;;  %v4858_v60 = vld [vmem:[%s14070_s3 + $0xe60] sm:$0xff] }
 0x318   :  { %v4170_v26 = vpop.f32.mrb[4].mxu0  ;;  %v12841_v8 = vpop.f32.mrb[4].mxu1 }
 0x319   :  { %v10122_v53 = vadd.f32 %v4170_v26, %v629_v13  ;;  %v4172_v18 = vpop.f32.mrb[5].mxu0  ;;  %v4377_v20 = vpop.f32.mrb[5].mxu1  ;;  %v9872_v13 = vcombine.high %v4815_v2, %v4819_v3  ;;  %v4823_v26 = vld [vmem:[%s14070_s3 + $0xd48] sm:$0xff] }
 0x31a   :  { %v10123_v19 = vadd.f32 %v4172_v18, %v633_v14  ;;  %v4174_v23 = vpop.f32.mrb[6].mxu0  ;;  %v10125_v33 = vadd.f32 %v4377_v20, %v641_v16  ;;  %v4379_v27 = vpop.f32.mrb[6].mxu1  ;;  %v4822_v14 = vld [vmem:[%s14070_s3 + $0xd40] sm:$0xff]  ;;  %v9869_v18 = vcombine.low %v4814_v57, %v4818_v1 }
 0x31b   :  { %v4386_v24 = vmax.f32 %v10122_v53, 0.0  ;;  %v4175_v15 = vpop.f32.mrb[7].mxu0  ;;  %v4380_v32 = vpop.f32.mrb[7].mxu1  ;;  %v4826_v16 = vld [vmem:[%s14070_s3 + $0xd60] sm:$0xff]  ;;  %v4827_v53 = vld [vmem:[%s14070_s3 + $0xd68] sm:$0xff] }
 0x31c   :  { %v4387_v30 = vmax.f32 %v10123_v19, 0.0  ;;  %v4389_v37 = vmax.f32 %v10125_v33, 0.0  ;;  %v9871_v19 = vcombine.low %v4815_v2, %v4819_v3  ;;  %v9878_v20 = vcombine.high %v4822_v14, %v4826_v16  ;;  %v4834_v33 = vld [vmem:[%s14070_s3 + $0xda0] sm:$0xff]  ;;  %v4831_v27 = vld [vmem:[%s14070_s3 + $0xd88] sm:$0xff] }
 0x31d   :  { %v12857_v46 = vpack.c.bf16 %v4386_v24, %v4386_v24  ;;  %v9880_v23 = vcombine.high %v4823_v26, %v4827_v53  ;;  %v4830_v24 = vld [vmem:[%s14070_s3 + $0xd80] sm:$0xff]  ;;  %v4835_v15 = vld [vmem:[%s14070_s3 + $0xda8] sm:$0xff]  ;;  %v9879_v32 = vcombine.low %v4823_v26, %v4827_v53 }
 0x31e   :  { %v12855_v25 = vpack.c.bf16 %v4387_v30, %v4387_v30  ;;  %v12873_v50 = vpack.c.bf16 %v4389_v37, %v4389_v37  ;;  %v9877_v30 = vcombine.low %v4822_v14, %v4826_v16  ;;  %v9886_v35 = vcombine.high %v4830_v24, %v4834_v33  ;;  %v4862_v1 = vld [vmem:[%s14070_s3 + $0xe80] sm:$0xff]  ;;  %v4863_v3 = vld [vmem:[%s14070_s3 + $0xe88] sm:$0xff] }
 0x31f   :  { %v9888_v37 = vcombine.high %v4831_v27, %v4835_v15  ;;  %v9887_v21 = vcombine.low %v4831_v27, %v4835_v15  ;;  %v4866_v2 = vld [vmem:[%s14070_s3 + $0xea0] sm:$0xff]  ;;  %v4871_v53 = vld [vmem:[%s14070_s3 + $0xec8] sm:$0xff] }
 0x320   :  { %7626 = vmatprep.mubr.bf16.mxu0 %v12855_v25  ;;  %7790 = vmatprep.mubr.bf16.mxu1 %v12855_v25  ;;  %v4870_v16 = vld [vmem:[%s14070_s3 + $0xec0] sm:$0xff]  ;;  %v4879_v15 = vld [vmem:[%s14070_s3 + $0xf08] sm:$0xff] }
 0x321   :  { %7627 = vmatmul.mubr.bf16.vlgmr.msra.gmra.mrb[8].mxu0 %v12857_v46  ;;  %7791 = vmatmul.mubr.bf16.vlgmr.msra.gmra.mrb[8].mxu1 %v12857_v46  ;;  %v4874_v26 = vld [vmem:[%s14070_s3 + $0xee0] sm:$0xff] }
 0x322   :  { %7636 = vmatpush1.bf16.msra.mxu0 %v9837_v42  ;;  %7800 = vmatpush1.bf16.msra.mxu1 %v9839_v44  ;;  %v4843_v42 = vld [vmem:[%s14070_s3 + $0xde8] sm:$0xff]  ;;  %v9885_v44 = vcombine.low %v4830_v24, %v4834_v33  ;;  %v4878_v33 = vld [vmem:[%s14070_s3 + $0xf00] sm:$0xff] }
 0x323   :  { %7667 = vmatprep.mubr.bf16.mxu0 %v12873_v50  ;;  %7831 = vmatprep.mubr.bf16.mxu1 %v12873_v50  ;;  %v4882_v27 = vld [vmem:[%s14070_s3 + $0xf20] sm:$0xff] }
 0x324   :  { %7637 = vmatprep.subr.bf16.mxu0 %v9846_v47  ;;  %7801 = vmatprep.subr.bf16.mxu1 %v9848_v29  ;;  %v9894_v47 = vcombine.high %v4838_v43, %v4842_v38  ;;  %v9896_v29 = vcombine.high %v4839_v12, %v4843_v42 }
 0x326   :  { %7638 = vmatpush1.bf16.msra.mxu0 %v9845_v51  ;;  %7802 = vmatpush1.bf16.msra.mxu1 %v9847_v52  ;;  %v4851_v51 = vld [vmem:[%s14070_s3 + $0xe28] sm:$0xff]  ;;  %v9893_v52 = vcombine.low %v4838_v43, %v4842_v38  ;;  %v4886_v38 = vld [vmem:[%s14070_s3 + $0xf40] sm:$0xff] }
 0x327   :  { %7639 = vmatprep.subr.bf16.mxu0 %v9854_v54  ;;  %7803 = vmatprep.subr.bf16.mxu1 %v9856_v58  ;;  %v9895_v54 = vcombine.low %v4839_v12, %v4843_v42  ;;  %v9902_v58 = vcombine.high %v4846_v48, %v4850_v49  ;;  %v9904_v59 = vcombine.high %v4847_v22, %v4851_v51  ;;  %v4890_v12 = vld [vmem:[%s14070_s3 + $0xf60] sm:$0xff]  ;;  %v4887_v42 = vld [vmem:[%s14070_s3 + $0xf48] sm:$0xff] }
 0x32a   :  { %7640 = vmatpush1.bf16.msra.mxu0 %v9853_v39  ;;  %7804 = vmatpush1.bf16.msra.mxu1 %v9855_v63  ;;  %v4859_v39 = vld [vmem:[%s14070_s3 + $0xe68] sm:$0xff]  ;;  %v9901_v63 = vcombine.low %v4846_v48, %v4850_v49  ;;  %v9942_v48 = vcombine.high %v4886_v38, %v4890_v12 }
 0x32b   :  { %7641 = vmatprep.subr.bf16.mxu0 %v9862_v0  ;;  %7805 = vmatprep.subr.bf16.mxu1 %v9864_v45  ;;  %v9903_v0 = vcombine.low %v4847_v22, %v4851_v51  ;;  %v9910_v45 = vcombine.high %v4854_v36, %v4858_v60  ;;  %v9912_v57 = vcombine.high %v4855_v62, %v4859_v39  ;;  %v4894_v22 = vld [vmem:[%s14070_s3 + $0xf80] sm:$0xff] }
 0x32c   :  { %v4898_v51 = vld [vmem:[%s14070_s3 + $0xfa0] sm:$0xff] }
 0x32e   :  { %7642 = vmatpush1.bf16.msra.mxu0 %v9861_v4  ;;  %7806 = vmatpush1.bf16.msra.mxu1 %v9863_v5  ;;  %v4867_v4 = vld [vmem:[%s14070_s3 + $0xea8] sm:$0xff]  ;;  %v9909_v5 = vcombine.low %v4854_v36, %v4858_v60  ;;  %v9950_v60 = vcombine.high %v4894_v22, %v4898_v51 }
 0x32f   :  { %7643 = vmatprep.subr.bf16.mxu0 %v9870_v6  ;;  %7807 = vmatprep.subr.bf16.mxu1 %v9872_v13  ;;  %v9911_v6 = vcombine.low %v4855_v62, %v4859_v39  ;;  %v9918_v13 = vcombine.high %v4862_v1, %v4866_v2  ;;  %v9920_v14 = vcombine.high %v4863_v3, %v4867_v4  ;;  %v4902_v39 = vld [vmem:[%s14070_s3 + $0xfc0] sm:$0xff] }
 0x332   :  { %7644 = vmatpush1.bf16.msra.mxu0 %v9869_v18  ;;  %7808 = vmatpush1.bf16.msra.mxu1 %v9871_v19  ;;  %v4875_v18 = vld [vmem:[%s14070_s3 + $0xee8] sm:$0xff]  ;;  %v9917_v19 = vcombine.low %v4862_v1, %v4866_v2 }
 0x333   :  { %7645 = vmatprep.subr.bf16.mxu0 %v9878_v20  ;;  %7809 = vmatprep.subr.bf16.mxu1 %v9880_v23  ;;  %v9919_v20 = vcombine.low %v4863_v3, %v4867_v4  ;;  %v9926_v23 = vcombine.high %v4870_v16, %v4874_v26  ;;  %v9928_v24 = vcombine.high %v4871_v53, %v4875_v18  ;;  %v4400_v4 = vld [vmem:[%s14070_s3 + $0x10] sm:$0xff] }
 0x336   :  { %7646 = vmatpush1.bf16.msra.mxu0 %v9877_v30  ;;  %7810 = vmatpush1.bf16.msra.mxu1 %v9879_v32  ;;  %v4883_v30 = vld [vmem:[%s14070_s3 + $0xf28] sm:$0xff]  ;;  %v9925_v32 = vcombine.low %v4870_v16, %v4874_v26 }
 0x337   :  { %7647 = vmatprep.subr.bf16.mxu0 %v9886_v35  ;;  %7811 = vmatprep.subr.bf16.mxu1 %v9888_v37  ;;  %v9927_v35 = vcombine.low %v4871_v53, %v4875_v18  ;;  %v9934_v37 = vcombine.high %v4878_v33, %v4882_v27  ;;  %v9936_v43 = vcombine.high %v4879_v15, %v4883_v30  ;;  %v4408_v18 = vld [vmem:[%s14070_s3 + $0x50] sm:$0xff] }
 0x33a   :  { %7648 = vmatpush1.bf16.msra.mxu0 %v9885_v44  ;;  %7812 = vmatpush1.bf16.msra.mxu1 %v9887_v21  ;;  %v4891_v44 = vld [vmem:[%s14070_s3 + $0xf68] sm:$0xff]  ;;  %v9933_v21 = vcombine.low %v4878_v33, %v4882_v27 }
 0x33b   :  { %7649 = vmatprep.subr.bf16.mxu0 %v9894_v47  ;;  %7813 = vmatprep.subr.bf16.mxu1 %v9896_v29  ;;  %v9935_v47 = vcombine.low %v4879_v15, %v4883_v30  ;;  %v636_v29 = vsub.s32 6, %v12160_v28  ;;  %v9944_v49 = vcombine.high %v4887_v42, %v4891_v44 }
 0x33d   :  { %v637_v36 = vrot.slane %v12830_v11, %v636_v29  ;;  %v4907_v11 = vld [vmem:[%s14070_s3 + $0xfe8] sm:$0xff] }
 0x33e   :  { %7650 = vmatpush1.bf16.msra.mxu0 %v9893_v52  ;;  %7814 = vmatpush1.bf16.msra.mxu1 %v9895_v54  ;;  %v4895_v52 = vld [vmem:[%s14070_s3 + $0xf88] sm:$0xff] }
 0x33f   :  { %7651 = vmatprep.subr.bf16.mxu0 %v9902_v58  ;;  %7815 = vmatprep.subr.bf16.mxu1 %v9904_v59  ;;  %v4899_v54 = vld [vmem:[%s14070_s3 + $0xfa8] sm:$0xff]  ;;  %v9941_v58 = vcombine.low %v4886_v38, %v4890_v12  ;;  %v9943_v59 = vcombine.low %v4887_v42, %v4891_v44  ;;  %v10124_v1 = vadd.f32 %v12841_v8, %v637_v36  ;;  %v4405_v8 = vld [vmem:[%s14070_s3 + $0x38] sm:$0xff] }
 0x340   :  { %v9952_v62 = vcombine.high %v4895_v52, %v4899_v54  ;;  %v4437_v36 = vld [vmem:[%s14070_s3 + $0x138] sm:$0xff] }
 0x341   :  { %v4388_v16 = vmax.f32 %v10124_v1, 0.0 }
 0x342   :  { %7652 = vmatpush1.bf16.msra.mxu0 %v9901_v63  ;;  %7816 = vmatpush1.bf16.msra.mxu1 %v9903_v0  ;;  %v4906_v63 = vld [vmem:[%s14070_s3 + $0xfe0] sm:$0xff]  ;;  %v4903_v0 = vld [vmem:[%s14070_s3 + $0xfc8] sm:$0xff] }
 0x343   :  { %7653 = vmatprep.subr.bf16.mxu0 %v9910_v45  ;;  %7817 = vmatprep.subr.bf16.mxu1 %v9912_v57  ;;  %v9949_v45 = vcombine.low %v4894_v22, %v4898_v51  ;;  %v9951_v57 = vcombine.low %v4895_v52, %v4899_v54  ;;  %v9958_v2 = vcombine.high %v4902_v39, %v4906_v63  ;;  %v4432_v54 = vld [vmem:[%s14070_s3 + $0x110] sm:$0xff] }
 0x344   :  { %v9960_v3 = vcombine.high %v4903_v0, %v4907_v11  ;;  %v13064_v33 = vpack.c.bf16 %v4388_v16, %v4388_v16 }
 0x346   :  { %7654 = vmatpush1.bf16.msra.mxu0 %v9909_v5  ;;  %7818 = vmatpush1.bf16.msra.mxu1 %v9911_v6  ;;  %v4404_v5 = vld [vmem:[%s14070_s3 + $0x30] sm:$0xff]  ;;  %v4401_v6 = vld [vmem:[%s14070_s3 + $0x18] sm:$0xff] }
 0x347   :  { %7655 = vmatprep.subr.bf16.mxu0 %v9918_v13  ;;  %7819 = vmatprep.subr.bf16.mxu1 %v9920_v14  ;;  %v9957_v13 = vcombine.low %v4902_v39, %v4906_v63  ;;  %v9959_v14 = vcombine.low %v4903_v0, %v4907_v11  ;;  %v9458_v26 = vcombine.high %v4400_v4, %v4404_v5  ;;  %v4440_v0 = vld [vmem:[%s14070_s3 + $0x150] sm:$0xff] }
 0x348   :  { %v9460_v53 = vcombine.high %v4401_v6, %v4405_v8  ;;  %v9459_v27 = vcombine.low %v4401_v6, %v4405_v8  ;;  %v4444_v11 = vld [vmem:[%s14070_s3 + $0x170] sm:$0xff]  ;;  %v4449_v8 = vld [vmem:[%s14070_s3 + $0x198] sm:$0xff] }
 0x349   :  { %v4452_v6 = vld [vmem:[%s14070_s3 + $0x1b0] sm:$0xff] }
 0x34a   :  { %7656 = vmatpush1.bf16.msra.mxu0 %v9917_v19  ;;  %7820 = vmatpush1.bf16.msra.mxu1 %v9919_v20  ;;  %v4412_v19 = vld [vmem:[%s14070_s3 + $0x70] sm:$0xff]  ;;  %v4409_v20 = vld [vmem:[%s14070_s3 + $0x58] sm:$0xff] }
 0x34b   :  { %7657 = vmatprep.subr.bf16.mxu0 %v9926_v23  ;;  %7821 = vmatprep.subr.bf16.mxu1 %v9928_v24  ;;  %v4413_v23 = vld [vmem:[%s14070_s3 + $0x78] sm:$0xff]  ;;  %v9457_v24 = vcombine.low %v4400_v4, %v4404_v5  ;;  %v9466_v15 = vcombine.high %v4408_v18, %v4412_v19  ;;  %v9465_v38 = vcombine.low %v4408_v18, %v4412_v19  ;;  %v4448_v5 = vld [vmem:[%s14070_s3 + $0x190] sm:$0xff] }
 0x34c   :  { %v9468_v30 = vcombine.high %v4409_v20, %v4413_v23  ;;  %v9467_v12 = vcombine.low %v4409_v20, %v4413_v23  ;;  %v4456_v18 = vld [vmem:[%s14070_s3 + $0x1d0] sm:$0xff]  ;;  %v4457_v20 = vld [vmem:[%s14070_s3 + $0x1d8] sm:$0xff] }
 0x34d   :  { %v4460_v19 = vld [vmem:[%s14070_s3 + $0x1f0] sm:$0xff]  ;;  %v4461_v23 = vld [vmem:[%s14070_s3 + $0x1f8] sm:$0xff] }
 0x34e   :  { %7658 = vmatpush1.bf16.msra.mxu0 %v9925_v32  ;;  %7822 = vmatpush1.bf16.msra.mxu1 %v9927_v35  ;;  %v4416_v32 = vld [vmem:[%s14070_s3 + $0x90] sm:$0xff] }
 0x34f   :  { %7659 = vmatprep.subr.bf16.mxu0 %v9934_v37  ;;  %7823 = vmatprep.subr.bf16.mxu1 %v9936_v43  ;;  %v4420_v35 = vld [vmem:[%s14070_s3 + $0xb0] sm:$0xff]  ;;  %v4417_v37 = vld [vmem:[%s14070_s3 + $0x98] sm:$0xff] }
 0x350   :  { %v4421_v43 = vld [vmem:[%s14070_s3 + $0xb8] sm:$0xff]  ;;  %v9474_v42 = vcombine.high %v4416_v32, %v4420_v35 }
 0x351   :  { %v9476_v44 = vcombine.high %v4417_v37, %v4421_v43  ;;  %v9475_v22 = vcombine.low %v4417_v37, %v4421_v43  ;;  %v4465_v37 = vld [vmem:[%s14070_s3 + $0x218] sm:$0xff] }
 0x352   :  { %7660 = vmatpush1.bf16.msra.mxu0 %v9933_v21  ;;  %7824 = vmatpush1.bf16.msra.mxu1 %v9935_v47  ;;  %v4424_v21 = vld [vmem:[%s14070_s3 + $0xd0] sm:$0xff]  ;;  %v4469_v43 = vld [vmem:[%s14070_s3 + $0x238] sm:$0xff] }
 0x353   :  { %7661 = vmatprep.subr.bf16.mxu0 %v9942_v48  ;;  %7825 = vmatprep.subr.bf16.mxu1 %v9944_v49  ;;  %v4428_v47 = vld [vmem:[%s14070_s3 + $0xf0] sm:$0xff]  ;;  %v4425_v48 = vld [vmem:[%s14070_s3 + $0xd8] sm:$0xff]  ;;  %v9473_v49 = vcombine.low %v4416_v32, %v4420_v35 }
 0x354   :  { %v9482_v51 = vcombine.high %v4424_v21, %v4428_v47  ;;  %v4464_v32 = vld [vmem:[%s14070_s3 + $0x210] sm:$0xff] }
 0x355   :  { %v4468_v35 = vld [vmem:[%s14070_s3 + $0x230] sm:$0xff] }
 0x356   :  { %7662 = vmatpush1.bf16.msra.mxu0 %v9941_v58  ;;  %7826 = vmatpush1.bf16.msra.mxu1 %v9943_v59  ;;  %v4436_v58 = vld [vmem:[%s14070_s3 + $0x130] sm:$0xff]  ;;  %v4433_v59 = vld [vmem:[%s14070_s3 + $0x118] sm:$0xff] }
 0x357   :  { %7663 = vmatprep.subr.bf16.mxu0 %v9950_v60  ;;  %7827 = vmatprep.subr.bf16.mxu1 %v9952_v62  ;;  %v9481_v60 = vcombine.low %v4424_v21, %v4428_v47  ;;  %v9490_v39 = vcombine.high %v4432_v54, %v4436_v58  ;;  %v9492_v63 = vcombine.high %v4433_v59, %v4437_v36  ;;  %v4472_v21 = vld [vmem:[%s14070_s3 + $0x250] sm:$0xff] }
 0x358   :  { %v9489_v1 = vcombine.low %v4432_v54, %v4436_v58  ;;  %v4476_v47 = vld [vmem:[%s14070_s3 + $0x270] sm:$0xff] }
 0x359   :  { %v4480_v54 = vld [vmem:[%s14070_s3 + $0x290] sm:$0xff] }
 0x35a   :  { %7664 = vmatpush1.bf16.msra.mxu0 %v9949_v45  ;;  %7828 = vmatpush1.bf16.msra.mxu1 %v9951_v57  ;;  %v4441_v45 = vld [vmem:[%s14070_s3 + $0x158] sm:$0xff]  ;;  %v4484_v58 = vld [vmem:[%s14070_s3 + $0x2b0] sm:$0xff] }
 0x35b   :  { %7665 = vmatprep.subr.bf16.mxu0 %v9958_v2  ;;  %7829 = vmatprep.subr.bf16.mxu1 %v9960_v3  ;;  %v4445_v57 = vld [vmem:[%s14070_s3 + $0x178] sm:$0xff]  ;;  %v9491_v2 = vcombine.low %v4433_v59, %v4437_v36  ;;  %v9498_v3 = vcombine.high %v4440_v0, %v4444_v11 }
 0x35c   :  { %v9500_v4 = vcombine.high %v4441_v45, %v4445_v57  ;;  %v9499_v16 = vcombine.low %v4441_v45, %v4445_v57  ;;  %v4481_v59 = vld [vmem:[%s14070_s3 + $0x298] sm:$0xff] }
 0x35d   :  { %v4485_v36 = vld [vmem:[%s14070_s3 + $0x2b8] sm:$0xff] }
 0x35e   :  { %7666 = vmatpush1.bf16.msra.mxu0 %v9957_v13  ;;  %7830 = vmatpush1.bf16.msra.mxu1 %v9959_v14  ;;  %v4453_v13 = vld [vmem:[%s14070_s3 + $0x1b8] sm:$0xff]  ;;  %v9497_v14 = vcombine.low %v4440_v0, %v4444_v11  ;;  %v4488_v0 = vld [vmem:[%s14070_s3 + $0x2d0] sm:$0xff] }
 0x35f   :  { %7840 = vmatprep.subr.bf16.mxu0 %v9458_v26  ;;  %8004 = vmatprep.subr.bf16.mxu1 %v9460_v53  ;;  %v9506_v26 = vcombine.high %v4448_v5, %v4452_v6  ;;  %v9508_v53 = vcombine.high %v4449_v8, %v4453_v13  ;;  %v4492_v11 = vld [vmem:[%s14070_s3 + $0x2f0] sm:$0xff]  ;;  %v4489_v45 = vld [vmem:[%s14070_s3 + $0x2d8] sm:$0xff] }
 0x360   :  { %v4493_v57 = vld [vmem:[%s14070_s3 + $0x2f8] sm:$0xff] }
 0x361   :  { %7668 = vmatmul.mubr.bf16.vlgmr.msra.gmra.mrb[8].mxu0 %v13064_v33  ;;  %7832 = vmatmul.mubr.bf16.vlgmr.msra.gmra.mrb[8].mxu1 %v13064_v33 }
 0x362   :  { %7841 = vmatpush1.bf16.msra.mxu0 %v9457_v24  ;;  %7872 = vmatprep.mubr.bf16.mxu0 %v12232_v9  ;;  %v9505_v24 = vcombine.low %v4448_v5, %v4452_v6  ;;  %v4496_v5 = vld [vmem:[%s14070_s3 + $0x310] sm:$0xff] }
 0x363   :  { %8005 = vmatpush1.bf16.msra.mxu1 %v9459_v27  ;;  %8036 = vmatprep.mubr.bf16.mxu1 %v12232_v9  ;;  %v4429_v9 = vld [vmem:[%s14070_s3 + $0xf8] sm:$0xff]  ;;  %v9507_v27 = vcombine.low %v4449_v8, %v4453_v13  ;;  %v4500_v6 = vld [vmem:[%s14070_s3 + $0x330] sm:$0xff] }
 0x364   :  { %7842 = vmatprep.subr.bf16.mxu0 %v9466_v15  ;;  %8006 = vmatprep.subr.bf16.mxu1 %v9468_v30  ;;  %v9484_v52 = vcombine.high %v4425_v48, %v4429_v9  ;;  %v9483_v62 = vcombine.low %v4425_v48, %v4429_v9  ;;  %v9514_v15 = vcombine.high %v4456_v18, %v4460_v19  ;;  %v4473_v48 = vld [vmem:[%s14070_s3 + $0x258] sm:$0xff] }
 0x365   :  { %v9516_v30 = vcombine.high %v4457_v20, %v4461_v23  ;;  %v4477_v9 = vld [vmem:[%s14070_s3 + $0x278] sm:$0xff] }
 0x366   :  { %7843 = vmatpush1.bf16.msra.mxu0 %v9465_v38  ;;  %v9513_v38 = vcombine.low %v4456_v18, %v4460_v19  ;;  %v4497_v8 = vld [vmem:[%s14070_s3 + $0x318] sm:$0xff]  ;;  %v4504_v18 = vld [vmem:[%s14070_s3 + $0x350] sm:$0xff] }
 0x367   :  { %8007 = vmatpush1.bf16.msra.mxu1 %v9467_v12  ;;  %7844 = vmatprep.subr.bf16.mxu0 %v9474_v42  ;;  %v9515_v12 = vcombine.low %v4457_v20, %v4461_v23  ;;  %v9522_v42 = vcombine.high %v4464_v32, %v4468_v35  ;;  %v4501_v13 = vld [vmem:[%s14070_s3 + $0x338] sm:$0xff]  ;;  %v4508_v19 = vld [vmem:[%s14070_s3 + $0x370] sm:$0xff] }
 0x368   :  { %8008 = vmatprep.subr.bf16.mxu1 %v9476_v44  ;;  %v9524_v44 = vcombine.high %v4465_v37, %v4469_v43  ;;  %v4505_v20 = vld [vmem:[%s14070_s3 + $0x358] sm:$0xff] }
 0x369   :  { %v4509_v23 = vld [vmem:[%s14070_s3 + $0x378] sm:$0xff] }
 0x36a   :  { %7845 = vmatpush1.bf16.msra.mxu0 %v9473_v49  ;;  %v9521_v49 = vcombine.low %v4464_v32, %v4468_v35  ;;  %v4512_v32 = vld [vmem:[%s14070_s3 + $0x390] sm:$0xff] }
 0x36b   :  { %8009 = vmatpush1.bf16.msra.mxu1 %v9475_v22  ;;  %7846 = vmatprep.subr.bf16.mxu0 %v9482_v51  ;;  %v9523_v22 = vcombine.low %v4465_v37, %v4469_v43  ;;  %v9530_v51 = vcombine.high %v4472_v21, %v4476_v47  ;;  %v4516_v35 = vld [vmem:[%s14070_s3 + $0x3b0] sm:$0xff]  ;;  %v4513_v37 = vld [vmem:[%s14070_s3 + $0x398] sm:$0xff] }
 0x36c   :  { %8010 = vmatprep.subr.bf16.mxu1 %v9484_v52  ;;  %v9532_v52 = vcombine.high %v4473_v48, %v4477_v9  ;;  %v4517_v43 = vld [vmem:[%s14070_s3 + $0x3b8] sm:$0xff] }
 0x36e   :  { %7847 = vmatpush1.bf16.msra.mxu0 %v9481_v60  ;;  %v9529_v60 = vcombine.low %v4472_v21, %v4476_v47  ;;  %v4520_v21 = vld [vmem:[%s14070_s3 + $0x3d0] sm:$0xff] }
 0x36f   :  { %8011 = vmatpush1.bf16.msra.mxu1 %v9483_v62  ;;  %7848 = vmatprep.subr.bf16.mxu0 %v9490_v39  ;;  %v9531_v62 = vcombine.low %v4473_v48, %v4477_v9  ;;  %v9538_v39 = vcombine.high %v4480_v54, %v4484_v58  ;;  %v4524_v47 = vld [vmem:[%s14070_s3 + $0x3f0] sm:$0xff]  ;;  %v4521_v48 = vld [vmem:[%s14070_s3 + $0x3d8] sm:$0xff] }
 0x370   :  { %8012 = vmatprep.subr.bf16.mxu1 %v9492_v63  ;;  %v9540_v63 = vcombine.high %v4481_v59, %v4485_v36  ;;  %v4525_v9 = vld [vmem:[%s14070_s3 + $0x3f8] sm:$0xff] }
 0x372   :  { %7849 = vmatpush1.bf16.msra.mxu0 %v9489_v1  ;;  %v9537_v1 = vcombine.low %v4480_v54, %v4484_v58  ;;  %v4528_v54 = vld [vmem:[%s14070_s3 + $0x410] sm:$0xff] }
 0x373   :  { %8013 = vmatpush1.bf16.msra.mxu1 %v9491_v2  ;;  %7850 = vmatprep.subr.bf16.mxu0 %v9498_v3  ;;  %v9539_v2 = vcombine.low %v4481_v59, %v4485_v36  ;;  %v9546_v3 = vcombine.high %v4488_v0, %v4492_v11  ;;  %v4532_v58 = vld [vmem:[%s14070_s3 + $0x430] sm:$0xff]  ;;  %v4529_v59 = vld [vmem:[%s14070_s3 + $0x418] sm:$0xff] }
 0x374   :  { %8014 = vmatprep.subr.bf16.mxu1 %v9500_v4  ;;  %v9548_v4 = vcombine.high %v4489_v45, %v4493_v57  ;;  %v4533_v36 = vld [vmem:[%s14070_s3 + $0x438] sm:$0xff] }
 0x376   :  { %7851 = vmatpush1.bf16.msra.mxu0 %v9497_v14  ;;  %v9545_v14 = vcombine.low %v4488_v0, %v4492_v11  ;;  %v4536_v0 = vld [vmem:[%s14070_s3 + $0x450] sm:$0xff] }
 0x377   :  { %8015 = vmatpush1.bf16.msra.mxu1 %v9499_v16  ;;  %7852 = vmatprep.subr.bf16.mxu0 %v9506_v26  ;;  %v9547_v16 = vcombine.low %v4489_v45, %v4493_v57  ;;  %v9554_v26 = vcombine.high %v4496_v5, %v4500_v6  ;;  %v4540_v11 = vld [vmem:[%s14070_s3 + $0x470] sm:$0xff]  ;;  %v9585_v45 = vcombine.low %v4528_v54, %v4532_v58  ;;  %v4537_v57 = vld [vmem:[%s14070_s3 + $0x458] sm:$0xff] }
 0x378   :  { %8016 = vmatprep.subr.bf16.mxu1 %v9508_v53  ;;  %v9556_v53 = vcombine.high %v4497_v8, %v4501_v13 }
 0x37a   :  { %7853 = vmatpush1.bf16.msra.mxu0 %v9505_v24  ;;  %v9553_v24 = vcombine.low %v4496_v5, %v4500_v6  ;;  %v4548_v5 = vld [vmem:[%s14070_s3 + $0x4b0] sm:$0xff] }
 0x37b   :  { %8017 = vmatpush1.bf16.msra.mxu1 %v9507_v27  ;;  %7854 = vmatprep.subr.bf16.mxu0 %v9514_v15  ;;  %v9555_v27 = vcombine.low %v4497_v8, %v4501_v13  ;;  %v9562_v15 = vcombine.high %v4504_v18, %v4508_v19  ;;  %v4545_v8 = vld [vmem:[%s14070_s3 + $0x498] sm:$0xff] }
 0x37c   :  { %8018 = vmatprep.subr.bf16.mxu1 %v9516_v30  ;;  %v9564_v30 = vcombine.high %v4505_v20, %v4509_v23  ;;  %v4549_v13 = vld [vmem:[%s14070_s3 + $0x4b8] sm:$0xff] }
 0x37e   :  { %7855 = vmatpush1.bf16.msra.mxu0 %v9513_v38  ;;  %v9561_v38 = vcombine.low %v4504_v18, %v4508_v19  ;;  %v4552_v18 = vld [vmem:[%s14070_s3 + $0x4d0] sm:$0xff] }
 0x37f   :  { %8019 = vmatpush1.bf16.msra.mxu1 %v9515_v12  ;;  %7856 = vmatprep.subr.bf16.mxu0 %v9522_v42  ;;  %v9563_v12 = vcombine.low %v4505_v20, %v4509_v23  ;;  %v9570_v42 = vcombine.high %v4512_v32, %v4516_v35  ;;  %v4556_v19 = vld [vmem:[%s14070_s3 + $0x4f0] sm:$0xff]  ;;  %v4557_v20 = vld [vmem:[%s14070_s3 + $0x4f8] sm:$0xff]  ;;  %v9603_v23 = vcombine.low %v4545_v8, %v4549_v13 }
 0x380   :  { %8020 = vmatprep.subr.bf16.mxu1 %v9524_v44  ;;  %v9572_v44 = vcombine.high %v4513_v37, %v4517_v43 }
 0x382   :  { %7857 = vmatpush1.bf16.msra.mxu0 %v9521_v49  ;;  %v9569_v49 = vcombine.low %v4512_v32, %v4516_v35  ;;  %v4561_v32 = vld [vmem:[%s14070_s3 + $0x518] sm:$0xff] }
 0x383   :  { %8021 = vmatpush1.bf16.msra.mxu1 %v9523_v22  ;;  %7858 = vmatprep.subr.bf16.mxu0 %v9530_v51  ;;  %v9571_v22 = vcombine.low %v4513_v37, %v4517_v43  ;;  %v9578_v51 = vcombine.high %v4520_v21, %v4524_v47  ;;  %v4565_v35 = vld [vmem:[%s14070_s3 + $0x538] sm:$0xff]  ;;  %v9609_v37 = vcombine.low %v4552_v18, %v4556_v19 }
 0x384   :  { %8022 = vmatprep.subr.bf16.mxu1 %v9532_v52  ;;  %v9580_v52 = vcombine.high %v4521_v48, %v4525_v9 }
 0x386   :  { %7859 = vmatpush1.bf16.msra.mxu0 %v9529_v60  ;;  %v9577_v60 = vcombine.low %v4520_v21, %v4524_v47  ;;  %v4569_v21 = vld [vmem:[%s14070_s3 + $0x558] sm:$0xff] }
 0x387   :  { %8023 = vmatpush1.bf16.msra.mxu1 %v9531_v62  ;;  %7860 = vmatprep.subr.bf16.mxu0 %v9538_v39  ;;  %v9579_v62 = vcombine.low %v4521_v48, %v4525_v9  ;;  %v9586_v39 = vcombine.high %v4528_v54, %v4532_v58  ;;  %v4573_v47 = vld [vmem:[%s14070_s3 + $0x578] sm:$0xff]  ;;  %v9619_v9 = vcombine.low %v4561_v32, %v4565_v35 }
 0x388   :  { %8024 = vmatprep.subr.bf16.mxu1 %v9540_v63  ;;  %v9588_v63 = vcombine.high %v4529_v59, %v4533_v36  ;;  %v4577_v54 = vld [vmem:[%s14070_s3 + $0x598] sm:$0xff] }
 0x389   :  { %v4581_v58 = vld [vmem:[%s14070_s3 + $0x5b8] sm:$0xff] }
 0x38a   :  { %7861 = vmatpush1.bf16.msra.mxu0 %v9537_v1  ;;  %v4541_v1 = vld [vmem:[%s14070_s3 + $0x478] sm:$0xff] }
 0x38b   :  { %8025 = vmatpush1.bf16.msra.mxu1 %v9539_v2  ;;  %7862 = vmatprep.subr.bf16.mxu0 %v9546_v3  ;;  %v9587_v2 = vcombine.low %v4529_v59, %v4533_v36  ;;  %v9594_v3 = vcombine.high %v4536_v0, %v4540_v11  ;;  %v9596_v6 = vcombine.high %v4537_v57, %v4541_v1 }
 0x38c   :  { %8026 = vmatprep.subr.bf16.mxu1 %v9548_v4  ;;  %v4544_v4 = vld [vmem:[%s14070_s3 + $0x490] sm:$0xff]  ;;  %v9627_v36 = vcombine.low %v4569_v21, %v4573_v47 }
 0x38e   :  { %7863 = vmatpush1.bf16.msra.mxu0 %v9545_v14  ;;  %v9593_v14 = vcombine.low %v4536_v0, %v4540_v11  ;;  %v4585_v0 = vld [vmem:[%s14070_s3 + $0x5d8] sm:$0xff] }
 0x38f   :  { %8027 = vmatpush1.bf16.msra.mxu1 %v9547_v16  ;;  %7864 = vmatprep.subr.bf16.mxu0 %v9554_v26  ;;  %v9595_v16 = vcombine.low %v4537_v57, %v4541_v1  ;;  %v9602_v26 = vcombine.high %v4544_v4, %v4548_v5  ;;  %v4589_v11 = vld [vmem:[%s14070_s3 + $0x5f8] sm:$0xff]  ;;  %v9635_v57 = vcombine.low %v4577_v54, %v4581_v58 }
 0x390   :  { %8028 = vmatprep.subr.bf16.mxu1 %v9556_v53  ;;  %v9604_v53 = vcombine.high %v4545_v8, %v4549_v13  ;;  %v9643_v13 = vcombine.low %v4585_v0, %v4589_v11 }
 0x392   :  { %7865 = vmatpush1.bf16.msra.mxu0 %v9553_v24  ;;  %v9610_v24 = vcombine.high %v4552_v18, %v4556_v19  ;;  %v4601_v18 = vld [vmem:[%s14070_s3 + $0x658] sm:$0xff] }
 0x393   :  { %8029 = vmatpush1.bf16.msra.mxu1 %v9555_v27  ;;  %7866 = vmatprep.subr.bf16.mxu0 %v9562_v15  ;;  %v4560_v15 = vld [vmem:[%s14070_s3 + $0x510] sm:$0xff]  ;;  %v4605_v19 = vld [vmem:[%s14070_s3 + $0x678] sm:$0xff] }
 0x394   :  { %8030 = vmatprep.subr.bf16.mxu1 %v9564_v30  ;;  %v4564_v30 = vld [vmem:[%s14070_s3 + $0x530] sm:$0xff] }
 0x395   :  { %v9617_v48 = vcombine.low %v4560_v15, %v4564_v30 }
 0x396   :  { %7867 = vmatpush1.bf16.msra.mxu0 %v9561_v38  ;;  %v9618_v38 = vcombine.high %v4560_v15, %v4564_v30  ;;  %v4609_v15 = vld [vmem:[%s14070_s3 + $0x698] sm:$0xff] }
 0x397   :  { %8031 = vmatpush1.bf16.msra.mxu1 %v9563_v12  ;;  %7868 = vmatprep.subr.bf16.mxu0 %v9570_v42  ;;  %v9620_v12 = vcombine.high %v4561_v32, %v4565_v35  ;;  %v4568_v42 = vld [vmem:[%s14070_s3 + $0x550] sm:$0xff]  ;;  %v4613_v30 = vld [vmem:[%s14070_s3 + $0x6b8] sm:$0xff]  ;;  %v9659_v35 = vcombine.low %v4601_v18, %v4605_v19 }
 0x398   :  { %8032 = vmatprep.subr.bf16.mxu1 %v9572_v44  ;;  %v4572_v44 = vld [vmem:[%s14070_s3 + $0x570] sm:$0xff] }
 0x399   :  { %v9625_v59 = vcombine.low %v4568_v42, %v4572_v44 }
 0x39a   :  { %7869 = vmatpush1.bf16.msra.mxu0 %v9569_v49  ;;  %v9626_v49 = vcombine.high %v4568_v42, %v4572_v44  ;;  %v4617_v42 = vld [vmem:[%s14070_s3 + $0x6d8] sm:$0xff] }
 0x39b   :  { %8033 = vmatpush1.bf16.msra.mxu1 %v9571_v22  ;;  %7870 = vmatprep.subr.bf16.mxu0 %v9578_v51  ;;  %v9628_v22 = vcombine.high %v4569_v21, %v4573_v47  ;;  %v4576_v51 = vld [vmem:[%s14070_s3 + $0x590] sm:$0xff]  ;;  %v4621_v44 = vld [vmem:[%s14070_s3 + $0x6f8] sm:$0xff]  ;;  %v9667_v47 = vcombine.low %v4609_v15, %v4613_v30 }
 0x39c   :  { %8034 = vmatprep.subr.bf16.mxu1 %v9580_v52  ;;  %v4580_v52 = vld [vmem:[%s14070_s3 + $0x5b0] sm:$0xff] }
 0x39e   :  { %7871 = vmatpush1.bf16.msra.mxu0 %v9577_v60  ;;  %v9634_v60 = vcombine.high %v4576_v51, %v4580_v52 }
 0x39f   :  { %8035 = vmatpush1.bf16.msra.mxu1 %v9579_v62  ;;  %7881 = vmatprep.subr.bf16.mxu0 %v9586_v39  ;;  %v9636_v62 = vcombine.high %v4577_v54, %v4581_v58  ;;  %v4584_v39 = vld [vmem:[%s14070_s3 + $0x5d0] sm:$0xff]  ;;  %v9675_v58 = vcombine.low %v4617_v42, %v4621_v44 }
 0x3a0   :  { %8045 = vmatprep.subr.bf16.mxu1 %v9588_v63  ;;  %v4588_v63 = vld [vmem:[%s14070_s3 + $0x5f0] sm:$0xff] }
 0x3a1   :  { %7873 = vmatmul.mubr.bf16.vlgmr.msra.gmra.mrb[12].mxu0 %v12435_v34  ;;  %v9642_v1 = vcombine.high %v4584_v39, %v4588_v63  ;;  %v9641_v8 = vcombine.low %v4584_v39, %v4588_v63  ;;  %v4633_v39 = vld [vmem:[%s14070_s3 + $0x758] sm:$0xff] }
 0x3a2   :  { %8037 = vmatmul.mubr.bf16.vlgmr.msra.gmra.mrb[12].mxu1 %v12435_v34  ;;  %7882 = vmatpush1.bf16.msra.mxu0 %v9585_v45  ;;  %v4553_v34 = vld [vmem:[%s14070_s3 + $0x4d8] sm:$0xff]  ;;  %v9633_v45 = vcombine.low %v4576_v51, %v4580_v52 }
 0x3a3   :  { %7913 = vmatprep.mubr.bf16.mxu0 %v12443_v40  ;;  %8046 = vmatpush1.bf16.msra.mxu1 %v9587_v2  ;;  %v9612_v27 = vcombine.high %v4553_v34, %v4557_v20  ;;  %v9611_v43 = vcombine.low %v4553_v34, %v4557_v20  ;;  %v9644_v2 = vcombine.high %v4585_v0, %v4589_v11  ;;  %v4625_v51 = vld [vmem:[%s14070_s3 + $0x718] sm:$0xff] }
 0x3a4   :  { %8077 = vmatprep.mubr.bf16.mxu1 %v12443_v40  ;;  %7883 = vmatprep.subr.bf16.mxu0 %v9594_v3  ;;  %v9601_v40 = vcombine.low %v4544_v4, %v4548_v5  ;;  %v4592_v3 = vld [vmem:[%s14070_s3 + $0x610] sm:$0xff]  ;;  %v4593_v5 = vld [vmem:[%s14070_s3 + $0x618] sm:$0xff] }
 0x3a5   :  { %8047 = vmatprep.subr.bf16.mxu1 %v9596_v6  ;;  %v4596_v4 = vld [vmem:[%s14070_s3 + $0x630] sm:$0xff]  ;;  %v4597_v6 = vld [vmem:[%s14070_s3 + $0x638] sm:$0xff] }
 0x3a6   :  { %7884 = vmatpush1.bf16.msra.mxu0 %v9593_v14  ;;  %v9650_v14 = vcombine.high %v4592_v3, %v4596_v4  ;;  %v9649_v34 = vcombine.low %v4592_v3, %v4596_v4  ;;  %v9651_v20 = vcombine.low %v4593_v5, %v4597_v6  ;;  %v4629_v52 = vld [vmem:[%s14070_s3 + $0x738] sm:$0xff] }
 0x3a7   :  { %8048 = vmatpush1.bf16.msra.mxu1 %v9595_v16  ;;  %7885 = vmatprep.subr.bf16.mxu0 %v9602_v26  ;;  %v9652_v16 = vcombine.high %v4593_v5, %v4597_v6  ;;  %v4600_v26 = vld [vmem:[%s14070_s3 + $0x650] sm:$0xff]  ;;  %v4637_v63 = vld [vmem:[%s14070_s3 + $0x778] sm:$0xff]  ;;  %v9683_v11 = vcombine.low %v4625_v51, %v4629_v52 }
 0x3a8   :  { %8049 = vmatprep.subr.bf16.mxu1 %v9604_v53  ;;  %v4604_v53 = vld [vmem:[%s14070_s3 + $0x670] sm:$0xff]  ;;  %v4641_v3 = vld [vmem:[%s14070_s3 + $0x798] sm:$0xff]  ;;  %v9691_v6 = vcombine.low %v4633_v39, %v4637_v63 }
 0x3a9   :  { %v9657_v32 = vcombine.low %v4600_v26, %v4604_v53  ;;  %v4645_v4 = vld [vmem:[%s14070_s3 + $0x7b8] sm:$0xff] }
 0x3aa   :  { %7886 = vmatpush1.bf16.msra.mxu0 %v9601_v40  ;;  %v9658_v40 = vcombine.high %v4600_v26, %v4604_v53  ;;  %v4649_v26 = vld [vmem:[%s14070_s3 + $0x7d8] sm:$0xff] }
 0x3ab   :  { %8050 = vmatpush1.bf16.msra.mxu1 %v9603_v23  ;;  %7887 = vmatprep.subr.bf16.mxu0 %v9610_v24  ;;  %v9660_v23 = vcombine.high %v4601_v18, %v4605_v19  ;;  %v4608_v24 = vld [vmem:[%s14070_s3 + $0x690] sm:$0xff]  ;;  %v4653_v53 = vld [vmem:[%s14070_s3 + $0x7f8] sm:$0xff]  ;;  %v9699_v19 = vcombine.low %v4641_v3, %v4645_v4 }
 0x3ac   :  { %8051 = vmatprep.subr.bf16.mxu1 %v9612_v27  ;;  %v4612_v27 = vld [vmem:[%s14070_s3 + $0x6b0] sm:$0xff] }
 0x3ad   :  { %v9665_v21 = vcombine.low %v4608_v24, %v4612_v27 }
 0x3ae   :  { %7888 = vmatpush1.bf16.msra.mxu0 %v9609_v37  ;;  %v9666_v37 = vcombine.high %v4608_v24, %v4612_v27  ;;  %v4657_v24 = vld [vmem:[%s14070_s3 + $0x818] sm:$0xff] }
 0x3af   :  { %8052 = vmatpush1.bf16.msra.mxu1 %v9611_v43  ;;  %7889 = vmatprep.subr.bf16.mxu0 %v9618_v38  ;;  %v9668_v43 = vcombine.high %v4609_v15, %v4613_v30  ;;  %v4616_v38 = vld [vmem:[%s14070_s3 + $0x6d0] sm:$0xff]  ;;  %v4661_v27 = vld [vmem:[%s14070_s3 + $0x838] sm:$0xff]  ;;  %v9707_v30 = vcombine.low %v4649_v26, %v4653_v53 }
 0x3b0   :  { %8053 = vmatprep.subr.bf16.mxu1 %v9620_v12  ;;  %v4620_v12 = vld [vmem:[%s14070_s3 + $0x6f0] sm:$0xff] }
 0x3b1   :  { %v9673_v54 = vcombine.low %v4616_v38, %v4620_v12 }
 0x3b2   :  { %7890 = vmatpush1.bf16.msra.mxu0 %v9617_v48  ;;  %v9674_v48 = vcombine.high %v4616_v38, %v4620_v12  ;;  %v4665_v12 = vld [vmem:[%s14070_s3 + $0x858] sm:$0xff] }
 0x3b3   :  { %8054 = vmatpush1.bf16.msra.mxu1 %v9619_v9  ;;  %7891 = vmatprep.subr.bf16.mxu0 %v9626_v49  ;;  %v9676_v9 = vcombine.high %v4617_v42, %v4621_v44  ;;  %v4624_v49 = vld [vmem:[%s14070_s3 + $0x710] sm:$0xff]  ;;  %v4669_v42 = vld [vmem:[%s14070_s3 + $0x878] sm:$0xff]  ;;  %v9715_v44 = vcombine.low %v4657_v24, %v4661_v27 }
 0x3b4   :  { %8055 = vmatprep.subr.bf16.mxu1 %v9628_v22  ;;  %v4628_v22 = vld [vmem:[%s14070_s3 + $0x730] sm:$0xff] }
 0x3b5   :  { %v9681_v0 = vcombine.low %v4624_v49, %v4628_v22 }
 0x3b6   :  { %7892 = vmatpush1.bf16.msra.mxu0 %v9625_v59  ;;  %v9682_v59 = vcombine.high %v4624_v49, %v4628_v22  ;;  %v9724_v49 = vcombine.high %v4665_v12, %v4669_v42  ;;  %v4677_v22 = vld [vmem:[%s14070_s3 + $0x8b8] sm:$0xff] }
 0x3b7   :  { %8056 = vmatpush1.bf16.msra.mxu1 %v9627_v36  ;;  %7893 = vmatprep.subr.bf16.mxu0 %v9634_v60  ;;  %v9684_v36 = vcombine.high %v4625_v51, %v4629_v52  ;;  %v4632_v60 = vld [vmem:[%s14070_s3 + $0x750] sm:$0xff] }
 0x3b8   :  { %8057 = vmatprep.subr.bf16.mxu1 %v9636_v62  ;;  %v4636_v62 = vld [vmem:[%s14070_s3 + $0x770] sm:$0xff] }
 0x3b9   :  { %v9689_v5 = vcombine.low %v4632_v60, %v4636_v62  ;;  %v4680_v52 = vld [vmem:[%s14070_s3 + $0x8d0] sm:$0xff] }
 0x3ba   :  { %7894 = vmatpush1.bf16.msra.mxu0 %v9633_v45  ;;  %v9690_v45 = vcombine.high %v4632_v60, %v4636_v62  ;;  %v4685_v60 = vld [vmem:[%s14070_s3 + $0x8f8] sm:$0xff] }
 0x3bb   :  { %8058 = vmatpush1.bf16.msra.mxu1 %v9635_v57  ;;  %7895 = vmatprep.subr.bf16.mxu0 %v9642_v1  ;;  %v9692_v57 = vcombine.high %v4633_v39, %v4637_v63  ;;  %v4640_v1 = vld [vmem:[%s14070_s3 + $0x790] sm:$0xff] }
 0x3bc   :  { %8059 = vmatprep.subr.bf16.mxu1 %v9644_v2  ;;  %v4644_v2 = vld [vmem:[%s14070_s3 + $0x7b0] sm:$0xff] }
 0x3bd   :  { %v9697_v18 = vcombine.low %v4640_v1, %v4644_v2  ;;  %v4688_v39 = vld [vmem:[%s14070_s3 + $0x910] sm:$0xff] }
 0x3be   :  { %7896 = vmatpush1.bf16.msra.mxu0 %v9641_v8  ;;  %v9698_v8 = vcombine.high %v4640_v1, %v4644_v2  ;;  %v4696_v2 = vld [vmem:[%s14070_s3 + $0x950] sm:$0xff] }
 0x3bf   :  { %8060 = vmatpush1.bf16.msra.mxu1 %v9643_v13  ;;  %7897 = vmatprep.subr.bf16.mxu0 %v9650_v14  ;;  %v9700_v13 = vcombine.high %v4641_v3, %v4645_v4  ;;  %v4648_v14 = vld [vmem:[%s14070_s3 + $0x7d0] sm:$0xff] }
 0x3c0   :  { %8061 = vmatprep.subr.bf16.mxu1 %v9652_v16  ;;  %v4652_v16 = vld [vmem:[%s14070_s3 + $0x7f0] sm:$0xff] }
 0x3c1   :  { %v9705_v15 = vcombine.low %v4648_v14, %v4652_v16 }
 0x3c2   :  { %7898 = vmatpush1.bf16.msra.mxu0 %v9649_v34  ;;  %v9706_v34 = vcombine.high %v4648_v14, %v4652_v16  ;;  %v4704_v16 = vld [vmem:[%s14070_s3 + $0x990] sm:$0xff] }
 0x3c3   :  { %8062 = vmatpush1.bf16.msra.mxu1 %v9651_v20  ;;  %7899 = vmatprep.subr.bf16.mxu0 %v9658_v40  ;;  %v9708_v20 = vcombine.high %v4649_v26, %v4653_v53  ;;  %v4656_v40 = vld [vmem:[%s14070_s3 + $0x810] sm:$0xff] }
 0x3c4   :  { %8063 = vmatprep.subr.bf16.mxu1 %v9660_v23  ;;  %v4660_v23 = vld [vmem:[%s14070_s3 + $0x830] sm:$0xff] }
 0x3c5   :  { %v9713_v38 = vcombine.low %v4656_v40, %v4660_v23 }
 0x3c6   :  { %7900 = vmatpush1.bf16.msra.mxu0 %v9657_v32  ;;  %v9714_v32 = vcombine.high %v4656_v40, %v4660_v23  ;;  %v4712_v23 = vld [vmem:[%s14070_s3 + $0x9d0] sm:$0xff] }
 0x3c7   :  { %8064 = vmatpush1.bf16.msra.mxu1 %v9659_v35  ;;  %7901 = vmatprep.subr.bf16.mxu0 %v9666_v37  ;;  %v9716_v35 = vcombine.high %v4657_v24, %v4661_v27  ;;  %v4664_v37 = vld [vmem:[%s14070_s3 + $0x850] sm:$0xff] }
 0x3c8   :  { %8065 = vmatprep.subr.bf16.mxu1 %v9668_v43  ;;  %v4668_v43 = vld [vmem:[%s14070_s3 + $0x870] sm:$0xff] }
 0x3c9   :  { %v9721_v51 = vcombine.low %v4664_v37, %v4668_v43 }
 0x3ca   :  { %7902 = vmatpush1.bf16.msra.mxu0 %v9665_v21  ;;  %v9722_v21 = vcombine.high %v4664_v37, %v4668_v43  ;;  %v4720_v43 = vld [vmem:[%s14070_s3 + $0xa10] sm:$0xff] }
 0x3cb   :  { %8066 = vmatpush1.bf16.msra.mxu1 %v9667_v47  ;;  %7903 = vmatprep.subr.bf16.mxu0 %v9674_v48  ;;  %v4672_v47 = vld [vmem:[%s14070_s3 + $0x890] sm:$0xff] }
 0x3cc   :  { %8067 = vmatprep.subr.bf16.mxu1 %v9676_v9  ;;  %v4676_v48 = vld [vmem:[%s14070_s3 + $0x8b0] sm:$0xff]  ;;  %v4673_v9 = vld [vmem:[%s14070_s3 + $0x898] sm:$0xff] }
 0x3cd   :  { %v9729_v62 = vcombine.low %v4672_v47, %v4676_v48 }
 0x3ce   :  { %7904 = vmatpush1.bf16.msra.mxu0 %v9673_v54  ;;  %v9723_v54 = vcombine.low %v4665_v12, %v4669_v42  ;;  %v4724_v42 = vld [vmem:[%s14070_s3 + $0xa30] sm:$0xff] }
 0x3cf   :  { %8068 = vmatpush1.bf16.msra.mxu1 %v9675_v58  ;;  %7905 = vmatprep.subr.bf16.mxu0 %v9682_v59  ;;  %v9730_v58 = vcombine.high %v4672_v47, %v4676_v48  ;;  %v4684_v59 = vld [vmem:[%s14070_s3 + $0x8f0] sm:$0xff]  ;;  %v4725_v47 = vld [vmem:[%s14070_s3 + $0xa38] sm:$0xff] }
 0x3d0   :  { %8069 = vmatprep.subr.bf16.mxu1 %v9684_v36  ;;  %v9732_v36 = vcombine.high %v4673_v9, %v4677_v22  ;;  %v9738_v63 = vcombine.high %v4680_v52, %v4684_v59  ;;  %v9737_v1 = vcombine.low %v4680_v52, %v4684_v59  ;;  %v9777_v59 = vcombine.low %v4720_v43, %v4724_v42 }
 0x3d2   :  { %7906 = vmatpush1.bf16.msra.mxu0 %v9681_v0  ;;  %v4692_v0 = vld [vmem:[%s14070_s3 + $0x930] sm:$0xff] }
 0x3d3   :  { %8070 = vmatpush1.bf16.msra.mxu1 %v9683_v11  ;;  %7907 = vmatprep.subr.bf16.mxu0 %v9690_v45  ;;  %v4689_v45 = vld [vmem:[%s14070_s3 + $0x918] sm:$0xff]  ;;  %v9746_v4 = vcombine.high %v4688_v39, %v4692_v0  ;;  %v9745_v14 = vcombine.low %v4688_v39, %v4692_v0 }
 0x3d4   :  { %8071 = vmatprep.subr.bf16.mxu1 %v9692_v57  ;;  %v4693_v57 = vld [vmem:[%s14070_s3 + $0x938] sm:$0xff] }
 0x3d5   :  { %v9747_v26 = vcombine.low %v4689_v45, %v4693_v57  ;;  %v4737_v39 = vld [vmem:[%s14070_s3 + $0xa98] sm:$0xff] }
 0x3d6   :  { %7908 = vmatpush1.bf16.msra.mxu0 %v9689_v5  ;;  %v4700_v5 = vld [vmem:[%s14070_s3 + $0x970] sm:$0xff] }
 0x3d7   :  { %8072 = vmatpush1.bf16.msra.mxu1 %v9691_v6  ;;  %7909 = vmatprep.subr.bf16.mxu0 %v9698_v8  ;;  %v9748_v6 = vcombine.high %v4689_v45, %v4693_v57  ;;  %v4697_v8 = vld [vmem:[%s14070_s3 + $0x958] sm:$0xff]  ;;  %v9754_v53 = vcombine.high %v4696_v2, %v4700_v5  ;;  %v9753_v40 = vcombine.low %v4696_v2, %v4700_v5 }
 0x3d8   :  { %8073 = vmatprep.subr.bf16.mxu1 %v9700_v13  ;;  %v4701_v13 = vld [vmem:[%s14070_s3 + $0x978] sm:$0xff] }
 0x3d9   :  { %v9755_v24 = vcombine.low %v4697_v8, %v4701_v13 }
 0x3da   :  { %7910 = vmatpush1.bf16.msra.mxu0 %v9697_v18  ;;  %v4708_v18 = vld [vmem:[%s14070_s3 + $0x9b0] sm:$0xff] }
 0x3db   :  { %8074 = vmatpush1.bf16.msra.mxu1 %v9699_v19  ;;  %7911 = vmatprep.subr.bf16.mxu0 %v9706_v34  ;;  %v9756_v19 = vcombine.high %v4697_v8, %v4701_v13  ;;  %v4705_v34 = vld [vmem:[%s14070_s3 + $0x998] sm:$0xff]  ;;  %v9762_v27 = vcombine.high %v4704_v16, %v4708_v18  ;;  %v9761_v37 = vcombine.low %v4704_v16, %v4708_v18 }
 0x3dc   :  { %8075 = vmatprep.subr.bf16.mxu1 %v9708_v20  ;;  %v4709_v20 = vld [vmem:[%s14070_s3 + $0x9b8] sm:$0xff] }
 0x3de   :  { %7912 = vmatpush1.bf16.msra.mxu0 %v9705_v15  ;;  %v4716_v15 = vld [vmem:[%s14070_s3 + $0x9f0] sm:$0xff] }
 0x3df   :  { %8076 = vmatpush1.bf16.msra.mxu1 %v9707_v30  ;;  %7922 = vmatprep.subr.bf16.mxu0 %v9714_v32  ;;  %v9764_v30 = vcombine.high %v4705_v34, %v4709_v20  ;;  %v4713_v32 = vld [vmem:[%s14070_s3 + $0x9d8] sm:$0xff]  ;;  %v9770_v12 = vcombine.high %v4712_v23, %v4716_v15  ;;  %v9769_v48 = vcombine.low %v4712_v23, %v4716_v15 }
 0x3e0   :  { %8086 = vmatprep.subr.bf16.mxu1 %v9716_v35  ;;  %v4717_v35 = vld [vmem:[%s14070_s3 + $0x9f8] sm:$0xff] }
 0x3e1   :  { %7914 = vmatmul.mubr.bf16.vlgmr.msra.gmra.mrb[12].mxu0 %v12640_v31 }
 0x3e2   :  { %8078 = vmatmul.mubr.bf16.vlgmr.msra.gmra.mrb[12].mxu1 %v12640_v31  ;;  %7923 = vmatpush1.bf16.msra.mxu0 %v9713_v38  ;;  %v4681_v31 = vld [vmem:[%s14070_s3 + $0x8d8] sm:$0xff]  ;;  %v9763_v38 = vcombine.low %v4705_v34, %v4709_v20 }
 0x3e3   :  { %7954 = vmatprep.mubr.bf16.mxu0 %v12855_v25  ;;  %8087 = vmatpush1.bf16.msra.mxu1 %v9715_v44  ;;  %v9740_v11 = vcombine.high %v4681_v31, %v4685_v60  ;;  %v9739_v3 = vcombine.low %v4681_v31, %v4685_v60  ;;  %v9772_v44 = vcombine.high %v4713_v32, %v4717_v35  ;;  %v4740_v31 = vld [vmem:[%s14070_s3 + $0xab0] sm:$0xff] }
 0x3e4   :  { %8118 = vmatprep.mubr.bf16.mxu1 %v12855_v25  ;;  %7924 = vmatprep.subr.bf16.mxu0 %v9722_v21  ;;  %v9731_v25 = vcombine.low %v4673_v9, %v4677_v22  ;;  %v4721_v21 = vld [vmem:[%s14070_s3 + $0xa18] sm:$0xff]  ;;  %v4728_v9 = vld [vmem:[%s14070_s3 + $0xa50] sm:$0xff]  ;;  %v9778_v22 = vcombine.high %v4720_v43, %v4724_v42 }
 0x3e5   :  { %8088 = vmatprep.subr.bf16.mxu1 %v9724_v49  ;;  %v9771_v49 = vcombine.low %v4713_v32, %v4717_v35  ;;  %v9780_v52 = vcombine.high %v4721_v21, %v4725_v47  ;;  %v9779_v60 = vcombine.low %v4721_v21, %v4725_v47 }
 0x3e6   :  { %7925 = vmatpush1.bf16.msra.mxu0 %v9721_v51  ;;  %v4732_v51 = vld [vmem:[%s14070_s3 + $0xa70] sm:$0xff] }
 0x3e7   :  { %8089 = vmatpush1.bf16.msra.mxu1 %v9723_v54  ;;  %7926 = vmatprep.subr.bf16.mxu0 %v9730_v58  ;;  %v4729_v54 = vld [vmem:[%s14070_s3 + $0xa58] sm:$0xff]  ;;  %v9785_v0 = vcombine.low %v4728_v9, %v4732_v51 }
 0x3e8   :  { %8090 = vmatprep.subr.bf16.mxu1 %v9732_v36  ;;  %v4733_v58 = vld [vmem:[%s14070_s3 + $0xa78] sm:$0xff]  ;;  %v4736_v36 = vld [vmem:[%s14070_s3 + $0xa90] sm:$0xff] }
 0x3e9   :  { %v9787_v45 = vcombine.low %v4729_v54, %v4733_v58  ;;  %v9794_v57 = vcombine.high %v4736_v36, %v4740_v31  ;;  %v9793_v5 = vcombine.low %v4736_v36, %v4740_v31  ;;  %v4785_v36 = vld [vmem:[%s14070_s3 + $0xc18] sm:$0xff] }
 0x3ea   :  { %7927 = vmatpush1.bf16.msra.mxu0 %v9729_v62  ;;  %v9786_v62 = vcombine.high %v4728_v9, %v4732_v51 }
 0x3eb   :  { %8091 = vmatpush1.bf16.msra.mxu1 %v9731_v25  ;;  %7928 = vmatprep.subr.bf16.mxu0 %v9738_v63  ;;  %v9788_v25 = vcombine.high %v4729_v54, %v4733_v58  ;;  %v4741_v63 = vld [vmem:[%s14070_s3 + $0xab8] sm:$0xff]  ;;  %v4788_v54 = vld [vmem:[%s14070_s3 + $0xc30] sm:$0xff] }
 0x3ec   :  { %8092 = vmatprep.subr.bf16.mxu1 %v9740_v11  ;;  %v4744_v11 = vld [vmem:[%s14070_s3 + $0xad0] sm:$0xff]  ;;  %v9796_v2 = vcombine.high %v4737_v39, %v4741_v63  ;;  %v9795_v8 = vcombine.low %v4737_v39, %v4741_v63 }
 0x3ed   :  { %v4792_v63 = vld [vmem:[%s14070_s3 + $0xc50] sm:$0xff] }
 0x3ee   :  { %7929 = vmatpush1.bf16.msra.mxu0 %v9737_v1  ;;  %v4748_v1 = vld [vmem:[%s14070_s3 + $0xaf0] sm:$0xff] }
 0x3ef   :  { %8093 = vmatpush1.bf16.msra.mxu1 %v9739_v3  ;;  %7930 = vmatprep.subr.bf16.mxu0 %v9746_v4  ;;  %v4745_v3 = vld [vmem:[%s14070_s3 + $0xad8] sm:$0xff]  ;;  %v9802_v13 = vcombine.high %v4744_v11, %v4748_v1  ;;  %v9801_v18 = vcombine.low %v4744_v11, %v4748_v1 }
 0x3f0   :  { %8094 = vmatprep.subr.bf16.mxu1 %v9748_v6  ;;  %v4749_v4 = vld [vmem:[%s14070_s3 + $0xaf8] sm:$0xff]  ;;  %v4752_v6 = vld [vmem:[%s14070_s3 + $0xb10] sm:$0xff] }
 0x3f1   :  { %v9804_v16 = vcombine.high %v4745_v3, %v4749_v4  ;;  %v9803_v34 = vcombine.low %v4745_v3, %v4749_v4  ;;  %v4797_v1 = vld [vmem:[%s14070_s3 + $0xc78] sm:$0xff]  ;;  %v4800_v4 = vld [vmem:[%s14070_s3 + $0xc90] sm:$0xff] }
 0x3f2   :  { %7931 = vmatpush1.bf16.msra.mxu0 %v9745_v14  ;;  %v4756_v14 = vld [vmem:[%s14070_s3 + $0xb30] sm:$0xff] }
 0x3f3   :  { %8095 = vmatpush1.bf16.msra.mxu1 %v9747_v26  ;;  %7932 = vmatprep.subr.bf16.mxu0 %v9754_v53  ;;  %v4753_v26 = vld [vmem:[%s14070_s3 + $0xb18] sm:$0xff]  ;;  %v9810_v20 = vcombine.high %v4752_v6, %v4756_v14  ;;  %v9809_v15 = vcombine.low %v4752_v6, %v4756_v14 }
 0x3f4   :  { %8096 = vmatprep.subr.bf16.mxu1 %v9756_v19  ;;  %v4757_v53 = vld [vmem:[%s14070_s3 + $0xb38] sm:$0xff]  ;;  %v4760_v19 = vld [vmem:[%s14070_s3 + $0xb50] sm:$0xff] }
 0x3f5   :  { %v9812_v23 = vcombine.high %v4753_v26, %v4757_v53  ;;  %v9811_v32 = vcombine.low %v4753_v26, %v4757_v53 }
 0x3f6   :  { %7933 = vmatpush1.bf16.msra.mxu0 %v9753_v40  ;;  %v4764_v40 = vld [vmem:[%s14070_s3 + $0xb70] sm:$0xff] }
 0x3f7   :  { %8097 = vmatpush1.bf16.msra.mxu1 %v9755_v24  ;;  %7934 = vmatprep.subr.bf16.mxu0 %v9762_v27  ;;  %v4761_v24 = vld [vmem:[%s14070_s3 + $0xb58] sm:$0xff]  ;;  %v9818_v35 = vcombine.high %v4760_v19, %v4764_v40  ;;  %v9817_v42 = vcombine.low %v4760_v19, %v4764_v40  ;;  %v4812_v19 = vld [vmem:[%s14070_s3 + $0xcf0] sm:$0xff] }
 0x3f8   :  { %8098 = vmatprep.subr.bf16.mxu1 %v9764_v30  ;;  %v4765_v27 = vld [vmem:[%s14070_s3 + $0xb78] sm:$0xff]  ;;  %v4768_v30 = vld [vmem:[%s14070_s3 + $0xb90] sm:$0xff] }
 0x3f9   :  { %v9820_v43 = vcombine.high %v4761_v24, %v4765_v27  ;;  %v9819_v21 = vcombine.low %v4761_v24, %v4765_v27  ;;  %v4816_v24 = vld [vmem:[%s14070_s3 + $0xd10] sm:$0xff] }
 0x3fa   :  { %7935 = vmatpush1.bf16.msra.mxu0 %v9761_v37  ;;  %v4772_v37 = vld [vmem:[%s14070_s3 + $0xbb0] sm:$0xff] }
 0x3fb   :  { %8099 = vmatpush1.bf16.msra.mxu1 %v9763_v38  ;;  %7936 = vmatprep.subr.bf16.mxu0 %v9770_v12  ;;  %v4769_v38 = vld [vmem:[%s14070_s3 + $0xb98] sm:$0xff]  ;;  %v9826_v47 = vcombine.high %v4768_v30, %v4772_v37  ;;  %v9825_v51 = vcombine.low %v4768_v30, %v4772_v37  ;;  %v4820_v27 = vld [vmem:[%s14070_s3 + $0xd30] sm:$0xff] }
 0x3fc   :  { %8100 = vmatprep.subr.bf16.mxu1 %v9772_v44  ;;  %v4773_v12 = vld [vmem:[%s14070_s3 + $0xbb8] sm:$0xff]  ;;  %v4776_v44 = vld [vmem:[%s14070_s3 + $0xbd0] sm:$0xff]  ;;  %v9874_v37 = vcombine.high %v4816_v24, %v4820_v27 }
 0x3fd   :  { %v9828_v9 = vcombine.high %v4769_v38, %v4773_v12  ;;  %v9827_v58 = vcombine.low %v4769_v38, %v4773_v12  ;;  %v4821_v30 = vld [vmem:[%s14070_s3 + $0xd38] sm:$0xff]  ;;  %v4824_v38 = vld [vmem:[%s14070_s3 + $0xd50] sm:$0xff] }
 0x3fe   :  { %7937 = vmatpush1.bf16.msra.mxu0 %v9769_v48  ;;  %v4780_v48 = vld [vmem:[%s14070_s3 + $0xbf0] sm:$0xff] }
 0x3ff   :  { %8101 = vmatpush1.bf16.msra.mxu1 %v9771_v49  ;;  %7938 = vmatprep.subr.bf16.mxu0 %v9778_v22  ;;  %v4777_v49 = vld [vmem:[%s14070_s3 + $0xbd8] sm:$0xff]  ;;  %v4828_v12 = vld [vmem:[%s14070_s3 + $0xd70] sm:$0xff] }
 0x400   :  { %8102 = vmatprep.subr.bf16.mxu1 %v9780_v52  ;;  %v4781_v22 = vld [vmem:[%s14070_s3 + $0xbf8] sm:$0xff]  ;;  %v4784_v52 = vld [vmem:[%s14070_s3 + $0xc10] sm:$0xff] }
 0x401   :  { %v9836_v31 = vcombine.high %v4777_v49, %v4781_v22  ;;  %v9835_v39 = vcombine.low %v4777_v49, %v4781_v22  ;;  %v4832_v49 = vld [vmem:[%s14070_s3 + $0xd90] sm:$0xff] }
 0x402   :  { %7939 = vmatpush1.bf16.msra.mxu0 %v9777_v59  ;;  %v9834_v59 = vcombine.high %v4776_v44, %v4780_v48  ;;  %v4836_v22 = vld [vmem:[%s14070_s3 + $0xdb0] sm:$0xff] }
 0x403   :  { %8103 = vmatpush1.bf16.msra.mxu1 %v9779_v60  ;;  %7940 = vmatprep.subr.bf16.mxu0 %v9786_v62  ;;  %v4789_v60 = vld [vmem:[%s14070_s3 + $0xc38] sm:$0xff]  ;;  %v9833_v62 = vcombine.low %v4776_v44, %v4780_v48  ;;  %v9882_v48 = vcombine.high %v4824_v38, %v4828_v12 }
 0x404   :  { %8104 = vmatprep.subr.bf16.mxu1 %v9788_v25  ;;  %v9842_v25 = vcombine.high %v4784_v52, %v4788_v54  ;;  %v9844_v11 = vcombine.high %v4785_v36, %v4789_v60  ;;  %v4829_v44 = vld [vmem:[%s14070_s3 + $0xd78] sm:$0xff] }
 0x406   :  { %7941 = vmatpush1.bf16.msra.mxu0 %v9785_v0  ;;  %v4796_v0 = vld [vmem:[%s14070_s3 + $0xc70] sm:$0xff] }
 0x407   :  { %8105 = vmatpush1.bf16.msra.mxu1 %v9787_v45  ;;  %7942 = vmatprep.subr.bf16.mxu0 %v9794_v57  ;;  %v9841_v45 = vcombine.low %v4784_v52, %v4788_v54  ;;  %v4793_v57 = vld [vmem:[%s14070_s3 + $0xc58] sm:$0xff]  ;;  %v9850_v3 = vcombine.high %v4792_v63, %v4796_v0  ;;  %v9849_v14 = vcombine.low %v4792_v63, %v4796_v0 }
 0x408   :  { %8106 = vmatprep.subr.bf16.mxu1 %v9796_v2  ;;  %v9843_v2 = vcombine.low %v4785_v36, %v4789_v60  ;;  %v9852_v6 = vcombine.high %v4793_v57, %v4797_v1  ;;  %v4837_v52 = vld [vmem:[%s14070_s3 + $0xdb8] sm:$0xff]  ;;  %v9881_v54 = vcombine.low %v4824_v38, %v4828_v12 }
 0x409   :  { %v4841_v0 = vld [vmem:[%s14070_s3 + $0xdd8] sm:$0xff] }
 0x40a   :  { %7943 = vmatpush1.bf16.msra.mxu0 %v9793_v5  ;;  %v4804_v5 = vld [vmem:[%s14070_s3 + $0xcb0] sm:$0xff] }
 0x40b   :  { %8107 = vmatpush1.bf16.msra.mxu1 %v9795_v8  ;;  %7944 = vmatprep.subr.bf16.mxu0 %v9802_v13  ;;  %v4801_v8 = vld [vmem:[%s14070_s3 + $0xc98] sm:$0xff]  ;;  %v9858_v26 = vcombine.high %v4800_v4, %v4804_v5 }
 0x40c   :  { %8108 = vmatprep.subr.bf16.mxu1 %v9804_v16  ;;  %v4805_v13 = vld [vmem:[%s14070_s3 + $0xcb8] sm:$0xff]  ;;  %v9851_v16 = vcombine.low %v4793_v57, %v4797_v1  ;;  %v9889_v1 = vcombine.low %v4832_v49, %v4836_v22 }
 0x40d   :  { %v9860_v53 = vcombine.high %v4801_v8, %v4805_v13 }
 0x40e   :  { %7945 = vmatpush1.bf16.msra.mxu0 %v9801_v18  ;;  %v4808_v18 = vld [vmem:[%s14070_s3 + $0xcd0] sm:$0xff] }
 0x40f   :  { %8109 = vmatpush1.bf16.msra.mxu1 %v9803_v34  ;;  %7946 = vmatprep.subr.bf16.mxu0 %v9810_v20  ;;  %v4813_v34 = vld [vmem:[%s14070_s3 + $0xcf8] sm:$0xff]  ;;  %v9859_v20 = vcombine.low %v4801_v8, %v4805_v13  ;;  %v9866_v40 = vcombine.high %v4808_v18, %v4812_v19  ;;  %v4848_v8 = vld [vmem:[%s14070_s3 + $0xe10] sm:$0xff] }
 0x410   :  { %8110 = vmatprep.subr.bf16.mxu1 %v9812_v23  ;;  %v4852_v13 = vld [vmem:[%s14070_s3 + $0xe30] sm:$0xff] }
 0x412   :  { %7947 = vmatpush1.bf16.msra.mxu0 %v9809_v15  ;;  %v4817_v15 = vld [vmem:[%s14070_s3 + $0xd18] sm:$0xff] }
 0x413   :  { %8111 = vmatpush1.bf16.msra.mxu1 %v9811_v32  ;;  %7948 = vmatprep.subr.bf16.mxu0 %v9818_v35  ;;  %v9865_v32 = vcombine.low %v4808_v18, %v4812_v19  ;;  %v9906_v18 = vcombine.high %v4848_v8, %v4852_v13 }
 0x414   :  { %8112 = vmatprep.subr.bf16.mxu1 %v9820_v43  ;;  %v9876_v43 = vcombine.high %v4817_v15, %v4821_v30 }
 0x416   :  { %7949 = vmatpush1.bf16.msra.mxu0 %v9817_v42  ;;  %v4825_v42 = vld [vmem:[%s14070_s3 + $0xd58] sm:$0xff] }
 0x417   :  { %8113 = vmatpush1.bf16.msra.mxu1 %v9819_v21  ;;  %7950 = vmatprep.subr.bf16.mxu0 %v9826_v47  ;;  %v9873_v21 = vcombine.low %v4816_v24, %v4820_v27  ;;  %v9875_v47 = vcombine.low %v4817_v15, %v4821_v30  ;;  %v4864_v15 = vld [vmem:[%s14070_s3 + $0xe90] sm:$0xff] }
 0x418   :  { %8114 = vmatprep.subr.bf16.mxu1 %v9828_v9  ;;  %v9884_v9 = vcombine.high %v4825_v42, %v4829_v44  ;;  %v4868_v30 = vld [vmem:[%s14070_s3 + $0xeb0] sm:$0xff] }
 0x419   :  { %v9922_v38 = vcombine.high %v4864_v15, %v4868_v30 }
 0x41a   :  { %7951 = vmatpush1.bf16.msra.mxu0 %v9825_v51  ;;  %v4833_v51 = vld [vmem:[%s14070_s3 + $0xd98] sm:$0xff] }
 0x41b   :  { %8115 = vmatpush1.bf16.msra.mxu1 %v9827_v58  ;;  %7952 = vmatprep.subr.bf16.mxu0 %v9834_v59  ;;  %v9883_v58 = vcombine.low %v4825_v42, %v4829_v44  ;;  %v9890_v59 = vcombine.high %v4832_v49, %v4836_v22  ;;  %v9892_v60 = vcombine.high %v4833_v51, %v4837_v52  ;;  %v4872_v42 = vld [vmem:[%s14070_s3 + $0xed0] sm:$0xff] }
 0x41c   :  { %8116 = vmatprep.subr.bf16.mxu1 %v9836_v31  ;;  %v4876_v44 = vld [vmem:[%s14070_s3 + $0xef0] sm:$0xff] }
 0x41d   :  { %v9930_v49 = vcombine.high %v4872_v42, %v4876_v44 }
 0x41e   :  { %7953 = vmatpush1.bf16.msra.mxu0 %v9833_v62  ;;  %v4840_v62 = vld [vmem:[%s14070_s3 + $0xdd0] sm:$0xff] }
 0x41f   :  { %8117 = vmatpush1.bf16.msra.mxu1 %v9835_v39  ;;  %7963 = vmatprep.subr.bf16.mxu0 %v9842_v25  ;;  %v4844_v39 = vld [vmem:[%s14070_s3 + $0xdf0] sm:$0xff] }
 0x420   :  { %8127 = vmatprep.subr.bf16.mxu1 %v9844_v11  ;;  %v4845_v11 = vld [vmem:[%s14070_s3 + $0xdf8] sm:$0xff] }
 0x421   :  { %7955 = vmatmul.mubr.bf16.vlgmr.msra.gmra.mrb[12].mxu0 %v12857_v46 }
 0x422   :  { %8119 = vmatmul.mubr.bf16.vlgmr.msra.gmra.mrb[12].mxu1 %v12857_v46  ;;  %7964 = vmatpush1.bf16.msra.mxu0 %v9841_v45  ;;  %v4809_v46 = vld [vmem:[%s14070_s3 + $0xcd8] sm:$0xff] }
 0x423   :  { %7995 = vmatprep.mubr.bf16.mxu0 %v12873_v50  ;;  %8128 = vmatpush1.bf16.msra.mxu1 %v9843_v2  ;;  %v9868_v23 = vcombine.high %v4809_v46, %v4813_v34  ;;  %v9867_v35 = vcombine.low %v4809_v46, %v4813_v34  ;;  %v4856_v46 = vld [vmem:[%s14070_s3 + $0xe50] sm:$0xff] }
 0x424   :  { %8159 = vmatprep.mubr.bf16.mxu1 %v12873_v50  ;;  %7965 = vmatprep.subr.bf16.mxu0 %v9850_v3  ;;  %v9857_v50 = vcombine.low %v4800_v4, %v4804_v5  ;;  %v9891_v4 = vcombine.low %v4833_v51, %v4837_v52  ;;  %v9898_v5 = vcombine.high %v4840_v62, %v4844_v39  ;;  %v4860_v34 = vld [vmem:[%s14070_s3 + $0xe70] sm:$0xff] }
 0x425   :  { %8129 = vmatprep.subr.bf16.mxu1 %v9852_v6  ;;  %v9900_v6 = vcombine.high %v4841_v0, %v4845_v11  ;;  %v9914_v24 = vcombine.high %v4856_v46, %v4860_v34  ;;  %v4880_v51 = vld [vmem:[%s14070_s3 + $0xf10] sm:$0xff] }
 0x426   :  { %7966 = vmatpush1.bf16.msra.mxu0 %v9849_v14  ;;  %v4849_v14 = vld [vmem:[%s14070_s3 + $0xe18] sm:$0xff]  ;;  %v4884_v52 = vld [vmem:[%s14070_s3 + $0xf30] sm:$0xff] }
 0x427   :  { %8130 = vmatpush1.bf16.msra.mxu1 %v9851_v16  ;;  %7967 = vmatprep.subr.bf16.mxu0 %v9858_v26  ;;  %v4853_v16 = vld [vmem:[%s14070_s3 + $0xe38] sm:$0xff]  ;;  %v9897_v26 = vcombine.low %v4840_v62, %v4844_v39  ;;  %v9938_v62 = vcombine.high %v4880_v51, %v4884_v52 }
 0x428   :  { %8131 = vmatprep.subr.bf16.mxu1 %v9860_v53  ;;  %v9899_v53 = vcombine.low %v4841_v0, %v4845_v11  ;;  %v9908_v19 = vcombine.high %v4849_v14, %v4853_v16  ;;  %v4888_v0 = vld [vmem:[%s14070_s3 + $0xf50] sm:$0xff] }
 0x429   :  { %v4892_v11 = vld [vmem:[%s14070_s3 + $0xf70] sm:$0xff] }
 0x42a   :  { %7968 = vmatpush1.bf16.msra.mxu0 %v9857_v50  ;;  %v4857_v50 = vld [vmem:[%s14070_s3 + $0xe58] sm:$0xff] }
 0x42b   :  { %8132 = vmatpush1.bf16.msra.mxu1 %v9859_v20  ;;  %7969 = vmatprep.subr.bf16.mxu0 %v9866_v40  ;;  %v4861_v20 = vld [vmem:[%s14070_s3 + $0xe78] sm:$0xff]  ;;  %v9905_v40 = vcombine.low %v4848_v8, %v4852_v13 }
 0x42c   :  { %8133 = vmatprep.subr.bf16.mxu1 %v9868_v23  ;;  %v9907_v23 = vcombine.low %v4849_v14, %v4853_v16  ;;  %v9916_v27 = vcombine.high %v4857_v50, %v4861_v20  ;;  %v4897_v8 = vld [vmem:[%s14070_s3 + $0xf98] sm:$0xff]  ;;  %v13825_v14 = vld [vmem:[%s14072_s4] sm:$0xff]  ;;  %v9945_v16 = vcombine.low %v4888_v0, %v4892_v11 }
 0x42d   :  { %v4901_v13 = vld [vmem:[%s14070_s3 + $0xfb8] sm:$0xff] }
 0x42e   :  { %7970 = vmatpush1.bf16.msra.mxu0 %v9865_v32  ;;  %v4865_v32 = vld [vmem:[%s14070_s3 + $0xe98] sm:$0xff] }
 0x42f   :  { %8134 = vmatpush1.bf16.msra.mxu1 %v9867_v35  ;;  %7971 = vmatprep.subr.bf16.mxu0 %v9874_v37  ;;  %v4869_v35 = vld [vmem:[%s14070_s3 + $0xeb8] sm:$0xff]  ;;  %v9913_v37 = vcombine.low %v4856_v46, %v4860_v34  ;;  %v4908_v46 = vld [vmem:[%s14070_s3 + $0xff0] sm:$0xff]  ;;  %v4919_v34 = vrot.slane %v13825_v14, %v616_v41 }
 0x430   :  { %8135 = vmatprep.subr.bf16.mxu1 %v9876_v43  ;;  %v9915_v43 = vcombine.low %v4857_v50, %v4861_v20  ;;  %v9924_v12 = vcombine.high %v4865_v32, %v4869_v35  ;;  %v4905_v50 = vld [vmem:[%s14070_s3 + $0xfd8] sm:$0xff] }
 0x431   :  { %v4909_v20 = vld [vmem:[%s14070_s3 + $0xff8] sm:$0xff] }
 0x432   :  { %7972 = vmatpush1.bf16.msra.mxu0 %v9873_v21  ;;  %v4873_v21 = vld [vmem:[%s14070_s3 + $0xed8] sm:$0xff]  ;;  %v9964_v41 = vcombine.high %v4905_v50, %v4909_v20 }
 0x433   :  { %8136 = vmatpush1.bf16.msra.mxu1 %v9875_v47  ;;  %7973 = vmatprep.subr.bf16.mxu0 %v9882_v48  ;;  %v4877_v47 = vld [vmem:[%s14070_s3 + $0xef8] sm:$0xff]  ;;  %v9921_v48 = vcombine.low %v4864_v15, %v4868_v30 }
 0x434   :  { %v13718_v36 = vpop.f32.mrb[8].mxu0  ;;  %v13720_v31 = vpop.f32.mrb[8].mxu1  ;;  %8137 = vmatprep.subr.bf16.mxu1 %v9884_v9  ;;  %v9923_v9 = vcombine.low %v4865_v32, %v4869_v35  ;;  %v9932_v22 = vcombine.high %v4873_v21, %v4877_v47  ;;  %v9963_v35 = vcombine.low %v4905_v50, %v4909_v20  ;;  %v10292_v50 = vld [vmem:[%s14071_s5 + $0x148] sm:$0xff]  }
 0x435   :  { %v13728_v25 = vpop.f32.mrb[9].mxu0  ;;  %v13730_v63 = vpop.f32.mrb[9].mxu1 }
 0x436   :  { %v7673_v45 = vpop.f32.mrb[10].mxu0  ;;  %v7837_v57 = vpop.f32.mrb[10].mxu1  ;;  %7974 = vmatpush1.bf16.msra.mxu0 %v9881_v54  ;;  %v4881_v54 = vld [vmem:[%s14070_s3 + $0xf18] sm:$0xff]  ;;  %v10127_v15 = vadd.f32 %v13728_v25, %v4919_v34  ;;  %v10258_v25 = vld [vmem:[%s14071_s5] sm:$0xff]  }
 0x437   :  { %8138 = vmatpush1.bf16.msra.mxu1 %v9883_v58  ;;  %v7674_v2 = vpop.f32.mrb[11].mxu0  ;;  %v7838_v3 = vpop.f32.mrb[11].mxu1  ;;  %7975 = vmatprep.subr.bf16.mxu0 %v9890_v59  ;;  %v4885_v58 = vld [vmem:[%s14070_s3 + $0xf38] sm:$0xff]  ;;  %v9929_v59 = vcombine.low %v4872_v42, %v4876_v44  ;;  %v10261_v44 = vld [vmem:[%s14071_s5 + $0xc8] sm:$0xff]   ;;  %v10291_v34 = vld [vmem:[%s14071_s5 + $0x180] sm:$0xff]  }
 0x438   :  { %8139 = vmatprep.subr.bf16.mxu1 %v9892_v60  ;;  %v9931_v60 = vcombine.low %v4873_v21, %v4877_v47  ;;  %v9940_v39 = vcombine.high %v4881_v54, %v4885_v58  ;;  %v4889_v45 = vld [vmem:[%s14070_s3 + $0xf58] sm:$0xff]  ;;  %v9939_v2 = vcombine.low %v4881_v54, %v4885_v58  ;;  %v9946_v3 = vcombine.high %v4888_v0, %v4892_v11  ;;  %v10262_v47 = vld [vmem:[%s14071_s5 + $0x8] sm:$0xff]  }
 0x439   :  { %v4893_v57 = vld [vmem:[%s14070_s3 + $0xf78] sm:$0xff]  ;;  %v10276_v0 = vld [vmem:[%s14071_s5 + $0x68] sm:$0xff]  }
 0x43a   :  { %7976 = vmatpush1.bf16.msra.mxu0 %v9889_v1  ;;  %v9937_v1 = vcombine.low %v4880_v51, %v4884_v52  ;;  %v10268_v51 = vld [vmem:[%s14071_s5 + $0x58] sm:$0xff]   ;;  %v10277_v11 = vld [vmem:[%s14071_s5 + $0xe8] sm:$0xff]  }
 0x43b   :  { %8140 = vmatpush1.bf16.msra.mxu1 %v9891_v4  ;;  %7977 = vmatprep.subr.bf16.mxu0 %v9898_v5  ;;  %v9948_v4 = vcombine.high %v4889_v45, %v4893_v57  ;;  %v4896_v5 = vld [vmem:[%s14070_s3 + $0xf90] sm:$0xff]  ;;  %v10269_v52 = vld [vmem:[%s14071_s5 + $0xd8] sm:$0xff]  }
 0x43c   :  { %8141 = vmatprep.subr.bf16.mxu1 %v9900_v6  ;;  %v4900_v6 = vld [vmem:[%s14070_s3 + $0xfb0] sm:$0xff]  ;;  %v10270_v54 = vld [vmem:[%s14071_s5 + $0x18] sm:$0xff]  }
 0x43d   :  { %v10271_v58 = vld [vmem:[%s14071_s5 + $0x98] sm:$0xff]  }
 0x43e   :  { %7978 = vmatpush1.bf16.msra.mxu0 %v9897_v26  ;;  %v9947_v26 = vcombine.low %v4889_v45, %v4893_v57  ;;  %v10278_v45 = vld [vmem:[%s14071_s5 + $0x28] sm:$0xff]   ;;  %v4915_v57 = vrot.slane %v13825_v14, %v612_v56  ;;  %v10282_v56 = vld [vmem:[%s14071_s5 + $0x30] sm:$0xff]  }
 0x43f   :  { %8142 = vmatpush1.bf16.msra.mxu1 %v9899_v53  ;;  %7979 = vmatprep.subr.bf16.mxu0 %v9906_v18  ;;  %v9954_v53 = vcombine.high %v4896_v5, %v4900_v6  ;;  %v9956_v18 = vcombine.high %v4897_v8, %v4901_v13 }
 0x440   :  { %8143 = vmatprep.subr.bf16.mxu1 %v9908_v19  ;;  %v4904_v19 = vld [vmem:[%s14070_s3 + $0xfd0] sm:$0xff] }
 0x441   :  { %v9961_v32 = vcombine.low %v4904_v19, %v4908_v46 }
 0x442   :  { %7980 = vmatpush1.bf16.msra.mxu0 %v9905_v40  ;;  %v4927_v40 = vrot.slane %v13825_v14, %v624_v61  ;;  %v10256_v61 = vld [vmem:[%s14071_s5 + $0x40] sm:$0xff]  }
 0x443   :  { %8144 = vmatpush1.bf16.msra.mxu1 %v9907_v23  ;;  %7981 = vmatprep.subr.bf16.mxu0 %v9914_v24  ;;  %v9953_v23 = vcombine.low %v4896_v5, %v4900_v6  ;;  %v9955_v24 = vcombine.low %v4897_v8, %v4901_v13  ;;  %v10126_v5 = vadd.f32 %v13718_v36, %v4915_v57  ;;  %v10283_v6 = vld [vmem:[%s14071_s5 + $0xb0] sm:$0xff]   ;;  %v10285_v13 = vld [vmem:[%s14071_s5 + $0xf8] sm:$0xff]  }
 0x444   :  { %8145 = vmatprep.subr.bf16.mxu1 %v9916_v27  ;;  %v9962_v27 = vcombine.high %v4904_v19, %v4908_v46  ;;  %v10129_v30 = vadd.f32 %v13730_v63, %v4927_v40  ;;  %v10259_v63 = vld [vmem:[%s14071_s5 + $0x80] sm:$0xff]   ;;  %v10286_v36 = vld [vmem:[%s14071_s5 + $0x38] sm:$0xff]   ;;  %v10293_v40 = vld [vmem:[%s14071_s5 + $0x1c8] sm:$0xff]  }
 0x445   :  { %v10290_v19 = vld [vmem:[%s14071_s5 + $0x100] sm:$0xff]  }
 0x446   :  { %7982 = vmatpush1.bf16.msra.mxu0 %v9913_v37  ;;  %v10257_v37 = vld [vmem:[%s14071_s5 + $0xc0] sm:$0xff]  }
 0x447   :  { %8146 = vmatpush1.bf16.msra.mxu1 %v9915_v43  ;;  %7983 = vmatprep.subr.bf16.mxu0 %v9922_v38  ;;  %v8169_v43 = vmax.f32 %v10127_v15, 0.0  ;;  %v8171_v38 = vmax.f32 %v10129_v30, 0.0  ;;  %v10298_v15 = vld [vmem:[%s14071_s5 + $0x110] sm:$0xff]  }
 0x448   :  { %8147 = vmatprep.subr.bf16.mxu1 %v9924_v12  ;;  %v10260_v12 = vld [vmem:[%s14071_s5 + $0x48] sm:$0xff]   ;;  %v10299_v30 = vld [vmem:[%s14071_s5 + $0x190] sm:$0xff]  }
 0x449   :  { %v8177_v42 = vpack.c.bf16 %v8169_v43, %v8169_v43  ;;  %v8179_v21 = vpack.c.bf16 %v8171_v38, %v8171_v38  ;;  %v10304_v43 = vld [vmem:[%s14071_s5 + $0x160] sm:$0xff]  }
 0x44a   :  { %7984 = vmatpush1.bf16.msra.mxu0 %v9921_v48  ;;  %v10263_v48 = vld [vmem:[%s14071_s5 + $0x88] sm:$0xff]   ;;  %v10305_v38 = vld [vmem:[%s14071_s5 + $0x1e0] sm:$0xff]  }
 0x44b   :  { %8148 = vmatpush1.bf16.msra.mxu1 %v9923_v9  ;;  %7985 = vmatprep.subr.bf16.mxu0 %v9930_v49  ;;  %v10264_v9 = vld [vmem:[%s14071_s5 + $0x50] sm:$0xff]  }
 0x44c   :  { %8149 = vmatprep.subr.bf16.mxu1 %v9932_v22  ;;  %v10266_v49 = vld [vmem:[%s14071_s5 + $0x10] sm:$0xff]  }
 0x44d   :  { %v10267_v22 = vld [vmem:[%s14071_s5 + $0x90] sm:$0xff]  }
 0x44e   :  { %7986 = vmatpush1.bf16.msra.mxu0 %v9929_v59  ;;  %v10272_v59 = vld [vmem:[%s14071_s5 + $0x60] sm:$0xff]  }
 0x44f   :  { %8150 = vmatpush1.bf16.msra.mxu1 %v9931_v60  ;;  %7987 = vmatprep.subr.bf16.mxu0 %v9938_v62  ;;  %v10273_v60 = vld [vmem:[%s14071_s5 + $0xe0] sm:$0xff]  }
 0x450   :  { %8151 = vmatprep.subr.bf16.mxu1 %v9940_v39  ;;  %v10274_v62 = vld [vmem:[%s14071_s5 + $0x20] sm:$0xff]  }
 0x451   :  { %v10275_v39 = vld [vmem:[%s14071_s5 + $0xa0] sm:$0xff]  }
 0x452   :  { %7988 = vmatpush1.bf16.msra.mxu0 %v9937_v1  ;;  %v10279_v1 = vld [vmem:[%s14071_s5 + $0xa8] sm:$0xff]  }
 0x453   :  { %8152 = vmatpush1.bf16.msra.mxu1 %v9939_v2  ;;  %7989 = vmatprep.subr.bf16.mxu0 %v9946_v3  ;;  %v10280_v2 = vld [vmem:[%s14071_s5 + $0x70] sm:$0xff]   ;;  %v4923_v3 = vrot.slane %v13825_v14, %v620_v17  ;;  %v10284_v17 = vld [vmem:[%s14071_s5 + $0x78] sm:$0xff]  }
 0x454   :  { %8153 = vmatprep.subr.bf16.mxu1 %v9948_v4  ;;  %v10281_v4 = vld [vmem:[%s14071_s5 + $0xf0] sm:$0xff]  }
 0x455   :  { %v10128_v8 = vadd.f32 %v13720_v31, %v4923_v3  ;;  %v10288_v31 = vld [vmem:[%s14071_s5 + $0x140] sm:$0xff]  }
 0x456   :  { %7990 = vmatpush1.bf16.msra.mxu0 %v9945_v16  ;;  %v8168_v16 = vmax.f32 %v10126_v5, 0.0 }
 0x457   :  { %8154 = vmatpush1.bf16.msra.mxu1 %v9947_v26  ;;  %7991 = vmatprep.subr.bf16.mxu0 %v9954_v53  ;;  %v10287_v26 = vld [vmem:[%s14071_s5 + $0xb8] sm:$0xff]   ;;  %v8170_v53 = vmax.f32 %v10128_v8, 0.0 }
 0x458   :  { %8155 = vmatprep.subr.bf16.mxu1 %v9956_v18  ;;  %v10289_v18 = vld [vmem:[%s14071_s5 + $0x1c0] sm:$0xff]   ;;  %v8176_v46 = vpack.c.bf16 %v8168_v16, %v8168_v16 }
 0x459   :  { %v8178_v20 = vpack.c.bf16 %v8170_v53, %v8170_v53 }
 0x45a   :  { %7992 = vmatpush1.bf16.msra.mxu0 %v9953_v23  ;;  %v10294_v23 = vld [vmem:[%s14071_s5 + $0x108] sm:$0xff]  }
 0x45b   :  { %8156 = vmatpush1.bf16.msra.mxu1 %v9955_v24  ;;  %7993 = vmatprep.subr.bf16.mxu0 %v9962_v27  ;;  %v10295_v24 = vld [vmem:[%s14071_s5 + $0x188] sm:$0xff]   ;;  %v10296_v27 = vld [vmem:[%s14071_s5 + $0x150] sm:$0xff]  }
 0x45c   :  { %8157 = vmatprep.subr.bf16.mxu1 %v9964_v41  ;;  %v10297_v41 = vld [vmem:[%s14071_s5 + $0x1d0] sm:$0xff]  }
 0x45e   :  { %7994 = vmatpush1.bf16.msra.mxu0 %v9961_v32  ;;  %v10300_v32 = vld [vmem:[%s14071_s5 + $0x158] sm:$0xff]  }
 0x45f   :  { %8158 = vmatpush1.bf16.msra.mxu1 %v9963_v35  ;;  %10030 = vmatprep.subr.bf16.mxu0 %v10256_v61  ;;  %v10301_v35 = vld [vmem:[%s14071_s5 + $0x1d8] sm:$0xff]  }
 0x460   :  { %10052 = vmatprep.subr.bf16.mxu1 %v10257_v37  ;;  %v10302_v61 = vld [vmem:[%s14071_s5 + $0x118] sm:$0xff]  }
 0x461   :  { %7996 = vmatmul.mubr.bf16.vlgmr.msra.gmra.mrb[12].mxu0 %v13064_v33  ;;  %v10303_v37 = vld [vmem:[%s14071_s5 + $0x198] sm:$0xff]  }
 0x462   :  { %8160 = vmatmul.mubr.bf16.vlgmr.msra.gmra.mrb[12].mxu1 %v13064_v33  ;;  %10031 = vmatpush3.bf16.msra.mxu0 %v10258_v25  ;;  %v10265_v33 = vld [vmem:[%s14071_s5 + $0xd0] sm:$0xff]   ;;  %v10306_v25 = vld [vmem:[%s14071_s5 + $0x120] sm:$0xff]  }
 0x463   :  { %8735 = vmatprep.mubr.bf16.mxu0 %v8177_v42  ;;  %10053 = vmatpush3.bf16.msra.mxu1 %v10259_v63  ;;  %v10307_v63 = vld [vmem:[%s14071_s5 + $0x1a0] sm:$0xff]   ;;  %v10309_v42 = vld [vmem:[%s14071_s5 + $0x1e8] sm:$0xff]  }
 0x464   :  { %8775 = vmatprep.mubr.bf16.mxu1 %v8179_v21  ;;  %10032 = vmatprep.subr.bf16.mxu0 %v10260_v12  ;;  %v10308_v12 = vld [vmem:[%s14071_s5 + $0x168] sm:$0xff]  }
 0x465   :  { %10054 = vmatprep.subr.bf16.mxu1 %v10261_v44  ;;  %v10310_v44 = vld [vmem:[%s14071_s5 + $0x128] sm:$0xff]  }
 0x466   :  { %10033 = vmatpush3.bf16.msra.mxu0 %v10262_v47  ;;  %v10311_v21 = vld [vmem:[%s14071_s5 + $0x1a8] sm:$0xff]   ;;  %v10312_v47 = vld [vmem:[%s14071_s5 + $0x170] sm:$0xff]  }
 0x467   :  { %10055 = vmatpush3.bf16.msra.mxu1 %v10263_v48  ;;  %10034 = vmatprep.subr.bf16.mxu0 %v10264_v9  ;;  %v10313_v48 = vld [vmem:[%s14071_s5 + $0x1f0] sm:$0xff]  }
 0x468   :  { %10056 = vmatprep.subr.bf16.mxu1 %v10265_v33  ;;  %v10314_v9 = vld [vmem:[%s14071_s5 + $0x130] sm:$0xff]  }
 0x469   :  { %v10315_v33 = vld [vmem:[%s14071_s5 + $0x1b0] sm:$0xff]  }
 0x46a   :  { %10035 = vmatpush3.bf16.msra.mxu0 %v10266_v49  ;;  %v10316_v49 = vld [vmem:[%s14071_s5 + $0x178] sm:$0xff]  }
 0x46b   :  { %10057 = vmatpush3.bf16.msra.mxu1 %v10267_v22  ;;  %10036 = vmatprep.subr.bf16.mxu0 %v10268_v51  ;;  %v10317_v22 = vld [vmem:[%s14071_s5 + $0x1f8] sm:$0xff]  }
 0x46c   :  { %10058 = vmatprep.subr.bf16.mxu1 %v10269_v52  ;;  %v10318_v51 = vld [vmem:[%s14071_s5 + $0x138] sm:$0xff]  }
 0x46d   :  { %v10319_v52 = vld [vmem:[%s14071_s5 + $0x1b8] sm:$0xff]  }
 0x46e   :  { %10037 = vmatpush3.bf16.msra.mxu0 %v10270_v54  ;;  %v4931_v54 = vrot.slane %v13825_v14, %v628_v7 }
 0x46f   :  { %10059 = vmatpush3.bf16.msra.mxu1 %v10271_v58  ;;  %10038 = vmatprep.subr.bf16.mxu0 %v10272_v59  ;;  %v4939_v58 = vrot.slane %v13825_v14, %v636_v29  ;;  %v4935_v59 = vrot.slane %v13825_v14, %v632_v55 }
 0x470   :  { %10060 = vmatprep.subr.bf16.mxu1 %v10273_v60  ;;  %v4943_v60 = vrot.slane %v13825_v14, %v640_v10 }
 0x472   :  { %10039 = vmatpush3.bf16.msra.mxu0 %v10274_v62 }
 0x473   :  { %10061 = vmatpush3.bf16.msra.mxu1 %v10275_v39  ;;  %10040 = vmatprep.subr.bf16.mxu0 %v10276_v0 }
 0x474   :  { %10062 = vmatprep.subr.bf16.mxu1 %v10277_v11 }
 0x476   :  { %10041 = vmatpush3.bf16.msra.mxu0 %v10278_v45 }
 0x477   :  { %10063 = vmatpush3.bf16.msra.mxu1 %v10279_v1  ;;  %10042 = vmatprep.subr.bf16.mxu0 %v10280_v2 }
 0x478   :  { %10064 = vmatprep.subr.bf16.mxu1 %v10281_v4 }
 0x47a   :  { %10043 = vmatpush3.bf16.msra.mxu0 %v10282_v56 }
 0x47b   :  { %10065 = vmatpush3.bf16.msra.mxu1 %v10283_v6  ;;  %10044 = vmatprep.subr.bf16.mxu0 %v10284_v17 }
 0x47c   :  { %10066 = vmatprep.subr.bf16.mxu1 %v10285_v13 }
 0x47e   :  { %10045 = vmatpush3.bf16.msra.mxu0 %v10286_v36  ;;  %v9965_v36 = vld [vmem:[%s14073_s6] ss:$0 sm:$0xff] }
 0x47f   :  { %10067 = vmatpush3.bf16.msra.mxu1 %v10287_v26  ;;  %10074 = vmatprep.subr.bf16.mxu0 %v10288_v31 }
 0x480   :  { %10096 = vmatprep.subr.bf16.mxu1 %v10289_v18 }
 0x481   :  { %8736 = vmatmul.mubr.bf16.vlgmr.msra.gmra.mrb[16].mxu0 %v8176_v46 }
 0x482   :  { %8776 = vmatmul.mubr.bf16.vlgmr.msra.gmra.mrb[16].mxu1 %v8178_v20  ;;  %10075 = vmatpush3.bf16.msra.mxu0 %v10290_v19 }
 0x483   :  { %10097 = vmatpush3.bf16.msra.mxu1 %v10291_v34  ;;  %10076 = vmatprep.subr.bf16.mxu0 %v10292_v50 }
 0x484   :  { %10098 = vmatprep.subr.bf16.mxu1 %v10293_v40 }
 0x486   :  { %10077 = vmatpush3.bf16.msra.mxu0 %v10294_v23 }
 0x487   :  { %10099 = vmatpush3.bf16.msra.mxu1 %v10295_v24  ;;  %10078 = vmatprep.subr.bf16.mxu0 %v10296_v27 }
 0x488   :  { %10100 = vmatprep.subr.bf16.mxu1 %v10297_v41 }
 0x48a   :  { %10079 = vmatpush3.bf16.msra.mxu0 %v10298_v15 }
 0x48b   :  { %10101 = vmatpush3.bf16.msra.mxu1 %v10299_v30  ;;  %10080 = vmatprep.subr.bf16.mxu0 %v10300_v32 }
 0x48c   :  { %10102 = vmatprep.subr.bf16.mxu1 %v10301_v35 }
 0x48e   :  { %10081 = vmatpush3.bf16.msra.mxu0 %v10302_v61 }
 0x48f   :  { %10103 = vmatpush3.bf16.msra.mxu1 %v10303_v37  ;;  %10082 = vmatprep.subr.bf16.mxu0 %v10304_v43 }
 0x490   :  { %10104 = vmatprep.subr.bf16.mxu1 %v10305_v38 }
 0x492   :  { %10083 = vmatpush3.bf16.msra.mxu0 %v10306_v25 }
 0x493   :  { %10105 = vmatpush3.bf16.msra.mxu1 %v10307_v63  ;;  %10084 = vmatprep.subr.bf16.mxu0 %v10308_v12 }
 0x494   :  { %10106 = vmatprep.subr.bf16.mxu1 %v10309_v42 }
 0x496   :  { %10085 = vmatpush3.bf16.msra.mxu0 %v10310_v44 }
 0x497   :  { %10107 = vmatpush3.bf16.msra.mxu1 %v10311_v21  ;;  %10086 = vmatprep.subr.bf16.mxu0 %v10312_v47 }
 0x498   :  { %10108 = vmatprep.subr.bf16.mxu1 %v10313_v48 }
 0x49a   :  { %10087 = vmatpush3.bf16.msra.mxu0 %v10314_v9 }
 0x49b   :  { %10109 = vmatpush3.bf16.msra.mxu1 %v10315_v33  ;;  %10088 = vmatprep.subr.bf16.mxu0 %v10316_v49 }
 0x49c   :  { %10110 = vmatprep.subr.bf16.mxu1 %v10317_v22 }
 0x49e   :  { %10089 = vmatpush3.bf16.msra.mxu0 %v10318_v51 }
 0x49f   :  { %10111 = vmatpush3.bf16.msra.mxu1 %v10319_v52 }
 0x534   :  { %v7997_v62 = vpop.f32.mrb[12].mxu0 }
 0x535   :  { %v10130_v39 = vadd.f32 %v7997_v62, %v4931_v54  ;;  %v8161_v0 = vpop.f32.mrb[12].mxu1  ;;  %v7999_v11 = vpop.f32.mrb[13].mxu0 }
 0x536   :  { %v10132_v45 = vadd.f32 %v8161_v0, %v4939_v58  ;;  %v10131_v57 = vadd.f32 %v7999_v11, %v4935_v59  ;;  %v8163_v1 = vpop.f32.mrb[13].mxu1  ;;  %v8001_v7 = vpop.f32.mrb[14].mxu0 }
 0x537   :  { %v8172_v2 = vmax.f32 %v10130_v39, 0.0  ;;  %v10133_v3 = vadd.f32 %v8163_v1, %v4943_v60  ;;  %v8165_v4 = vpop.f32.mrb[14].mxu1  ;;  %v8002_v29 = vpop.f32.mrb[15].mxu0 }
 0x538   :  { %v8174_v56 = vmax.f32 %v10132_v45, 0.0  ;;  %v8173_v5 = vmax.f32 %v10131_v57, 0.0  ;;  %v8166_v6 = vpop.f32.mrb[15].mxu1 }
 0x539   :  { %v8175_v55 = vmax.f32 %v10133_v3, 0.0  ;;  %v8180_v28 = vpack.c.bf16 %v8172_v2, %v8172_v2 }
 0x53a   :  { %v8181_v17 = vpack.c.bf16 %v8173_v5, %v8173_v5  ;;  %v8182_v10 = vpack.c.bf16 %v8174_v56, %v8174_v56 }
 0x53b   :  { %v8183_v8 = vpack.c.bf16 %v8175_v55, %v8175_v55 }
 0x53c   :  { %8815 = vmatprep.mubr.bf16.mxu0 %v8181_v17 }
 0x53d   :  { %8855 = vmatprep.mubr.bf16.mxu1 %v8183_v8  ;;  %8816 = vmatmul.mubr.bf16.vlgmr.msra.gmra.mrb[20].mxu0 %v8180_v28 }
 0x53e   :  { %8856 = vmatmul.mubr.bf16.vlgmr.msra.gmra.mrb[20].mxu1 %v8182_v10 }
 0x554   :  { %v10046_v14 = vpop.f32.mrb[16].mxu0 }
 0x555   :  { %v10068_v13 = vpop.f32.mrb[16].mxu1  ;;  %v10047_v16 = vpop.f32.mrb[17].mxu0 }
 0x556   :  { %v10048_v26 = vadd.f32 %v10047_v16, %v10046_v14  ;;  %v10069_v31 = vpop.f32.mrb[17].mxu1  ;;  %v10049_v53 = vpop.f32.mrb[18].mxu0 }
 0x557   :  { %v10070_v18 = vadd.f32 %v10069_v31, %v10068_v13  ;;  %v10071_v19 = vpop.f32.mrb[18].mxu1  ;;  %v10050_v46 = vpop.f32.mrb[19].mxu0 }
 0x558   :  { %v8738_v34 = vadd.f32 %v10048_v26, %v9965_v36  ;;  %v10072_v50 = vpop.f32.mrb[19].mxu1 }
 0x55a   :  { %v8778_v20 = vadd.f32 %v10070_v18, %v8738_v34 }
 0x610   :  { %v10090_v40 = vpop.f32.mrb[20].mxu0 }
 0x611   :  { %v10112_v23 = vpop.f32.mrb[20].mxu1  ;;  %v10091_v24 = vpop.f32.mrb[21].mxu0 }
 0x612   :  { %v10092_v27 = vadd.f32 %v10091_v24, %v10090_v40  ;;  %v10113_v41 = vpop.f32.mrb[21].mxu1  ;;  %v10093_v15 = vpop.f32.mrb[22].mxu0 }
 0x613   :  { %v10114_v30 = vadd.f32 %v10113_v41, %v10112_v23  ;;  %v10115_v32 = vpop.f32.mrb[22].mxu1  ;;  %v10094_v35 = vpop.f32.mrb[23].mxu0 }
 0x614   :  { %v8818_v61 = vadd.f32 %v10092_v27, %v8778_v20  ;;  %v10116_v37 = vpop.f32.mrb[23].mxu1 }
 0x616   :  { %v8858_v43 = vadd.f32 %v10114_v30, %v8818_v61 }
 0x618   :  { %8863 = vst [vmem:[%s14074_s7] sm:$0xff] %v8858_v43 }

</bundles_post_ra>
